<compile_context>
chip_gen: v5e
topology: v5e:2x2
jax: 0.10.0
libtpu: 0.0.40
codegen_flags: <defaults>
</compile_context>

<pallas_src>
import jax
import jax.numpy as jnp
from jax.experimental import pallas as pl
from jax.experimental.pallas import tpu as pltpu

# small shapes consistent with the module (L == F is required by the module's inner LN)
B, L, H, F, T = 2, 32, 32, 32, 6          # batch, seq, bert hidden, filters, n_tags
VOCAB, N_TYPES = 100, 2


# ---------------------------------------------------------------------------
# Fused kernel: IDCNN encoder + hidden2tag + CRF NLL (torchcrf, reduction='mean')
# ---------------------------------------------------------------------------
def _ner_loss_kernel(emb_ref, wlin_ref, blin_ref, wconv_ref, bconv_ref,
                     g_in_ref, b_in_ref, g_top_ref, b_top_ref,
                     wh2t_ref, bh2t_ref,
                     ml1_ref, mr1_ref, ml2_ref, mr2_ref,
                     tag_ohm_ref, prev_ohnf_ref, first_oh_ref, last_oh_ref,
                     maskbl_ref, start_ref, end_ref, trans_ref,
                     out_ref):
    EPS = 1e-5
    f32 = jnp.float32
    BLk = emb_ref.shape[0]
    Fk = wlin_ref.shape[1]
    Tk = wh2t_ref.shape[1]
    Bk, Lk = maskbl_ref.shape

    # ---- hoisted small parameters (loaded / reshaped once) ----
    blin = blin_ref[...]                       # (1, F)
    bconv = bconv_ref[...]                     # (3, F)
    g_in3 = g_in_ref[...].reshape(1, Lk, 1)    # inner LN, indexed by position (L == F)
    b_in3 = b_in_ref[...].reshape(1, Lk, 1)
    g_top = g_top_ref[...]                     # (1, F) — top LN over channels
    b_top = b_top_ref[...]
    m_l1 = ml1_ref[...]
    m_r1 = mr1_ref[...]
    m_l2 = ml2_ref[...]
    m_r2 = mr2_ref[...]

    # ------------------------- IDCNN encoder (stacked batch, all f32) ----------------
    # self.linear : (B*L, H) @ (H, F) + b
    x = jnp.dot(emb_ref[...], wlin_ref[...], preferred_element_type=f32) + blin

    def conv(x2, j, d, m_l, m_r):
        # dilated conv, kernel_size=3, padding=d (same length), channels F->F:
        #   y[l] = x[l-d] @ W0 + x[l] @ W1 + x[l+d] @ W2 + b
        # shifted taps via XLU sublane rolls + hoisted edge masks (masks also zero any
        # cross-sequence contamination from rolling the stacked (B*L, F) slab).
        left = pltpu.roll(x2, shift=d, axis=0) * m_l          # x[l-d]
        right = pltpu.roll(x2, shift=BLk - d, axis=0) * m_r   # x[l+d]
        y = (jnp.dot(left, wconv_ref[j, 0], preferred_element_type=f32)
             + jnp.dot(x2, wconv_ref[j, 1], preferred_element_type=f32)
             + jnp.dot(right, wconv_ref[j, 2], preferred_element_type=f32))
        return y + bconv[j:j + 1, :]

    def ln_inner(x2):
        # LayerNorm([F]) applied to the channels-first tensor -> normalizes over the
        # position axis; gamma/beta are indexed by position (valid because L == F).
        x3 = x2.reshape(Bk, Lk, Fk)
        mu = jnp.mean(x3, axis=1, keepdims=True)
        xc = x3 - mu
        var = jnp.mean(xc * xc, axis=1, keepdims=True)
        y = xc * jax.lax.rsqrt(var + EPS) * g_in3 + b_in3
        return y.reshape(BLk, Fk)

    def ln_top(x2):
        # top-level LayerNorm (applied after permute) -> over channels
        mu = jnp.mean(x2, axis=1, keepdims=True)
        xc = x2 - mu
        var = jnp.mean(xc * xc, axis=1, keepdims=True)
        return xc * jax.lax.rsqrt(var + EPS) * g_top + b_top

    def block(x2):
        # shared `net`: conv(d=1) -> ReLU -> LayerNorm -> conv(d=1) -> conv(d=2)
        x2 = conv(x2, 0, 1, m_l1, m_r1)
        x2 = jnp.maximum(x2, 0.0)
        x2 = ln_inner(x2)
        x2 = conv(x2, 1, 1, m_l1, m_r1)
        x2 = conv(x2, 2, 2, m_l2, m_r2)
        return x2

    # idcnn: block -> ReLU -> LayerNorm -> block -> block -> block (shared weights)
    x = block(x)
    x = jnp.maximum(x, 0.0)
    x = ln_top(x)
    x = block(x)
    x = block(x)
    x = block(x)

    # hidden2tag -> emissions, kept on-chip only
    em = jnp.dot(x, wh2t_ref[...], preferred_element_type=f32) + bh2t_ref[...]  # (BL, T)

    # ------------------------- CRF numerator (fully vectorized) ----------------------
    start = start_ref[...]        # (1, T)
    end = end_ref[...]            # (1, T)
    trans = trans_ref[...]        # (T, T)
    tag_ohm = tag_ohm_ref[...]    # (BL, T)  one_hot(tags) * mask  (wrapper-built)

    gold_em = jnp.sum(em * tag_ohm, axis=1, keepdims=True)                        # (BL,1)
    gold_tr = jnp.sum(jnp.dot(prev_ohnf_ref[...], trans, preferred_element_type=f32)
                      * tag_ohm, axis=1, keepdims=True)                           # (BL,1)
    gold_se = jnp.sum(first_oh_ref[...] * start + last_oh_ref[...] * end,
                      axis=1, keepdims=True)                                      # (BL,1)
    numer = jnp.sum(gold_em + gold_tr + gold_se, axis=0, keepdims=True)           # (1,1)

    # ------------------------- CRF partition function (forward alg) ------------------
    # Fully unrolled serial recurrence over tiny (B, T, T) work; emissions sliced with
    # static indices straight out of registers (no VMEM stash).
    em3 = em.reshape(Bk, Lk, Tk)              # (B, L, T)
    maskbl = maskbl_ref[...]                  # (B, L)
    trans_b = trans.reshape(1, Tk, Tk)        # hoisted

    score = start + em3[:, 0, :]              # (B, T)
    for l in range(1, Lk):
        nxt = score[:, :, None] + trans_b + em3[:, l, :][:, None, :]   # (B, T, T)
        mx = jnp.max(nxt, axis=1, keepdims=True)                       # (B, 1, T)
        lse = jnp.log(jnp.sum(jnp.exp(nxt - mx), axis=1)) + mx.reshape(Bk, Tk)
        m_l = maskbl[:, l:l + 1]                                       # (B, 1)
        score = score + m_l * (lse - score)    # == where(mask, lse, score), mask in {0,1}

    score = score + end
    mx2 = jnp.max(score, axis=1, keepdims=True)                        # (B, 1)
    denom = jnp.log(jnp.sum(jnp.exp(score - mx2), axis=1, keepdims=True)) + mx2
    denom_sum = jnp.sum(denom, axis=0, keepdims=True)                  # (1, 1)

    out_ref[...] = (denom_sum - numer) * (1.0 / Bk)


def ner_loss_pallas(emb, tags, mask_f, p):
    """emb: (B, L, H) f32; tags: (B, L) int32; mask_f: (B, L) f32 (prefix mask)."""
    Bc, Lc, Hc = emb.shape
    Fc = p["W_lin"].shape[1]
    Tc = p["W_h2t"].shape[1]
    BL = Bc * Lc
    f32 = jnp.float32

    # --- conv edge masks (zero the rolled taps that fall outside each sequence) ---
    pos = jnp.tile(jnp.arange(Lc), Bc)                                   # (BL,)

    def edge(keep):
        return jnp.broadcast_to(keep.astype(f32)[:, None], (BL, Fc))

    m_l1 = edge(pos >= 1)
    m_r1 = edge(pos <= Lc - 2)
    m_l2 = edge(pos >= 2)
    m_r2 = edge(pos <= Lc - 3)

    # --- CRF gold-path one-hots / structural position masks (wrapper-precomputed) ---
    maskf = mask_f.reshape(BL, 1)
    tag_oh = jax.nn.one_hot(tags.reshape(BL), Tc, dtype=f32)             # (BL, T)
    tag_ohm = tag_oh * maskf
    not_first = (pos >= 1).astype(f32)[:, None]                          # (BL, 1)
    prev_oh = jnp.concatenate([jnp.zeros((1, Tc), f32), tag_oh[:-1]], axis=0)
    prev_ohnf = prev_oh * not_first                                      # zeroed at l==0
    is_first = 1.0 - not_first
    seq_len = jnp.sum(mask_f, axis=1).astype(jnp.int32)                  # (B,)
    is_last = (jnp.arange(Lc)[None, :] == (seq_len - 1)[:, None]).astype(f32).reshape(BL, 1)
    first_oh = tag_oh * is_first
    last_oh = tag_oh * is_last

    out = pl.pallas_call(
        _ner_loss_kernel,
        out_shape=jax.ShapeDtypeStruct((1, 1), f32),
    )(emb.reshape(BL, Hc).astype(f32),
      p["W_lin"], p["b_lin"],
      p["W_conv"], p["b_conv"],
      p["ln_in_g"], p["ln_in_b"], p["ln_top_g"], p["ln_top_b"],
      p["W_h2t"], p["b_h2t"],
      m_l1, m_r1, m_l2, m_r2,
      tag_ohm, prev_ohnf, first_oh, last_oh,
      mask_f,
      p["crf_start"][None, :], p["crf_end"][None, :], p["crf_trans"])
    return out[0, 0]


# ---------------------------------------------------------------------------
# Glue (plain JAX): BERT surrogate + parameter init + pure-JAX f32 reference
# ---------------------------------------------------------------------------
def bert_embed_surrogate(p, input_ids, token_type_ids):
    # TODO(synk): the pretrained BERT transformer stack (AutoModel.from_pretrained)
    # has no self-contained equivalent; a deterministic BERT-style embedding layer
    # (word + position + type embeddings + LayerNorm) is used as last_hidden_state.
    Lc = input_ids.shape[1]
    emb = (p["tok_emb"][input_ids]
           + p["pos_emb"][jnp.arange(Lc)][None, :, :]
           + p["type_emb"][token_type_ids])
    mu = emb.mean(-1, keepdims=True)
    var = ((emb - mu) ** 2).mean(-1, keepdims=True)
    return (emb - mu) / jnp.sqrt(var + 1e-12) * p["emb_ln_g"] + p["emb_ln_b"]


def init_params(key):
    ks = jax.random.split(key, 16)

    def nrm(k, shape, s=0.1):
        return (s * jax.random.normal(k, shape)).astype(jnp.float32)

    p = dict(
        tok_emb=nrm(ks[0], (VOCAB, H)),
        pos_emb=nrm(ks[1], (L, H)),
        type_emb=nrm(ks[2], (N_TYPES, H)),
        emb_ln_g=1.0 + nrm(ks[3], (H,)),
        emb_ln_b=nrm(ks[4], (H,)),
        W_lin=nrm(ks[5], (H, F)),
        b_lin=nrm(ks[6], (1, F)),
        W_conv=nrm(ks[7], (3, 3, F, F)),    # [conv_layer, tap, c_in, c_out]
        b_conv=nrm(ks[8], (3, F)),
        ln_in_g=1.0 + nrm(ks[9], (L, 1)),   # inner LN (indexed by position, L == F)
        ln_in_b=nrm(ks[10], (L, 1)),
        ln_top_g=1.0 + nrm(ks[11], (1, F)),
        ln_top_b=nrm(ks[12], (1, F)),
        W_h2t=nrm(ks[13], (F, T)),
        b_h2t=nrm(ks[14], (1, T)),
    )
    kc = jax.random.split(ks[15], 3)
    p["crf_start"] = nrm(kc[0], (T,))
    p["crf_end"] = nrm(kc[1], (T,))
    p["crf_trans"] = nrm(kc[2], (T, T))
    return p


def reference_loss(p, input_ids, attention_mask, token_type_ids, target_tags):
    emb = bert_embed_surrogate(p, input_ids, token_type_ids)
    hi = jax.lax.Precision.HIGHEST

    def enc_one(x):                                  # x: [L, H]
        x = jnp.dot(x, p["W_lin"], precision=hi) + p["b_lin"][0]

        def conv(x, j, d):
            xp = jnp.pad(x, ((d, d), (0, 0)))
            out = jnp.zeros_like(x) + p["b_conv"][j]
            for k in range(3):
                out = out + jnp.dot(xp[k * d:k * d + x.shape[0]],
                                    p["W_conv"][j, k], precision=hi)
            return out

        def ln_inner(x):
            mu = x.mean(axis=0, keepdims=True)
            var = ((x - mu) ** 2).mean(axis=0, keepdims=True)
            return (x - mu) / jnp.sqrt(var + 1e-5) * p["ln_in_g"] + p["ln_in_b"]

        def ln_top(x):
            mu = x.mean(axis=1, keepdims=True)
            var = ((x - mu) ** 2).mean(axis=1, keepdims=True)
            return (x - mu) / jnp.sqrt(var + 1e-5) * p["ln_top_g"] + p["ln_top_b"]

        def block(x):
            x = conv(x, 0, 1)
            x = jnp.maximum(x, 0.0)
            x = ln_inner(x)
            x = conv(x, 1, 1)
            x = conv(x, 2, 2)
            return x

        x = block(x)
        x = jnp.maximum(x, 0.0)
        x = ln_top(x)
        x = block(x); x = block(x); x = block(x)
        return jnp.dot(x, p["W_h2t"], precision=hi) + p["b_h2t"][0]

    em = jax.vmap(enc_one)(emb)
    tags = target_tags
    mask_f = attention_mask.astype(jnp.float32)
    start, end, trans = p["crf_start"], p["crf_end"], p["crf_trans"]
    Bc, Lc, Tc = em.shape
    tag_oh = jax.nn.one_hot(tags, Tc, dtype=jnp.float32)
    em_gold = jnp.sum(em * tag_oh, axis=-1)
    numer = start[tags[:, 0]] + em_gold[:, 0]
    for i in range(1, Lc):
        numer = numer + (trans[tags[:, i - 1], tags[:, i]] + em_gold[:, i]) * mask_f[:, i]
    seq_len = jnp.sum(mask_f, axis=1).astype(jnp.int32)
    last_tags = tags[jnp.arange(Bc), seq_len - 1]
    numer = numer + end[last_tags]

    def lse(x, axis):
        m = jnp.max(x, axis=axis, keepdims=True)
        return jnp.squeeze(m, axis=axis) + jnp.log(jnp.sum(jnp.exp(x - m), axis=axis))

    score = start[None, :] + em[:, 0, :]
    for i in range(1, Lc):
        nxt = lse(score[:, :, None] + trans[None, :, :] + em[:, i, None, :], 1)
        score = jnp.where(mask_f[:, i:i + 1] > 0.5, nxt, score)
    score = score + end[None, :]
    denom = lse(score, 1)
    return -jnp.mean(numer - denom)


# TODO(synk): model_type='lstm' branch (nn.LSTM) and CRF.decode (Viterbi) are not
# implemented; only the 'idcnn' forward-loss path is translated.

if __name__ == "__main__":
    key = jax.random.PRNGKey(0)
    kp, k1, k2 = jax.random.split(key, 3)
    params = init_params(kp)

    input_ids = jax.random.randint(k1, (B, L), 0, VOCAB, dtype=jnp.int32)
    token_type_ids = jnp.zeros((B, L), dtype=jnp.int32)
    target_tags = jax.random.randint(k2, (B, L), 0, T, dtype=jnp.int32)
    lengths = jnp.array([L, L - 12], dtype=jnp.int32)
    attention_mask = (jnp.arange(L)[None, :] < lengths[:, None]).astype(jnp.int32)

    @jax.jit
    def forward_loss(input_ids, attention_mask, token_type_ids, target_tags):
        emb = bert_embed_surrogate(params, input_ids, token_type_ids)
        mask_f = attention_mask.astype(jnp.float32)
        return ner_loss_pallas(emb, target_tags, mask_f, params)   # fused Pallas kernel

    loss = jax.block_until_ready(
        forward_loss(input_ids, attention_mask, token_type_ids, target_tags))

    ref = jax.block_until_ready(
        jax.jit(reference_loss)(params, input_ids, attention_mask,
                                token_type_ids, target_tags))

    assert bool(jnp.isfinite(loss))
    assert jnp.allclose(loss, ref, rtol=2e-2, atol=2e-1), (float(loss), float(ref))
    print("KERNEL_OK")
</pallas_src>

<mosaic_0001>
module attributes {stable_mosaic.version = 11 : i64} {
  func.func @_ner_loss_kernel(%arg0: memref<64x32xf32, #tpu.memory_space<vmem>>, %arg1: memref<32x32xf32, #tpu.memory_space<vmem>>, %arg2: memref<1x32xf32, #tpu.memory_space<vmem>>, %arg3: memref<3x3x32x32xf32, #tpu.memory_space<vmem>>, %arg4: memref<3x32xf32, #tpu.memory_space<vmem>>, %arg5: memref<32x1xf32, #tpu.memory_space<vmem>>, %arg6: memref<32x1xf32, #tpu.memory_space<vmem>>, %arg7: memref<1x32xf32, #tpu.memory_space<vmem>>, %arg8: memref<1x32xf32, #tpu.memory_space<vmem>>, %arg9: memref<32x6xf32, #tpu.memory_space<vmem>>, %arg10: memref<1x6xf32, #tpu.memory_space<vmem>>, %arg11: memref<64x32xf32, #tpu.memory_space<vmem>>, %arg12: memref<64x32xf32, #tpu.memory_space<vmem>>, %arg13: memref<64x32xf32, #tpu.memory_space<vmem>>, %arg14: memref<64x32xf32, #tpu.memory_space<vmem>>, %arg15: memref<64x6xf32, #tpu.memory_space<vmem>>, %arg16: memref<64x6xf32, #tpu.memory_space<vmem>>, %arg17: memref<64x6xf32, #tpu.memory_space<vmem>>, %arg18: memref<64x6xf32, #tpu.memory_space<vmem>>, %arg19: memref<2x32xf32, #tpu.memory_space<vmem>>, %arg20: memref<1x6xf32, #tpu.memory_space<vmem>>, %arg21: memref<1x6xf32, #tpu.memory_space<vmem>>, %arg22: memref<6x6xf32, #tpu.memory_space<vmem>>, %arg23: memref<1x1xf32, #tpu.memory_space<vmem>>) attributes {dimension_semantics = [], scalar_prefetch = 0 : i64, scratch_operands = 0 : i64, tpu.core_type = #tpu.core_type<tc>} {
    %c0 = arith.constant 0 : index
    %c0_0 = arith.constant 0 : index
    %0 = vector.load %arg2[%c0, %c0_0] : memref<1x32xf32, #tpu.memory_space<vmem>>, vector<1x32xf32>
    %c0_1 = arith.constant 0 : index
    %c0_2 = arith.constant 0 : index
    %1 = vector.load %arg4[%c0_1, %c0_2] : memref<3x32xf32, #tpu.memory_space<vmem>>, vector<3x32xf32>
    %c0_3 = arith.constant 0 : index
    %c0_4 = arith.constant 0 : index
    %2 = vector.load %arg5[%c0_3, %c0_4] : memref<32x1xf32, #tpu.memory_space<vmem>>, vector<32x1xf32>
    %3 = vector.shape_cast %2 : vector<32x1xf32> to vector<1x32x1xf32>
    %c0_5 = arith.constant 0 : index
    %c0_6 = arith.constant 0 : index
    %4 = vector.load %arg6[%c0_5, %c0_6] : memref<32x1xf32, #tpu.memory_space<vmem>>, vector<32x1xf32>
    %5 = vector.shape_cast %4 : vector<32x1xf32> to vector<1x32x1xf32>
    %c0_7 = arith.constant 0 : index
    %c0_8 = arith.constant 0 : index
    %6 = vector.load %arg7[%c0_7, %c0_8] : memref<1x32xf32, #tpu.memory_space<vmem>>, vector<1x32xf32>
    %c0_9 = arith.constant 0 : index
    %c0_10 = arith.constant 0 : index
    %7 = vector.load %arg8[%c0_9, %c0_10] : memref<1x32xf32, #tpu.memory_space<vmem>>, vector<1x32xf32>
    %c0_11 = arith.constant 0 : index
    %c0_12 = arith.constant 0 : index
    %8 = vector.load %arg11[%c0_11, %c0_12] : memref<64x32xf32, #tpu.memory_space<vmem>>, vector<64x32xf32>
    %c0_13 = arith.constant 0 : index
    %c0_14 = arith.constant 0 : index
    %9 = vector.load %arg12[%c0_13, %c0_14] : memref<64x32xf32, #tpu.memory_space<vmem>>, vector<64x32xf32>
    %c0_15 = arith.constant 0 : index
    %c0_16 = arith.constant 0 : index
    %10 = vector.load %arg13[%c0_15, %c0_16] : memref<64x32xf32, #tpu.memory_space<vmem>>, vector<64x32xf32>
    %c0_17 = arith.constant 0 : index
    %c0_18 = arith.constant 0 : index
    %11 = vector.load %arg14[%c0_17, %c0_18] : memref<64x32xf32, #tpu.memory_space<vmem>>, vector<64x32xf32>
    %c0_19 = arith.constant 0 : index
    %c0_20 = arith.constant 0 : index
    %12 = vector.load %arg0[%c0_19, %c0_20] : memref<64x32xf32, #tpu.memory_space<vmem>>, vector<64x32xf32>
    %c0_21 = arith.constant 0 : index
    %c0_22 = arith.constant 0 : index
    %13 = vector.load %arg1[%c0_21, %c0_22] : memref<32x32xf32, #tpu.memory_space<vmem>>, vector<32x32xf32>
    %cst = arith.constant dense<0.000000e+00> : vector<64x32xf32>
    %14 = tpu.matmul %12, %13, %cst {dimension_numbers = #tpu.dot_dimension_numbers<[1], [0], [0], [1], [0, 0, 1, 1], [], []>} : vector<64x32xf32>, vector<32x32xf32>, vector<64x32xf32> -> vector<64x32xf32>
    %15 = vector.broadcast %0 : vector<1x32xf32> to vector<64x32xf32>
    %16 = arith.addf %14, %15 : vector<64x32xf32>
    %c1_i32 = arith.constant 1 : i32
    %17 = tpu.dynamic_rotate %16 by %c1_i32 dim 0 : vector<64x32xf32>, i32 -> vector<64x32xf32>
    %18 = arith.mulf %17, %8 : vector<64x32xf32>
    %c63_i32 = arith.constant 63 : i32
    %19 = tpu.dynamic_rotate %16 by %c63_i32 dim 0 : vector<64x32xf32>, i32 -> vector<64x32xf32>
    %20 = arith.mulf %19, %9 : vector<64x32xf32>
    %c0_23 = arith.constant 0 : index
    %c0_24 = arith.constant 0 : index
    %c0_25 = arith.constant 0 : index
    %c0_26 = arith.constant 0 : index
    %21 = vector.load %arg3[%c0_23, %c0_24, %c0_25, %c0_26] : memref<3x3x32x32xf32, #tpu.memory_space<vmem>>, vector<1x1x32x32xf32>
    %22 = vector.shape_cast %21 : vector<1x1x32x32xf32> to vector<32x32xf32>
    %cst_27 = arith.constant dense<0.000000e+00> : vector<64x32xf32>
    %23 = tpu.matmul %18, %22, %cst_27 {dimension_numbers = #tpu.dot_dimension_numbers<[1], [0], [0], [1], [0, 0, 1, 1], [], []>} : vector<64x32xf32>, vector<32x32xf32>, vector<64x32xf32> -> vector<64x32xf32>
    %c0_28 = arith.constant 0 : index
    %c1 = arith.constant 1 : index
    %c0_29 = arith.constant 0 : index
    %c0_30 = arith.constant 0 : index
    %24 = vector.load %arg3[%c0_28, %c1, %c0_29, %c0_30] : memref<3x3x32x32xf32, #tpu.memory_space<vmem>>, vector<1x1x32x32xf32>
    %25 = vector.shape_cast %24 : vector<1x1x32x32xf32> to vector<32x32xf32>
    %cst_31 = arith.constant dense<0.000000e+00> : vector<64x32xf32>
    %26 = tpu.matmul %16, %25, %cst_31 {dimension_numbers = #tpu.dot_dimension_numbers<[1], [0], [0], [1], [0, 0, 1, 1], [], []>} : vector<64x32xf32>, vector<32x32xf32>, vector<64x32xf32> -> vector<64x32xf32>
    %27 = arith.addf %23, %26 : vector<64x32xf32>
    %c0_32 = arith.constant 0 : index
    %c2 = arith.constant 2 : index
    %c0_33 = arith.constant 0 : index
    %c0_34 = arith.constant 0 : index
    %28 = vector.load %arg3[%c0_32, %c2, %c0_33, %c0_34] : memref<3x3x32x32xf32, #tpu.memory_space<vmem>>, vector<1x1x32x32xf32>
    %29 = vector.shape_cast %28 : vector<1x1x32x32xf32> to vector<32x32xf32>
    %cst_35 = arith.constant dense<0.000000e+00> : vector<64x32xf32>
    %30 = tpu.matmul %20, %29, %cst_35 {dimension_numbers = #tpu.dot_dimension_numbers<[1], [0], [0], [1], [0, 0, 1, 1], [], []>} : vector<64x32xf32>, vector<32x32xf32>, vector<64x32xf32> -> vector<64x32xf32>
    %31 = arith.addf %27, %30 : vector<64x32xf32>
    %32 = vector.extract_strided_slice %1 {offsets = [0, 0], sizes = [1, 32], strides = [1, 1]} : vector<3x32xf32> to vector<1x32xf32>
    %33 = vector.broadcast %32 : vector<1x32xf32> to vector<64x32xf32>
    %34 = arith.addf %31, %33 : vector<64x32xf32>
    %cst_36 = arith.constant 0.000000e+00 : f32
    %35 = vector.broadcast %cst_36 : f32 to vector<64x32xf32>
    %36 = arith.maximumf %34, %35 : vector<64x32xf32>
    %37 = vector.shape_cast %36 : vector<64x32xf32> to vector<2x32x32xf32>
    %cst_37 = arith.constant dense<0.000000e+00> : vector<2x32xf32>
    %38 = vector.multi_reduction <add>, %37, %cst_37 [1] : vector<2x32x32xf32> to vector<2x32xf32>
    %39 = vector.shape_cast %38 : vector<2x32xf32> to vector<2x1x32xf32>
    %cst_38 = arith.constant 3.200000e+01 : f32
    %40 = vector.broadcast %cst_38 : f32 to vector<2x1x32xf32>
    %41 = arith.divf %39, %40 : vector<2x1x32xf32>
    %42 = vector.broadcast %41 : vector<2x1x32xf32> to vector<2x32x32xf32>
    %43 = arith.subf %37, %42 : vector<2x32x32xf32>
    %44 = arith.mulf %43, %43 : vector<2x32x32xf32>
    %cst_39 = arith.constant dense<0.000000e+00> : vector<2x32xf32>
    %45 = vector.multi_reduction <add>, %44, %cst_39 [1] : vector<2x32x32xf32> to vector<2x32xf32>
    %46 = vector.shape_cast %45 : vector<2x32xf32> to vector<2x1x32xf32>
    %cst_40 = arith.constant 3.200000e+01 : f32
    %47 = vector.broadcast %cst_40 : f32 to vector<2x1x32xf32>
    %48 = arith.divf %46, %47 : vector<2x1x32xf32>
    %cst_41 = arith.constant 9.99999974E-6 : f32
    %49 = vector.broadcast %cst_41 : f32 to vector<2x1x32xf32>
    %50 = arith.addf %48, %49 : vector<2x1x32xf32>
    %51 = math.rsqrt %50 : vector<2x1x32xf32>
    %52 = vector.broadcast %51 : vector<2x1x32xf32> to vector<2x32x32xf32>
    %53 = arith.mulf %43, %52 : vector<2x32x32xf32>
    %54 = vector.broadcast %3 : vector<1x32x1xf32> to vector<2x32x32xf32>
    %55 = arith.mulf %53, %54 : vector<2x32x32xf32>
    %56 = vector.broadcast %5 : vector<1x32x1xf32> to vector<2x32x32xf32>
    %57 = arith.addf %55, %56 : vector<2x32x32xf32>
    %58 = vector.shape_cast %57 : vector<2x32x32xf32> to vector<64x32xf32>
    %c1_i32_42 = arith.constant 1 : i32
    %59 = tpu.dynamic_rotate %58 by %c1_i32_42 dim 0 : vector<64x32xf32>, i32 -> vector<64x32xf32>
    %60 = arith.mulf %59, %8 : vector<64x32xf32>
    %c63_i32_43 = arith.constant 63 : i32
    %61 = tpu.dynamic_rotate %58 by %c63_i32_43 dim 0 : vector<64x32xf32>, i32 -> vector<64x32xf32>
    %62 = arith.mulf %61, %9 : vector<64x32xf32>
    %c1_44 = arith.constant 1 : index
    %c0_45 = arith.constant 0 : index
    %c0_46 = arith.constant 0 : index
    %c0_47 = arith.constant 0 : index
    %63 = vector.load %arg3[%c1_44, %c0_45, %c0_46, %c0_47] : memref<3x3x32x32xf32, #tpu.memory_space<vmem>>, vector<1x1x32x32xf32>
    %64 = vector.shape_cast %63 : vector<1x1x32x32xf32> to vector<32x32xf32>
    %cst_48 = arith.constant dense<0.000000e+00> : vector<64x32xf32>
    %65 = tpu.matmul %60, %64, %cst_48 {dimension_numbers = #tpu.dot_dimension_numbers<[1], [0], [0], [1], [0, 0, 1, 1], [], []>} : vector<64x32xf32>, vector<32x32xf32>, vector<64x32xf32> -> vector<64x32xf32>
    %c1_49 = arith.constant 1 : index
    %c1_50 = arith.constant 1 : index
    %c0_51 = arith.constant 0 : index
    %c0_52 = arith.constant 0 : index
    %66 = vector.load %arg3[%c1_49, %c1_50, %c0_51, %c0_52] : memref<3x3x32x32xf32, #tpu.memory_space<vmem>>, vector<1x1x32x32xf32>
    %67 = vector.shape_cast %66 : vector<1x1x32x32xf32> to vector<32x32xf32>
    %cst_53 = arith.constant dense<0.000000e+00> : vector<64x32xf32>
    %68 = tpu.matmul %58, %67, %cst_53 {dimension_numbers = #tpu.dot_dimension_numbers<[1], [0], [0], [1], [0, 0, 1, 1], [], []>} : vector<64x32xf32>, vector<32x32xf32>, vector<64x32xf32> -> vector<64x32xf32>
    %69 = arith.addf %65, %68 : vector<64x32xf32>
    %c1_54 = arith.constant 1 : index
    %c2_55 = arith.constant 2 : index
    %c0_56 = arith.constant 0 : index
    %c0_57 = arith.constant 0 : index
    %70 = vector.load %arg3[%c1_54, %c2_55, %c0_56, %c0_57] : memref<3x3x32x32xf32, #tpu.memory_space<vmem>>, vector<1x1x32x32xf32>
    %71 = vector.shape_cast %70 : vector<1x1x32x32xf32> to vector<32x32xf32>
    %cst_58 = arith.constant dense<0.000000e+00> : vector<64x32xf32>
    %72 = tpu.matmul %62, %71, %cst_58 {dimension_numbers = #tpu.dot_dimension_numbers<[1], [0], [0], [1], [0, 0, 1, 1], [], []>} : vector<64x32xf32>, vector<32x32xf32>, vector<64x32xf32> -> vector<64x32xf32>
    %73 = arith.addf %69, %72 : vector<64x32xf32>
    %74 = vector.extract_strided_slice %1 {offsets = [1, 0], sizes = [1, 32], strides = [1, 1]} : vector<3x32xf32> to vector<1x32xf32>
    %75 = vector.broadcast %74 : vector<1x32xf32> to vector<64x32xf32>
    %76 = arith.addf %73, %75 : vector<64x32xf32>
    %c2_i32 = arith.constant 2 : i32
    %77 = tpu.dynamic_rotate %76 by %c2_i32 dim 0 : vector<64x32xf32>, i32 -> vector<64x32xf32>
    %78 = arith.mulf %77, %10 : vector<64x32xf32>
    %c62_i32 = arith.constant 62 : i32
    %79 = tpu.dynamic_rotate %76 by %c62_i32 dim 0 : vector<64x32xf32>, i32 -> vector<64x32xf32>
    %80 = arith.mulf %79, %11 : vector<64x32xf32>
    %c2_59 = arith.constant 2 : index
    %c0_60 = arith.constant 0 : index
    %c0_61 = arith.constant 0 : index
    %c0_62 = arith.constant 0 : index
    %81 = vector.load %arg3[%c2_59, %c0_60, %c0_61, %c0_62] : memref<3x3x32x32xf32, #tpu.memory_space<vmem>>, vector<1x1x32x32xf32>
    %82 = vector.shape_cast %81 : vector<1x1x32x32xf32> to vector<32x32xf32>
    %cst_63 = arith.constant dense<0.000000e+00> : vector<64x32xf32>
    %83 = tpu.matmul %78, %82, %cst_63 {dimension_numbers = #tpu.dot_dimension_numbers<[1], [0], [0], [1], [0, 0, 1, 1], [], []>} : vector<64x32xf32>, vector<32x32xf32>, vector<64x32xf32> -> vector<64x32xf32>
    %c2_64 = arith.constant 2 : index
    %c1_65 = arith.constant 1 : index
    %c0_66 = arith.constant 0 : index
    %c0_67 = arith.constant 0 : index
    %84 = vector.load %arg3[%c2_64, %c1_65, %c0_66, %c0_67] : memref<3x3x32x32xf32, #tpu.memory_space<vmem>>, vector<1x1x32x32xf32>
    %85 = vector.shape_cast %84 : vector<1x1x32x32xf32> to vector<32x32xf32>
    %cst_68 = arith.constant dense<0.000000e+00> : vector<64x32xf32>
    %86 = tpu.matmul %76, %85, %cst_68 {dimension_numbers = #tpu.dot_dimension_numbers<[1], [0], [0], [1], [0, 0, 1, 1], [], []>} : vector<64x32xf32>, vector<32x32xf32>, vector<64x32xf32> -> vector<64x32xf32>
    %87 = arith.addf %83, %86 : vector<64x32xf32>
    %c2_69 = arith.constant 2 : index
    %c2_70 = arith.constant 2 : index
    %c0_71 = arith.constant 0 : index
    %c0_72 = arith.constant 0 : index
    %88 = vector.load %arg3[%c2_69, %c2_70, %c0_71, %c0_72] : memref<3x3x32x32xf32, #tpu.memory_space<vmem>>, vector<1x1x32x32xf32>
    %89 = vector.shape_cast %88 : vector<1x1x32x32xf32> to vector<32x32xf32>
    %cst_73 = arith.constant dense<0.000000e+00> : vector<64x32xf32>
    %90 = tpu.matmul %80, %89, %cst_73 {dimension_numbers = #tpu.dot_dimension_numbers<[1], [0], [0], [1], [0, 0, 1, 1], [], []>} : vector<64x32xf32>, vector<32x32xf32>, vector<64x32xf32> -> vector<64x32xf32>
    %91 = arith.addf %87, %90 : vector<64x32xf32>
    %92 = vector.extract_strided_slice %1 {offsets = [2, 0], sizes = [1, 32], strides = [1, 1]} : vector<3x32xf32> to vector<1x32xf32>
    %93 = vector.broadcast %92 : vector<1x32xf32> to vector<64x32xf32>
    %94 = arith.addf %91, %93 : vector<64x32xf32>
    %cst_74 = arith.constant 0.000000e+00 : f32
    %95 = vector.broadcast %cst_74 : f32 to vector<64x32xf32>
    %96 = arith.maximumf %94, %95 : vector<64x32xf32>
    %cst_75 = arith.constant dense<0.000000e+00> : vector<64xf32>
    %97 = vector.multi_reduction <add>, %96, %cst_75 [1] : vector<64x32xf32> to vector<64xf32>
    %98 = vector.shape_cast %97 : vector<64xf32> to vector<64x1xf32>
    %cst_76 = arith.constant 3.200000e+01 : f32
    %99 = vector.broadcast %cst_76 : f32 to vector<64x1xf32>
    %100 = arith.divf %98, %99 : vector<64x1xf32>
    %101 = vector.broadcast %100 : vector<64x1xf32> to vector<64x32xf32>
    %102 = arith.subf %96, %101 : vector<64x32xf32>
    %103 = arith.mulf %102, %102 : vector<64x32xf32>
    %cst_77 = arith.constant dense<0.000000e+00> : vector<64xf32>
    %104 = vector.multi_reduction <add>, %103, %cst_77 [1] : vector<64x32xf32> to vector<64xf32>
    %105 = vector.shape_cast %104 : vector<64xf32> to vector<64x1xf32>
    %cst_78 = arith.constant 3.200000e+01 : f32
    %106 = vector.broadcast %cst_78 : f32 to vector<64x1xf32>
    %107 = arith.divf %105, %106 : vector<64x1xf32>
    %cst_79 = arith.constant 9.99999974E-6 : f32
    %108 = vector.broadcast %cst_79 : f32 to vector<64x1xf32>
    %109 = arith.addf %107, %108 : vector<64x1xf32>
    %110 = math.rsqrt %109 : vector<64x1xf32>
    %111 = vector.broadcast %110 : vector<64x1xf32> to vector<64x32xf32>
    %112 = arith.mulf %102, %111 : vector<64x32xf32>
    %113 = vector.broadcast %6 : vector<1x32xf32> to vector<64x32xf32>
    %114 = arith.mulf %112, %113 : vector<64x32xf32>
    %115 = vector.broadcast %7 : vector<1x32xf32> to vector<64x32xf32>
    %116 = arith.addf %114, %115 : vector<64x32xf32>
    %c1_i32_80 = arith.constant 1 : i32
    %117 = tpu.dynamic_rotate %116 by %c1_i32_80 dim 0 : vector<64x32xf32>, i32 -> vector<64x32xf32>
    %118 = arith.mulf %117, %8 : vector<64x32xf32>
    %c63_i32_81 = arith.constant 63 : i32
    %119 = tpu.dynamic_rotate %116 by %c63_i32_81 dim 0 : vector<64x32xf32>, i32 -> vector<64x32xf32>
    %120 = arith.mulf %119, %9 : vector<64x32xf32>
    %c0_82 = arith.constant 0 : index
    %c0_83 = arith.constant 0 : index
    %c0_84 = arith.constant 0 : index
    %c0_85 = arith.constant 0 : index
    %121 = vector.load %arg3[%c0_82, %c0_83, %c0_84, %c0_85] : memref<3x3x32x32xf32, #tpu.memory_space<vmem>>, vector<1x1x32x32xf32>
    %122 = vector.shape_cast %121 : vector<1x1x32x32xf32> to vector<32x32xf32>
    %cst_86 = arith.constant dense<0.000000e+00> : vector<64x32xf32>
    %123 = tpu.matmul %118, %122, %cst_86 {dimension_numbers = #tpu.dot_dimension_numbers<[1], [0], [0], [1], [0, 0, 1, 1], [], []>} : vector<64x32xf32>, vector<32x32xf32>, vector<64x32xf32> -> vector<64x32xf32>
    %c0_87 = arith.constant 0 : index
    %c1_88 = arith.constant 1 : index
    %c0_89 = arith.constant 0 : index
    %c0_90 = arith.constant 0 : index
    %124 = vector.load %arg3[%c0_87, %c1_88, %c0_89, %c0_90] : memref<3x3x32x32xf32, #tpu.memory_space<vmem>>, vector<1x1x32x32xf32>
    %125 = vector.shape_cast %124 : vector<1x1x32x32xf32> to vector<32x32xf32>
    %cst_91 = arith.constant dense<0.000000e+00> : vector<64x32xf32>
    %126 = tpu.matmul %116, %125, %cst_91 {dimension_numbers = #tpu.dot_dimension_numbers<[1], [0], [0], [1], [0, 0, 1, 1], [], []>} : vector<64x32xf32>, vector<32x32xf32>, vector<64x32xf32> -> vector<64x32xf32>
    %127 = arith.addf %123, %126 : vector<64x32xf32>
    %c0_92 = arith.constant 0 : index
    %c2_93 = arith.constant 2 : index
    %c0_94 = arith.constant 0 : index
    %c0_95 = arith.constant 0 : index
    %128 = vector.load %arg3[%c0_92, %c2_93, %c0_94, %c0_95] : memref<3x3x32x32xf32, #tpu.memory_space<vmem>>, vector<1x1x32x32xf32>
    %129 = vector.shape_cast %128 : vector<1x1x32x32xf32> to vector<32x32xf32>
    %cst_96 = arith.constant dense<0.000000e+00> : vector<64x32xf32>
    %130 = tpu.matmul %120, %129, %cst_96 {dimension_numbers = #tpu.dot_dimension_numbers<[1], [0], [0], [1], [0, 0, 1, 1], [], []>} : vector<64x32xf32>, vector<32x32xf32>, vector<64x32xf32> -> vector<64x32xf32>
    %131 = arith.addf %127, %130 : vector<64x32xf32>
    %132 = vector.extract_strided_slice %1 {offsets = [0, 0], sizes = [1, 32], strides = [1, 1]} : vector<3x32xf32> to vector<1x32xf32>
    %133 = vector.broadcast %132 : vector<1x32xf32> to vector<64x32xf32>
    %134 = arith.addf %131, %133 : vector<64x32xf32>
    %cst_97 = arith.constant 0.000000e+00 : f32
    %135 = vector.broadcast %cst_97 : f32 to vector<64x32xf32>
    %136 = arith.maximumf %134, %135 : vector<64x32xf32>
    %137 = vector.shape_cast %136 : vector<64x32xf32> to vector<2x32x32xf32>
    %cst_98 = arith.constant dense<0.000000e+00> : vector<2x32xf32>
    %138 = vector.multi_reduction <add>, %137, %cst_98 [1] : vector<2x32x32xf32> to vector<2x32xf32>
    %139 = vector.shape_cast %138 : vector<2x32xf32> to vector<2x1x32xf32>
    %cst_99 = arith.constant 3.200000e+01 : f32
    %140 = vector.broadcast %cst_99 : f32 to vector<2x1x32xf32>
    %141 = arith.divf %139, %140 : vector<2x1x32xf32>
    %142 = vector.broadcast %141 : vector<2x1x32xf32> to vector<2x32x32xf32>
    %143 = arith.subf %137, %142 : vector<2x32x32xf32>
    %144 = arith.mulf %143, %143 : vector<2x32x32xf32>
    %cst_100 = arith.constant dense<0.000000e+00> : vector<2x32xf32>
    %145 = vector.multi_reduction <add>, %144, %cst_100 [1] : vector<2x32x32xf32> to vector<2x32xf32>
    %146 = vector.shape_cast %145 : vector<2x32xf32> to vector<2x1x32xf32>
    %cst_101 = arith.constant 3.200000e+01 : f32
    %147 = vector.broadcast %cst_101 : f32 to vector<2x1x32xf32>
    %148 = arith.divf %146, %147 : vector<2x1x32xf32>
    %cst_102 = arith.constant 9.99999974E-6 : f32
    %149 = vector.broadcast %cst_102 : f32 to vector<2x1x32xf32>
    %150 = arith.addf %148, %149 : vector<2x1x32xf32>
    %151 = math.rsqrt %150 : vector<2x1x32xf32>
    %152 = vector.broadcast %151 : vector<2x1x32xf32> to vector<2x32x32xf32>
    %153 = arith.mulf %143, %152 : vector<2x32x32xf32>
    %154 = vector.broadcast %3 : vector<1x32x1xf32> to vector<2x32x32xf32>
    %155 = arith.mulf %153, %154 : vector<2x32x32xf32>
    %156 = vector.broadcast %5 : vector<1x32x1xf32> to vector<2x32x32xf32>
    %157 = arith.addf %155, %156 : vector<2x32x32xf32>
    %158 = vector.shape_cast %157 : vector<2x32x32xf32> to vector<64x32xf32>
    %c1_i32_103 = arith.constant 1 : i32
    %159 = tpu.dynamic_rotate %158 by %c1_i32_103 dim 0 : vector<64x32xf32>, i32 -> vector<64x32xf32>
    %160 = arith.mulf %159, %8 : vector<64x32xf32>
    %c63_i32_104 = arith.constant 63 : i32
    %161 = tpu.dynamic_rotate %158 by %c63_i32_104 dim 0 : vector<64x32xf32>, i32 -> vector<64x32xf32>
    %162 = arith.mulf %161, %9 : vector<64x32xf32>
    %c1_105 = arith.constant 1 : index
    %c0_106 = arith.constant 0 : index
    %c0_107 = arith.constant 0 : index
    %c0_108 = arith.constant 0 : index
    %163 = vector.load %arg3[%c1_105, %c0_106, %c0_107, %c0_108] : memref<3x3x32x32xf32, #tpu.memory_space<vmem>>, vector<1x1x32x32xf32>
    %164 = vector.shape_cast %163 : vector<1x1x32x32xf32> to vector<32x32xf32>
    %cst_109 = arith.constant dense<0.000000e+00> : vector<64x32xf32>
    %165 = tpu.matmul %160, %164, %cst_109 {dimension_numbers = #tpu.dot_dimension_numbers<[1], [0], [0], [1], [0, 0, 1, 1], [], []>} : vector<64x32xf32>, vector<32x32xf32>, vector<64x32xf32> -> vector<64x32xf32>
    %c1_110 = arith.constant 1 : index
    %c1_111 = arith.constant 1 : index
    %c0_112 = arith.constant 0 : index
    %c0_113 = arith.constant 0 : index
    %166 = vector.load %arg3[%c1_110, %c1_111, %c0_112, %c0_113] : memref<3x3x32x32xf32, #tpu.memory_space<vmem>>, vector<1x1x32x32xf32>
    %167 = vector.shape_cast %166 : vector<1x1x32x32xf32> to vector<32x32xf32>
    %cst_114 = arith.constant dense<0.000000e+00> : vector<64x32xf32>
    %168 = tpu.matmul %158, %167, %cst_114 {dimension_numbers = #tpu.dot_dimension_numbers<[1], [0], [0], [1], [0, 0, 1, 1], [], []>} : vector<64x32xf32>, vector<32x32xf32>, vector<64x32xf32> -> vector<64x32xf32>
    %169 = arith.addf %165, %168 : vector<64x32xf32>
    %c1_115 = arith.constant 1 : index
    %c2_116 = arith.constant 2 : index
    %c0_117 = arith.constant 0 : index
    %c0_118 = arith.constant 0 : index
    %170 = vector.load %arg3[%c1_115, %c2_116, %c0_117, %c0_118] : memref<3x3x32x32xf32, #tpu.memory_space<vmem>>, vector<1x1x32x32xf32>
    %171 = vector.shape_cast %170 : vector<1x1x32x32xf32> to vector<32x32xf32>
    %cst_119 = arith.constant dense<0.000000e+00> : vector<64x32xf32>
    %172 = tpu.matmul %162, %171, %cst_119 {dimension_numbers = #tpu.dot_dimension_numbers<[1], [0], [0], [1], [0, 0, 1, 1], [], []>} : vector<64x32xf32>, vector<32x32xf32>, vector<64x32xf32> -> vector<64x32xf32>
    %173 = arith.addf %169, %172 : vector<64x32xf32>
    %174 = vector.extract_strided_slice %1 {offsets = [1, 0], sizes = [1, 32], strides = [1, 1]} : vector<3x32xf32> to vector<1x32xf32>
    %175 = vector.broadcast %174 : vector<1x32xf32> to vector<64x32xf32>
    %176 = arith.addf %173, %175 : vector<64x32xf32>
    %c2_i32_120 = arith.constant 2 : i32
    %177 = tpu.dynamic_rotate %176 by %c2_i32_120 dim 0 : vector<64x32xf32>, i32 -> vector<64x32xf32>
    %178 = arith.mulf %177, %10 : vector<64x32xf32>
    %c62_i32_121 = arith.constant 62 : i32
    %179 = tpu.dynamic_rotate %176 by %c62_i32_121 dim 0 : vector<64x32xf32>, i32 -> vector<64x32xf32>
    %180 = arith.mulf %179, %11 : vector<64x32xf32>
    %c2_122 = arith.constant 2 : index
    %c0_123 = arith.constant 0 : index
    %c0_124 = arith.constant 0 : index
    %c0_125 = arith.constant 0 : index
    %181 = vector.load %arg3[%c2_122, %c0_123, %c0_124, %c0_125] : memref<3x3x32x32xf32, #tpu.memory_space<vmem>>, vector<1x1x32x32xf32>
    %182 = vector.shape_cast %181 : vector<1x1x32x32xf32> to vector<32x32xf32>
    %cst_126 = arith.constant dense<0.000000e+00> : vector<64x32xf32>
    %183 = tpu.matmul %178, %182, %cst_126 {dimension_numbers = #tpu.dot_dimension_numbers<[1], [0], [0], [1], [0, 0, 1, 1], [], []>} : vector<64x32xf32>, vector<32x32xf32>, vector<64x32xf32> -> vector<64x32xf32>
    %c2_127 = arith.constant 2 : index
    %c1_128 = arith.constant 1 : index
    %c0_129 = arith.constant 0 : index
    %c0_130 = arith.constant 0 : index
    %184 = vector.load %arg3[%c2_127, %c1_128, %c0_129, %c0_130] : memref<3x3x32x32xf32, #tpu.memory_space<vmem>>, vector<1x1x32x32xf32>
    %185 = vector.shape_cast %184 : vector<1x1x32x32xf32> to vector<32x32xf32>
    %cst_131 = arith.constant dense<0.000000e+00> : vector<64x32xf32>
    %186 = tpu.matmul %176, %185, %cst_131 {dimension_numbers = #tpu.dot_dimension_numbers<[1], [0], [0], [1], [0, 0, 1, 1], [], []>} : vector<64x32xf32>, vector<32x32xf32>, vector<64x32xf32> -> vector<64x32xf32>
    %187 = arith.addf %183, %186 : vector<64x32xf32>
    %c2_132 = arith.constant 2 : index
    %c2_133 = arith.constant 2 : index
    %c0_134 = arith.constant 0 : index
    %c0_135 = arith.constant 0 : index
    %188 = vector.load %arg3[%c2_132, %c2_133, %c0_134, %c0_135] : memref<3x3x32x32xf32, #tpu.memory_space<vmem>>, vector<1x1x32x32xf32>
    %189 = vector.shape_cast %188 : vector<1x1x32x32xf32> to vector<32x32xf32>
    %cst_136 = arith.constant dense<0.000000e+00> : vector<64x32xf32>
    %190 = tpu.matmul %180, %189, %cst_136 {dimension_numbers = #tpu.dot_dimension_numbers<[1], [0], [0], [1], [0, 0, 1, 1], [], []>} : vector<64x32xf32>, vector<32x32xf32>, vector<64x32xf32> -> vector<64x32xf32>
    %191 = arith.addf %187, %190 : vector<64x32xf32>
    %192 = vector.extract_strided_slice %1 {offsets = [2, 0], sizes = [1, 32], strides = [1, 1]} : vector<3x32xf32> to vector<1x32xf32>
    %193 = vector.broadcast %192 : vector<1x32xf32> to vector<64x32xf32>
    %194 = arith.addf %191, %193 : vector<64x32xf32>
    %c1_i32_137 = arith.constant 1 : i32
    %195 = tpu.dynamic_rotate %194 by %c1_i32_137 dim 0 : vector<64x32xf32>, i32 -> vector<64x32xf32>
    %196 = arith.mulf %195, %8 : vector<64x32xf32>
    %c63_i32_138 = arith.constant 63 : i32
    %197 = tpu.dynamic_rotate %194 by %c63_i32_138 dim 0 : vector<64x32xf32>, i32 -> vector<64x32xf32>
    %198 = arith.mulf %197, %9 : vector<64x32xf32>
    %c0_139 = arith.constant 0 : index
    %c0_140 = arith.constant 0 : index
    %c0_141 = arith.constant 0 : index
    %c0_142 = arith.constant 0 : index
    %199 = vector.load %arg3[%c0_139, %c0_140, %c0_141, %c0_142] : memref<3x3x32x32xf32, #tpu.memory_space<vmem>>, vector<1x1x32x32xf32>
    %200 = vector.shape_cast %199 : vector<1x1x32x32xf32> to vector<32x32xf32>
    %cst_143 = arith.constant dense<0.000000e+00> : vector<64x32xf32>
    %201 = tpu.matmul %196, %200, %cst_143 {dimension_numbers = #tpu.dot_dimension_numbers<[1], [0], [0], [1], [0, 0, 1, 1], [], []>} : vector<64x32xf32>, vector<32x32xf32>, vector<64x32xf32> -> vector<64x32xf32>
    %c0_144 = arith.constant 0 : index
    %c1_145 = arith.constant 1 : index
    %c0_146 = arith.constant 0 : index
    %c0_147 = arith.constant 0 : index
    %202 = vector.load %arg3[%c0_144, %c1_145, %c0_146, %c0_147] : memref<3x3x32x32xf32, #tpu.memory_space<vmem>>, vector<1x1x32x32xf32>
    %203 = vector.shape_cast %202 : vector<1x1x32x32xf32> to vector<32x32xf32>
    %cst_148 = arith.constant dense<0.000000e+00> : vector<64x32xf32>
    %204 = tpu.matmul %194, %203, %cst_148 {dimension_numbers = #tpu.dot_dimension_numbers<[1], [0], [0], [1], [0, 0, 1, 1], [], []>} : vector<64x32xf32>, vector<32x32xf32>, vector<64x32xf32> -> vector<64x32xf32>
    %205 = arith.addf %201, %204 : vector<64x32xf32>
    %c0_149 = arith.constant 0 : index
    %c2_150 = arith.constant 2 : index
    %c0_151 = arith.constant 0 : index
    %c0_152 = arith.constant 0 : index
    %206 = vector.load %arg3[%c0_149, %c2_150, %c0_151, %c0_152] : memref<3x3x32x32xf32, #tpu.memory_space<vmem>>, vector<1x1x32x32xf32>
    %207 = vector.shape_cast %206 : vector<1x1x32x32xf32> to vector<32x32xf32>
    %cst_153 = arith.constant dense<0.000000e+00> : vector<64x32xf32>
    %208 = tpu.matmul %198, %207, %cst_153 {dimension_numbers = #tpu.dot_dimension_numbers<[1], [0], [0], [1], [0, 0, 1, 1], [], []>} : vector<64x32xf32>, vector<32x32xf32>, vector<64x32xf32> -> vector<64x32xf32>
    %209 = arith.addf %205, %208 : vector<64x32xf32>
    %210 = vector.extract_strided_slice %1 {offsets = [0, 0], sizes = [1, 32], strides = [1, 1]} : vector<3x32xf32> to vector<1x32xf32>
    %211 = vector.broadcast %210 : vector<1x32xf32> to vector<64x32xf32>
    %212 = arith.addf %209, %211 : vector<64x32xf32>
    %cst_154 = arith.constant 0.000000e+00 : f32
    %213 = vector.broadcast %cst_154 : f32 to vector<64x32xf32>
    %214 = arith.maximumf %212, %213 : vector<64x32xf32>
    %215 = vector.shape_cast %214 : vector<64x32xf32> to vector<2x32x32xf32>
    %cst_155 = arith.constant dense<0.000000e+00> : vector<2x32xf32>
    %216 = vector.multi_reduction <add>, %215, %cst_155 [1] : vector<2x32x32xf32> to vector<2x32xf32>
    %217 = vector.shape_cast %216 : vector<2x32xf32> to vector<2x1x32xf32>
    %cst_156 = arith.constant 3.200000e+01 : f32
    %218 = vector.broadcast %cst_156 : f32 to vector<2x1x32xf32>
    %219 = arith.divf %217, %218 : vector<2x1x32xf32>
    %220 = vector.broadcast %219 : vector<2x1x32xf32> to vector<2x32x32xf32>
    %221 = arith.subf %215, %220 : vector<2x32x32xf32>
    %222 = arith.mulf %221, %221 : vector<2x32x32xf32>
    %cst_157 = arith.constant dense<0.000000e+00> : vector<2x32xf32>
    %223 = vector.multi_reduction <add>, %222, %cst_157 [1] : vector<2x32x32xf32> to vector<2x32xf32>
    %224 = vector.shape_cast %223 : vector<2x32xf32> to vector<2x1x32xf32>
    %cst_158 = arith.constant 3.200000e+01 : f32
    %225 = vector.broadcast %cst_158 : f32 to vector<2x1x32xf32>
    %226 = arith.divf %224, %225 : vector<2x1x32xf32>
    %cst_159 = arith.constant 9.99999974E-6 : f32
    %227 = vector.broadcast %cst_159 : f32 to vector<2x1x32xf32>
    %228 = arith.addf %226, %227 : vector<2x1x32xf32>
    %229 = math.rsqrt %228 : vector<2x1x32xf32>
    %230 = vector.broadcast %229 : vector<2x1x32xf32> to vector<2x32x32xf32>
    %231 = arith.mulf %221, %230 : vector<2x32x32xf32>
    %232 = vector.broadcast %3 : vector<1x32x1xf32> to vector<2x32x32xf32>
    %233 = arith.mulf %231, %232 : vector<2x32x32xf32>
    %234 = vector.broadcast %5 : vector<1x32x1xf32> to vector<2x32x32xf32>
    %235 = arith.addf %233, %234 : vector<2x32x32xf32>
    %236 = vector.shape_cast %235 : vector<2x32x32xf32> to vector<64x32xf32>
    %c1_i32_160 = arith.constant 1 : i32
    %237 = tpu.dynamic_rotate %236 by %c1_i32_160 dim 0 : vector<64x32xf32>, i32 -> vector<64x32xf32>
    %238 = arith.mulf %237, %8 : vector<64x32xf32>
    %c63_i32_161 = arith.constant 63 : i32
    %239 = tpu.dynamic_rotate %236 by %c63_i32_161 dim 0 : vector<64x32xf32>, i32 -> vector<64x32xf32>
    %240 = arith.mulf %239, %9 : vector<64x32xf32>
    %c1_162 = arith.constant 1 : index
    %c0_163 = arith.constant 0 : index
    %c0_164 = arith.constant 0 : index
    %c0_165 = arith.constant 0 : index
    %241 = vector.load %arg3[%c1_162, %c0_163, %c0_164, %c0_165] : memref<3x3x32x32xf32, #tpu.memory_space<vmem>>, vector<1x1x32x32xf32>
    %242 = vector.shape_cast %241 : vector<1x1x32x32xf32> to vector<32x32xf32>
    %cst_166 = arith.constant dense<0.000000e+00> : vector<64x32xf32>
    %243 = tpu.matmul %238, %242, %cst_166 {dimension_numbers = #tpu.dot_dimension_numbers<[1], [0], [0], [1], [0, 0, 1, 1], [], []>} : vector<64x32xf32>, vector<32x32xf32>, vector<64x32xf32> -> vector<64x32xf32>
    %c1_167 = arith.constant 1 : index
    %c1_168 = arith.constant 1 : index
    %c0_169 = arith.constant 0 : index
    %c0_170 = arith.constant 0 : index
    %244 = vector.load %arg3[%c1_167, %c1_168, %c0_169, %c0_170] : memref<3x3x32x32xf32, #tpu.memory_space<vmem>>, vector<1x1x32x32xf32>
    %245 = vector.shape_cast %244 : vector<1x1x32x32xf32> to vector<32x32xf32>
    %cst_171 = arith.constant dense<0.000000e+00> : vector<64x32xf32>
    %246 = tpu.matmul %236, %245, %cst_171 {dimension_numbers = #tpu.dot_dimension_numbers<[1], [0], [0], [1], [0, 0, 1, 1], [], []>} : vector<64x32xf32>, vector<32x32xf32>, vector<64x32xf32> -> vector<64x32xf32>
    %247 = arith.addf %243, %246 : vector<64x32xf32>
    %c1_172 = arith.constant 1 : index
    %c2_173 = arith.constant 2 : index
    %c0_174 = arith.constant 0 : index
    %c0_175 = arith.constant 0 : index
    %248 = vector.load %arg3[%c1_172, %c2_173, %c0_174, %c0_175] : memref<3x3x32x32xf32, #tpu.memory_space<vmem>>, vector<1x1x32x32xf32>
    %249 = vector.shape_cast %248 : vector<1x1x32x32xf32> to vector<32x32xf32>
    %cst_176 = arith.constant dense<0.000000e+00> : vector<64x32xf32>
    %250 = tpu.matmul %240, %249, %cst_176 {dimension_numbers = #tpu.dot_dimension_numbers<[1], [0], [0], [1], [0, 0, 1, 1], [], []>} : vector<64x32xf32>, vector<32x32xf32>, vector<64x32xf32> -> vector<64x32xf32>
    %251 = arith.addf %247, %250 : vector<64x32xf32>
    %252 = vector.extract_strided_slice %1 {offsets = [1, 0], sizes = [1, 32], strides = [1, 1]} : vector<3x32xf32> to vector<1x32xf32>
    %253 = vector.broadcast %252 : vector<1x32xf32> to vector<64x32xf32>
    %254 = arith.addf %251, %253 : vector<64x32xf32>
    %c2_i32_177 = arith.constant 2 : i32
    %255 = tpu.dynamic_rotate %254 by %c2_i32_177 dim 0 : vector<64x32xf32>, i32 -> vector<64x32xf32>
    %256 = arith.mulf %255, %10 : vector<64x32xf32>
    %c62_i32_178 = arith.constant 62 : i32
    %257 = tpu.dynamic_rotate %254 by %c62_i32_178 dim 0 : vector<64x32xf32>, i32 -> vector<64x32xf32>
    %258 = arith.mulf %257, %11 : vector<64x32xf32>
    %c2_179 = arith.constant 2 : index
    %c0_180 = arith.constant 0 : index
    %c0_181 = arith.constant 0 : index
    %c0_182 = arith.constant 0 : index
    %259 = vector.load %arg3[%c2_179, %c0_180, %c0_181, %c0_182] : memref<3x3x32x32xf32, #tpu.memory_space<vmem>>, vector<1x1x32x32xf32>
    %260 = vector.shape_cast %259 : vector<1x1x32x32xf32> to vector<32x32xf32>
    %cst_183 = arith.constant dense<0.000000e+00> : vector<64x32xf32>
    %261 = tpu.matmul %256, %260, %cst_183 {dimension_numbers = #tpu.dot_dimension_numbers<[1], [0], [0], [1], [0, 0, 1, 1], [], []>} : vector<64x32xf32>, vector<32x32xf32>, vector<64x32xf32> -> vector<64x32xf32>
    %c2_184 = arith.constant 2 : index
    %c1_185 = arith.constant 1 : index
    %c0_186 = arith.constant 0 : index
    %c0_187 = arith.constant 0 : index
    %262 = vector.load %arg3[%c2_184, %c1_185, %c0_186, %c0_187] : memref<3x3x32x32xf32, #tpu.memory_space<vmem>>, vector<1x1x32x32xf32>
    %263 = vector.shape_cast %262 : vector<1x1x32x32xf32> to vector<32x32xf32>
    %cst_188 = arith.constant dense<0.000000e+00> : vector<64x32xf32>
    %264 = tpu.matmul %254, %263, %cst_188 {dimension_numbers = #tpu.dot_dimension_numbers<[1], [0], [0], [1], [0, 0, 1, 1], [], []>} : vector<64x32xf32>, vector<32x32xf32>, vector<64x32xf32> -> vector<64x32xf32>
    %265 = arith.addf %261, %264 : vector<64x32xf32>
    %c2_189 = arith.constant 2 : index
    %c2_190 = arith.constant 2 : index
    %c0_191 = arith.constant 0 : index
    %c0_192 = arith.constant 0 : index
    %266 = vector.load %arg3[%c2_189, %c2_190, %c0_191, %c0_192] : memref<3x3x32x32xf32, #tpu.memory_space<vmem>>, vector<1x1x32x32xf32>
    %267 = vector.shape_cast %266 : vector<1x1x32x32xf32> to vector<32x32xf32>
    %cst_193 = arith.constant dense<0.000000e+00> : vector<64x32xf32>
    %268 = tpu.matmul %258, %267, %cst_193 {dimension_numbers = #tpu.dot_dimension_numbers<[1], [0], [0], [1], [0, 0, 1, 1], [], []>} : vector<64x32xf32>, vector<32x32xf32>, vector<64x32xf32> -> vector<64x32xf32>
    %269 = arith.addf %265, %268 : vector<64x32xf32>
    %270 = vector.extract_strided_slice %1 {offsets = [2, 0], sizes = [1, 32], strides = [1, 1]} : vector<3x32xf32> to vector<1x32xf32>
    %271 = vector.broadcast %270 : vector<1x32xf32> to vector<64x32xf32>
    %272 = arith.addf %269, %271 : vector<64x32xf32>
    %c1_i32_194 = arith.constant 1 : i32
    %273 = tpu.dynamic_rotate %272 by %c1_i32_194 dim 0 : vector<64x32xf32>, i32 -> vector<64x32xf32>
    %274 = arith.mulf %273, %8 : vector<64x32xf32>
    %c63_i32_195 = arith.constant 63 : i32
    %275 = tpu.dynamic_rotate %272 by %c63_i32_195 dim 0 : vector<64x32xf32>, i32 -> vector<64x32xf32>
    %276 = arith.mulf %275, %9 : vector<64x32xf32>
    %c0_196 = arith.constant 0 : index
    %c0_197 = arith.constant 0 : index
    %c0_198 = arith.constant 0 : index
    %c0_199 = arith.constant 0 : index
    %277 = vector.load %arg3[%c0_196, %c0_197, %c0_198, %c0_199] : memref<3x3x32x32xf32, #tpu.memory_space<vmem>>, vector<1x1x32x32xf32>
    %278 = vector.shape_cast %277 : vector<1x1x32x32xf32> to vector<32x32xf32>
    %cst_200 = arith.constant dense<0.000000e+00> : vector<64x32xf32>
    %279 = tpu.matmul %274, %278, %cst_200 {dimension_numbers = #tpu.dot_dimension_numbers<[1], [0], [0], [1], [0, 0, 1, 1], [], []>} : vector<64x32xf32>, vector<32x32xf32>, vector<64x32xf32> -> vector<64x32xf32>
    %c0_201 = arith.constant 0 : index
    %c1_202 = arith.constant 1 : index
    %c0_203 = arith.constant 0 : index
    %c0_204 = arith.constant 0 : index
    %280 = vector.load %arg3[%c0_201, %c1_202, %c0_203, %c0_204] : memref<3x3x32x32xf32, #tpu.memory_space<vmem>>, vector<1x1x32x32xf32>
    %281 = vector.shape_cast %280 : vector<1x1x32x32xf32> to vector<32x32xf32>
    %cst_205 = arith.constant dense<0.000000e+00> : vector<64x32xf32>
    %282 = tpu.matmul %272, %281, %cst_205 {dimension_numbers = #tpu.dot_dimension_numbers<[1], [0], [0], [1], [0, 0, 1, 1], [], []>} : vector<64x32xf32>, vector<32x32xf32>, vector<64x32xf32> -> vector<64x32xf32>
    %283 = arith.addf %279, %282 : vector<64x32xf32>
    %c0_206 = arith.constant 0 : index
    %c2_207 = arith.constant 2 : index
    %c0_208 = arith.constant 0 : index
    %c0_209 = arith.constant 0 : index
    %284 = vector.load %arg3[%c0_206, %c2_207, %c0_208, %c0_209] : memref<3x3x32x32xf32, #tpu.memory_space<vmem>>, vector<1x1x32x32xf32>
    %285 = vector.shape_cast %284 : vector<1x1x32x32xf32> to vector<32x32xf32>
    %cst_210 = arith.constant dense<0.000000e+00> : vector<64x32xf32>
    %286 = tpu.matmul %276, %285, %cst_210 {dimension_numbers = #tpu.dot_dimension_numbers<[1], [0], [0], [1], [0, 0, 1, 1], [], []>} : vector<64x32xf32>, vector<32x32xf32>, vector<64x32xf32> -> vector<64x32xf32>
    %287 = arith.addf %283, %286 : vector<64x32xf32>
    %288 = vector.extract_strided_slice %1 {offsets = [0, 0], sizes = [1, 32], strides = [1, 1]} : vector<3x32xf32> to vector<1x32xf32>
    %289 = vector.broadcast %288 : vector<1x32xf32> to vector<64x32xf32>
    %290 = arith.addf %287, %289 : vector<64x32xf32>
    %cst_211 = arith.constant 0.000000e+00 : f32
    %291 = vector.broadcast %cst_211 : f32 to vector<64x32xf32>
    %292 = arith.maximumf %290, %291 : vector<64x32xf32>
    %293 = vector.shape_cast %292 : vector<64x32xf32> to vector<2x32x32xf32>
    %cst_212 = arith.constant dense<0.000000e+00> : vector<2x32xf32>
    %294 = vector.multi_reduction <add>, %293, %cst_212 [1] : vector<2x32x32xf32> to vector<2x32xf32>
    %295 = vector.shape_cast %294 : vector<2x32xf32> to vector<2x1x32xf32>
    %cst_213 = arith.constant 3.200000e+01 : f32
    %296 = vector.broadcast %cst_213 : f32 to vector<2x1x32xf32>
    %297 = arith.divf %295, %296 : vector<2x1x32xf32>
    %298 = vector.broadcast %297 : vector<2x1x32xf32> to vector<2x32x32xf32>
    %299 = arith.subf %293, %298 : vector<2x32x32xf32>
    %300 = arith.mulf %299, %299 : vector<2x32x32xf32>
    %cst_214 = arith.constant dense<0.000000e+00> : vector<2x32xf32>
    %301 = vector.multi_reduction <add>, %300, %cst_214 [1] : vector<2x32x32xf32> to vector<2x32xf32>
    %302 = vector.shape_cast %301 : vector<2x32xf32> to vector<2x1x32xf32>
    %cst_215 = arith.constant 3.200000e+01 : f32
    %303 = vector.broadcast %cst_215 : f32 to vector<2x1x32xf32>
    %304 = arith.divf %302, %303 : vector<2x1x32xf32>
    %cst_216 = arith.constant 9.99999974E-6 : f32
    %305 = vector.broadcast %cst_216 : f32 to vector<2x1x32xf32>
    %306 = arith.addf %304, %305 : vector<2x1x32xf32>
    %307 = math.rsqrt %306 : vector<2x1x32xf32>
    %308 = vector.broadcast %307 : vector<2x1x32xf32> to vector<2x32x32xf32>
    %309 = arith.mulf %299, %308 : vector<2x32x32xf32>
    %310 = vector.broadcast %3 : vector<1x32x1xf32> to vector<2x32x32xf32>
    %311 = arith.mulf %309, %310 : vector<2x32x32xf32>
    %312 = vector.broadcast %5 : vector<1x32x1xf32> to vector<2x32x32xf32>
    %313 = arith.addf %311, %312 : vector<2x32x32xf32>
    %314 = vector.shape_cast %313 : vector<2x32x32xf32> to vector<64x32xf32>
    %c1_i32_217 = arith.constant 1 : i32
    %315 = tpu.dynamic_rotate %314 by %c1_i32_217 dim 0 : vector<64x32xf32>, i32 -> vector<64x32xf32>
    %316 = arith.mulf %315, %8 : vector<64x32xf32>
    %c63_i32_218 = arith.constant 63 : i32
    %317 = tpu.dynamic_rotate %314 by %c63_i32_218 dim 0 : vector<64x32xf32>, i32 -> vector<64x32xf32>
    %318 = arith.mulf %317, %9 : vector<64x32xf32>
    %c1_219 = arith.constant 1 : index
    %c0_220 = arith.constant 0 : index
    %c0_221 = arith.constant 0 : index
    %c0_222 = arith.constant 0 : index
    %319 = vector.load %arg3[%c1_219, %c0_220, %c0_221, %c0_222] : memref<3x3x32x32xf32, #tpu.memory_space<vmem>>, vector<1x1x32x32xf32>
    %320 = vector.shape_cast %319 : vector<1x1x32x32xf32> to vector<32x32xf32>
    %cst_223 = arith.constant dense<0.000000e+00> : vector<64x32xf32>
    %321 = tpu.matmul %316, %320, %cst_223 {dimension_numbers = #tpu.dot_dimension_numbers<[1], [0], [0], [1], [0, 0, 1, 1], [], []>} : vector<64x32xf32>, vector<32x32xf32>, vector<64x32xf32> -> vector<64x32xf32>
    %c1_224 = arith.constant 1 : index
    %c1_225 = arith.constant 1 : index
    %c0_226 = arith.constant 0 : index
    %c0_227 = arith.constant 0 : index
    %322 = vector.load %arg3[%c1_224, %c1_225, %c0_226, %c0_227] : memref<3x3x32x32xf32, #tpu.memory_space<vmem>>, vector<1x1x32x32xf32>
    %323 = vector.shape_cast %322 : vector<1x1x32x32xf32> to vector<32x32xf32>
    %cst_228 = arith.constant dense<0.000000e+00> : vector<64x32xf32>
    %324 = tpu.matmul %314, %323, %cst_228 {dimension_numbers = #tpu.dot_dimension_numbers<[1], [0], [0], [1], [0, 0, 1, 1], [], []>} : vector<64x32xf32>, vector<32x32xf32>, vector<64x32xf32> -> vector<64x32xf32>
    %325 = arith.addf %321, %324 : vector<64x32xf32>
    %c1_229 = arith.constant 1 : index
    %c2_230 = arith.constant 2 : index
    %c0_231 = arith.constant 0 : index
    %c0_232 = arith.constant 0 : index
    %326 = vector.load %arg3[%c1_229, %c2_230, %c0_231, %c0_232] : memref<3x3x32x32xf32, #tpu.memory_space<vmem>>, vector<1x1x32x32xf32>
    %327 = vector.shape_cast %326 : vector<1x1x32x32xf32> to vector<32x32xf32>
    %cst_233 = arith.constant dense<0.000000e+00> : vector<64x32xf32>
    %328 = tpu.matmul %318, %327, %cst_233 {dimension_numbers = #tpu.dot_dimension_numbers<[1], [0], [0], [1], [0, 0, 1, 1], [], []>} : vector<64x32xf32>, vector<32x32xf32>, vector<64x32xf32> -> vector<64x32xf32>
    %329 = arith.addf %325, %328 : vector<64x32xf32>
    %330 = vector.extract_strided_slice %1 {offsets = [1, 0], sizes = [1, 32], strides = [1, 1]} : vector<3x32xf32> to vector<1x32xf32>
    %331 = vector.broadcast %330 : vector<1x32xf32> to vector<64x32xf32>
    %332 = arith.addf %329, %331 : vector<64x32xf32>
    %c2_i32_234 = arith.constant 2 : i32
    %333 = tpu.dynamic_rotate %332 by %c2_i32_234 dim 0 : vector<64x32xf32>, i32 -> vector<64x32xf32>
    %334 = arith.mulf %333, %10 : vector<64x32xf32>
    %c62_i32_235 = arith.constant 62 : i32
    %335 = tpu.dynamic_rotate %332 by %c62_i32_235 dim 0 : vector<64x32xf32>, i32 -> vector<64x32xf32>
    %336 = arith.mulf %335, %11 : vector<64x32xf32>
    %c2_236 = arith.constant 2 : index
    %c0_237 = arith.constant 0 : index
    %c0_238 = arith.constant 0 : index
    %c0_239 = arith.constant 0 : index
    %337 = vector.load %arg3[%c2_236, %c0_237, %c0_238, %c0_239] : memref<3x3x32x32xf32, #tpu.memory_space<vmem>>, vector<1x1x32x32xf32>
    %338 = vector.shape_cast %337 : vector<1x1x32x32xf32> to vector<32x32xf32>
    %cst_240 = arith.constant dense<0.000000e+00> : vector<64x32xf32>
    %339 = tpu.matmul %334, %338, %cst_240 {dimension_numbers = #tpu.dot_dimension_numbers<[1], [0], [0], [1], [0, 0, 1, 1], [], []>} : vector<64x32xf32>, vector<32x32xf32>, vector<64x32xf32> -> vector<64x32xf32>
    %c2_241 = arith.constant 2 : index
    %c1_242 = arith.constant 1 : index
    %c0_243 = arith.constant 0 : index
    %c0_244 = arith.constant 0 : index
    %340 = vector.load %arg3[%c2_241, %c1_242, %c0_243, %c0_244] : memref<3x3x32x32xf32, #tpu.memory_space<vmem>>, vector<1x1x32x32xf32>
    %341 = vector.shape_cast %340 : vector<1x1x32x32xf32> to vector<32x32xf32>
    %cst_245 = arith.constant dense<0.000000e+00> : vector<64x32xf32>
    %342 = tpu.matmul %332, %341, %cst_245 {dimension_numbers = #tpu.dot_dimension_numbers<[1], [0], [0], [1], [0, 0, 1, 1], [], []>} : vector<64x32xf32>, vector<32x32xf32>, vector<64x32xf32> -> vector<64x32xf32>
    %343 = arith.addf %339, %342 : vector<64x32xf32>
    %c2_246 = arith.constant 2 : index
    %c2_247 = arith.constant 2 : index
    %c0_248 = arith.constant 0 : index
    %c0_249 = arith.constant 0 : index
    %344 = vector.load %arg3[%c2_246, %c2_247, %c0_248, %c0_249] : memref<3x3x32x32xf32, #tpu.memory_space<vmem>>, vector<1x1x32x32xf32>
    %345 = vector.shape_cast %344 : vector<1x1x32x32xf32> to vector<32x32xf32>
    %cst_250 = arith.constant dense<0.000000e+00> : vector<64x32xf32>
    %346 = tpu.matmul %336, %345, %cst_250 {dimension_numbers = #tpu.dot_dimension_numbers<[1], [0], [0], [1], [0, 0, 1, 1], [], []>} : vector<64x32xf32>, vector<32x32xf32>, vector<64x32xf32> -> vector<64x32xf32>
    %347 = arith.addf %343, %346 : vector<64x32xf32>
    %348 = vector.extract_strided_slice %1 {offsets = [2, 0], sizes = [1, 32], strides = [1, 1]} : vector<3x32xf32> to vector<1x32xf32>
    %349 = vector.broadcast %348 : vector<1x32xf32> to vector<64x32xf32>
    %350 = arith.addf %347, %349 : vector<64x32xf32>
    %c0_251 = arith.constant 0 : index
    %c0_252 = arith.constant 0 : index
    %351 = vector.load %arg9[%c0_251, %c0_252] : memref<32x6xf32, #tpu.memory_space<vmem>>, vector<32x6xf32>
    %cst_253 = arith.constant dense<0.000000e+00> : vector<64x6xf32>
    %352 = tpu.matmul %350, %351, %cst_253 {dimension_numbers = #tpu.dot_dimension_numbers<[1], [0], [0], [1], [0, 0, 1, 1], [], []>} : vector<64x32xf32>, vector<32x6xf32>, vector<64x6xf32> -> vector<64x6xf32>
    %c0_254 = arith.constant 0 : index
    %c0_255 = arith.constant 0 : index
    %353 = vector.load %arg10[%c0_254, %c0_255] : memref<1x6xf32, #tpu.memory_space<vmem>>, vector<1x6xf32>
    %354 = vector.broadcast %353 : vector<1x6xf32> to vector<64x6xf32>
    %355 = arith.addf %352, %354 : vector<64x6xf32>
    %c0_256 = arith.constant 0 : index
    %c0_257 = arith.constant 0 : index
    %356 = vector.load %arg20[%c0_256, %c0_257] : memref<1x6xf32, #tpu.memory_space<vmem>>, vector<1x6xf32>
    %c0_258 = arith.constant 0 : index
    %c0_259 = arith.constant 0 : index
    %357 = vector.load %arg21[%c0_258, %c0_259] : memref<1x6xf32, #tpu.memory_space<vmem>>, vector<1x6xf32>
    %c0_260 = arith.constant 0 : index
    %c0_261 = arith.constant 0 : index
    %358 = vector.load %arg22[%c0_260, %c0_261] : memref<6x6xf32, #tpu.memory_space<vmem>>, vector<6x6xf32>
    %c0_262 = arith.constant 0 : index
    %c0_263 = arith.constant 0 : index
    %359 = vector.load %arg15[%c0_262, %c0_263] : memref<64x6xf32, #tpu.memory_space<vmem>>, vector<64x6xf32>
    %360 = arith.mulf %355, %359 : vector<64x6xf32>
    %cst_264 = arith.constant dense<0.000000e+00> : vector<64xf32>
    %361 = vector.multi_reduction <add>, %360, %cst_264 [1] : vector<64x6xf32> to vector<64xf32>
    %362 = vector.shape_cast %361 : vector<64xf32> to vector<64x1xf32>
    %c0_265 = arith.constant 0 : index
    %c0_266 = arith.constant 0 : index
    %363 = vector.load %arg16[%c0_265, %c0_266] : memref<64x6xf32, #tpu.memory_space<vmem>>, vector<64x6xf32>
    %cst_267 = arith.constant dense<0.000000e+00> : vector<64x6xf32>
    %364 = tpu.matmul %363, %358, %cst_267 {dimension_numbers = #tpu.dot_dimension_numbers<[1], [0], [0], [1], [0, 0, 1, 1], [], []>} : vector<64x6xf32>, vector<6x6xf32>, vector<64x6xf32> -> vector<64x6xf32>
    %365 = arith.mulf %364, %359 : vector<64x6xf32>
    %cst_268 = arith.constant dense<0.000000e+00> : vector<64xf32>
    %366 = vector.multi_reduction <add>, %365, %cst_268 [1] : vector<64x6xf32> to vector<64xf32>
    %367 = vector.shape_cast %366 : vector<64xf32> to vector<64x1xf32>
    %c0_269 = arith.constant 0 : index
    %c0_270 = arith.constant 0 : index
    %368 = vector.load %arg17[%c0_269, %c0_270] : memref<64x6xf32, #tpu.memory_space<vmem>>, vector<64x6xf32>
    %369 = vector.broadcast %356 : vector<1x6xf32> to vector<64x6xf32>
    %370 = arith.mulf %368, %369 : vector<64x6xf32>
    %c0_271 = arith.constant 0 : index
    %c0_272 = arith.constant 0 : index
    %371 = vector.load %arg18[%c0_271, %c0_272] : memref<64x6xf32, #tpu.memory_space<vmem>>, vector<64x6xf32>
    %372 = vector.broadcast %357 : vector<1x6xf32> to vector<64x6xf32>
    %373 = arith.mulf %371, %372 : vector<64x6xf32>
    %374 = arith.addf %370, %373 : vector<64x6xf32>
    %cst_273 = arith.constant dense<0.000000e+00> : vector<64xf32>
    %375 = vector.multi_reduction <add>, %374, %cst_273 [1] : vector<64x6xf32> to vector<64xf32>
    %376 = vector.shape_cast %375 : vector<64xf32> to vector<64x1xf32>
    %377 = arith.addf %362, %367 : vector<64x1xf32>
    %378 = arith.addf %377, %376 : vector<64x1xf32>
    %cst_274 = arith.constant dense<0.000000e+00> : vector<1xf32>
    %379 = vector.multi_reduction <add>, %378, %cst_274 [0] : vector<64x1xf32> to vector<1xf32>
    %380 = vector.shape_cast %379 : vector<1xf32> to vector<1x1xf32>
    %381 = vector.shape_cast %355 : vector<64x6xf32> to vector<2x32x6xf32>
    %c0_275 = arith.constant 0 : index
    %c0_276 = arith.constant 0 : index
    %382 = vector.load %arg19[%c0_275, %c0_276] : memref<2x32xf32, #tpu.memory_space<vmem>>, vector<2x32xf32>
    %383 = vector.shape_cast %358 : vector<6x6xf32> to vector<1x6x6xf32>
    %384 = vector.extract_strided_slice %381 {offsets = [0, 0, 0], sizes = [2, 1, 6], strides = [1, 1, 1]} : vector<2x32x6xf32> to vector<2x1x6xf32>
    %385 = vector.shape_cast %384 : vector<2x1x6xf32> to vector<2x6xf32>
    %386 = vector.broadcast %356 : vector<1x6xf32> to vector<2x6xf32>
    %387 = arith.addf %386, %385 : vector<2x6xf32>
    %388 = vector.shape_cast %387 : vector<2x6xf32> to vector<2x6x1xf32>
    %389 = vector.broadcast %388 : vector<2x6x1xf32> to vector<2x6x6xf32>
    %390 = vector.broadcast %383 : vector<1x6x6xf32> to vector<2x6x6xf32>
    %391 = arith.addf %389, %390 : vector<2x6x6xf32>
    %392 = vector.extract_strided_slice %381 {offsets = [0, 1, 0], sizes = [2, 1, 6], strides = [1, 1, 1]} : vector<2x32x6xf32> to vector<2x1x6xf32>
    %393 = vector.shape_cast %392 : vector<2x1x6xf32> to vector<2x6xf32>
    %394 = vector.shape_cast %393 : vector<2x6xf32> to vector<2x1x6xf32>
    %395 = vector.broadcast %394 : vector<2x1x6xf32> to vector<2x6x6xf32>
    %396 = arith.addf %391, %395 : vector<2x6x6xf32>
    %cst_277 = arith.constant dense<0xFF800000> : vector<2x6xf32>
    %397 = vector.multi_reduction <maximumf>, %396, %cst_277 [1] : vector<2x6x6xf32> to vector<2x6xf32>
    %398 = vector.shape_cast %397 : vector<2x6xf32> to vector<2x1x6xf32>
    %399 = vector.broadcast %398 : vector<2x1x6xf32> to vector<2x6x6xf32>
    %400 = arith.subf %396, %399 : vector<2x6x6xf32>
    %401 = math.exp %400 : vector<2x6x6xf32>
    %cst_278 = arith.constant dense<0.000000e+00> : vector<2x6xf32>
    %402 = vector.multi_reduction <add>, %401, %cst_278 [1] : vector<2x6x6xf32> to vector<2x6xf32>
    %403 = math.log %402 : vector<2x6xf32>
    %404 = vector.shape_cast %398 : vector<2x1x6xf32> to vector<2x6xf32>
    %405 = arith.addf %403, %404 : vector<2x6xf32>
    %406 = vector.extract_strided_slice %382 {offsets = [0, 1], sizes = [2, 1], strides = [1, 1]} : vector<2x32xf32> to vector<2x1xf32>
    %407 = arith.subf %405, %387 : vector<2x6xf32>
    %408 = vector.broadcast %406 : vector<2x1xf32> to vector<2x6xf32>
    %409 = arith.mulf %408, %407 : vector<2x6xf32>
    %410 = arith.addf %387, %409 : vector<2x6xf32>
    %411 = vector.shape_cast %410 : vector<2x6xf32> to vector<2x6x1xf32>
    %412 = vector.broadcast %411 : vector<2x6x1xf32> to vector<2x6x6xf32>
    %413 = vector.broadcast %383 : vector<1x6x6xf32> to vector<2x6x6xf32>
    %414 = arith.addf %412, %413 : vector<2x6x6xf32>
    %415 = vector.extract_strided_slice %381 {offsets = [0, 2, 0], sizes = [2, 1, 6], strides = [1, 1, 1]} : vector<2x32x6xf32> to vector<2x1x6xf32>
    %416 = vector.shape_cast %415 : vector<2x1x6xf32> to vector<2x6xf32>
    %417 = vector.shape_cast %416 : vector<2x6xf32> to vector<2x1x6xf32>
    %418 = vector.broadcast %417 : vector<2x1x6xf32> to vector<2x6x6xf32>
    %419 = arith.addf %414, %418 : vector<2x6x6xf32>
    %cst_279 = arith.constant dense<0xFF800000> : vector<2x6xf32>
    %420 = vector.multi_reduction <maximumf>, %419, %cst_279 [1] : vector<2x6x6xf32> to vector<2x6xf32>
    %421 = vector.shape_cast %420 : vector<2x6xf32> to vector<2x1x6xf32>
    %422 = vector.broadcast %421 : vector<2x1x6xf32> to vector<2x6x6xf32>
    %423 = arith.subf %419, %422 : vector<2x6x6xf32>
    %424 = math.exp %423 : vector<2x6x6xf32>
    %cst_280 = arith.constant dense<0.000000e+00> : vector<2x6xf32>
    %425 = vector.multi_reduction <add>, %424, %cst_280 [1] : vector<2x6x6xf32> to vector<2x6xf32>
    %426 = math.log %425 : vector<2x6xf32>
    %427 = vector.shape_cast %421 : vector<2x1x6xf32> to vector<2x6xf32>
    %428 = arith.addf %426, %427 : vector<2x6xf32>
    %429 = vector.extract_strided_slice %382 {offsets = [0, 2], sizes = [2, 1], strides = [1, 1]} : vector<2x32xf32> to vector<2x1xf32>
    %430 = arith.subf %428, %410 : vector<2x6xf32>
    %431 = vector.broadcast %429 : vector<2x1xf32> to vector<2x6xf32>
    %432 = arith.mulf %431, %430 : vector<2x6xf32>
    %433 = arith.addf %410, %432 : vector<2x6xf32>
    %434 = vector.shape_cast %433 : vector<2x6xf32> to vector<2x6x1xf32>
    %435 = vector.broadcast %434 : vector<2x6x1xf32> to vector<2x6x6xf32>
    %436 = vector.broadcast %383 : vector<1x6x6xf32> to vector<2x6x6xf32>
    %437 = arith.addf %435, %436 : vector<2x6x6xf32>
    %438 = vector.extract_strided_slice %381 {offsets = [0, 3, 0], sizes = [2, 1, 6], strides = [1, 1, 1]} : vector<2x32x6xf32> to vector<2x1x6xf32>
    %439 = vector.shape_cast %438 : vector<2x1x6xf32> to vector<2x6xf32>
    %440 = vector.shape_cast %439 : vector<2x6xf32> to vector<2x1x6xf32>
    %441 = vector.broadcast %440 : vector<2x1x6xf32> to vector<2x6x6xf32>
    %442 = arith.addf %437, %441 : vector<2x6x6xf32>
    %cst_281 = arith.constant dense<0xFF800000> : vector<2x6xf32>
    %443 = vector.multi_reduction <maximumf>, %442, %cst_281 [1] : vector<2x6x6xf32> to vector<2x6xf32>
    %444 = vector.shape_cast %443 : vector<2x6xf32> to vector<2x1x6xf32>
    %445 = vector.broadcast %444 : vector<2x1x6xf32> to vector<2x6x6xf32>
    %446 = arith.subf %442, %445 : vector<2x6x6xf32>
    %447 = math.exp %446 : vector<2x6x6xf32>
    %cst_282 = arith.constant dense<0.000000e+00> : vector<2x6xf32>
    %448 = vector.multi_reduction <add>, %447, %cst_282 [1] : vector<2x6x6xf32> to vector<2x6xf32>
    %449 = math.log %448 : vector<2x6xf32>
    %450 = vector.shape_cast %444 : vector<2x1x6xf32> to vector<2x6xf32>
    %451 = arith.addf %449, %450 : vector<2x6xf32>
    %452 = vector.extract_strided_slice %382 {offsets = [0, 3], sizes = [2, 1], strides = [1, 1]} : vector<2x32xf32> to vector<2x1xf32>
    %453 = arith.subf %451, %433 : vector<2x6xf32>
    %454 = vector.broadcast %452 : vector<2x1xf32> to vector<2x6xf32>
    %455 = arith.mulf %454, %453 : vector<2x6xf32>
    %456 = arith.addf %433, %455 : vector<2x6xf32>
    %457 = vector.shape_cast %456 : vector<2x6xf32> to vector<2x6x1xf32>
    %458 = vector.broadcast %457 : vector<2x6x1xf32> to vector<2x6x6xf32>
    %459 = vector.broadcast %383 : vector<1x6x6xf32> to vector<2x6x6xf32>
    %460 = arith.addf %458, %459 : vector<2x6x6xf32>
    %461 = vector.extract_strided_slice %381 {offsets = [0, 4, 0], sizes = [2, 1, 6], strides = [1, 1, 1]} : vector<2x32x6xf32> to vector<2x1x6xf32>
    %462 = vector.shape_cast %461 : vector<2x1x6xf32> to vector<2x6xf32>
    %463 = vector.shape_cast %462 : vector<2x6xf32> to vector<2x1x6xf32>
    %464 = vector.broadcast %463 : vector<2x1x6xf32> to vector<2x6x6xf32>
    %465 = arith.addf %460, %464 : vector<2x6x6xf32>
    %cst_283 = arith.constant dense<0xFF800000> : vector<2x6xf32>
    %466 = vector.multi_reduction <maximumf>, %465, %cst_283 [1] : vector<2x6x6xf32> to vector<2x6xf32>
    %467 = vector.shape_cast %466 : vector<2x6xf32> to vector<2x1x6xf32>
    %468 = vector.broadcast %467 : vector<2x1x6xf32> to vector<2x6x6xf32>
    %469 = arith.subf %465, %468 : vector<2x6x6xf32>
    %470 = math.exp %469 : vector<2x6x6xf32>
    %cst_284 = arith.constant dense<0.000000e+00> : vector<2x6xf32>
    %471 = vector.multi_reduction <add>, %470, %cst_284 [1] : vector<2x6x6xf32> to vector<2x6xf32>
    %472 = math.log %471 : vector<2x6xf32>
    %473 = vector.shape_cast %467 : vector<2x1x6xf32> to vector<2x6xf32>
    %474 = arith.addf %472, %473 : vector<2x6xf32>
    %475 = vector.extract_strided_slice %382 {offsets = [0, 4], sizes = [2, 1], strides = [1, 1]} : vector<2x32xf32> to vector<2x1xf32>
    %476 = arith.subf %474, %456 : vector<2x6xf32>
    %477 = vector.broadcast %475 : vector<2x1xf32> to vector<2x6xf32>
    %478 = arith.mulf %477, %476 : vector<2x6xf32>
    %479 = arith.addf %456, %478 : vector<2x6xf32>
    %480 = vector.shape_cast %479 : vector<2x6xf32> to vector<2x6x1xf32>
    %481 = vector.broadcast %480 : vector<2x6x1xf32> to vector<2x6x6xf32>
    %482 = vector.broadcast %383 : vector<1x6x6xf32> to vector<2x6x6xf32>
    %483 = arith.addf %481, %482 : vector<2x6x6xf32>
    %484 = vector.extract_strided_slice %381 {offsets = [0, 5, 0], sizes = [2, 1, 6], strides = [1, 1, 1]} : vector<2x32x6xf32> to vector<2x1x6xf32>
    %485 = vector.shape_cast %484 : vector<2x1x6xf32> to vector<2x6xf32>
    %486 = vector.shape_cast %485 : vector<2x6xf32> to vector<2x1x6xf32>
    %487 = vector.broadcast %486 : vector<2x1x6xf32> to vector<2x6x6xf32>
    %488 = arith.addf %483, %487 : vector<2x6x6xf32>
    %cst_285 = arith.constant dense<0xFF800000> : vector<2x6xf32>
    %489 = vector.multi_reduction <maximumf>, %488, %cst_285 [1] : vector<2x6x6xf32> to vector<2x6xf32>
    %490 = vector.shape_cast %489 : vector<2x6xf32> to vector<2x1x6xf32>
    %491 = vector.broadcast %490 : vector<2x1x6xf32> to vector<2x6x6xf32>
    %492 = arith.subf %488, %491 : vector<2x6x6xf32>
    %493 = math.exp %492 : vector<2x6x6xf32>
    %cst_286 = arith.constant dense<0.000000e+00> : vector<2x6xf32>
    %494 = vector.multi_reduction <add>, %493, %cst_286 [1] : vector<2x6x6xf32> to vector<2x6xf32>
    %495 = math.log %494 : vector<2x6xf32>
    %496 = vector.shape_cast %490 : vector<2x1x6xf32> to vector<2x6xf32>
    %497 = arith.addf %495, %496 : vector<2x6xf32>
    %498 = vector.extract_strided_slice %382 {offsets = [0, 5], sizes = [2, 1], strides = [1, 1]} : vector<2x32xf32> to vector<2x1xf32>
    %499 = arith.subf %497, %479 : vector<2x6xf32>
    %500 = vector.broadcast %498 : vector<2x1xf32> to vector<2x6xf32>
    %501 = arith.mulf %500, %499 : vector<2x6xf32>
    %502 = arith.addf %479, %501 : vector<2x6xf32>
    %503 = vector.shape_cast %502 : vector<2x6xf32> to vector<2x6x1xf32>
    %504 = vector.broadcast %503 : vector<2x6x1xf32> to vector<2x6x6xf32>
    %505 = vector.broadcast %383 : vector<1x6x6xf32> to vector<2x6x6xf32>
    %506 = arith.addf %504, %505 : vector<2x6x6xf32>
    %507 = vector.extract_strided_slice %381 {offsets = [0, 6, 0], sizes = [2, 1, 6], strides = [1, 1, 1]} : vector<2x32x6xf32> to vector<2x1x6xf32>
    %508 = vector.shape_cast %507 : vector<2x1x6xf32> to vector<2x6xf32>
    %509 = vector.shape_cast %508 : vector<2x6xf32> to vector<2x1x6xf32>
    %510 = vector.broadcast %509 : vector<2x1x6xf32> to vector<2x6x6xf32>
    %511 = arith.addf %506, %510 : vector<2x6x6xf32>
    %cst_287 = arith.constant dense<0xFF800000> : vector<2x6xf32>
    %512 = vector.multi_reduction <maximumf>, %511, %cst_287 [1] : vector<2x6x6xf32> to vector<2x6xf32>
    %513 = vector.shape_cast %512 : vector<2x6xf32> to vector<2x1x6xf32>
    %514 = vector.broadcast %513 : vector<2x1x6xf32> to vector<2x6x6xf32>
    %515 = arith.subf %511, %514 : vector<2x6x6xf32>
    %516 = math.exp %515 : vector<2x6x6xf32>
    %cst_288 = arith.constant dense<0.000000e+00> : vector<2x6xf32>
    %517 = vector.multi_reduction <add>, %516, %cst_288 [1] : vector<2x6x6xf32> to vector<2x6xf32>
    %518 = math.log %517 : vector<2x6xf32>
    %519 = vector.shape_cast %513 : vector<2x1x6xf32> to vector<2x6xf32>
    %520 = arith.addf %518, %519 : vector<2x6xf32>
    %521 = vector.extract_strided_slice %382 {offsets = [0, 6], sizes = [2, 1], strides = [1, 1]} : vector<2x32xf32> to vector<2x1xf32>
    %522 = arith.subf %520, %502 : vector<2x6xf32>
    %523 = vector.broadcast %521 : vector<2x1xf32> to vector<2x6xf32>
    %524 = arith.mulf %523, %522 : vector<2x6xf32>
    %525 = arith.addf %502, %524 : vector<2x6xf32>
    %526 = vector.shape_cast %525 : vector<2x6xf32> to vector<2x6x1xf32>
    %527 = vector.broadcast %526 : vector<2x6x1xf32> to vector<2x6x6xf32>
    %528 = vector.broadcast %383 : vector<1x6x6xf32> to vector<2x6x6xf32>
    %529 = arith.addf %527, %528 : vector<2x6x6xf32>
    %530 = vector.extract_strided_slice %381 {offsets = [0, 7, 0], sizes = [2, 1, 6], strides = [1, 1, 1]} : vector<2x32x6xf32> to vector<2x1x6xf32>
    %531 = vector.shape_cast %530 : vector<2x1x6xf32> to vector<2x6xf32>
    %532 = vector.shape_cast %531 : vector<2x6xf32> to vector<2x1x6xf32>
    %533 = vector.broadcast %532 : vector<2x1x6xf32> to vector<2x6x6xf32>
    %534 = arith.addf %529, %533 : vector<2x6x6xf32>
    %cst_289 = arith.constant dense<0xFF800000> : vector<2x6xf32>
    %535 = vector.multi_reduction <maximumf>, %534, %cst_289 [1] : vector<2x6x6xf32> to vector<2x6xf32>
    %536 = vector.shape_cast %535 : vector<2x6xf32> to vector<2x1x6xf32>
    %537 = vector.broadcast %536 : vector<2x1x6xf32> to vector<2x6x6xf32>
    %538 = arith.subf %534, %537 : vector<2x6x6xf32>
    %539 = math.exp %538 : vector<2x6x6xf32>
    %cst_290 = arith.constant dense<0.000000e+00> : vector<2x6xf32>
    %540 = vector.multi_reduction <add>, %539, %cst_290 [1] : vector<2x6x6xf32> to vector<2x6xf32>
    %541 = math.log %540 : vector<2x6xf32>
    %542 = vector.shape_cast %536 : vector<2x1x6xf32> to vector<2x6xf32>
    %543 = arith.addf %541, %542 : vector<2x6xf32>
    %544 = vector.extract_strided_slice %382 {offsets = [0, 7], sizes = [2, 1], strides = [1, 1]} : vector<2x32xf32> to vector<2x1xf32>
    %545 = arith.subf %543, %525 : vector<2x6xf32>
    %546 = vector.broadcast %544 : vector<2x1xf32> to vector<2x6xf32>
    %547 = arith.mulf %546, %545 : vector<2x6xf32>
    %548 = arith.addf %525, %547 : vector<2x6xf32>
    %549 = vector.shape_cast %548 : vector<2x6xf32> to vector<2x6x1xf32>
    %550 = vector.broadcast %549 : vector<2x6x1xf32> to vector<2x6x6xf32>
    %551 = vector.broadcast %383 : vector<1x6x6xf32> to vector<2x6x6xf32>
    %552 = arith.addf %550, %551 : vector<2x6x6xf32>
    %553 = vector.extract_strided_slice %381 {offsets = [0, 8, 0], sizes = [2, 1, 6], strides = [1, 1, 1]} : vector<2x32x6xf32> to vector<2x1x6xf32>
    %554 = vector.shape_cast %553 : vector<2x1x6xf32> to vector<2x6xf32>
    %555 = vector.shape_cast %554 : vector<2x6xf32> to vector<2x1x6xf32>
    %556 = vector.broadcast %555 : vector<2x1x6xf32> to vector<2x6x6xf32>
    %557 = arith.addf %552, %556 : vector<2x6x6xf32>
    %cst_291 = arith.constant dense<0xFF800000> : vector<2x6xf32>
    %558 = vector.multi_reduction <maximumf>, %557, %cst_291 [1] : vector<2x6x6xf32> to vector<2x6xf32>
    %559 = vector.shape_cast %558 : vector<2x6xf32> to vector<2x1x6xf32>
    %560 = vector.broadcast %559 : vector<2x1x6xf32> to vector<2x6x6xf32>
    %561 = arith.subf %557, %560 : vector<2x6x6xf32>
    %562 = math.exp %561 : vector<2x6x6xf32>
    %cst_292 = arith.constant dense<0.000000e+00> : vector<2x6xf32>
    %563 = vector.multi_reduction <add>, %562, %cst_292 [1] : vector<2x6x6xf32> to vector<2x6xf32>
    %564 = math.log %563 : vector<2x6xf32>
    %565 = vector.shape_cast %559 : vector<2x1x6xf32> to vector<2x6xf32>
    %566 = arith.addf %564, %565 : vector<2x6xf32>
    %567 = vector.extract_strided_slice %382 {offsets = [0, 8], sizes = [2, 1], strides = [1, 1]} : vector<2x32xf32> to vector<2x1xf32>
    %568 = arith.subf %566, %548 : vector<2x6xf32>
    %569 = vector.broadcast %567 : vector<2x1xf32> to vector<2x6xf32>
    %570 = arith.mulf %569, %568 : vector<2x6xf32>
    %571 = arith.addf %548, %570 : vector<2x6xf32>
    %572 = vector.shape_cast %571 : vector<2x6xf32> to vector<2x6x1xf32>
    %573 = vector.broadcast %572 : vector<2x6x1xf32> to vector<2x6x6xf32>
    %574 = vector.broadcast %383 : vector<1x6x6xf32> to vector<2x6x6xf32>
    %575 = arith.addf %573, %574 : vector<2x6x6xf32>
    %576 = vector.extract_strided_slice %381 {offsets = [0, 9, 0], sizes = [2, 1, 6], strides = [1, 1, 1]} : vector<2x32x6xf32> to vector<2x1x6xf32>
    %577 = vector.shape_cast %576 : vector<2x1x6xf32> to vector<2x6xf32>
    %578 = vector.shape_cast %577 : vector<2x6xf32> to vector<2x1x6xf32>
    %579 = vector.broadcast %578 : vector<2x1x6xf32> to vector<2x6x6xf32>
    %580 = arith.addf %575, %579 : vector<2x6x6xf32>
    %cst_293 = arith.constant dense<0xFF800000> : vector<2x6xf32>
    %581 = vector.multi_reduction <maximumf>, %580, %cst_293 [1] : vector<2x6x6xf32> to vector<2x6xf32>
    %582 = vector.shape_cast %581 : vector<2x6xf32> to vector<2x1x6xf32>
    %583 = vector.broadcast %582 : vector<2x1x6xf32> to vector<2x6x6xf32>
    %584 = arith.subf %580, %583 : vector<2x6x6xf32>
    %585 = math.exp %584 : vector<2x6x6xf32>
    %cst_294 = arith.constant dense<0.000000e+00> : vector<2x6xf32>
    %586 = vector.multi_reduction <add>, %585, %cst_294 [1] : vector<2x6x6xf32> to vector<2x6xf32>
    %587 = math.log %586 : vector<2x6xf32>
    %588 = vector.shape_cast %582 : vector<2x1x6xf32> to vector<2x6xf32>
    %589 = arith.addf %587, %588 : vector<2x6xf32>
    %590 = vector.extract_strided_slice %382 {offsets = [0, 9], sizes = [2, 1], strides = [1, 1]} : vector<2x32xf32> to vector<2x1xf32>
    %591 = arith.subf %589, %571 : vector<2x6xf32>
    %592 = vector.broadcast %590 : vector<2x1xf32> to vector<2x6xf32>
    %593 = arith.mulf %592, %591 : vector<2x6xf32>
    %594 = arith.addf %571, %593 : vector<2x6xf32>
    %595 = vector.shape_cast %594 : vector<2x6xf32> to vector<2x6x1xf32>
    %596 = vector.broadcast %595 : vector<2x6x1xf32> to vector<2x6x6xf32>
    %597 = vector.broadcast %383 : vector<1x6x6xf32> to vector<2x6x6xf32>
    %598 = arith.addf %596, %597 : vector<2x6x6xf32>
    %599 = vector.extract_strided_slice %381 {offsets = [0, 10, 0], sizes = [2, 1, 6], strides = [1, 1, 1]} : vector<2x32x6xf32> to vector<2x1x6xf32>
    %600 = vector.shape_cast %599 : vector<2x1x6xf32> to vector<2x6xf32>
    %601 = vector.shape_cast %600 : vector<2x6xf32> to vector<2x1x6xf32>
    %602 = vector.broadcast %601 : vector<2x1x6xf32> to vector<2x6x6xf32>
    %603 = arith.addf %598, %602 : vector<2x6x6xf32>
    %cst_295 = arith.constant dense<0xFF800000> : vector<2x6xf32>
    %604 = vector.multi_reduction <maximumf>, %603, %cst_295 [1] : vector<2x6x6xf32> to vector<2x6xf32>
    %605 = vector.shape_cast %604 : vector<2x6xf32> to vector<2x1x6xf32>
    %606 = vector.broadcast %605 : vector<2x1x6xf32> to vector<2x6x6xf32>
    %607 = arith.subf %603, %606 : vector<2x6x6xf32>
    %608 = math.exp %607 : vector<2x6x6xf32>
    %cst_296 = arith.constant dense<0.000000e+00> : vector<2x6xf32>
    %609 = vector.multi_reduction <add>, %608, %cst_296 [1] : vector<2x6x6xf32> to vector<2x6xf32>
    %610 = math.log %609 : vector<2x6xf32>
    %611 = vector.shape_cast %605 : vector<2x1x6xf32> to vector<2x6xf32>
    %612 = arith.addf %610, %611 : vector<2x6xf32>
    %613 = vector.extract_strided_slice %382 {offsets = [0, 10], sizes = [2, 1], strides = [1, 1]} : vector<2x32xf32> to vector<2x1xf32>
    %614 = arith.subf %612, %594 : vector<2x6xf32>
    %615 = vector.broadcast %613 : vector<2x1xf32> to vector<2x6xf32>
    %616 = arith.mulf %615, %614 : vector<2x6xf32>
    %617 = arith.addf %594, %616 : vector<2x6xf32>
    %618 = vector.shape_cast %617 : vector<2x6xf32> to vector<2x6x1xf32>
    %619 = vector.broadcast %618 : vector<2x6x1xf32> to vector<2x6x6xf32>
    %620 = vector.broadcast %383 : vector<1x6x6xf32> to vector<2x6x6xf32>
    %621 = arith.addf %619, %620 : vector<2x6x6xf32>
    %622 = vector.extract_strided_slice %381 {offsets = [0, 11, 0], sizes = [2, 1, 6], strides = [1, 1, 1]} : vector<2x32x6xf32> to vector<2x1x6xf32>
    %623 = vector.shape_cast %622 : vector<2x1x6xf32> to vector<2x6xf32>
    %624 = vector.shape_cast %623 : vector<2x6xf32> to vector<2x1x6xf32>
    %625 = vector.broadcast %624 : vector<2x1x6xf32> to vector<2x6x6xf32>
    %626 = arith.addf %621, %625 : vector<2x6x6xf32>
    %cst_297 = arith.constant dense<0xFF800000> : vector<2x6xf32>
    %627 = vector.multi_reduction <maximumf>, %626, %cst_297 [1] : vector<2x6x6xf32> to vector<2x6xf32>
    %628 = vector.shape_cast %627 : vector<2x6xf32> to vector<2x1x6xf32>
    %629 = vector.broadcast %628 : vector<2x1x6xf32> to vector<2x6x6xf32>
    %630 = arith.subf %626, %629 : vector<2x6x6xf32>
    %631 = math.exp %630 : vector<2x6x6xf32>
    %cst_298 = arith.constant dense<0.000000e+00> : vector<2x6xf32>
    %632 = vector.multi_reduction <add>, %631, %cst_298 [1] : vector<2x6x6xf32> to vector<2x6xf32>
    %633 = math.log %632 : vector<2x6xf32>
    %634 = vector.shape_cast %628 : vector<2x1x6xf32> to vector<2x6xf32>
    %635 = arith.addf %633, %634 : vector<2x6xf32>
    %636 = vector.extract_strided_slice %382 {offsets = [0, 11], sizes = [2, 1], strides = [1, 1]} : vector<2x32xf32> to vector<2x1xf32>
    %637 = arith.subf %635, %617 : vector<2x6xf32>
    %638 = vector.broadcast %636 : vector<2x1xf32> to vector<2x6xf32>
    %639 = arith.mulf %638, %637 : vector<2x6xf32>
    %640 = arith.addf %617, %639 : vector<2x6xf32>
    %641 = vector.shape_cast %640 : vector<2x6xf32> to vector<2x6x1xf32>
    %642 = vector.broadcast %641 : vector<2x6x1xf32> to vector<2x6x6xf32>
    %643 = vector.broadcast %383 : vector<1x6x6xf32> to vector<2x6x6xf32>
    %644 = arith.addf %642, %643 : vector<2x6x6xf32>
    %645 = vector.extract_strided_slice %381 {offsets = [0, 12, 0], sizes = [2, 1, 6], strides = [1, 1, 1]} : vector<2x32x6xf32> to vector<2x1x6xf32>
    %646 = vector.shape_cast %645 : vector<2x1x6xf32> to vector<2x6xf32>
    %647 = vector.shape_cast %646 : vector<2x6xf32> to vector<2x1x6xf32>
    %648 = vector.broadcast %647 : vector<2x1x6xf32> to vector<2x6x6xf32>
    %649 = arith.addf %644, %648 : vector<2x6x6xf32>
    %cst_299 = arith.constant dense<0xFF800000> : vector<2x6xf32>
    %650 = vector.multi_reduction <maximumf>, %649, %cst_299 [1] : vector<2x6x6xf32> to vector<2x6xf32>
    %651 = vector.shape_cast %650 : vector<2x6xf32> to vector<2x1x6xf32>
    %652 = vector.broadcast %651 : vector<2x1x6xf32> to vector<2x6x6xf32>
    %653 = arith.subf %649, %652 : vector<2x6x6xf32>
    %654 = math.exp %653 : vector<2x6x6xf32>
    %cst_300 = arith.constant dense<0.000000e+00> : vector<2x6xf32>
    %655 = vector.multi_reduction <add>, %654, %cst_300 [1] : vector<2x6x6xf32> to vector<2x6xf32>
    %656 = math.log %655 : vector<2x6xf32>
    %657 = vector.shape_cast %651 : vector<2x1x6xf32> to vector<2x6xf32>
    %658 = arith.addf %656, %657 : vector<2x6xf32>
    %659 = vector.extract_strided_slice %382 {offsets = [0, 12], sizes = [2, 1], strides = [1, 1]} : vector<2x32xf32> to vector<2x1xf32>
    %660 = arith.subf %658, %640 : vector<2x6xf32>
    %661 = vector.broadcast %659 : vector<2x1xf32> to vector<2x6xf32>
    %662 = arith.mulf %661, %660 : vector<2x6xf32>
    %663 = arith.addf %640, %662 : vector<2x6xf32>
    %664 = vector.shape_cast %663 : vector<2x6xf32> to vector<2x6x1xf32>
    %665 = vector.broadcast %664 : vector<2x6x1xf32> to vector<2x6x6xf32>
    %666 = vector.broadcast %383 : vector<1x6x6xf32> to vector<2x6x6xf32>
    %667 = arith.addf %665, %666 : vector<2x6x6xf32>
    %668 = vector.extract_strided_slice %381 {offsets = [0, 13, 0], sizes = [2, 1, 6], strides = [1, 1, 1]} : vector<2x32x6xf32> to vector<2x1x6xf32>
    %669 = vector.shape_cast %668 : vector<2x1x6xf32> to vector<2x6xf32>
    %670 = vector.shape_cast %669 : vector<2x6xf32> to vector<2x1x6xf32>
    %671 = vector.broadcast %670 : vector<2x1x6xf32> to vector<2x6x6xf32>
    %672 = arith.addf %667, %671 : vector<2x6x6xf32>
    %cst_301 = arith.constant dense<0xFF800000> : vector<2x6xf32>
    %673 = vector.multi_reduction <maximumf>, %672, %cst_301 [1] : vector<2x6x6xf32> to vector<2x6xf32>
    %674 = vector.shape_cast %673 : vector<2x6xf32> to vector<2x1x6xf32>
    %675 = vector.broadcast %674 : vector<2x1x6xf32> to vector<2x6x6xf32>
    %676 = arith.subf %672, %675 : vector<2x6x6xf32>
    %677 = math.exp %676 : vector<2x6x6xf32>
    %cst_302 = arith.constant dense<0.000000e+00> : vector<2x6xf32>
    %678 = vector.multi_reduction <add>, %677, %cst_302 [1] : vector<2x6x6xf32> to vector<2x6xf32>
    %679 = math.log %678 : vector<2x6xf32>
    %680 = vector.shape_cast %674 : vector<2x1x6xf32> to vector<2x6xf32>
    %681 = arith.addf %679, %680 : vector<2x6xf32>
    %682 = vector.extract_strided_slice %382 {offsets = [0, 13], sizes = [2, 1], strides = [1, 1]} : vector<2x32xf32> to vector<2x1xf32>
    %683 = arith.subf %681, %663 : vector<2x6xf32>
    %684 = vector.broadcast %682 : vector<2x1xf32> to vector<2x6xf32>
    %685 = arith.mulf %684, %683 : vector<2x6xf32>
    %686 = arith.addf %663, %685 : vector<2x6xf32>
    %687 = vector.shape_cast %686 : vector<2x6xf32> to vector<2x6x1xf32>
    %688 = vector.broadcast %687 : vector<2x6x1xf32> to vector<2x6x6xf32>
    %689 = vector.broadcast %383 : vector<1x6x6xf32> to vector<2x6x6xf32>
    %690 = arith.addf %688, %689 : vector<2x6x6xf32>
    %691 = vector.extract_strided_slice %381 {offsets = [0, 14, 0], sizes = [2, 1, 6], strides = [1, 1, 1]} : vector<2x32x6xf32> to vector<2x1x6xf32>
    %692 = vector.shape_cast %691 : vector<2x1x6xf32> to vector<2x6xf32>
    %693 = vector.shape_cast %692 : vector<2x6xf32> to vector<2x1x6xf32>
    %694 = vector.broadcast %693 : vector<2x1x6xf32> to vector<2x6x6xf32>
    %695 = arith.addf %690, %694 : vector<2x6x6xf32>
    %cst_303 = arith.constant dense<0xFF800000> : vector<2x6xf32>
    %696 = vector.multi_reduction <maximumf>, %695, %cst_303 [1] : vector<2x6x6xf32> to vector<2x6xf32>
    %697 = vector.shape_cast %696 : vector<2x6xf32> to vector<2x1x6xf32>
    %698 = vector.broadcast %697 : vector<2x1x6xf32> to vector<2x6x6xf32>
    %699 = arith.subf %695, %698 : vector<2x6x6xf32>
    %700 = math.exp %699 : vector<2x6x6xf32>
    %cst_304 = arith.constant dense<0.000000e+00> : vector<2x6xf32>
    %701 = vector.multi_reduction <add>, %700, %cst_304 [1] : vector<2x6x6xf32> to vector<2x6xf32>
    %702 = math.log %701 : vector<2x6xf32>
    %703 = vector.shape_cast %697 : vector<2x1x6xf32> to vector<2x6xf32>
    %704 = arith.addf %702, %703 : vector<2x6xf32>
    %705 = vector.extract_strided_slice %382 {offsets = [0, 14], sizes = [2, 1], strides = [1, 1]} : vector<2x32xf32> to vector<2x1xf32>
    %706 = arith.subf %704, %686 : vector<2x6xf32>
    %707 = vector.broadcast %705 : vector<2x1xf32> to vector<2x6xf32>
    %708 = arith.mulf %707, %706 : vector<2x6xf32>
    %709 = arith.addf %686, %708 : vector<2x6xf32>
    %710 = vector.shape_cast %709 : vector<2x6xf32> to vector<2x6x1xf32>
    %711 = vector.broadcast %710 : vector<2x6x1xf32> to vector<2x6x6xf32>
    %712 = vector.broadcast %383 : vector<1x6x6xf32> to vector<2x6x6xf32>
    %713 = arith.addf %711, %712 : vector<2x6x6xf32>
    %714 = vector.extract_strided_slice %381 {offsets = [0, 15, 0], sizes = [2, 1, 6], strides = [1, 1, 1]} : vector<2x32x6xf32> to vector<2x1x6xf32>
    %715 = vector.shape_cast %714 : vector<2x1x6xf32> to vector<2x6xf32>
    %716 = vector.shape_cast %715 : vector<2x6xf32> to vector<2x1x6xf32>
    %717 = vector.broadcast %716 : vector<2x1x6xf32> to vector<2x6x6xf32>
    %718 = arith.addf %713, %717 : vector<2x6x6xf32>
    %cst_305 = arith.constant dense<0xFF800000> : vector<2x6xf32>
    %719 = vector.multi_reduction <maximumf>, %718, %cst_305 [1] : vector<2x6x6xf32> to vector<2x6xf32>
    %720 = vector.shape_cast %719 : vector<2x6xf32> to vector<2x1x6xf32>
    %721 = vector.broadcast %720 : vector<2x1x6xf32> to vector<2x6x6xf32>
    %722 = arith.subf %718, %721 : vector<2x6x6xf32>
    %723 = math.exp %722 : vector<2x6x6xf32>
    %cst_306 = arith.constant dense<0.000000e+00> : vector<2x6xf32>
    %724 = vector.multi_reduction <add>, %723, %cst_306 [1] : vector<2x6x6xf32> to vector<2x6xf32>
    %725 = math.log %724 : vector<2x6xf32>
    %726 = vector.shape_cast %720 : vector<2x1x6xf32> to vector<2x6xf32>
    %727 = arith.addf %725, %726 : vector<2x6xf32>
    %728 = vector.extract_strided_slice %382 {offsets = [0, 15], sizes = [2, 1], strides = [1, 1]} : vector<2x32xf32> to vector<2x1xf32>
    %729 = arith.subf %727, %709 : vector<2x6xf32>
    %730 = vector.broadcast %728 : vector<2x1xf32> to vector<2x6xf32>
    %731 = arith.mulf %730, %729 : vector<2x6xf32>
    %732 = arith.addf %709, %731 : vector<2x6xf32>
    %733 = vector.shape_cast %732 : vector<2x6xf32> to vector<2x6x1xf32>
    %734 = vector.broadcast %733 : vector<2x6x1xf32> to vector<2x6x6xf32>
    %735 = vector.broadcast %383 : vector<1x6x6xf32> to vector<2x6x6xf32>
    %736 = arith.addf %734, %735 : vector<2x6x6xf32>
    %737 = vector.extract_strided_slice %381 {offsets = [0, 16, 0], sizes = [2, 1, 6], strides = [1, 1, 1]} : vector<2x32x6xf32> to vector<2x1x6xf32>
    %738 = vector.shape_cast %737 : vector<2x1x6xf32> to vector<2x6xf32>
    %739 = vector.shape_cast %738 : vector<2x6xf32> to vector<2x1x6xf32>
    %740 = vector.broadcast %739 : vector<2x1x6xf32> to vector<2x6x6xf32>
    %741 = arith.addf %736, %740 : vector<2x6x6xf32>
    %cst_307 = arith.constant dense<0xFF800000> : vector<2x6xf32>
    %742 = vector.multi_reduction <maximumf>, %741, %cst_307 [1] : vector<2x6x6xf32> to vector<2x6xf32>
    %743 = vector.shape_cast %742 : vector<2x6xf32> to vector<2x1x6xf32>
    %744 = vector.broadcast %743 : vector<2x1x6xf32> to vector<2x6x6xf32>
    %745 = arith.subf %741, %744 : vector<2x6x6xf32>
    %746 = math.exp %745 : vector<2x6x6xf32>
    %cst_308 = arith.constant dense<0.000000e+00> : vector<2x6xf32>
    %747 = vector.multi_reduction <add>, %746, %cst_308 [1] : vector<2x6x6xf32> to vector<2x6xf32>
    %748 = math.log %747 : vector<2x6xf32>
    %749 = vector.shape_cast %743 : vector<2x1x6xf32> to vector<2x6xf32>
    %750 = arith.addf %748, %749 : vector<2x6xf32>
    %751 = vector.extract_strided_slice %382 {offsets = [0, 16], sizes = [2, 1], strides = [1, 1]} : vector<2x32xf32> to vector<2x1xf32>
    %752 = arith.subf %750, %732 : vector<2x6xf32>
    %753 = vector.broadcast %751 : vector<2x1xf32> to vector<2x6xf32>
    %754 = arith.mulf %753, %752 : vector<2x6xf32>
    %755 = arith.addf %732, %754 : vector<2x6xf32>
    %756 = vector.shape_cast %755 : vector<2x6xf32> to vector<2x6x1xf32>
    %757 = vector.broadcast %756 : vector<2x6x1xf32> to vector<2x6x6xf32>
    %758 = vector.broadcast %383 : vector<1x6x6xf32> to vector<2x6x6xf32>
    %759 = arith.addf %757, %758 : vector<2x6x6xf32>
    %760 = vector.extract_strided_slice %381 {offsets = [0, 17, 0], sizes = [2, 1, 6], strides = [1, 1, 1]} : vector<2x32x6xf32> to vector<2x1x6xf32>
    %761 = vector.shape_cast %760 : vector<2x1x6xf32> to vector<2x6xf32>
    %762 = vector.shape_cast %761 : vector<2x6xf32> to vector<2x1x6xf32>
    %763 = vector.broadcast %762 : vector<2x1x6xf32> to vector<2x6x6xf32>
    %764 = arith.addf %759, %763 : vector<2x6x6xf32>
    %cst_309 = arith.constant dense<0xFF800000> : vector<2x6xf32>
    %765 = vector.multi_reduction <maximumf>, %764, %cst_309 [1] : vector<2x6x6xf32> to vector<2x6xf32>
    %766 = vector.shape_cast %765 : vector<2x6xf32> to vector<2x1x6xf32>
    %767 = vector.broadcast %766 : vector<2x1x6xf32> to vector<2x6x6xf32>
    %768 = arith.subf %764, %767 : vector<2x6x6xf32>
    %769 = math.exp %768 : vector<2x6x6xf32>
    %cst_310 = arith.constant dense<0.000000e+00> : vector<2x6xf32>
    %770 = vector.multi_reduction <add>, %769, %cst_310 [1] : vector<2x6x6xf32> to vector<2x6xf32>
    %771 = math.log %770 : vector<2x6xf32>
    %772 = vector.shape_cast %766 : vector<2x1x6xf32> to vector<2x6xf32>
    %773 = arith.addf %771, %772 : vector<2x6xf32>
    %774 = vector.extract_strided_slice %382 {offsets = [0, 17], sizes = [2, 1], strides = [1, 1]} : vector<2x32xf32> to vector<2x1xf32>
    %775 = arith.subf %773, %755 : vector<2x6xf32>
    %776 = vector.broadcast %774 : vector<2x1xf32> to vector<2x6xf32>
    %777 = arith.mulf %776, %775 : vector<2x6xf32>
    %778 = arith.addf %755, %777 : vector<2x6xf32>
    %779 = vector.shape_cast %778 : vector<2x6xf32> to vector<2x6x1xf32>
    %780 = vector.broadcast %779 : vector<2x6x1xf32> to vector<2x6x6xf32>
    %781 = vector.broadcast %383 : vector<1x6x6xf32> to vector<2x6x6xf32>
    %782 = arith.addf %780, %781 : vector<2x6x6xf32>
    %783 = vector.extract_strided_slice %381 {offsets = [0, 18, 0], sizes = [2, 1, 6], strides = [1, 1, 1]} : vector<2x32x6xf32> to vector<2x1x6xf32>
    %784 = vector.shape_cast %783 : vector<2x1x6xf32> to vector<2x6xf32>
    %785 = vector.shape_cast %784 : vector<2x6xf32> to vector<2x1x6xf32>
    %786 = vector.broadcast %785 : vector<2x1x6xf32> to vector<2x6x6xf32>
    %787 = arith.addf %782, %786 : vector<2x6x6xf32>
    %cst_311 = arith.constant dense<0xFF800000> : vector<2x6xf32>
    %788 = vector.multi_reduction <maximumf>, %787, %cst_311 [1] : vector<2x6x6xf32> to vector<2x6xf32>
    %789 = vector.shape_cast %788 : vector<2x6xf32> to vector<2x1x6xf32>
    %790 = vector.broadcast %789 : vector<2x1x6xf32> to vector<2x6x6xf32>
    %791 = arith.subf %787, %790 : vector<2x6x6xf32>
    %792 = math.exp %791 : vector<2x6x6xf32>
    %cst_312 = arith.constant dense<0.000000e+00> : vector<2x6xf32>
    %793 = vector.multi_reduction <add>, %792, %cst_312 [1] : vector<2x6x6xf32> to vector<2x6xf32>
    %794 = math.log %793 : vector<2x6xf32>
    %795 = vector.shape_cast %789 : vector<2x1x6xf32> to vector<2x6xf32>
    %796 = arith.addf %794, %795 : vector<2x6xf32>
    %797 = vector.extract_strided_slice %382 {offsets = [0, 18], sizes = [2, 1], strides = [1, 1]} : vector<2x32xf32> to vector<2x1xf32>
    %798 = arith.subf %796, %778 : vector<2x6xf32>
    %799 = vector.broadcast %797 : vector<2x1xf32> to vector<2x6xf32>
    %800 = arith.mulf %799, %798 : vector<2x6xf32>
    %801 = arith.addf %778, %800 : vector<2x6xf32>
    %802 = vector.shape_cast %801 : vector<2x6xf32> to vector<2x6x1xf32>
    %803 = vector.broadcast %802 : vector<2x6x1xf32> to vector<2x6x6xf32>
    %804 = vector.broadcast %383 : vector<1x6x6xf32> to vector<2x6x6xf32>
    %805 = arith.addf %803, %804 : vector<2x6x6xf32>
    %806 = vector.extract_strided_slice %381 {offsets = [0, 19, 0], sizes = [2, 1, 6], strides = [1, 1, 1]} : vector<2x32x6xf32> to vector<2x1x6xf32>
    %807 = vector.shape_cast %806 : vector<2x1x6xf32> to vector<2x6xf32>
    %808 = vector.shape_cast %807 : vector<2x6xf32> to vector<2x1x6xf32>
    %809 = vector.broadcast %808 : vector<2x1x6xf32> to vector<2x6x6xf32>
    %810 = arith.addf %805, %809 : vector<2x6x6xf32>
    %cst_313 = arith.constant dense<0xFF800000> : vector<2x6xf32>
    %811 = vector.multi_reduction <maximumf>, %810, %cst_313 [1] : vector<2x6x6xf32> to vector<2x6xf32>
    %812 = vector.shape_cast %811 : vector<2x6xf32> to vector<2x1x6xf32>
    %813 = vector.broadcast %812 : vector<2x1x6xf32> to vector<2x6x6xf32>
    %814 = arith.subf %810, %813 : vector<2x6x6xf32>
    %815 = math.exp %814 : vector<2x6x6xf32>
    %cst_314 = arith.constant dense<0.000000e+00> : vector<2x6xf32>
    %816 = vector.multi_reduction <add>, %815, %cst_314 [1] : vector<2x6x6xf32> to vector<2x6xf32>
    %817 = math.log %816 : vector<2x6xf32>
    %818 = vector.shape_cast %812 : vector<2x1x6xf32> to vector<2x6xf32>
    %819 = arith.addf %817, %818 : vector<2x6xf32>
    %820 = vector.extract_strided_slice %382 {offsets = [0, 19], sizes = [2, 1], strides = [1, 1]} : vector<2x32xf32> to vector<2x1xf32>
    %821 = arith.subf %819, %801 : vector<2x6xf32>
    %822 = vector.broadcast %820 : vector<2x1xf32> to vector<2x6xf32>
    %823 = arith.mulf %822, %821 : vector<2x6xf32>
    %824 = arith.addf %801, %823 : vector<2x6xf32>
    %825 = vector.shape_cast %824 : vector<2x6xf32> to vector<2x6x1xf32>
    %826 = vector.broadcast %825 : vector<2x6x1xf32> to vector<2x6x6xf32>
    %827 = vector.broadcast %383 : vector<1x6x6xf32> to vector<2x6x6xf32>
    %828 = arith.addf %826, %827 : vector<2x6x6xf32>
    %829 = vector.extract_strided_slice %381 {offsets = [0, 20, 0], sizes = [2, 1, 6], strides = [1, 1, 1]} : vector<2x32x6xf32> to vector<2x1x6xf32>
    %830 = vector.shape_cast %829 : vector<2x1x6xf32> to vector<2x6xf32>
    %831 = vector.shape_cast %830 : vector<2x6xf32> to vector<2x1x6xf32>
    %832 = vector.broadcast %831 : vector<2x1x6xf32> to vector<2x6x6xf32>
    %833 = arith.addf %828, %832 : vector<2x6x6xf32>
    %cst_315 = arith.constant dense<0xFF800000> : vector<2x6xf32>
    %834 = vector.multi_reduction <maximumf>, %833, %cst_315 [1] : vector<2x6x6xf32> to vector<2x6xf32>
    %835 = vector.shape_cast %834 : vector<2x6xf32> to vector<2x1x6xf32>
    %836 = vector.broadcast %835 : vector<2x1x6xf32> to vector<2x6x6xf32>
    %837 = arith.subf %833, %836 : vector<2x6x6xf32>
    %838 = math.exp %837 : vector<2x6x6xf32>
    %cst_316 = arith.constant dense<0.000000e+00> : vector<2x6xf32>
    %839 = vector.multi_reduction <add>, %838, %cst_316 [1] : vector<2x6x6xf32> to vector<2x6xf32>
    %840 = math.log %839 : vector<2x6xf32>
    %841 = vector.shape_cast %835 : vector<2x1x6xf32> to vector<2x6xf32>
    %842 = arith.addf %840, %841 : vector<2x6xf32>
    %843 = vector.extract_strided_slice %382 {offsets = [0, 20], sizes = [2, 1], strides = [1, 1]} : vector<2x32xf32> to vector<2x1xf32>
    %844 = arith.subf %842, %824 : vector<2x6xf32>
    %845 = vector.broadcast %843 : vector<2x1xf32> to vector<2x6xf32>
    %846 = arith.mulf %845, %844 : vector<2x6xf32>
    %847 = arith.addf %824, %846 : vector<2x6xf32>
    %848 = vector.shape_cast %847 : vector<2x6xf32> to vector<2x6x1xf32>
    %849 = vector.broadcast %848 : vector<2x6x1xf32> to vector<2x6x6xf32>
    %850 = vector.broadcast %383 : vector<1x6x6xf32> to vector<2x6x6xf32>
    %851 = arith.addf %849, %850 : vector<2x6x6xf32>
    %852 = vector.extract_strided_slice %381 {offsets = [0, 21, 0], sizes = [2, 1, 6], strides = [1, 1, 1]} : vector<2x32x6xf32> to vector<2x1x6xf32>
    %853 = vector.shape_cast %852 : vector<2x1x6xf32> to vector<2x6xf32>
    %854 = vector.shape_cast %853 : vector<2x6xf32> to vector<2x1x6xf32>
    %855 = vector.broadcast %854 : vector<2x1x6xf32> to vector<2x6x6xf32>
    %856 = arith.addf %851, %855 : vector<2x6x6xf32>
    %cst_317 = arith.constant dense<0xFF800000> : vector<2x6xf32>
    %857 = vector.multi_reduction <maximumf>, %856, %cst_317 [1] : vector<2x6x6xf32> to vector<2x6xf32>
    %858 = vector.shape_cast %857 : vector<2x6xf32> to vector<2x1x6xf32>
    %859 = vector.broadcast %858 : vector<2x1x6xf32> to vector<2x6x6xf32>
    %860 = arith.subf %856, %859 : vector<2x6x6xf32>
    %861 = math.exp %860 : vector<2x6x6xf32>
    %cst_318 = arith.constant dense<0.000000e+00> : vector<2x6xf32>
    %862 = vector.multi_reduction <add>, %861, %cst_318 [1] : vector<2x6x6xf32> to vector<2x6xf32>
    %863 = math.log %862 : vector<2x6xf32>
    %864 = vector.shape_cast %858 : vector<2x1x6xf32> to vector<2x6xf32>
    %865 = arith.addf %863, %864 : vector<2x6xf32>
    %866 = vector.extract_strided_slice %382 {offsets = [0, 21], sizes = [2, 1], strides = [1, 1]} : vector<2x32xf32> to vector<2x1xf32>
    %867 = arith.subf %865, %847 : vector<2x6xf32>
    %868 = vector.broadcast %866 : vector<2x1xf32> to vector<2x6xf32>
    %869 = arith.mulf %868, %867 : vector<2x6xf32>
    %870 = arith.addf %847, %869 : vector<2x6xf32>
    %871 = vector.shape_cast %870 : vector<2x6xf32> to vector<2x6x1xf32>
    %872 = vector.broadcast %871 : vector<2x6x1xf32> to vector<2x6x6xf32>
    %873 = vector.broadcast %383 : vector<1x6x6xf32> to vector<2x6x6xf32>
    %874 = arith.addf %872, %873 : vector<2x6x6xf32>
    %875 = vector.extract_strided_slice %381 {offsets = [0, 22, 0], sizes = [2, 1, 6], strides = [1, 1, 1]} : vector<2x32x6xf32> to vector<2x1x6xf32>
    %876 = vector.shape_cast %875 : vector<2x1x6xf32> to vector<2x6xf32>
    %877 = vector.shape_cast %876 : vector<2x6xf32> to vector<2x1x6xf32>
    %878 = vector.broadcast %877 : vector<2x1x6xf32> to vector<2x6x6xf32>
    %879 = arith.addf %874, %878 : vector<2x6x6xf32>
    %cst_319 = arith.constant dense<0xFF800000> : vector<2x6xf32>
    %880 = vector.multi_reduction <maximumf>, %879, %cst_319 [1] : vector<2x6x6xf32> to vector<2x6xf32>
    %881 = vector.shape_cast %880 : vector<2x6xf32> to vector<2x1x6xf32>
    %882 = vector.broadcast %881 : vector<2x1x6xf32> to vector<2x6x6xf32>
    %883 = arith.subf %879, %882 : vector<2x6x6xf32>
    %884 = math.exp %883 : vector<2x6x6xf32>
    %cst_320 = arith.constant dense<0.000000e+00> : vector<2x6xf32>
    %885 = vector.multi_reduction <add>, %884, %cst_320 [1] : vector<2x6x6xf32> to vector<2x6xf32>
    %886 = math.log %885 : vector<2x6xf32>
    %887 = vector.shape_cast %881 : vector<2x1x6xf32> to vector<2x6xf32>
    %888 = arith.addf %886, %887 : vector<2x6xf32>
    %889 = vector.extract_strided_slice %382 {offsets = [0, 22], sizes = [2, 1], strides = [1, 1]} : vector<2x32xf32> to vector<2x1xf32>
    %890 = arith.subf %888, %870 : vector<2x6xf32>
    %891 = vector.broadcast %889 : vector<2x1xf32> to vector<2x6xf32>
    %892 = arith.mulf %891, %890 : vector<2x6xf32>
    %893 = arith.addf %870, %892 : vector<2x6xf32>
    %894 = vector.shape_cast %893 : vector<2x6xf32> to vector<2x6x1xf32>
    %895 = vector.broadcast %894 : vector<2x6x1xf32> to vector<2x6x6xf32>
    %896 = vector.broadcast %383 : vector<1x6x6xf32> to vector<2x6x6xf32>
    %897 = arith.addf %895, %896 : vector<2x6x6xf32>
    %898 = vector.extract_strided_slice %381 {offsets = [0, 23, 0], sizes = [2, 1, 6], strides = [1, 1, 1]} : vector<2x32x6xf32> to vector<2x1x6xf32>
    %899 = vector.shape_cast %898 : vector<2x1x6xf32> to vector<2x6xf32>
    %900 = vector.shape_cast %899 : vector<2x6xf32> to vector<2x1x6xf32>
    %901 = vector.broadcast %900 : vector<2x1x6xf32> to vector<2x6x6xf32>
    %902 = arith.addf %897, %901 : vector<2x6x6xf32>
    %cst_321 = arith.constant dense<0xFF800000> : vector<2x6xf32>
    %903 = vector.multi_reduction <maximumf>, %902, %cst_321 [1] : vector<2x6x6xf32> to vector<2x6xf32>
    %904 = vector.shape_cast %903 : vector<2x6xf32> to vector<2x1x6xf32>
    %905 = vector.broadcast %904 : vector<2x1x6xf32> to vector<2x6x6xf32>
    %906 = arith.subf %902, %905 : vector<2x6x6xf32>
    %907 = math.exp %906 : vector<2x6x6xf32>
    %cst_322 = arith.constant dense<0.000000e+00> : vector<2x6xf32>
    %908 = vector.multi_reduction <add>, %907, %cst_322 [1] : vector<2x6x6xf32> to vector<2x6xf32>
    %909 = math.log %908 : vector<2x6xf32>
    %910 = vector.shape_cast %904 : vector<2x1x6xf32> to vector<2x6xf32>
    %911 = arith.addf %909, %910 : vector<2x6xf32>
    %912 = vector.extract_strided_slice %382 {offsets = [0, 23], sizes = [2, 1], strides = [1, 1]} : vector<2x32xf32> to vector<2x1xf32>
    %913 = arith.subf %911, %893 : vector<2x6xf32>
    %914 = vector.broadcast %912 : vector<2x1xf32> to vector<2x6xf32>
    %915 = arith.mulf %914, %913 : vector<2x6xf32>
    %916 = arith.addf %893, %915 : vector<2x6xf32>
    %917 = vector.shape_cast %916 : vector<2x6xf32> to vector<2x6x1xf32>
    %918 = vector.broadcast %917 : vector<2x6x1xf32> to vector<2x6x6xf32>
    %919 = vector.broadcast %383 : vector<1x6x6xf32> to vector<2x6x6xf32>
    %920 = arith.addf %918, %919 : vector<2x6x6xf32>
    %921 = vector.extract_strided_slice %381 {offsets = [0, 24, 0], sizes = [2, 1, 6], strides = [1, 1, 1]} : vector<2x32x6xf32> to vector<2x1x6xf32>
    %922 = vector.shape_cast %921 : vector<2x1x6xf32> to vector<2x6xf32>
    %923 = vector.shape_cast %922 : vector<2x6xf32> to vector<2x1x6xf32>
    %924 = vector.broadcast %923 : vector<2x1x6xf32> to vector<2x6x6xf32>
    %925 = arith.addf %920, %924 : vector<2x6x6xf32>
    %cst_323 = arith.constant dense<0xFF800000> : vector<2x6xf32>
    %926 = vector.multi_reduction <maximumf>, %925, %cst_323 [1] : vector<2x6x6xf32> to vector<2x6xf32>
    %927 = vector.shape_cast %926 : vector<2x6xf32> to vector<2x1x6xf32>
    %928 = vector.broadcast %927 : vector<2x1x6xf32> to vector<2x6x6xf32>
    %929 = arith.subf %925, %928 : vector<2x6x6xf32>
    %930 = math.exp %929 : vector<2x6x6xf32>
    %cst_324 = arith.constant dense<0.000000e+00> : vector<2x6xf32>
    %931 = vector.multi_reduction <add>, %930, %cst_324 [1] : vector<2x6x6xf32> to vector<2x6xf32>
    %932 = math.log %931 : vector<2x6xf32>
    %933 = vector.shape_cast %927 : vector<2x1x6xf32> to vector<2x6xf32>
    %934 = arith.addf %932, %933 : vector<2x6xf32>
    %935 = vector.extract_strided_slice %382 {offsets = [0, 24], sizes = [2, 1], strides = [1, 1]} : vector<2x32xf32> to vector<2x1xf32>
    %936 = arith.subf %934, %916 : vector<2x6xf32>
    %937 = vector.broadcast %935 : vector<2x1xf32> to vector<2x6xf32>
    %938 = arith.mulf %937, %936 : vector<2x6xf32>
    %939 = arith.addf %916, %938 : vector<2x6xf32>
    %940 = vector.shape_cast %939 : vector<2x6xf32> to vector<2x6x1xf32>
    %941 = vector.broadcast %940 : vector<2x6x1xf32> to vector<2x6x6xf32>
    %942 = vector.broadcast %383 : vector<1x6x6xf32> to vector<2x6x6xf32>
    %943 = arith.addf %941, %942 : vector<2x6x6xf32>
    %944 = vector.extract_strided_slice %381 {offsets = [0, 25, 0], sizes = [2, 1, 6], strides = [1, 1, 1]} : vector<2x32x6xf32> to vector<2x1x6xf32>
    %945 = vector.shape_cast %944 : vector<2x1x6xf32> to vector<2x6xf32>
    %946 = vector.shape_cast %945 : vector<2x6xf32> to vector<2x1x6xf32>
    %947 = vector.broadcast %946 : vector<2x1x6xf32> to vector<2x6x6xf32>
    %948 = arith.addf %943, %947 : vector<2x6x6xf32>
    %cst_325 = arith.constant dense<0xFF800000> : vector<2x6xf32>
    %949 = vector.multi_reduction <maximumf>, %948, %cst_325 [1] : vector<2x6x6xf32> to vector<2x6xf32>
    %950 = vector.shape_cast %949 : vector<2x6xf32> to vector<2x1x6xf32>
    %951 = vector.broadcast %950 : vector<2x1x6xf32> to vector<2x6x6xf32>
    %952 = arith.subf %948, %951 : vector<2x6x6xf32>
    %953 = math.exp %952 : vector<2x6x6xf32>
    %cst_326 = arith.constant dense<0.000000e+00> : vector<2x6xf32>
    %954 = vector.multi_reduction <add>, %953, %cst_326 [1] : vector<2x6x6xf32> to vector<2x6xf32>
    %955 = math.log %954 : vector<2x6xf32>
    %956 = vector.shape_cast %950 : vector<2x1x6xf32> to vector<2x6xf32>
    %957 = arith.addf %955, %956 : vector<2x6xf32>
    %958 = vector.extract_strided_slice %382 {offsets = [0, 25], sizes = [2, 1], strides = [1, 1]} : vector<2x32xf32> to vector<2x1xf32>
    %959 = arith.subf %957, %939 : vector<2x6xf32>
    %960 = vector.broadcast %958 : vector<2x1xf32> to vector<2x6xf32>
    %961 = arith.mulf %960, %959 : vector<2x6xf32>
    %962 = arith.addf %939, %961 : vector<2x6xf32>
    %963 = vector.shape_cast %962 : vector<2x6xf32> to vector<2x6x1xf32>
    %964 = vector.broadcast %963 : vector<2x6x1xf32> to vector<2x6x6xf32>
    %965 = vector.broadcast %383 : vector<1x6x6xf32> to vector<2x6x6xf32>
    %966 = arith.addf %964, %965 : vector<2x6x6xf32>
    %967 = vector.extract_strided_slice %381 {offsets = [0, 26, 0], sizes = [2, 1, 6], strides = [1, 1, 1]} : vector<2x32x6xf32> to vector<2x1x6xf32>
    %968 = vector.shape_cast %967 : vector<2x1x6xf32> to vector<2x6xf32>
    %969 = vector.shape_cast %968 : vector<2x6xf32> to vector<2x1x6xf32>
    %970 = vector.broadcast %969 : vector<2x1x6xf32> to vector<2x6x6xf32>
    %971 = arith.addf %966, %970 : vector<2x6x6xf32>
    %cst_327 = arith.constant dense<0xFF800000> : vector<2x6xf32>
    %972 = vector.multi_reduction <maximumf>, %971, %cst_327 [1] : vector<2x6x6xf32> to vector<2x6xf32>
    %973 = vector.shape_cast %972 : vector<2x6xf32> to vector<2x1x6xf32>
    %974 = vector.broadcast %973 : vector<2x1x6xf32> to vector<2x6x6xf32>
    %975 = arith.subf %971, %974 : vector<2x6x6xf32>
    %976 = math.exp %975 : vector<2x6x6xf32>
    %cst_328 = arith.constant dense<0.000000e+00> : vector<2x6xf32>
    %977 = vector.multi_reduction <add>, %976, %cst_328 [1] : vector<2x6x6xf32> to vector<2x6xf32>
    %978 = math.log %977 : vector<2x6xf32>
    %979 = vector.shape_cast %973 : vector<2x1x6xf32> to vector<2x6xf32>
    %980 = arith.addf %978, %979 : vector<2x6xf32>
    %981 = vector.extract_strided_slice %382 {offsets = [0, 26], sizes = [2, 1], strides = [1, 1]} : vector<2x32xf32> to vector<2x1xf32>
    %982 = arith.subf %980, %962 : vector<2x6xf32>
    %983 = vector.broadcast %981 : vector<2x1xf32> to vector<2x6xf32>
    %984 = arith.mulf %983, %982 : vector<2x6xf32>
    %985 = arith.addf %962, %984 : vector<2x6xf32>
    %986 = vector.shape_cast %985 : vector<2x6xf32> to vector<2x6x1xf32>
    %987 = vector.broadcast %986 : vector<2x6x1xf32> to vector<2x6x6xf32>
    %988 = vector.broadcast %383 : vector<1x6x6xf32> to vector<2x6x6xf32>
    %989 = arith.addf %987, %988 : vector<2x6x6xf32>
    %990 = vector.extract_strided_slice %381 {offsets = [0, 27, 0], sizes = [2, 1, 6], strides = [1, 1, 1]} : vector<2x32x6xf32> to vector<2x1x6xf32>
    %991 = vector.shape_cast %990 : vector<2x1x6xf32> to vector<2x6xf32>
    %992 = vector.shape_cast %991 : vector<2x6xf32> to vector<2x1x6xf32>
    %993 = vector.broadcast %992 : vector<2x1x6xf32> to vector<2x6x6xf32>
    %994 = arith.addf %989, %993 : vector<2x6x6xf32>
    %cst_329 = arith.constant dense<0xFF800000> : vector<2x6xf32>
    %995 = vector.multi_reduction <maximumf>, %994, %cst_329 [1] : vector<2x6x6xf32> to vector<2x6xf32>
    %996 = vector.shape_cast %995 : vector<2x6xf32> to vector<2x1x6xf32>
    %997 = vector.broadcast %996 : vector<2x1x6xf32> to vector<2x6x6xf32>
    %998 = arith.subf %994, %997 : vector<2x6x6xf32>
    %999 = math.exp %998 : vector<2x6x6xf32>
    %cst_330 = arith.constant dense<0.000000e+00> : vector<2x6xf32>
    %1000 = vector.multi_reduction <add>, %999, %cst_330 [1] : vector<2x6x6xf32> to vector<2x6xf32>
    %1001 = math.log %1000 : vector<2x6xf32>
    %1002 = vector.shape_cast %996 : vector<2x1x6xf32> to vector<2x6xf32>
    %1003 = arith.addf %1001, %1002 : vector<2x6xf32>
    %1004 = vector.extract_strided_slice %382 {offsets = [0, 27], sizes = [2, 1], strides = [1, 1]} : vector<2x32xf32> to vector<2x1xf32>
    %1005 = arith.subf %1003, %985 : vector<2x6xf32>
    %1006 = vector.broadcast %1004 : vector<2x1xf32> to vector<2x6xf32>
    %1007 = arith.mulf %1006, %1005 : vector<2x6xf32>
    %1008 = arith.addf %985, %1007 : vector<2x6xf32>
    %1009 = vector.shape_cast %1008 : vector<2x6xf32> to vector<2x6x1xf32>
    %1010 = vector.broadcast %1009 : vector<2x6x1xf32> to vector<2x6x6xf32>
    %1011 = vector.broadcast %383 : vector<1x6x6xf32> to vector<2x6x6xf32>
    %1012 = arith.addf %1010, %1011 : vector<2x6x6xf32>
    %1013 = vector.extract_strided_slice %381 {offsets = [0, 28, 0], sizes = [2, 1, 6], strides = [1, 1, 1]} : vector<2x32x6xf32> to vector<2x1x6xf32>
    %1014 = vector.shape_cast %1013 : vector<2x1x6xf32> to vector<2x6xf32>
    %1015 = vector.shape_cast %1014 : vector<2x6xf32> to vector<2x1x6xf32>
    %1016 = vector.broadcast %1015 : vector<2x1x6xf32> to vector<2x6x6xf32>
    %1017 = arith.addf %1012, %1016 : vector<2x6x6xf32>
    %cst_331 = arith.constant dense<0xFF800000> : vector<2x6xf32>
    %1018 = vector.multi_reduction <maximumf>, %1017, %cst_331 [1] : vector<2x6x6xf32> to vector<2x6xf32>
    %1019 = vector.shape_cast %1018 : vector<2x6xf32> to vector<2x1x6xf32>
    %1020 = vector.broadcast %1019 : vector<2x1x6xf32> to vector<2x6x6xf32>
    %1021 = arith.subf %1017, %1020 : vector<2x6x6xf32>
    %1022 = math.exp %1021 : vector<2x6x6xf32>
    %cst_332 = arith.constant dense<0.000000e+00> : vector<2x6xf32>
    %1023 = vector.multi_reduction <add>, %1022, %cst_332 [1] : vector<2x6x6xf32> to vector<2x6xf32>
    %1024 = math.log %1023 : vector<2x6xf32>
    %1025 = vector.shape_cast %1019 : vector<2x1x6xf32> to vector<2x6xf32>
    %1026 = arith.addf %1024, %1025 : vector<2x6xf32>
    %1027 = vector.extract_strided_slice %382 {offsets = [0, 28], sizes = [2, 1], strides = [1, 1]} : vector<2x32xf32> to vector<2x1xf32>
    %1028 = arith.subf %1026, %1008 : vector<2x6xf32>
    %1029 = vector.broadcast %1027 : vector<2x1xf32> to vector<2x6xf32>
    %1030 = arith.mulf %1029, %1028 : vector<2x6xf32>
    %1031 = arith.addf %1008, %1030 : vector<2x6xf32>
    %1032 = vector.shape_cast %1031 : vector<2x6xf32> to vector<2x6x1xf32>
    %1033 = vector.broadcast %1032 : vector<2x6x1xf32> to vector<2x6x6xf32>
    %1034 = vector.broadcast %383 : vector<1x6x6xf32> to vector<2x6x6xf32>
    %1035 = arith.addf %1033, %1034 : vector<2x6x6xf32>
    %1036 = vector.extract_strided_slice %381 {offsets = [0, 29, 0], sizes = [2, 1, 6], strides = [1, 1, 1]} : vector<2x32x6xf32> to vector<2x1x6xf32>
    %1037 = vector.shape_cast %1036 : vector<2x1x6xf32> to vector<2x6xf32>
    %1038 = vector.shape_cast %1037 : vector<2x6xf32> to vector<2x1x6xf32>
    %1039 = vector.broadcast %1038 : vector<2x1x6xf32> to vector<2x6x6xf32>
    %1040 = arith.addf %1035, %1039 : vector<2x6x6xf32>
    %cst_333 = arith.constant dense<0xFF800000> : vector<2x6xf32>
    %1041 = vector.multi_reduction <maximumf>, %1040, %cst_333 [1] : vector<2x6x6xf32> to vector<2x6xf32>
    %1042 = vector.shape_cast %1041 : vector<2x6xf32> to vector<2x1x6xf32>
    %1043 = vector.broadcast %1042 : vector<2x1x6xf32> to vector<2x6x6xf32>
    %1044 = arith.subf %1040, %1043 : vector<2x6x6xf32>
    %1045 = math.exp %1044 : vector<2x6x6xf32>
    %cst_334 = arith.constant dense<0.000000e+00> : vector<2x6xf32>
    %1046 = vector.multi_reduction <add>, %1045, %cst_334 [1] : vector<2x6x6xf32> to vector<2x6xf32>
    %1047 = math.log %1046 : vector<2x6xf32>
    %1048 = vector.shape_cast %1042 : vector<2x1x6xf32> to vector<2x6xf32>
    %1049 = arith.addf %1047, %1048 : vector<2x6xf32>
    %1050 = vector.extract_strided_slice %382 {offsets = [0, 29], sizes = [2, 1], strides = [1, 1]} : vector<2x32xf32> to vector<2x1xf32>
    %1051 = arith.subf %1049, %1031 : vector<2x6xf32>
    %1052 = vector.broadcast %1050 : vector<2x1xf32> to vector<2x6xf32>
    %1053 = arith.mulf %1052, %1051 : vector<2x6xf32>
    %1054 = arith.addf %1031, %1053 : vector<2x6xf32>
    %1055 = vector.shape_cast %1054 : vector<2x6xf32> to vector<2x6x1xf32>
    %1056 = vector.broadcast %1055 : vector<2x6x1xf32> to vector<2x6x6xf32>
    %1057 = vector.broadcast %383 : vector<1x6x6xf32> to vector<2x6x6xf32>
    %1058 = arith.addf %1056, %1057 : vector<2x6x6xf32>
    %1059 = vector.extract_strided_slice %381 {offsets = [0, 30, 0], sizes = [2, 1, 6], strides = [1, 1, 1]} : vector<2x32x6xf32> to vector<2x1x6xf32>
    %1060 = vector.shape_cast %1059 : vector<2x1x6xf32> to vector<2x6xf32>
    %1061 = vector.shape_cast %1060 : vector<2x6xf32> to vector<2x1x6xf32>
    %1062 = vector.broadcast %1061 : vector<2x1x6xf32> to vector<2x6x6xf32>
    %1063 = arith.addf %1058, %1062 : vector<2x6x6xf32>
    %cst_335 = arith.constant dense<0xFF800000> : vector<2x6xf32>
    %1064 = vector.multi_reduction <maximumf>, %1063, %cst_335 [1] : vector<2x6x6xf32> to vector<2x6xf32>
    %1065 = vector.shape_cast %1064 : vector<2x6xf32> to vector<2x1x6xf32>
    %1066 = vector.broadcast %1065 : vector<2x1x6xf32> to vector<2x6x6xf32>
    %1067 = arith.subf %1063, %1066 : vector<2x6x6xf32>
    %1068 = math.exp %1067 : vector<2x6x6xf32>
    %cst_336 = arith.constant dense<0.000000e+00> : vector<2x6xf32>
    %1069 = vector.multi_reduction <add>, %1068, %cst_336 [1] : vector<2x6x6xf32> to vector<2x6xf32>
    %1070 = math.log %1069 : vector<2x6xf32>
    %1071 = vector.shape_cast %1065 : vector<2x1x6xf32> to vector<2x6xf32>
    %1072 = arith.addf %1070, %1071 : vector<2x6xf32>
    %1073 = vector.extract_strided_slice %382 {offsets = [0, 30], sizes = [2, 1], strides = [1, 1]} : vector<2x32xf32> to vector<2x1xf32>
    %1074 = arith.subf %1072, %1054 : vector<2x6xf32>
    %1075 = vector.broadcast %1073 : vector<2x1xf32> to vector<2x6xf32>
    %1076 = arith.mulf %1075, %1074 : vector<2x6xf32>
    %1077 = arith.addf %1054, %1076 : vector<2x6xf32>
    %1078 = vector.shape_cast %1077 : vector<2x6xf32> to vector<2x6x1xf32>
    %1079 = vector.broadcast %1078 : vector<2x6x1xf32> to vector<2x6x6xf32>
    %1080 = vector.broadcast %383 : vector<1x6x6xf32> to vector<2x6x6xf32>
    %1081 = arith.addf %1079, %1080 : vector<2x6x6xf32>
    %1082 = vector.extract_strided_slice %381 {offsets = [0, 31, 0], sizes = [2, 1, 6], strides = [1, 1, 1]} : vector<2x32x6xf32> to vector<2x1x6xf32>
    %1083 = vector.shape_cast %1082 : vector<2x1x6xf32> to vector<2x6xf32>
    %1084 = vector.shape_cast %1083 : vector<2x6xf32> to vector<2x1x6xf32>
    %1085 = vector.broadcast %1084 : vector<2x1x6xf32> to vector<2x6x6xf32>
    %1086 = arith.addf %1081, %1085 : vector<2x6x6xf32>
    %cst_337 = arith.constant dense<0xFF800000> : vector<2x6xf32>
    %1087 = vector.multi_reduction <maximumf>, %1086, %cst_337 [1] : vector<2x6x6xf32> to vector<2x6xf32>
    %1088 = vector.shape_cast %1087 : vector<2x6xf32> to vector<2x1x6xf32>
    %1089 = vector.broadcast %1088 : vector<2x1x6xf32> to vector<2x6x6xf32>
    %1090 = arith.subf %1086, %1089 : vector<2x6x6xf32>
    %1091 = math.exp %1090 : vector<2x6x6xf32>
    %cst_338 = arith.constant dense<0.000000e+00> : vector<2x6xf32>
    %1092 = vector.multi_reduction <add>, %1091, %cst_338 [1] : vector<2x6x6xf32> to vector<2x6xf32>
    %1093 = math.log %1092 : vector<2x6xf32>
    %1094 = vector.shape_cast %1088 : vector<2x1x6xf32> to vector<2x6xf32>
    %1095 = arith.addf %1093, %1094 : vector<2x6xf32>
    %1096 = vector.extract_strided_slice %382 {offsets = [0, 31], sizes = [2, 1], strides = [1, 1]} : vector<2x32xf32> to vector<2x1xf32>
    %1097 = arith.subf %1095, %1077 : vector<2x6xf32>
    %1098 = vector.broadcast %1096 : vector<2x1xf32> to vector<2x6xf32>
    %1099 = arith.mulf %1098, %1097 : vector<2x6xf32>
    %1100 = arith.addf %1077, %1099 : vector<2x6xf32>
    %1101 = vector.broadcast %357 : vector<1x6xf32> to vector<2x6xf32>
    %1102 = arith.addf %1100, %1101 : vector<2x6xf32>
    %cst_339 = arith.constant dense<0xFF800000> : vector<2xf32>
    %1103 = vector.multi_reduction <maximumf>, %1102, %cst_339 [1] : vector<2x6xf32> to vector<2xf32>
    %1104 = vector.shape_cast %1103 : vector<2xf32> to vector<2x1xf32>
    %1105 = vector.broadcast %1104 : vector<2x1xf32> to vector<2x6xf32>
    %1106 = arith.subf %1102, %1105 : vector<2x6xf32>
    %1107 = math.exp %1106 : vector<2x6xf32>
    %cst_340 = arith.constant dense<0.000000e+00> : vector<2xf32>
    %1108 = vector.multi_reduction <add>, %1107, %cst_340 [1] : vector<2x6xf32> to vector<2xf32>
    %1109 = vector.shape_cast %1108 : vector<2xf32> to vector<2x1xf32>
    %1110 = math.log %1109 : vector<2x1xf32>
    %1111 = arith.addf %1110, %1104 : vector<2x1xf32>
    %cst_341 = arith.constant dense<0.000000e+00> : vector<1xf32>
    %1112 = vector.multi_reduction <add>, %1111, %cst_341 [0] : vector<2x1xf32> to vector<1xf32>
    %1113 = vector.shape_cast %1112 : vector<1xf32> to vector<1x1xf32>
    %1114 = arith.subf %1113, %380 : vector<1x1xf32>
    %cst_342 = arith.constant 5.000000e-01 : f32
    %1115 = vector.broadcast %cst_342 : f32 to vector<1x1xf32>
    %1116 = arith.mulf %1114, %1115 : vector<1x1xf32>
    %c0_343 = arith.constant 0 : index
    %c0_344 = arith.constant 0 : index
    %1117 = vector.load %arg23[%c0_343, %c0_344] : memref<1x1xf32, #tpu.memory_space<vmem>>, vector<1x1xf32>
    tpu.vector_store %arg23[%c0_343, %c0_344], %1116 {strides = array<i32>} : memref<1x1xf32, #tpu.memory_space<vmem>>, vector<1x1xf32>,
    return
  }
}

</mosaic_0001>

<bundles_post_ra>
// kernel: forward_loss.1
= control target key start
LH: loop header
LB: loop body
LE: loop exit
PB: predicated region body
PF: predicated region fallthrough
CT: control target
= control target key end

     0   :  { %s11599_s0 = inlined_call_operand.vmem [shape: f32[64,32], index: 0, kind: input, shape index: {}]   ;;  %s11600_s1 = inlined_call_operand.vmem [shape: f32[32,32], index: 1, kind: input, shape index: {}]   ;;  %s11601_s2 = inlined_call_operand.vmem [shape: f32[1,32], index: 2, kind: input, shape index: {}]   ;;  %s11602_s3 = inlined_call_operand.vmem [shape: f32[3,3,32,32], index: 3, kind: input, shape index: {}]   ;;  %s11603_s4 = inlined_call_operand.vmem [shape: f32[3,32], index: 4, kind: input, shape index: {}]   ;;  %s11604_s5 = inlined_call_operand.vmem [shape: f32[32,1], index: 5, kind: input, shape index: {}]   ;;  %s11605_s6 = inlined_call_operand.vmem [shape: f32[32,1], index: 6, kind: input, shape index: {}]   ;;  %s11606_s7 = inlined_call_operand.vmem [shape: f32[1,32], index: 7, kind: input, shape index: {}]   ;;  %s11607_s8 = inlined_call_operand.vmem [shape: f32[1,32], index: 8, kind: input, shape index: {}]   ;;  %s11608_s9 = inlined_call_operand.vmem [shape: f32[32,6], index: 9, kind: input, shape index: {}]   ;;  %s11609_s10 = inlined_call_operand.vmem [shape: f32[1,6], index: 10, kind: input, shape index: {}]   ;;  %s11610_s11 = inlined_call_operand.vmem [shape: f32[64,32], index: 11, kind: input, shape index: {}]   ;;  %s11611_s12 = inlined_call_operand.vmem [shape: f32[64,32], index: 12, kind: input, shape index: {}]   ;;  %s11612_s13 = inlined_call_operand.vmem [shape: f32[64,32], index: 13, kind: input, shape index: {}]   ;;  %s11613_s14 = inlined_call_operand.vmem [shape: f32[64,32], index: 14, kind: input, shape index: {}]   ;;  %s11614_s15 = inlined_call_operand.vmem [shape: f32[64,6], index: 15, kind: input, shape index: {}]   ;;  %s11615_s16 = inlined_call_operand.vmem [shape: f32[64,6], index: 16, kind: input, shape index: {}]   ;;  %s11616_s17 = inlined_call_operand.vmem [shape: f32[64,6], index: 17, kind: input, shape index: {}]   ;;  %s11617_s18 = inlined_call_operand.vmem [shape: f32[64,6], index: 18, kind: input, shape index: {}]   ;;  %s11618_s19 = inlined_call_operand.vmem [shape: f32[2,32], index: 19, kind: input, shape index: {}]   ;;  %s11619_s20 = inlined_call_operand.vmem [shape: f32[1,6], index: 20, kind: input, shape index: {}]   ;;  %s11620_s21 = inlined_call_operand.vmem [shape: f32[1,6], index: 21, kind: input, shape index: {}]   ;;  %s11621_s22 = inlined_call_operand.vmem [shape: f32[6,6], index: 22, kind: input, shape index: {}]   ;;  %s11622_s23 = inlined_call_operand.hbm [shape: f32[1,1], index: 23, kind: output, shape index: {}]  }
   0x1   :  { %11646 = sst [smem:[#allocation17_spill]] %s11599_s0 }
   0x2   :  { %11647 = sst [smem:[#allocation18_spill]] %s11600_s1 }
   0x3   :  { %11648 = sst [smem:[#allocation19_spill]] %s11601_s2 }
   0x4   :  { %11649 = sst [smem:[#allocation20_spill]] %s11602_s3 }
   0x5   :  { %11650 = sst [smem:[#allocation21_spill]] %s11603_s4 }
   0x6   :  { %11651 = sst [smem:[#allocation22_spill]] %s11604_s5 }
   0x7   :  { %11652 = sst [smem:[#allocation23_spill]] %s11605_s6 }
   0x8   :  { %11653 = sst [smem:[#allocation24_spill]] %s11606_s7 }
   0x9   :  { %s11654_s24 = sld [smem:[#allocation18_spill]]  ;;  %vm134_vm0 = vcmask 261120  }
   0xa   :  { %s11655_s28 = sld [smem:[#allocation17_spill]] }
   0xf   :  { %v130_v0 = vld [vmem:[%s11654_s24 + $0x18] sm:$0xff]  ;;  %v129_v1 = vld [vmem:[%s11654_s24 + $0x10] sm:$0xff]  ;;  %v128_v2 = vld [vmem:[%s11654_s24 + $0x8] sm:$0xff] }
  0x10   :  { %171 = vmatpush.msra.mxu0 %v130_v0  ;;  %7227 = vmatpush.msra.mxu3 %v130_v0  ;;  %v127_v3 = vld [vmem:[%s11654_s24] sm:$0xff]  ;;  %v125_v5 = vld [vmem:[%s11655_s28 + $0x30] sm:$0xff] }
  0x11   :  { %v119_v4 = vld [vmem:[%s11655_s28] sm:$0xff] }
  0x12   :  { %172 = vmatpush.msra.mxu0 %v129_v1  ;;  %7228 = vmatpush.msra.mxu3 %v129_v1 }
  0x14   :  { %173 = vmatpush.msra.mxu0 %v128_v2  ;;  %7229 = vmatpush.msra.mxu3 %v128_v2 }
  0x15   :  { %28 = vsyncpa [#allocation3], 0  ;;  %v120_v6 = vld [vmem:[%s11655_s28 + $0x8] sm:$0xff]  ;;  %v126_v7 = vld [vmem:[%s11655_s28 + $0x38] sm:$0xff]  ;;  %s11656_s1 = sld [smem:[#allocation20_spill]]  ;;  %v208_v27 = vlaneseq }
  0x16   :  { %174 = vmatpush.msra.mxu0 %v127_v3  ;;  %7230 = vmatpush.msra.mxu3 %v127_v3  ;;  %v121_v10 = vld [vmem:[%s11655_s28 + $0x10] sm:$0xff]  ;;  %v122_v11 = vld [vmem:[%s11655_s28 + $0x18] sm:$0xff]  ;;  %v123_v12 = vld [vmem:[%s11655_s28 + $0x20] sm:$0xff]  ;;  %s11657_s24 = sld [smem:[#allocation19_spill]] }
  0x17   :  { %6882 = vmatmul.msk.f32.vlgmr.msra.gmra.mxu0 %vm134_vm0, %v119_v4  ;;  %6888 = vmatmul.msk.f32.vlgmr.msra.gmra.mxu3 %vm134_vm0, %v125_v5  ;;  %v124_v13 = vld [vmem:[%s11655_s28 + $0x28] sm:$0xff]  ;;  %v8056_v28 = vshrl.u32 %v208_v27, 7  ;;  %v8073_v37 = vld [vmem:[%s11610_s11] sm:$0xff]  ;;  %v8131_v54 = vld [vmem:[%s11610_s11 + $0x10] sm:$0xff]  ;;  %s11661_s25 = sld [smem:[#allocation22_spill]] }
  0x18   :  { %v8117_v48 = vld [vmem:[%s11610_s11 + $0x8] sm:$0xff]  ;;  %v8142_v60 = vld [vmem:[%s11610_s11 + $0x18] sm:$0xff]  ;;  %v8150_v63 = vld [vmem:[%s11610_s11 + $0x30] sm:$0xff]  ;;  %s11662_s28 = sld [smem:[#allocation23_spill]] }
  0x19   :  { %vm210_vm1 = vcmp.lt.s32.totalorder %v8056_v28, 1  ;;  %vm235_vm2 = vcmp.lt.s32.totalorder %v8056_v28, 7  ;;  %v8162_v5 = vld [vmem:[%s11610_s11 + $0x20] sm:$0xff]  ;;  %s11663_s6 = sld [smem:[#allocation21_spill]]  ;;  %vm959_vm10 = vcmp.lt.s32.totalorder %v8056_v28, 6  ;;  %vm934_vm11 = vcmp.lt.s32.totalorder %v8056_v28, 2 }
  0x1a   :  { %s11669_s2 = sld [smem:[#allocation24_spill]] }
  0x1b   :  { %v7972_v8 = vld [vmem:[%s11656_s1 + $0x38] sm:$0xff]  ;;  %v7977_v9 = vld [vmem:[%s11656_s1 + $0x30] sm:$0xff]  ;;  %v8002_v14 = vld [vmem:[%s11656_s1 + $0x28] sm:$0xff] }
  0x1c   :  { %297 = vmatpush.msra.mxu1 %v7972_v8  ;;  %7231 = vmatpush.msrb.mxu3 %v7972_v8  ;;  %v8009_v15 = vld [vmem:[%s11656_s1 + $0x20] sm:$0xff]  ;;  %v8016_v16 = vld [vmem:[%s11656_s1 + $0x18] sm:$0xff]  ;;  %v8023_v17 = vld [vmem:[%s11656_s1 + $0x10] sm:$0xff] }
  0x1d   :  { %362 = vmatpush.msra.mxu2 %v8016_v16  ;;  %v8030_v18 = vld [vmem:[%s11656_s1 + $0x8] sm:$0xff]  ;;  %v8036_v19 = vld [vmem:[%s11656_s1] sm:$0xff]  ;;  %v8064_v33 = vld [vmem:[%s11656_s1 + $0x58] sm:$0xff] }
  0x1e   :  { %298 = vmatpush.msra.mxu1 %v7977_v9  ;;  %7232 = vmatpush.msrb.mxu3 %v7977_v9  ;;  %v7314_v20 = vld [vmem:[%s11657_s24] ss:$0 sm:$0xff]  ;;  %v8080_v38 = vld [vmem:[%s11656_s1 + $0x50] sm:$0xff]  ;;  %v8105_v45 = vld [vmem:[%s11656_s1 + $0x48] sm:$0xff] }
  0x1f   :  { %6883 = vmatmul.msk.f32.gmra.mxu0 %vm134_vm0, %v120_v6  ;;  %6889 = vmatmul.msk.f32.gmra.mxu3 %vm134_vm0, %v126_v7  ;;  %11658 = vst [vmem:[#allocation5_spill] sm:$0xff] %v8080_v38  ;;  %v8110_v46 = vld [vmem:[%s11656_s1 + $0x40] sm:$0xff]  ;;  %v8169_v7 = vld [vmem:[%s11610_s11 + $0x38] sm:$0xff] }
  0x20   :  { %299 = vmatpush.msra.mxu1 %v8002_v14  ;;  %7233 = vmatpush.msrb.mxu3 %v8002_v14  ;;  %11659 = vst [vmem:[#allocation6_spill] sm:$0xff] %v8105_v45 }
  0x21   :  { %363 = vmatpush.msra.mxu2 %v8023_v17  ;;  %11660 = vst [vmem:[#allocation7_spill] sm:$0xff] %v8110_v46 }
  0x22   :  { %300 = vmatpush.msra.mxu1 %v8009_v15  ;;  %7234 = vmatpush.msrb.mxu3 %v8009_v15 }
  0x23   :  { %364 = vmatpush.msra.mxu2 %v8030_v18 }
  0x24   :  { %7235 = vmatpush.msra.mxu3 %v8016_v16 }
  0x25   :  { %365 = vmatpush.msra.mxu2 %v8036_v19 }
  0x26   :  { %7236 = vmatpush.msra.mxu3 %v8023_v17 }
  0x27   :  { %6884 = vmatmul.msk.f32.gmra.mxu0 %vm134_vm0, %v121_v10 }
  0x28   :  { %7237 = vmatpush.msra.mxu3 %v8030_v18 }
  0x2a   :  { %7238 = vmatpush.msra.mxu3 %v8036_v19 }
  0x2f   :  { %6885 = vmatmul.msk.f32.gmra.mxu0 %vm134_vm0, %v122_v11 }
  0x37   :  { %6886 = vmatmul.msk.f32.gmra.mxu0 %vm134_vm0, %v123_v12 }
  0x3f   :  { %6887 = vmatmul.msk.f32.gmra.mxu0 %vm134_vm0, %v124_v13 }
  0x94   :  { %v176_v21 = vpop.f32.mrf.mxu0 }
  0x95   :  { %v8044_v22 = vadd.f32 %v7314_v20, %v176_v21  ;;  %v8182_v21 = vld [vmem:[%s11610_s11 + $0x28] sm:$0xff] }
  0x97   :  { %6894 = vmatmul.msk.f32.vlgmr.msra.gmra.mxu1 %vm134_vm0, %v8044_v22  ;;  %v200_v34 = vrot.slane %v8044_v22, 7 }
  0x9a   :  { %v194_v23 = vpop.f32.mrf.mxu3 }
  0x9b   :  { %v8048_v24 = vadd.f32 %v7314_v20, %v194_v23 }
  0x9c   :  { %v179_v25 = vpop.f32.mrf.mxu0 }
  0x9d   :  { %v8050_v26 = vadd.f32 %v7314_v20, %v179_v25  ;;  %6900 = vmatmul.msk.f32.vlgmr.msrb.gmra.mxu3 %vm134_vm0, %v8048_v24  ;;  %v233_v31 = vrot.slane %v8048_v24, 1  ;;  %v206_v62 = vrot.slane %v8048_v24, 7  ;;  %v8189_v25 = vld [vmem:[%s11611_s12] sm:$0xff]  ;;  %v8257_v24 = vld [vmem:[%s11611_s12 + $0x38] sm:$0xff] }
  0x9e   :  { %432 = vmatpush.msrb.mxu3 %v8064_v33 }
  0x9f   :  { %6895 = vmatmul.msk.f32.gmra.mxu1 %vm134_vm0, %v8050_v26  ;;  %v201_v43 = vrot.slane %v8050_v26, 7  ;;  %v228_v13 = vrot.slane %v8050_v26, 1 }
  0xa0   :  { %433 = vmatpush.msrb.mxu3 %v8080_v38 }
  0xa1   :  { %v217_v49 = vsel %vm210_vm1, %v200_v34, %v201_v43 }
  0xa2   :  { %v197_v29 = vpop.f32.mrf.mxu3  ;;  %434 = vmatpush.msrb.mxu3 %v8105_v45  ;;  %v220_v50 = vmul.f32 %v217_v49, %v8117_v48  ;;  %v8220_v49 = vld [vmem:[%s11611_s12 + $0x18] sm:$0xff] }
  0xa3   :  { %v8058_v30 = vadd.f32 %v7314_v20, %v197_v29 }
  0xa4   :  { %v182_v32 = vpop.f32.mrf.mxu0  ;;  %435 = vmatpush.msrb.mxu3 %v8110_v46 }
  0xa5   :  { %v207_v35 = vrot.slane %v8058_v30, 7  ;;  %v8068_v36 = vadd.f32 %v7314_v20, %v182_v32  ;;  %6901 = vmatmul.msk.f32.gmra.mxu3 %vm134_vm0, %v8058_v30  ;;  %v234_v39 = vrot.slane %v8058_v30, 1  ;;  %v8201_v32 = vld [vmem:[%s11611_s12 + $0x8] sm:$0xff]  ;;  %v81_v30 = vld [vmem:[%s11662_s28] sm:$0xff] }
  0xa7   :  { %6896 = vmatmul.msk.f32.gmra.mxu1 %vm134_vm0, %v8068_v36  ;;  %v218_v40 = vsel %vm210_vm1, %v207_v35, %v200_v34  ;;  %v8098_v42 = vsel %vm235_vm2, %v233_v31, %v234_v39  ;;  %v202_v51 = vrot.slane %v8068_v36, 7  ;;  %v211_v10 = vsel %vm210_vm1, %v206_v62, %v207_v35 }
  0xa8   :  { %v219_v41 = vmul.f32 %v218_v40, %v8073_v37  ;;  %v226_v12 = vmul.f32 %v211_v10, %v8169_v7  ;;  %v229_v29 = vrot.slane %v8068_v36, 1  ;;  %v8211_v36 = vld [vmem:[%s11611_s12 + $0x10] sm:$0xff] }
  0xa9   :  { %v216_v55 = vsel %vm210_vm1, %v201_v43, %v202_v51 }
  0xaa   :  { %6902 = vmatmul.msk.f32.vlgmr.msra.gmra.mxu2 %vm134_vm0, %v219_v41  ;;  %v221_v56 = vmul.f32 %v216_v55, %v8131_v54  ;;  %v241_v34 = vsel %vm235_vm2, %v228_v13, %v229_v29 }
  0xab   :  { %v245_v35 = vmul.f32 %v241_v34, %v8201_v32 }
  0xac   :  { %v185_v44 = vpop.f32.mrf.mxu0 }
  0xad   :  { %v8112_v47 = vadd.f32 %v7314_v20, %v185_v44 }
  0xaf   :  { %6897 = vmatmul.msk.f32.gmra.mxu1 %vm134_vm0, %v8112_v47  ;;  %v203_v57 = vrot.slane %v8112_v47, 7  ;;  %v230_v40 = vrot.slane %v8112_v47, 1 }
  0xb1   :  { %v215_v61 = vsel %vm210_vm1, %v202_v51, %v203_v57  ;;  %v240_v41 = vsel %vm235_vm2, %v229_v29, %v230_v40 }
  0xb2   :  { %6903 = vmatmul.msk.f32.gmra.mxu2 %vm134_vm0, %v220_v50  ;;  %v222_v1 = vmul.f32 %v215_v61, %v8142_v60  ;;  %v246_v43 = vmul.f32 %v240_v41, %v8211_v36  ;;  %v8302_v41 = vld [vmem:[%s11663_s6] sm:$0x7] }
  0xb4   :  { %v188_v52 = vpop.f32.mrf.mxu0 }
  0xb5   :  { %v189_v53 = vadd.f32 %v7314_v20, %v188_v52  ;;  %v8229_v52 = vld [vmem:[%s11611_s12 + $0x20] sm:$0xff] }
  0xb7   :  { %6898 = vmatmul.msk.f32.gmra.mxu1 %vm134_vm0, %v189_v53  ;;  %v204_v2 = vrot.slane %v189_v53, 7  ;;  %v231_v44 = vrot.slane %v189_v53, 1 }
  0xb9   :  { %v214_v6 = vsel %vm210_vm1, %v203_v57, %v204_v2  ;;  %v239_v47 = vsel %vm235_vm2, %v230_v40, %v231_v44 }
  0xba   :  { %6904 = vmatmul.msk.f32.gmra.mxu2 %vm134_vm0, %v221_v56  ;;  %v223_v11 = vmul.f32 %v214_v6, %v8162_v5  ;;  %v247_v50 = vmul.f32 %v239_v47, %v8220_v49  ;;  %v8238_v56 = vld [vmem:[%s11611_s12 + $0x28] sm:$0xff] }
  0xbc   :  { %v191_v58 = vpop.f32.mrf.mxu0 }
  0xbd   :  { %v192_v59 = vadd.f32 %v7314_v20, %v191_v58  ;;  %v227_v20 = vrot.slane %v8044_v22, 1 }
  0xbf   :  { %v205_v0 = vrot.slane %v192_v59, 7  ;;  %6899 = vmatmul.msk.f32.gmra.mxu1 %vm134_vm0, %v192_v59  ;;  %v242_v26 = vsel %vm235_vm2, %v227_v20, %v228_v13  ;;  %v232_v51 = vrot.slane %v192_v59, 1  ;;  %v8249_v59 = vld [vmem:[%s11611_s12 + $0x30] sm:$0xff] }
  0xc0   :  { %v244_v22 = vmul.f32 %v242_v26, %v8189_v25  ;;  %v250_v61 = vmul.f32 %v8098_v42, %v8249_v59  ;;  %v77_v42 = vld [vmem:[%s11661_s25] sm:$0xff] }
  0xc1   :  { %v212_v3 = vsel %vm210_vm1, %v205_v0, %v206_v62  ;;  %v213_v23 = vsel %vm210_vm1, %v204_v2, %v205_v0  ;;  %v238_v53 = vsel %vm235_vm2, %v231_v44, %v232_v51  ;;  %v237_v57 = vsel %vm235_vm2, %v232_v51, %v233_v31  ;;  %v79_v2 = vld [vmem:[%s11661_s25 + $0x10] sm:$0xff] }
  0xc2   :  { %v225_v4 = vmul.f32 %v212_v3, %v8150_v63  ;;  %6905 = vmatmul.msk.f32.gmra.mxu2 %vm134_vm0, %v222_v1  ;;  %v224_v27 = vmul.f32 %v213_v23, %v8182_v21  ;;  %v248_v55 = vmul.f32 %v238_v53, %v8229_v52  ;;  %v249_v58 = vmul.f32 %v237_v57, %v8238_v56  ;;  %v82_v1 = vld [vmem:[%s11662_s28 + $0x8] sm:$0xff]  ;;  %v83_v3 = vld [vmem:[%s11662_s28 + $0x10] sm:$0xff] }
  0xc3   :  { %v243_v31 = vsel %vm235_vm2, %v234_v39, %v227_v20  ;;  %v7787_v0 = vmov 0   ;;  %v78_v39 = vld [vmem:[%s11661_s25 + $0x8] sm:$0xff]  ;;  %v8305_v51 = vperm.slane %v8302_v41, 0 }
  0xc4   :  { %6908 = vmatmul.msk.f32.vlgmr.msra.gmra.mxu3 %vm134_vm0, %v225_v4  ;;  %v251_v62 = vmul.f32 %v243_v31, %v8257_v24  ;;  %7273 = vset.pattern.permute.xlu0 %v7787_v0  ;;  %v80_v4 = vld [vmem:[%s11661_s25 + $0x18] sm:$0xff] }
  0xc5   :  { %7274 = vset.pattern.permute.xlu1 %v7787_v0  ;;  %597 = vperm.xlu0 %7273, %v77_v42   ;;  %11664 = vst [vmem:[#allocation8_spill] sm:$0xff] %v8305_v51 }
  0xc6   :  { %7275 = vset.pattern.permute.xlu2 %v7787_v0  ;;  %625 = vperm.xlu1 %7274, %v81_v30  }
  0xc7   :  { %612 = vperm.xlu2 %7275, %v80_v4  }
  0xca   :  { %6906 = vmatmul.msk.f32.gmra.mxu2 %vm134_vm0, %v223_v11  ;;  %v84_v11 = vld [vmem:[%s11662_s28 + $0x18] sm:$0xff] }
  0xcc   :  { %6909 = vmatmul.msk.f32.gmra.mxu3 %vm134_vm0, %v226_v12 }
  0xcd   :  { %602 = vperm.xlu0 %7273, %v78_v39  }
  0xce   :  { %630 = vperm.xlu1 %7274, %v82_v1  }
  0xcf   :  { %640 = vperm.xlu2 %7275, %v84_v11  }
  0xd2   :  { %6907 = vmatmul.msk.f32.gmra.mxu2 %vm134_vm0, %v224_v27 }
  0xd4   :  { %6914 = vmatmul.msk.f32.vlgmr.msrb.gmra.mxu3 %vm134_vm0, %v244_v22 }
  0xd5   :  { %607 = vperm.xlu0 %7273, %v79_v2  }
  0xd6   :  { %635 = vperm.xlu1 %7274, %v83_v3  }
  0xd7   :  { %7276 = vset.pattern.permute.xlu2 %v8056_v28 }
  0xdc   :  { %6915 = vmatmul.msk.f32.gmra.mxu3 %vm134_vm0, %v245_v35 }
  0xdd   :  { %7277 = vset.pattern.permute.xlu0 %v8056_v28 }
  0xe4   :  { %6916 = vmatmul.msk.f32.gmra.mxu3 %vm134_vm0, %v246_v43 }
  0xec   :  { %6917 = vmatmul.msk.f32.gmra.mxu3 %vm134_vm0, %v247_v50 }
  0xf4   :  { %6918 = vmatmul.msk.f32.gmra.mxu3 %vm134_vm0, %v248_v55 }
  0xfc   :  { %6919 = vmatmul.msk.f32.gmra.mxu3 %vm134_vm0, %v249_v58  ;;  %v7788_v58 = vmov 32.0  }
  0xfd   :  { %7320 = vrcp.f32 %v7788_v58 }
 0x103   :  { %v7321_v2 = vpop.eup %7320 }
 0x104   :  { %6920 = vmatmul.msk.f32.gmra.mxu3 %vm134_vm0, %v250_v61  ;;  %vm517_vm3 = vweird.f32 %v7321_v2 }
 0x10c   :  { %6921 = vmatmul.msk.f32.gmra.mxu3 %vm134_vm0, %v251_v62 }
 0x114   :  { %v302_v20 = vpop.f32.mrf.mxu1 }
 0x11c   :  { %v305_v22 = vpop.f32.mrf.mxu1 }
 0x120   :  { %v8287_v6 = vpop.f32.mrf.mxu3 }
 0x124   :  { %v308_v40 = vpop.f32.mrf.mxu1 }
 0x128   :  { %v8289_v10 = vpop.f32.mrf.mxu3 }
 0x12c   :  { %v311_v0 = vpop.f32.mrf.mxu1 }
 0x12d   :  { %v367_v13 = vpop.f32.mrf.mxu2 }
 0x12e   :  { %v368_v43 = vadd.f32 %v367_v13, %v302_v20 }
 0x135   :  { %v370_v26 = vpop.f32.mrf.mxu2 }
 0x136   :  { %v371_v35 = vadd.f32 %v370_v26, %v305_v22 }
 0x13d   :  { %v373_v34 = vpop.f32.mrf.mxu2 }
 0x13e   :  { %v374_v47 = vadd.f32 %v373_v34, %v308_v40 }
 0x145   :  { %v376_v62 = vpop.f32.mrf.mxu2 }
 0x146   :  { %v377_v30 = vadd.f32 %v376_v62, %v311_v0 }
 0x147   :  { %v8295_v12 = vpop.f32.mrf.mxu3 }
 0x14d   :  { %v379_v34 = vpop.f32.mrf.mxu2 }
 0x14f   :  { %v8297_v23 = vpop.f32.mrf.mxu3 }
 0x157   :  { %v437_v27 = vpop.f32.mrf.mxu3 }
 0x158   :  { %v461_v50 = vadd.f32 %v437_v27, %v368_v43  ;;  %v513_v27 = vmul.f32 32.0, %v7321_v2 }
 0x15a   :  { %v470_v61 = vadd.f32 %v8305_v51, %v461_v50  ;;  %v514_v43 = vsub.f32 1.0, %v513_v27 }
 0x15c   :  { %v478_v39 = vmax.f32 %v470_v61, 0.0 }
 0x15e   :  { %v486_v13 = vsel %vm134_vm0, %v478_v39, 0.0 }
 0x15f   :  { %v440_v29 = vpop.f32.mrf.mxu3 }
 0x160   :  { %v462_v44 = vadd.f32 %v440_v29, %v371_v35 }
 0x162   :  { %v471_v55 = vadd.f32 %v8305_v51, %v462_v44  ;;  %v314_v44 = vpop.f32.mrf.mxu1 }
 0x164   :  { %v479_v42 = vmax.f32 %v471_v55, 0.0  ;;  %v515_v55 = vmul.f32 %v7321_v2, %v514_v43 }
 0x166   :  { %v487_v4 = vsel %vm134_vm0, %v479_v42, 0.0  ;;  %v516_v61 = vadd.f32 %v7321_v2, %v515_v55 }
 0x167   :  { %v443_v53 = vpop.f32.mrf.mxu3  ;;  %v488_v22 = vadd.f32 %v487_v4, %v486_v13 }
 0x168   :  { %v463_v57 = vadd.f32 %v443_v53, %v374_v47 }
 0x16a   :  { %v472_v31 = vadd.f32 %v8305_v51, %v463_v57 }
 0x16c   :  { %v480_v1 = vmax.f32 %v472_v31, 0.0  ;;  %v382_v31 = vpop.f32.mrf.mxu2 }
 0x16e   :  { %v489_v20 = vsel %vm134_vm0, %v480_v1, 0.0 }
 0x16f   :  { %v446_v3 = vpop.f32.mrf.mxu3  ;;  %v490_v35 = vadd.f32 %v489_v20, %v488_v22  ;;  %v380_v20 = vadd.f32 %v379_v34, %v314_v44  ;;  %v386_v22 = vadd.f32 %v8295_v12, %v8287_v6 }
 0x170   :  { %v464_v11 = vadd.f32 %v446_v3, %v377_v30  ;;  %v317_v30 = vpop.f32.mrf.mxu1 }
 0x171   :  { %v383_v4 = vadd.f32 %v382_v31, %v317_v30  ;;  %v389_v31 = vadd.f32 %v8297_v23, %v8289_v10  ;;  %v8361_v23 = vld [vmem:[%s11656_s1 + $0x98] sm:$0xff] }
 0x172   :  { %v473_v26 = vadd.f32 %v8305_v51, %v464_v11  ;;  %v8315_v11 = vsel %vm517_vm3, %v7321_v2, %v516_v61  ;;  %745 = vmatpush.msrb.mxu0 %v8361_v23 }
 0x174   :  { %v481_v29 = vmax.f32 %v473_v26, 0.0 }
 0x176   :  { %v491_v40 = vsel %vm134_vm0, %v481_v29, 0.0 }
 0x177   :  { %v492_v47 = vadd.f32 %v491_v40, %v490_v35  ;;  %v449_v50 = vpop.f32.mrf.mxu3 }
 0x178   :  { %v465_v35 = vadd.f32 %v449_v50, %v380_v20 }
 0x179   :  { %v493_v53 = vrot.slane %v492_v47, 4 }
 0x17b   :  { %v494_v57 = vadd.f32 %v493_v53, %v492_v47 }
 0x17d   :  { %v495_v58 = vrot.slane %v494_v57, 2 }
 0x17f   :  { %v496_v62 = vadd.f32 %v495_v58, %v494_v57  ;;  %v452_v0 = vpop.f32.mrf.mxu3 }
 0x180   :  { %v466_v26 = vadd.f32 %v452_v0, %v383_v4 }
 0x181   :  { %v497_v3 = vrot.slane %v496_v62, 1 }
 0x182   :  { %v8329_v2 = vadd.f32 %v8305_v51, %v466_v26 }
 0x183   :  { %v498_v13 = vadd.f32 %v497_v3, %v496_v62 }
 0x184   :  { %v483_v58 = vmax.f32 %v8329_v2, 0.0 }
 0x185   :  { %v519_v27 = vmul.f32 %v8315_v11, %v498_v13 }
 0x186   :  { %v500_v20 = vsel %vm134_vm0, %v483_v58, 0.0 }
 0x187   :  { %v8320_v40 = vsub.f32 %v478_v39, %v519_v27  ;;  %v8322_v43 = vsub.f32 %v479_v42, %v519_v27  ;;  %v8324_v47 = vsub.f32 %v480_v1, %v519_v27  ;;  %v8326_v53 = vsub.f32 %v481_v29, %v519_v27  ;;  %v455_v55 = vpop.f32.mrf.mxu3 }
 0x188   :  { %v467_v34 = vadd.f32 %v455_v55, %v386_v22  ;;  %v8338_v42 = vadd.f32 %v8305_v51, %v465_v35 }
 0x189   :  { %v529_v44 = vmul.f32 %v8320_v40, %v8320_v40  ;;  %v530_v6 = vmul.f32 %v8322_v43, %v8322_v43  ;;  %v531_v12 = vmul.f32 %v8324_v47, %v8324_v47  ;;  %v532_v1 = vmul.f32 %v8326_v53, %v8326_v53 }
 0x18a   :  { %v8341_v39 = vadd.f32 %v8305_v51, %v467_v34  ;;  %v482_v0 = vmax.f32 %v8338_v42, 0.0 }
 0x18b   :  { %v537_v29 = vsel %vm134_vm0, %v529_v44, 0.0  ;;  %v538_v50 = vsel %vm134_vm0, %v530_v6, 0.0  ;;  %v540_v61 = vsel %vm134_vm0, %v531_v12, 0.0  ;;  %v542_v3 = vsel %vm134_vm0, %v532_v1, 0.0  ;;  %v8367_v6 = vld [vmem:[%s11656_s1 + $0x90] sm:$0xff]  ;;  %v8374_v1 = vld [vmem:[%s11656_s1 + $0x88] sm:$0xff] }
 0x18c   :  { %v539_v57 = vadd.f32 %v538_v50, %v537_v29  ;;  %v484_v30 = vmax.f32 %v8341_v39, 0.0  ;;  %v499_v22 = vsel %vm134_vm0, %v482_v0, 0.0  ;;  %746 = vmatpush.msrb.mxu0 %v8367_v6  ;;  %v8379_v50 = vld [vmem:[%s11656_s1 + $0xb8] sm:$0xff] }
 0x18d   :  { %v501_v10 = vadd.f32 %v500_v20, %v499_v22  ;;  %880 = vmatpush.msrb.mxu2 %v8379_v50 }
 0x18e   :  { %v541_v62 = vadd.f32 %v540_v61, %v539_v57  ;;  %v502_v35 = vsel %vm134_vm0, %v484_v30, 0.0  ;;  %747 = vmatpush.msrb.mxu0 %v8374_v1  ;;  %v8386_v61 = vld [vmem:[%s11656_s1 + $0x80] sm:$0xff] }
 0x18f   :  { %v458_v4 = vpop.f32.mrf.mxu3  ;;  %v503_v44 = vadd.f32 %v502_v35, %v501_v10 }
 0x190   :  { %v543_v13 = vadd.f32 %v542_v3, %v541_v62  ;;  %v468_v26 = vadd.f32 %v458_v4, %v389_v31  ;;  %v8391_v62 = vld [vmem:[%s11656_s1 + $0xb0] sm:$0xff]  ;;  %748 = vmatpush.msrb.mxu0 %v8386_v61 }
 0x191   :  { %881 = vmatpush.msrb.mxu2 %v8391_v62 }
 0x192   :  { %v544_v27 = vrot.slane %v543_v13, 4  ;;  %v477_v55 = vadd.f32 %v8305_v51, %v468_v26 }
 0x194   :  { %v545_v2 = vadd.f32 %v544_v27, %v543_v13  ;;  %v485_v34 = vmax.f32 %v477_v55, 0.0  ;;  %v8398_v13 = vld [vmem:[%s11656_s1 + $0xa8] sm:$0xff]  ;;  %v8405_v27 = vld [vmem:[%s11656_s1 + $0xa0] sm:$0xff]  ;;  %v8408_v55 = vpop.permute.xlu0 %597 }
 0x195   :  { %882 = vmatpush.msrb.mxu2 %v8398_v13 }
 0x196   :  { %v546_v12 = vrot.slane %v545_v2, 2  ;;  %v504_v42 = vsel %vm134_vm0, %v485_v34, 0.0 }
 0x197   :  { %v505_v39 = vadd.f32 %v504_v42, %v503_v44  ;;  %883 = vmatpush.msrb.mxu2 %v8405_v27  ;;  %v8412_v44 = vpop.permute.xlu1 %625 }
 0x198   :  { %v547_v29 = vadd.f32 %v546_v12, %v545_v2 }
 0x199   :  { %v506_v57 = vrot.slane %v505_v39, 4  ;;  %1493 = vmatpush.msra.mxu2 %v7972_v8 }
 0x19a   :  { %v548_v31 = vrot.slane %v547_v29, 1 }
 0x19b   :  { %v507_v3 = vadd.f32 %v506_v57, %v505_v39  ;;  %1494 = vmatpush.msra.mxu2 %v7977_v9 }
 0x19c   :  { %v549_v4 = vadd.f32 %v548_v31, %v547_v29 }
 0x19d   :  { %v508_v20 = vrot.slane %v507_v3, 2  ;;  %1495 = vmatpush.msra.mxu2 %v8002_v14 }
 0x19e   :  { %v563_v26 = vmul.f32 %v549_v4, %v8315_v11 }
 0x19f   :  { %v509_v22 = vadd.f32 %v508_v20, %v507_v3  ;;  %1496 = vmatpush.msra.mxu2 %v8009_v15  ;;  %v8431_v15 = vpop.permute.xlu0 %602 }
 0x1a0   :  { %v565_v35 = vadd.f32 1e-05, %v563_v26 }
 0x1a1   :  { %v510_v10 = vrot.slane %v509_v22, 1 }
 0x1a2   :  { %7322 = vrsqrt.f32 %v565_v35  ;;  %vm573_vm5 = vweird.f32 %v565_v35 }
 0x1a3   :  { %v511_v2 = vadd.f32 %v510_v10, %v509_v22  ;;  %v8438_v10 = vpop.permute.xlu1 %630 }
 0x1a5   :  { %v520_v12 = vmul.f32 %v8315_v11, %v511_v2 }
 0x1a7   :  { %v8417_v42 = vsub.f32 %v482_v0, %v520_v12  ;;  %v8419_v39 = vsub.f32 %v483_v58, %v520_v12  ;;  %v8421_v29 = vsub.f32 %v484_v30, %v520_v12  ;;  %v8423_v8 = vsub.f32 %v485_v34, %v520_v12 }
 0x1a8   :  { %v7323_v57 = vpop.eup %7322 }
 0x1a9   :  { %v568_v31 = vmul.f32 %v7323_v57, %v565_v35  ;;  %v533_v9 = vmul.f32 %v8417_v42, %v8417_v42  ;;  %v534_v14 = vmul.f32 %v8419_v39, %v8419_v39  ;;  %v535_v3 = vmul.f32 %v8421_v29, %v8421_v29 }
 0x1aa   :  { %v536_v58 = vmul.f32 %v8423_v8, %v8423_v8  ;;  %vm574_vm4 = vweird.f32 %v7323_v57 }
 0x1ab   :  { %v569_v0 = vmul.f32 %v7323_v57, %v568_v31  ;;  %v550_v30 = vsel %vm134_vm0, %v533_v9, 0.0  ;;  %v551_v34 = vsel %vm134_vm0, %v534_v14, 0.0  ;;  %v553_v26 = vsel %vm134_vm0, %v535_v3, 0.0  ;;  %vm575_vm6 = vmor %vm573_vm5, %vm574_vm4  ;;  %v6925_v3 = vld [vmem:[%s11656_s1 + $0x78] sm:$0xff] }
 0x1ac   :  { %v552_v4 = vadd.f32 %v551_v34, %v550_v30  ;;  %v555_v12 = vsel %vm134_vm0, %v536_v58, 0.0  ;;  %v8446_v30 = vpop.permute.xlu0 %607  ;;  %v6924_v58 = vld [vmem:[%s11656_s1 + $0x70] sm:$0xff]  ;;  %810 = vmatpush.msrb.mxu1 %v6925_v3 }
 0x1ad   :  { %v570_v20 = vmul.f32 0.5, %v569_v0 }
 0x1ae   :  { %v554_v22 = vadd.f32 %v553_v26, %v552_v4  ;;  %811 = vmatpush.msrb.mxu1 %v6924_v58 }
 0x1af   :  { %v571_v2 = vsub.f32 1.5, %v570_v20  ;;  %v8460_v20 = vpop.permute.xlu1 %635 }
 0x1b0   :  { %v556_v51 = vadd.f32 %v555_v12, %v554_v22 }
 0x1b1   :  { %v572_v31 = vmul.f32 %v7323_v57, %v571_v2 }
 0x1b2   :  { %v557_v46 = vrot.slane %v556_v51, 4 }
 0x1b3   :  { %v576_v45 = vsel %vm575_vm6, %v7323_v57, %v572_v31  ;;  %v8452_v57 = vpop.permute.xlu2 %612 }
 0x1b4   :  { %v588_v9 = vmul.f32 %v576_v45, %v8322_v43  ;;  %v589_v14 = vmul.f32 %v576_v45, %v8324_v47  ;;  %v558_v0 = vadd.f32 %v557_v46, %v556_v51  ;;  %v587_v35 = vmul.f32 %v576_v45, %v8320_v40  ;;  %v6923_v46 = vld [vmem:[%s11656_s1 + $0x68] sm:$0xff]  ;;  %v6922_v40 = vld [vmem:[%s11656_s1 + $0x60] sm:$0xff] }
 0x1b5   :  { %812 = vmatpush.msrb.mxu1 %v6923_v46  ;;  %v590_v31 = vmul.f32 %v576_v45, %v8326_v53 }
 0x1b6   :  { %v559_v34 = vrot.slane %v558_v0, 2  ;;  %v616_v43 = vmul.f32 %v8431_v15, %v588_v9  ;;  %v615_v51 = vmul.f32 %v8408_v55, %v587_v35  ;;  %v617_v47 = vmul.f32 %v8446_v30, %v589_v14 }
 0x1b7   :  { %813 = vmatpush.msrb.mxu1 %v6922_v40  ;;  %v618_v53 = vmul.f32 %v8452_v57, %v590_v31 }
 0x1b8   :  { %v560_v4 = vadd.f32 %v559_v34, %v558_v0  ;;  %v8463_v26 = vadd.f32 %v8438_v10, %v616_v43  ;;  %v8469_v22 = vadd.f32 %v8412_v44, %v615_v51  ;;  %v8477_v14 = vadd.f32 %v8460_v20, %v617_v47 }
 0x1ba   :  { %v561_v2 = vrot.slane %v560_v4, 1  ;;  %v676_v12 = vrot.slane %v8463_v26, 1  ;;  %v675_v9 = vrot.slane %v8469_v22, 1  ;;  %6930 = vmatmul.msk.f32.vlgmr.msrb.gmra.mxu0 %vm134_vm0, %v8469_v22  ;;  %v677_v45 = vrot.slane %v8477_v14, 1 }
 0x1bb   :  { %v8487_v38 = vpop.permute.xlu2 %640 }
 0x1bc   :  { %v562_v0 = vadd.f32 %v561_v2, %v560_v4  ;;  %v689_v35 = vsel %vm235_vm2, %v675_v9, %v676_v12  ;;  %v688_v47 = vsel %vm235_vm2, %v676_v12, %v677_v45  ;;  %v8495_v4 = vadd.f32 %v8487_v38, %v618_v53 }
 0x1bd   :  { %v691_v43 = vmul.f32 %v689_v35, %v8189_v25  ;;  %v692_v25 = vmul.f32 %v688_v47, %v8201_v32 }
 0x1be   :  { %v564_v34 = vmul.f32 %v562_v0, %v8315_v11  ;;  %v678_v2 = vrot.slane %v8495_v4, 1 }
 0x1bf   :  { %6950 = vmatmul.msk.f32.vlgmr.msrb.gmra.mxu2 %vm134_vm0, %v691_v43 }
 0x1c0   :  { %v566_v51 = vadd.f32 1e-05, %v564_v34  ;;  %1943 = vmatpush.msrb.mxu2 %v6925_v3  ;;  %v687_v12 = vsel %vm235_vm2, %v677_v45, %v678_v2 }
 0x1c2   :  { %7324 = vrsqrt.f32 %v566_v51  ;;  %6931 = vmatmul.msk.f32.gmra.mxu0 %vm134_vm0, %v8463_v26  ;;  %1944 = vmatpush.msrb.mxu2 %v6924_v58  ;;  %v693_v58 = vmul.f32 %v687_v12, %v8211_v36  ;;  %vm583_vm8 = vweird.f32 %v566_v51 }
 0x1c4   :  { %1945 = vmatpush.msrb.mxu2 %v6923_v46 }
 0x1c6   :  { %1946 = vmatpush.msrb.mxu2 %v6922_v40 }
 0x1c7   :  { %6951 = vmatmul.msk.f32.gmra.mxu2 %vm134_vm0, %v692_v25 }
 0x1c8   :  { %v7325_v31 = vpop.eup %7324 }
 0x1c9   :  { %v578_v3 = vmul.f32 %v7325_v31, %v566_v51  ;;  %vm584_vm7 = vweird.f32 %v7325_v31 }
 0x1ca   :  { %6932 = vmatmul.msk.f32.gmra.mxu0 %vm134_vm0, %v8477_v14  ;;  %vm585_vm9 = vmor %vm583_vm8, %vm584_vm7 }
 0x1cb   :  { %v579_v0 = vmul.f32 %v7325_v31, %v578_v3 }
 0x1cd   :  { %v580_v35 = vmul.f32 0.5, %v579_v0 }
 0x1cf   :  { %v581_v46 = vsub.f32 1.5, %v580_v35  ;;  %6952 = vmatmul.msk.f32.gmra.mxu2 %vm134_vm0, %v693_v58 }
 0x1d1   :  { %v582_v32 = vmul.f32 %v7325_v31, %v581_v46 }
 0x1d2   :  { %6933 = vmatmul.msk.f32.gmra.mxu0 %vm134_vm0, %v8495_v4 }
 0x1d3   :  { %v586_v40 = vsel %vm585_vm9, %v7325_v31, %v582_v32  ;;  %v651_v31 = vrot.slane %v8469_v22, 7  ;;  %v652_v32 = vrot.slane %v8463_v26, 7 }
 0x1d4   :  { %v594_v34 = vmul.f32 %v586_v40, %v8423_v8  ;;  %v591_v43 = vmul.f32 %v586_v40, %v8417_v42  ;;  %v592_v45 = vmul.f32 %v586_v40, %v8419_v39  ;;  %v593_v42 = vmul.f32 %v586_v40, %v8421_v29 }
 0x1d5   :  { %v665_v29 = vsel %vm210_vm1, %v651_v31, %v652_v32 }
 0x1d6   :  { %v619_v53 = vmul.f32 %v8408_v55, %v591_v43  ;;  %v622_v36 = vmul.f32 %v8452_v57, %v594_v34  ;;  %v620_v47 = vmul.f32 %v8431_v15, %v592_v45  ;;  %v621_v34 = vmul.f32 %v8446_v30, %v593_v42 }
 0x1d7   :  { %v653_v43 = vrot.slane %v8477_v14, 7 }
 0x1d8   :  { %v647_v25 = vadd.f32 %v8412_v44, %v619_v53  ;;  %v650_v51 = vadd.f32 %v8487_v38, %v622_v36  ;;  %v648_v8 = vadd.f32 %v8438_v10, %v620_v47 }
 0x1d9   :  { %v664_v45 = vsel %vm210_vm1, %v652_v32, %v653_v43  ;;  %v8628_v32 = vld [vmem:[%s11656_s1 + $0x108] sm:$0xff] }
 0x1da   :  { %v679_v3 = vrot.slane %v647_v25, 1  ;;  %v658_v0 = vrot.slane %v650_v51, 7  ;;  %6934 = vmatmul.msk.f32.gmra.mxu0 %vm134_vm0, %v647_v25  ;;  %v680_v46 = vrot.slane %v648_v8, 1  ;;  %v669_v36 = vmul.f32 %v664_v45, %v8131_v54 }
 0x1db   :  { %v682_v47 = vrot.slane %v650_v51, 1 }
 0x1dc   :  { %v666_v39 = vsel %vm210_vm1, %v658_v0, %v651_v31  ;;  %v686_v12 = vsel %vm235_vm2, %v678_v2, %v679_v3  ;;  %v685_v40 = vsel %vm235_vm2, %v679_v3, %v680_v46  ;;  %v649_v2 = vadd.f32 %v8460_v20, %v621_v34 }
 0x1dd   :  { %v667_v35 = vmul.f32 %v666_v39, %v8073_v37  ;;  %v694_v58 = vmul.f32 %v686_v12, %v8220_v49  ;;  %v668_v37 = vmul.f32 %v665_v29, %v8117_v48  ;;  %v695_v49 = vmul.f32 %v685_v40, %v8229_v52 }
 0x1de   :  { %v681_v26 = vrot.slane %v649_v2, 1  ;;  %v654_v52 = vrot.slane %v8495_v4, 7  ;;  %v690_v42 = vsel %vm235_vm2, %v682_v47, %v675_v9  ;;  %v657_v12 = vrot.slane %v649_v2, 7 }
 0x1df   :  { %6938 = vmatmul.msk.f32.vlgmr.msrb.gmra.mxu1 %vm134_vm0, %v667_v35  ;;  %6953 = vmatmul.msk.f32.gmra.mxu2 %vm134_vm0, %v694_v58  ;;  %v8611_v35 = vld [vmem:[%s11656_s1 + $0x118] sm:$0xff]  ;;  %v8620_v58 = vld [vmem:[%s11656_s1 + $0x110] sm:$0xff] }
 0x1e0   :  { %v684_v53 = vsel %vm235_vm2, %v680_v46, %v681_v26  ;;  %v663_v14 = vsel %vm210_vm1, %v653_v43, %v654_v52  ;;  %v683_v31 = vsel %vm235_vm2, %v681_v26, %v682_v47  ;;  %1157 = vmatpush.msra.mxu1 %v8611_v35 }
 0x1e1   :  { %v696_v48 = vmul.f32 %v684_v53, %v8238_v56  ;;  %v670_v3 = vmul.f32 %v663_v14, %v8142_v60  ;;  %v697_v54 = vmul.f32 %v683_v31, %v8249_v59  ;;  %v655_v56 = vrot.slane %v647_v25, 7  ;;  %v6958_v31 = vld [vmem:[%s11656_s1 + $0xc0] sm:$0xff] }
 0x1e2   :  { %6935 = vmatmul.msk.f32.gmra.mxu0 %vm134_vm0, %v648_v8  ;;  %v656_v60 = vrot.slane %v648_v8, 7  ;;  %v8605_v8 = vld [vmem:[%s11656_s1 + $0xe0] sm:$0xff]  ;;  %1158 = vmatpush.msra.mxu1 %v8620_v58 }
 0x1e3   :  { %v662_v4 = vsel %vm210_vm1, %v654_v52, %v655_v56 }
 0x1e4   :  { %v671_v39 = vmul.f32 %v662_v4, %v8162_v5  ;;  %v661_v59 = vsel %vm210_vm1, %v655_v56, %v656_v60  ;;  %v660_v22 = vsel %vm210_vm1, %v656_v60, %v657_v12  ;;  %1159 = vmatpush.msra.mxu1 %v8628_v32  ;;  %v112_v56 = vld [vmem:[%s11613_s14 + $0x8] sm:$0xff] }
 0x1e5   :  { %v672_v25 = vmul.f32 %v661_v59, %v8182_v21  ;;  %v673_v5 = vmul.f32 %v660_v22, %v8150_v63  ;;  %v8585_v21 = vld [vmem:[%s11656_s1 + $0xf8] sm:$0xff]  ;;  %v8591_v63 = vld [vmem:[%s11656_s1 + $0xf0] sm:$0xff]  ;;  %v11665_v4 = vld [vmem:[#allocation5_spill] sm:$0xff] }
 0x1e6   :  { %1022 = vmatpush.msra.mxu3 %v8585_v21  ;;  %v11666_v60 = vld [vmem:[#allocation6_spill] sm:$0xff] }
 0x1e7   :  { %6939 = vmatmul.msk.f32.gmra.mxu1 %vm134_vm0, %v668_v37  ;;  %6954 = vmatmul.msk.f32.gmra.mxu2 %vm134_vm0, %v695_v49  ;;  %v6959_v49 = vld [vmem:[%s11656_s1 + $0xc8] sm:$0xff] }
 0x1e8   :  { %1023 = vmatpush.msra.mxu3 %v8591_v63 }
 0x1ea   :  { %6936 = vmatmul.msk.f32.gmra.mxu0 %vm134_vm0, %v649_v2  ;;  %v8645_v2 = vperm.slane %v8302_v41, 1 }
 0x1ef   :  { %6940 = vmatmul.msk.f32.gmra.mxu1 %vm134_vm0, %v669_v36  ;;  %6955 = vmatmul.msk.f32.gmra.mxu2 %vm134_vm0, %v696_v48 }
 0x1f2   :  { %6937 = vmatmul.msk.f32.gmra.mxu0 %vm134_vm0, %v650_v51  ;;  %v698_v51 = vmul.f32 %v690_v42, %v8257_v24  ;;  %v659_v24 = vsel %vm210_vm1, %v657_v12, %v658_v0  ;;  %v6961_v0 = vld [vmem:[%s11656_s1 + $0xd8] sm:$0xff] }
 0x1f3   :  { %v674_v9 = vmul.f32 %v659_v24, %v8169_v7  ;;  %v8597_v7 = vld [vmem:[%s11656_s1 + $0xe8] sm:$0xff]  ;;  %1087 = vmatpush.msra.mxu0 %v6961_v0  ;;  %v11667_v12 = vld [vmem:[#allocation7_spill] sm:$0xff] }
 0x1f4   :  { %1024 = vmatpush.msra.mxu3 %v8597_v7 }
 0x1f6   :  { %1025 = vmatpush.msra.mxu3 %v8605_v8 }
 0x1f7   :  { %6941 = vmatmul.msk.f32.gmra.mxu1 %vm134_vm0, %v670_v3  ;;  %6956 = vmatmul.msk.f32.gmra.mxu2 %vm134_vm0, %v697_v54 }
 0x1f8   :  { %1558 = vmatpush.msrb.mxu3 %v8016_v16  ;;  %v8634_v16 = vld [vmem:[%s11656_s1 + $0x100] sm:$0xff] }
 0x1f9   :  { %1160 = vmatpush.msra.mxu1 %v8634_v16 }
 0x1fa   :  { %1559 = vmatpush.msrb.mxu3 %v8023_v17  ;;  %v6960_v17 = vld [vmem:[%s11656_s1 + $0xd0] sm:$0xff] }
 0x1fb   :  { %1088 = vmatpush.msra.mxu0 %v6960_v17  ;;  %1878 = vmatpush.msrb.mxu1 %v8361_v23 }
 0x1fc   :  { %1560 = vmatpush.msrb.mxu3 %v8030_v18 }
 0x1fd   :  { %1879 = vmatpush.msrb.mxu1 %v8367_v6  ;;  %1089 = vmatpush.msra.mxu0 %v6959_v49 }
 0x1fe   :  { %1561 = vmatpush.msrb.mxu3 %v8036_v19 }
 0x1ff   :  { %6942 = vmatmul.msk.f32.gmra.mxu1 %vm134_vm0, %v671_v39  ;;  %6957 = vmatmul.msk.f32.gmra.mxu2 %vm134_vm0, %v698_v51 }
 0x200   :  { %1880 = vmatpush.msrb.mxu1 %v8374_v1  ;;  %1090 = vmatpush.msra.mxu0 %v6958_v31 }
 0x202   :  { %1881 = vmatpush.msrb.mxu1 %v8386_v61  ;;  %1623 = vmatpush.msrb.mxu0 %v8064_v33 }
 0x204   :  { %1624 = vmatpush.msrb.mxu0 %v11665_v4  ;;  %v116_v4 = vld [vmem:[%s11613_s14 + $0x28] sm:$0xff] }
 0x206   :  { %1625 = vmatpush.msrb.mxu0 %v11666_v60 }
 0x207   :  { %6943 = vmatmul.msk.f32.gmra.mxu1 %vm134_vm0, %v672_v25 }
 0x208   :  { %1626 = vmatpush.msrb.mxu0 %v11667_v12 }
 0x20f   :  { %6944 = vmatmul.msk.f32.gmra.mxu1 %vm134_vm0, %v673_v5 }
 0x217   :  { %6945 = vmatmul.msk.f32.gmra.mxu1 %vm134_vm0, %v674_v9  ;;  %v113_v9 = vld [vmem:[%s11613_s14 + $0x10] sm:$0xff] }
 0x237   :  { %v750_v46 = vpop.f32.mrf.mxu0 }
 0x23f   :  { %v753_v19 = vpop.f32.mrf.mxu0 }
 0x242   :  { %v885_v18 = vpop.f32.mrf.mxu2 }
 0x247   :  { %v756_v6 = vpop.f32.mrf.mxu0 }
 0x24a   :  { %v888_v34 = vpop.f32.mrf.mxu2 }
 0x252   :  { %v891_v26 = vpop.f32.mrf.mxu2 }
 0x25c   :  { %v815_v29 = vpop.f32.mrf.mxu1 }
 0x25d   :  { %v816_v40 = vadd.f32 %v815_v29, %v750_v46 }
 0x25f   :  { %v909_v37 = vadd.f32 %v885_v18, %v816_v40 }
 0x261   :  { %v8651_v23 = vadd.f32 %v8645_v2, %v909_v37 }
 0x263   :  { %6966 = vmatmul.msk.f32.vlgmr.msra.gmra.mxu3 %vm134_vm0, %v8651_v23  ;;  %v951_v53 = vrot.slane %v8651_v23, 2 }
 0x264   :  { %v818_v1 = vpop.f32.mrf.mxu1  ;;  %2008 = vmatpush.msra.mxu3 %v8379_v50  ;;  %v111_v50 = vld [vmem:[%s11613_s14] sm:$0xff] }
 0x265   :  { %v819_v61 = vadd.f32 %v818_v1, %v753_v19 }
 0x266   :  { %2009 = vmatpush.msra.mxu3 %v8391_v62  ;;  %v759_v62 = vpop.f32.mrf.mxu0 }
 0x267   :  { %v910_v43 = vadd.f32 %v888_v34, %v819_v61 }
 0x268   :  { %2010 = vmatpush.msra.mxu3 %v8398_v13 }
 0x269   :  { %v8659_v45 = vadd.f32 %v8645_v2, %v910_v43 }
 0x26a   :  { %2011 = vmatpush.msra.mxu3 %v8405_v27  ;;  %v894_v27 = vpop.f32.mrf.mxu2 }
 0x26b   :  { %v952_v36 = vrot.slane %v8659_v45, 2  ;;  %6967 = vmatmul.msk.f32.gmra.mxu3 %vm134_vm0, %v8659_v45 }
 0x26c   :  { %v821_v13 = vpop.f32.mrf.mxu1 }
 0x26d   :  { %v822_v48 = vadd.f32 %v821_v13, %v756_v6  ;;  %v966_v52 = vsel %vm959_vm10, %v951_v53, %v952_v36  ;;  %v115_v13 = vld [vmem:[%s11613_s14 + $0x20] sm:$0xff] }
 0x26e   :  { %v968_v47 = vmul.f32 %v966_v52, %v111_v50  ;;  %v762_v33 = vpop.f32.mrf.mxu0 }
 0x26f   :  { %v911_v14 = vadd.f32 %v891_v26, %v822_v48 }
 0x270   :  { %6986 = vmatmul.msk.f32.vlgmr.msra.gmra.mxu1 %vm134_vm0, %v968_v47 }
 0x271   :  { %v8679_v3 = vadd.f32 %v8645_v2, %v911_v14  ;;  %2202 = vmatpush.msra.mxu1 %v6961_v0 }
 0x272   :  { %v897_v22 = vpop.f32.mrf.mxu2 }
 0x273   :  { %v953_v54 = vrot.slane %v8679_v3, 2  ;;  %6968 = vmatmul.msk.f32.gmra.mxu3 %vm134_vm0, %v8679_v3  ;;  %2203 = vmatpush.msra.mxu1 %v6960_v17 }
 0x274   :  { %v824_v42 = vpop.f32.mrf.mxu1 }
 0x275   :  { %v825_v39 = vadd.f32 %v824_v42, %v759_v62  ;;  %v965_v51 = vsel %vm959_vm10, %v952_v36, %v953_v54  ;;  %2204 = vmatpush.msra.mxu1 %v6959_v49  ;;  %v114_v49 = vld [vmem:[%s11613_s14 + $0x18] sm:$0xff] }
 0x276   :  { %v969_v59 = vmul.f32 %v965_v51, %v112_v56  ;;  %v765_v34 = vpop.f32.mrf.mxu0 }
 0x277   :  { %v912_v25 = vadd.f32 %v894_v27, %v825_v39  ;;  %2205 = vmatpush.msra.mxu1 %v6958_v31 }
 0x278   :  { %6987 = vmatmul.msk.f32.gmra.mxu1 %vm134_vm0, %v969_v59 }
 0x279   :  { %v8695_v5 = vadd.f32 %v8645_v2, %v912_v25 }
 0x27a   :  { %v900_v40 = vpop.f32.mrf.mxu2 }
 0x27b   :  { %v954_v24 = vrot.slane %v8695_v5, 2  ;;  %6969 = vmatmul.msk.f32.gmra.mxu3 %vm134_vm0, %v8695_v5 }
 0x27c   :  { %v827_v0 = vpop.f32.mrf.mxu1 }
 0x27d   :  { %v828_v46 = vadd.f32 %v827_v0, %v762_v33  ;;  %v964_v17 = vsel %vm959_vm10, %v953_v54, %v954_v24  ;;  %v103_v0 = vld [vmem:[%s11612_s13] sm:$0xff] }
 0x27e   :  { %v970_v18 = vmul.f32 %v964_v17, %v113_v9  ;;  %v768_v50 = vpop.f32.mrf.mxu0 }
 0x27f   :  { %v913_v19 = vadd.f32 %v897_v22, %v828_v46  ;;  %v926_v22 = vrot.slane %v8651_v23, 6  ;;  %v117_v46 = vld [vmem:[%s11613_s14 + $0x30] sm:$0xff] }
 0x280   :  { %6988 = vmatmul.msk.f32.gmra.mxu1 %vm134_vm0, %v970_v18  ;;  %v105_v23 = vld [vmem:[%s11612_s13 + $0x10] sm:$0xff] }
 0x281   :  { %v8707_v29 = vadd.f32 %v8645_v2, %v913_v19 }
 0x282   :  { %v903_v48 = vpop.f32.mrf.mxu2 }
 0x283   :  { %v955_v37 = vrot.slane %v8707_v29, 2  ;;  %6970 = vmatmul.msk.f32.gmra.mxu3 %vm134_vm0, %v8707_v29 }
 0x284   :  { %v830_v6 = vpop.f32.mrf.mxu1 }
 0x285   :  { %v831_v1 = vadd.f32 %v830_v6, %v765_v34  ;;  %v963_v61 = vsel %vm959_vm10, %v954_v24, %v955_v37  ;;  %v118_v6 = vld [vmem:[%s11613_s14 + $0x38] sm:$0xff] }
 0x286   :  { %v971_v26 = vmul.f32 %v963_v61, %v114_v49  ;;  %v771_v42 = vpop.f32.mrf.mxu0  ;;  %v928_v61 = vrot.slane %v8679_v3, 6 }
 0x287   :  { %v914_v43 = vadd.f32 %v900_v40, %v831_v1  ;;  %v927_v40 = vrot.slane %v8659_v45, 6 }
 0x288   :  { %6989 = vmatmul.msk.f32.gmra.mxu1 %vm134_vm0, %v971_v26 }
 0x289   :  { %v8719_v36 = vadd.f32 %v8645_v2, %v914_v43  ;;  %v941_v49 = vsel %vm934_vm11, %v926_v22, %v927_v40  ;;  %v930_v43 = vrot.slane %v8707_v29, 6 }
 0x28a   :  { %v906_v33 = vpop.f32.mrf.mxu2 }
 0x28b   :  { %v956_v62 = vrot.slane %v8719_v36, 2  ;;  %6971 = vmatmul.msk.f32.gmra.mxu3 %vm134_vm0, %v8719_v36 }
 0x28c   :  { %v833_v52 = vpop.f32.mrf.mxu1 }
 0x28d   :  { %v834_v27 = vadd.f32 %v833_v52, %v768_v50  ;;  %v962_v47 = vsel %vm959_vm10, %v955_v37, %v956_v62  ;;  %v104_v37 = vld [vmem:[%s11612_s13 + $0x8] sm:$0xff]  ;;  %v107_v50 = vld [vmem:[%s11612_s13 + $0x20] sm:$0xff] }
 0x28e   :  { %v972_v14 = vmul.f32 %v962_v47, %v115_v13  ;;  %v931_v13 = vrot.slane %v8719_v36, 6  ;;  %v109_v47 = vld [vmem:[%s11612_s13 + $0x30] sm:$0xff] }
 0x28f   :  { %v915_v31 = vadd.f32 %v903_v48, %v834_v27  ;;  %v108_v48 = vld [vmem:[%s11612_s13 + $0x28] sm:$0xff] }
 0x290   :  { %6990 = vmatmul.msk.f32.gmra.mxu1 %vm134_vm0, %v972_v14  ;;  %v937_v29 = vsel %vm934_vm11, %v930_v43, %v931_v13 }
 0x291   :  { %v8731_v54 = vadd.f32 %v8645_v2, %v915_v31  ;;  %v948_v52 = vmul.f32 %v937_v29, %v108_v48  ;;  %v110_v31 = vld [vmem:[%s11612_s13 + $0x38] sm:$0xff] }
 0x293   :  { %v957_v56 = vrot.slane %v8731_v54, 2  ;;  %6972 = vmatmul.msk.f32.gmra.mxu3 %vm134_vm0, %v8731_v54  ;;  %v932_v27 = vrot.slane %v8731_v54, 6 }
 0x294   :  { %v836_v39 = vpop.f32.mrf.mxu1 }
 0x295   :  { %v837_v51 = vadd.f32 %v836_v39, %v771_v42  ;;  %v961_v60 = vsel %vm959_vm10, %v956_v62, %v957_v56  ;;  %v936_v36 = vsel %vm934_vm11, %v931_v13, %v932_v27 }
 0x296   :  { %v973_v59 = vmul.f32 %v961_v60, %v116_v4  ;;  %v949_v14 = vmul.f32 %v936_v36, %v109_v47 }
 0x297   :  { %v916_v25 = vadd.f32 %v906_v33, %v837_v51 }
 0x298   :  { %6991 = vmatmul.msk.f32.gmra.mxu1 %vm134_vm0, %v973_v59  ;;  %v8819_v59 = vperm.slane %v8302_v41, 2 }
 0x299   :  { %v925_v12 = vadd.f32 %v8645_v2, %v916_v25 }
 0x29a   :  { %11668 = vst [vmem:[#allocation5_spill] sm:$0xff] %v8819_v59 }
 0x29b   :  { %v933_v24 = vrot.slane %v925_v12, 6  ;;  %v958_v9 = vrot.slane %v925_v12, 2  ;;  %6973 = vmatmul.msk.f32.gmra.mxu3 %vm134_vm0, %v925_v12 }
 0x29d   :  { %v942_v17 = vsel %vm934_vm11, %v933_v24, %v926_v22  ;;  %v960_v18 = vsel %vm959_vm10, %v957_v56, %v958_v9  ;;  %v967_v45 = vsel %vm959_vm10, %v958_v9, %v951_v53  ;;  %v940_v53 = vsel %vm934_vm11, %v927_v40, %v928_v61 }
 0x29e   :  { %v943_v19 = vmul.f32 %v942_v17, %v103_v0  ;;  %v974_v34 = vmul.f32 %v960_v18, %v117_v46  ;;  %v975_v1 = vmul.f32 %v967_v45, %v118_v6  ;;  %v935_v56 = vsel %vm934_vm11, %v932_v27, %v933_v24 }
 0x29f   :  { %v950_v54 = vmul.f32 %v935_v56, %v110_v31 }
 0x2a0   :  { %6974 = vmatmul.msk.f32.vlgmr.msra.gmra.mxu0 %vm134_vm0, %v943_v19  ;;  %6992 = vmatmul.msk.f32.gmra.mxu1 %vm134_vm0, %v974_v34 }
 0x2a1   :  { %2137 = vmatpush.msra.mxu0 %v8585_v21  ;;  %v944_v21 = vmul.f32 %v941_v49, %v104_v37 }
 0x2a3   :  { %2138 = vmatpush.msra.mxu0 %v8591_v63  ;;  %v945_v63 = vmul.f32 %v940_v53, %v105_v23 }
 0x2a5   :  { %2139 = vmatpush.msra.mxu0 %v8597_v7  ;;  %v929_v7 = vrot.slane %v8695_v5, 6 }
 0x2a7   :  { %2140 = vmatpush.msra.mxu0 %v8605_v8  ;;  %v106_v8 = vld [vmem:[%s11612_s13 + $0x18] sm:$0xff]  ;;  %v939_v3 = vsel %vm934_vm11, %v928_v61, %v929_v7  ;;  %v938_v5 = vsel %vm934_vm11, %v929_v7, %v930_v43 }
 0x2a8   :  { %6975 = vmatmul.msk.f32.gmra.mxu0 %vm134_vm0, %v944_v21  ;;  %6993 = vmatmul.msk.f32.gmra.mxu1 %vm134_vm0, %v975_v1  ;;  %v946_v26 = vmul.f32 %v939_v3, %v106_v8  ;;  %v947_v62 = vmul.f32 %v938_v5, %v107_v50 }
 0x2b0   :  { %6976 = vmatmul.msk.f32.gmra.mxu0 %vm134_vm0, %v945_v63 }
 0x2b8   :  { %6977 = vmatmul.msk.f32.gmra.mxu0 %vm134_vm0, %v946_v26 }
 0x2c0   :  { %6978 = vmatmul.msk.f32.gmra.mxu0 %vm134_vm0, %v947_v62 }
 0x2c8   :  { %6979 = vmatmul.msk.f32.gmra.mxu0 %vm134_vm0, %v948_v52 }
 0x2d0   :  { %6980 = vmatmul.msk.f32.gmra.mxu0 %vm134_vm0, %v949_v14 }
 0x2d8   :  { %6981 = vmatmul.msk.f32.gmra.mxu0 %vm134_vm0, %v950_v54 }
 0x2e6   :  { %v1027_v4 = vpop.f32.mrf.mxu3 }
 0x2ed   :  { %v1162_v42 = vpop.f32.mrf.mxu1 }
 0x2ee   :  { %v1030_v39 = vpop.f32.mrf.mxu3 }
 0x2f5   :  { %v1165_v51 = vpop.f32.mrf.mxu1 }
 0x2f6   :  { %v1033_v22 = vpop.f32.mrf.mxu3 }
 0x2fd   :  { %v1168_v24 = vpop.f32.mrf.mxu1 }
 0x2fe   :  { %v1036_v34 = vpop.f32.mrf.mxu3 }
 0x305   :  { %v1171_v6 = vpop.f32.mrf.mxu1 }
 0x306   :  { %v1039_v63 = vpop.f32.mrf.mxu3 }
 0x30d   :  { %v1174_v8 = vpop.f32.mrf.mxu1 }
 0x30e   :  { %v1042_v5 = vpop.f32.mrf.mxu3 }
 0x315   :  { %v1177_v62 = vpop.f32.mrf.mxu1 }
 0x316   :  { %v1045_v27 = vpop.f32.mrf.mxu3 }
 0x31d   :  { %v1092_v60 = vpop.f32.mrf.mxu0  ;;  %v1180_v36 = vpop.f32.mrf.mxu1 }
 0x31e   :  { %v1093_v33 = vadd.f32 %v1092_v60, %v1027_v4 }
 0x320   :  { %v1186_v25 = vadd.f32 %v1162_v42, %v1093_v33 }
 0x322   :  { %v8822_v12 = vadd.f32 %v8819_v59, %v1186_v25 }
 0x324   :  { %v1203_v9 = vmax.f32 %v8822_v12, 0.0 }
 0x325   :  { %v1095_v0 = vpop.f32.mrf.mxu0 }
 0x326   :  { %v1096_v46 = vadd.f32 %v1095_v0, %v1030_v39  ;;  %v1211_v17 = vsel %vm134_vm0, %v1203_v9, 0.0  ;;  %v1048_v39 = vpop.f32.mrf.mxu3 }
 0x327   :  { %1212 = vadd.xlane.f32.xlu2 %v1211_v17 }
 0x328   :  { %v1187_v18 = vadd.f32 %v1165_v51, %v1096_v46 }
 0x32a   :  { %v8829_v19 = vadd.f32 %v8819_v59, %v1187_v18 }
 0x32c   :  { %v1204_v41 = vmax.f32 %v8829_v19, 0.0 }
 0x32d   :  { %v1098_v40 = vpop.f32.mrf.mxu0 }
 0x32e   :  { %v1099_v37 = vadd.f32 %v1098_v40, %v1033_v22  ;;  %v1214_v49 = vsel %vm134_vm0, %v1204_v41, 0.0  ;;  %v1183_v22 = vpop.f32.mrf.mxu1 }
 0x32f   :  { %1215 = vadd.xlane.f32.xlu1 %v1214_v49 }
 0x330   :  { %v1188_v45 = vadd.f32 %v1168_v24, %v1099_v37 }
 0x332   :  { %v8836_v21 = vadd.f32 %v8819_v59, %v1188_v45 }
 0x334   :  { %v1205_v1 = vmax.f32 %v8836_v21, 0.0 }
 0x335   :  { %v1101_v61 = vpop.f32.mrf.mxu0 }
 0x336   :  { %v1102_v23 = vadd.f32 %v1101_v61, %v1036_v34  ;;  %v1217_v53 = vsel %vm134_vm0, %v1205_v1, 0.0 }
 0x337   :  { %1218 = vadd.xlane.f32.xlu2 %v1217_v53 }
 0x338   :  { %v1189_v7 = vadd.f32 %v1171_v6, %v1102_v23 }
 0x33a   :  { %v1198_v3 = vadd.f32 %v8819_v59, %v1189_v7 }
 0x33c   :  { %v1206_v26 = vmax.f32 %v1198_v3, 0.0 }
 0x33d   :  { %v1104_v43 = vpop.f32.mrf.mxu0 }
 0x33e   :  { %v1220_v50 = vsel %vm134_vm0, %v1206_v26, 0.0  ;;  %v1105_v60 = vadd.f32 %v1104_v43, %v1039_v63 }
 0x33f   :  { %1221 = vadd.xlane.f32.xlu2 %v1220_v50 }
 0x340   :  { %v1190_v0 = vadd.f32 %v1174_v8, %v1105_v60 }
 0x342   :  { %v1199_v34 = vadd.f32 %v8819_v59, %v1190_v0 }
 0x344   :  { %v1207_v40 = vmax.f32 %v1199_v34, 0.0 }
 0x345   :  { %v1107_v13 = vpop.f32.mrf.mxu0 }
 0x346   :  { %v1108_v48 = vadd.f32 %v1107_v13, %v1042_v5  ;;  %v1223_v37 = vsel %vm134_vm0, %v1207_v40, 0.0 }
 0x348   :  { %v1191_v29 = vadd.f32 %v1177_v62, %v1108_v48 }
 0x34a   :  { %v8845_v52 = vadd.f32 %v8819_v59, %v1191_v29 }
 0x34c   :  { %v1208_v47 = vmax.f32 %v8845_v52, 0.0 }
 0x34d   :  { %v1110_v14 = vpop.f32.mrf.mxu0 }
 0x34e   :  { %v1111_v31 = vadd.f32 %v1110_v14, %v1045_v27  ;;  %v1226_v56 = vsel %vm134_vm0, %v1208_v47, 0.0 }
 0x34f   :  { %1227 = vadd.xlane.f32.xlu1 %v1226_v56 }
 0x350   :  { %v1192_v54 = vadd.f32 %v1180_v36, %v1111_v31 }
 0x352   :  { %v1201_v4 = vadd.f32 %v8819_v59, %v1192_v54 }
 0x354   :  { %v1209_v42 = vmax.f32 %v1201_v4, 0.0 }
 0x355   :  { %v1113_v51 = vpop.f32.mrf.mxu0 }
 0x356   :  { %v1114_v33 = vadd.f32 %v1113_v51, %v1048_v39  ;;  %v1229_v25 = vsel %vm134_vm0, %v1209_v42, 0.0 }
 0x357   :  { %1230 = vadd.xlane.f32.xlu1 %v1229_v25 }
 0x358   :  { %v1193_v24 = vadd.f32 %v1183_v22, %v1114_v33 }
 0x35a   :  { %v1202_v46 = vadd.f32 %v8819_v59, %v1193_v24 }
 0x35c   :  { %v1210_v17 = vmax.f32 %v1202_v46, 0.0 }
 0x35e   :  { %v1232_v18 = vsel %vm134_vm0, %v1210_v17, 0.0 }
 0x35f   :  { %1233 = vadd.xlane.f32.xlu0 %v1232_v18 }
 0x367   :  { %1224 = vadd.xlane.f32.xlu0 %v1223_v37 }
 0x39a   :  { %v1213_v49 = vpop.xlane.xlu2 %1212 }
 0x39b   :  { %v1235_v6 = vmul.f32 %v1213_v49, %v8315_v11 }
 0x39d   :  { %v8860_v45 = vsub.f32 %v1203_v9, %v1235_v6 }
 0x39f   :  { %v1251_v61 = vmul.f32 %v8860_v45, %v8860_v45 }
 0x3a1   :  { %v1259_v23 = vsel %vm134_vm0, %v1251_v61, 0.0 }
 0x3a2   :  { %v1216_v53 = vpop.xlane.xlu1 %1215  ;;  %1260 = vadd.xlane.f32.xlu2 %v1259_v23 }
 0x3a3   :  { %v1236_v63 = vmul.f32 %v1216_v53, %v8315_v11 }
 0x3a5   :  { %v8868_v7 = vsub.f32 %v1204_v41, %v1236_v63 }
 0x3a7   :  { %v1252_v8 = vmul.f32 %v8868_v7, %v8868_v7 }
 0x3a9   :  { %v1262_v12 = vsel %vm134_vm0, %v1252_v8, 0.0  ;;  %v8918_v8 = vld [vmem:[%s11669_s2] ss:$0 sm:$0xff] }
 0x3aa   :  { %1263 = vadd.xlane.f32.xlu2 %v1262_v12  ;;  %v1219_v9 = vpop.xlane.xlu2 %1218 }
 0x3ab   :  { %v1237_v14 = vmul.f32 %v1219_v9, %v8315_v11 }
 0x3ad   :  { %v8893_v54 = vsub.f32 %v1205_v1, %v1237_v14 }
 0x3af   :  { %v1253_v33 = vmul.f32 %v8893_v54, %v8893_v54 }
 0x3b1   :  { %v1265_v22 = vsel %vm134_vm0, %v1253_v33, 0.0 }
 0x3b2   :  { %v1222_v3 = vpop.xlane.xlu2 %1221 }
 0x3b3   :  { %v1238_v43 = vmul.f32 %v1222_v3, %v8315_v11 }
 0x3b5   :  { %v8874_v50 = vsub.f32 %v1206_v26, %v1238_v43  ;;  %v8924_v43 = vld [vmem:[%s11607_s8] ss:$0 sm:$0xff] }
 0x3b7   :  { %v1254_v5 = vmul.f32 %v8874_v50, %v8874_v50 }
 0x3b9   :  { %v1268_v62 = vsel %vm134_vm0, %v1254_v5, 0.0 }
 0x3ba   :  { %1269 = vadd.xlane.f32.xlu1 %v1268_v62 }
 0x3c2   :  { %v1228_v19 = vpop.xlane.xlu1 %1227 }
 0x3c3   :  { %v1240_v51 = vmul.f32 %v1228_v19, %v8315_v11 }
 0x3c5   :  { %v8906_v21 = vsub.f32 %v1208_v47, %v1240_v51 }
 0x3c7   :  { %v1256_v24 = vmul.f32 %v8906_v21, %v8906_v21 }
 0x3c9   :  { %v1274_v0 = vsel %vm134_vm0, %v1256_v24, 0.0 }
 0x3ca   :  { %v1231_v41 = vpop.xlane.xlu1 %1230 }
 0x3cb   :  { %v1241_v13 = vmul.f32 %v1231_v41, %v8315_v11 }
 0x3cd   :  { %v8880_v48 = vsub.f32 %v1209_v42, %v1241_v13 }
 0x3cf   :  { %v1257_v29 = vmul.f32 %v8880_v48, %v8880_v48 }
 0x3d1   :  { %v1277_v27 = vsel %vm134_vm0, %v1257_v29, 0.0 }
 0x3d2   :  { %v1234_v36 = vpop.xlane.xlu0 %1233  ;;  %1278 = vadd.xlane.f32.xlu1 %v1277_v27 }
 0x3d3   :  { %v1242_v26 = vmul.f32 %v1234_v36, %v8315_v11 }
 0x3d5   :  { %v8887_v31 = vsub.f32 %v1210_v17, %v1242_v26 }
 0x3d7   :  { %v1258_v56 = vmul.f32 %v8887_v31, %v8887_v31 }
 0x3d9   :  { %v1280_v4 = vsel %vm134_vm0, %v1258_v56, 0.0  ;;  %v7608_v56 = vld [vmem:[%s11656_s1 + $0x10] sm:$0xff] }
 0x3da   :  { %1281 = vadd.xlane.f32.xlu0 %v1280_v4  ;;  %v1225_v42 = vpop.xlane.xlu0 %1224 }
 0x3db   :  { %v1239_v39 = vmul.f32 %v1225_v42, %v8315_v11  ;;  %v7609_v42 = vld [vmem:[%s11656_s1 + $0x8] sm:$0xff] }
 0x3dd   :  { %v8898_v60 = vsub.f32 %v1207_v40, %v1239_v39  ;;  %v7610_v39 = vld [vmem:[%s11656_s1] sm:$0xff] }
 0x3df   :  { %v1255_v25 = vmul.f32 %v8898_v60, %v8898_v60 }
 0x3e1   :  { %v1271_v1 = vsel %vm134_vm0, %v1255_v25, 0.0 }
 0x3e2   :  { %1272 = vadd.xlane.f32.xlu2 %v1271_v1  ;;  %1266 = vadd.xlane.f32.xlu0 %v1265_v22 }
 0x3ea   :  { %1275 = vadd.xlane.f32.xlu0 %v1274_v0 }
 0x415   :  { %v1261_v46 = vpop.xlane.xlu2 %1260 }
 0x416   :  { %v1283_v17 = vmul.f32 %v1261_v46, %v8315_v11 }
 0x418   :  { %v1291_v18 = vadd.f32 1e-05, %v1283_v17 }
 0x41a   :  { %7326 = vrsqrt.f32 %v1291_v18  ;;  %vm1305_vm13 = vweird.f32 %v1291_v18 }
 0x41d   :  { %v1264_v52 = vpop.xlane.xlu2 %1263 }
 0x41e   :  { %v1284_v47 = vmul.f32 %v1264_v52, %v8315_v11 }
 0x420   :  { %v7327_v34 = vpop.eup %7326  ;;  %v1292_v40 = vadd.f32 1e-05, %v1284_v47 }
 0x421   :  { %v1300_v37 = vmul.f32 %v7327_v34, %v1291_v18  ;;  %vm1306_vm12 = vweird.f32 %v7327_v34 }
 0x422   :  { %7328 = vrsqrt.f32 %v1292_v40  ;;  %vm1307_vm14 = vmor %vm1305_vm13, %vm1306_vm12  ;;  %vm1315_vm3 = vweird.f32 %v1292_v40 }
 0x423   :  { %v1301_v49 = vmul.f32 %v7327_v34, %v1300_v37 }
 0x425   :  { %v1302_v6 = vmul.f32 0.5, %v1301_v49 }
 0x427   :  { %v1303_v61 = vsub.f32 1.5, %v1302_v6 }
 0x428   :  { %v7329_v23 = vpop.eup %7328 }
 0x429   :  { %v1304_v53 = vmul.f32 %v7327_v34, %v1303_v61  ;;  %v1310_v63 = vmul.f32 %v7329_v23, %v1292_v40  ;;  %vm1316_vm15 = vweird.f32 %v7329_v23 }
 0x42a   :  { %vm1317_vm4 = vmor %vm1315_vm3, %vm1316_vm15 }
 0x42b   :  { %v1308_v12 = vsel %vm1307_vm14, %v7327_v34, %v1304_v53  ;;  %v1311_v9 = vmul.f32 %v7329_v23, %v1310_v63 }
 0x42c   :  { %v1379_v3 = vmul.f32 %v1308_v12, %v8860_v45 }
 0x42d   :  { %v1312_v5 = vmul.f32 0.5, %v1311_v9 }
 0x42e   :  { %v1390_v62 = vmul.f32 %v8918_v8, %v1379_v3 }
 0x42f   :  { %v1313_v19 = vsub.f32 1.5, %v1312_v5 }
 0x430   :  { %v8928_v41 = vadd.f32 %v8924_v43, %v1390_v62 }
 0x431   :  { %v1314_v13 = vmul.f32 %v7329_v23, %v1313_v19 }
 0x432   :  { %6994 = vmatmul.msk.f32.vlgmr.msra.gmra.mxu2 %vm134_vm0, %v8928_v41  ;;  %v1433_v26 = vrot.slane %v8928_v41, 1 }
 0x433   :  { %v1318_v45 = vsel %vm1317_vm4, %v7329_v23, %v1314_v13  ;;  %2267 = vmatpush.msra.mxu2 %v8611_v35 }
 0x434   :  { %v1380_v29 = vmul.f32 %v1318_v45, %v8868_v7  ;;  %v1270_v7 = vpop.xlane.xlu1 %1269 }
 0x435   :  { %2268 = vmatpush.msra.mxu2 %v8620_v58  ;;  %v8954_v58 = vld [vmem:[%s11611_s12] sm:$0xff]  ;;  %v1286_v4 = vmul.f32 %v1270_v7, %v8315_v11 }
 0x436   :  { %v1391_v27 = vmul.f32 %v8918_v8, %v1380_v29 }
 0x437   :  { %2269 = vmatpush.msra.mxu2 %v8628_v32  ;;  %v1294_v51 = vadd.f32 1e-05, %v1286_v4 }
 0x438   :  { %v8938_v36 = vadd.f32 %v8924_v43, %v1391_v27 }
 0x439   :  { %2270 = vmatpush.msra.mxu2 %v8634_v16  ;;  %v7607_v16 = vld [vmem:[%s11656_s1 + $0x18] sm:$0xff]  ;;  %7330 = vrsqrt.f32 %v1294_v51  ;;  %vm1335_vm9 = vweird.f32 %v1294_v51 }
 0x43a   :  { %v1434_v14 = vrot.slane %v8938_v36, 1  ;;  %6995 = vmatmul.msk.f32.gmra.mxu2 %vm134_vm0, %v8938_v36 }
 0x43c   :  { %v1447_v35 = vsel %vm235_vm2, %v1433_v26, %v1434_v14 }
 0x43d   :  { %v1449_v32 = vmul.f32 %v8954_v58, %v1447_v35 }
 0x43f   :  { %7010 = vmatmul.msk.f32.vlgmr.msrb.gmra.mxu0 %vm134_vm0, %v1449_v32  ;;  %v8972_v22 = vpop.eup %7330 }
 0x440   :  { %2461 = vmatpush.msrb.mxu0 %v7607_v16  ;;  %v1330_v24 = vmul.f32 %v8972_v22, %v1294_v51  ;;  %vm1336_vm8 = vweird.f32 %v8972_v22 }
 0x441   :  { %vm8996_vm13 = vmor %vm1335_vm9, %vm1336_vm8 }
 0x442   :  { %2462 = vmatpush.msrb.mxu0 %v7608_v56  ;;  %v1331_v40 = vmul.f32 %v8972_v22, %v1330_v24 }
 0x444   :  { %2463 = vmatpush.msrb.mxu0 %v7609_v42  ;;  %v1332_v23 = vmul.f32 0.5, %v1331_v40 }
 0x445   :  { %v1279_v37 = vpop.xlane.xlu1 %1278 }
 0x446   :  { %2464 = vmatpush.msrb.mxu0 %v7610_v39  ;;  %v1289_v61 = vmul.f32 %v1279_v37, %v8315_v11  ;;  %v1333_v13 = vsub.f32 1.5, %v1332_v23 }
 0x448   :  { %v8983_v5 = vadd.f32 1e-05, %v1289_v61  ;;  %v1334_v56 = vmul.f32 %v8972_v22, %v1333_v13  ;;  %v7612_v13 = vld [vmem:[%s11656_s1 + $0x38] sm:$0xff] }
 0x44d   :  { %v1282_v33 = vpop.xlane.xlu0 %1281 }
 0x44e   :  { %v1290_v25 = vmul.f32 %v1282_v33, %v8315_v11 }
 0x450   :  { %v1298_v1 = vadd.f32 1e-05, %v1290_v25 }
 0x452   :  { %7332 = vrsqrt.f32 %v1298_v1  ;;  %vm1375_vm6 = vweird.f32 %v1298_v1 }
 0x455   :  { %v1267_v0 = vpop.xlane.xlu0 %1266  ;;  %v1273_v46 = vpop.xlane.xlu2 %1272 }
 0x456   :  { %v1285_v17 = vmul.f32 %v1267_v0, %v8315_v11  ;;  %v1287_v18 = vmul.f32 %v1273_v46, %v8315_v11  ;;  %v1338_v0 = vsel %vm8996_vm13, %v8972_v22, %v1334_v56 }
 0x458   :  { %v7333_v52 = vpop.eup %7332  ;;  %v1293_v47 = vadd.f32 1e-05, %v1285_v17  ;;  %v8977_v34 = vadd.f32 1e-05, %v1287_v18  ;;  %v1409_v18 = vrot.slane %v8928_v41, 7 }
 0x459   :  { %v1370_v49 = vmul.f32 %v7333_v52, %v1298_v1  ;;  %vm1376_vm5 = vweird.f32 %v7333_v52 }
 0x45a   :  { %7334 = vrsqrt.f32 %v1293_v47  ;;  %vm1377_vm7 = vmor %vm1375_vm6, %vm1376_vm5  ;;  %vm1325_vm14 = vweird.f32 %v1293_v47  ;;  %vm1345_vm4 = vweird.f32 %v8977_v34 }
 0x45b   :  { %v1371_v6 = vmul.f32 %v7333_v52, %v1370_v49  ;;  %7336 = vrsqrt.f32 %v8977_v34 }
 0x45d   :  { %v1372_v53 = vmul.f32 0.5, %v1371_v6  ;;  %v1276_v63 = vpop.xlane.xlu0 %1275  ;;  %v1382_v6 = vmul.f32 %v1338_v0, %v8874_v50 }
 0x45e   :  { %v1288_v12 = vmul.f32 %v1276_v63, %v8315_v11 }
 0x45f   :  { %v1373_v9 = vsub.f32 1.5, %v1372_v53  ;;  %v9025_v53 = vld [vmem:[%s11610_s11] sm:$0xff] }
 0x460   :  { %v7335_v3 = vpop.eup %7334  ;;  %v8985_v62 = vadd.f32 1e-05, %v1288_v12  ;;  %v1410_v12 = vrot.slane %v8938_v36, 7 }
 0x461   :  { %v7337_v19 = vpop.eup %7336  ;;  %v1374_v45 = vmul.f32 %v7333_v52, %v1373_v9  ;;  %v1320_v29 = vmul.f32 %v7335_v3, %v1293_v47  ;;  %vm1326_vm12 = vweird.f32 %v7335_v3 }
 0x462   :  { %v1340_v27 = vmul.f32 %v7337_v19, %v8977_v34  ;;  %7338 = vrsqrt.f32 %v8985_v62  ;;  %vm1327_vm15 = vmor %vm1325_vm14, %vm1326_vm12  ;;  %vm1346_vm3 = vweird.f32 %v7337_v19  ;;  %v1393_v34 = vmul.f32 %v8918_v8, %v1382_v6 }
 0x463   :  { %v1378_v35 = vsel %vm1377_vm7, %v7333_v52, %v1374_v45  ;;  %v1321_v32 = vmul.f32 %v7335_v3, %v1320_v29  ;;  %7340 = vrsqrt.f32 %v8983_v5  ;;  %vm1347_vm5 = vmor %vm1345_vm4, %vm1346_vm3  ;;  %vm1355_vm7 = vweird.f32 %v8985_v62 }
 0x464   :  { %v1386_v16 = vmul.f32 %v1378_v35, %v8887_v31  ;;  %v1341_v7 = vmul.f32 %v7337_v19, %v1340_v27  ;;  %v7613_v35 = vld [vmem:[%s11656_s1 + $0x30] sm:$0xff]  ;;  %vm1365_vm12 = vweird.f32 %v8983_v5 }
 0x465   :  { %v1322_v4 = vmul.f32 0.5, %v1321_v32 }
 0x466   :  { %v1397_v42 = vmul.f32 %v8918_v8, %v1386_v16  ;;  %v1342_v39 = vmul.f32 0.5, %v1341_v7  ;;  %v1404_v7 = vadd.f32 %v8924_v43, %v1393_v34 }
 0x467   :  { %v1323_v33 = vsub.f32 1.5, %v1322_v4  ;;  %v9058_v4 = vld [vmem:[%s11610_s11 + $0x8] sm:$0xff] }
 0x468   :  { %v8994_v25 = vpop.eup %7338  ;;  %v9001_v31 = vadd.f32 %v8924_v43, %v1397_v42  ;;  %v1343_v24 = vsub.f32 1.5, %v1342_v39 }
 0x469   :  { %v1324_v46 = vmul.f32 %v7335_v3, %v1323_v33  ;;  %v1350_v51 = vmul.f32 %v8994_v25, %v8985_v62  ;;  %v9008_v17 = vpop.eup %7340  ;;  %vm1356_vm6 = vweird.f32 %v8994_v25  ;;  %v7617_v62 = vld [vmem:[%s11656_s1 + $0x20] sm:$0xff] }
 0x46a   :  { %v1416_v52 = vrot.slane %v9001_v31, 7  ;;  %v1344_v37 = vmul.f32 %v7337_v19, %v1343_v24  ;;  %v1360_v61 = vmul.f32 %v9008_v17, %v8983_v5  ;;  %vm1357_vm8 = vmor %vm1355_vm7, %vm1356_vm6  ;;  %v1436_v24 = vrot.slane %v1404_v7, 1 }
 0x46b   :  { %v1328_v40 = vsel %vm1327_vm15, %v7335_v3, %v1324_v46  ;;  %v1351_v49 = vmul.f32 %v8994_v25, %v1350_v51  ;;  %vm1366_vm9 = vweird.f32 %v9008_v17 }
 0x46c   :  { %v1424_v22 = vsel %vm210_vm1, %v1416_v52, %v1409_v18  ;;  %v1381_v47 = vmul.f32 %v1328_v40, %v8893_v54  ;;  %v1348_v9 = vsel %vm1347_vm5, %v7337_v19, %v1344_v37  ;;  %v1361_v45 = vmul.f32 %v9008_v17, %v1360_v61  ;;  %v9086_v37 = vld [vmem:[%s11610_s11 + $0x10] sm:$0xff]  ;;  %vm1367_vm13 = vmor %vm1365_vm12, %vm1366_vm9 }
 0x46d   :  { %v1352_v23 = vmul.f32 0.5, %v1351_v49  ;;  %v1425_v63 = vmul.f32 %v9025_v53, %v1424_v22  ;;  %v1423_v19 = vsel %vm210_vm1, %v1409_v18, %v1410_v12  ;;  %v1383_v27 = vmul.f32 %v1348_v9, %v8898_v60  ;;  %v7614_v60 = vld [vmem:[%s11656_s1 + $0x28] sm:$0xff]  ;;  %v9092_v22 = vld [vmem:[%s11611_s12 + $0x10] sm:$0xff]  ;;  %v9110_v9 = vld [vmem:[%s11610_s11 + $0x18] sm:$0xff] }
 0x46e   :  { %v1392_v54 = vmul.f32 %v8918_v8, %v1381_v47  ;;  %v1362_v56 = vmul.f32 0.5, %v1361_v45  ;;  %v1426_v36 = vmul.f32 %v9058_v4, %v1423_v19  ;;  %v1412_v61 = vrot.slane %v1404_v7, 7 }
 0x46f   :  { %v1353_v50 = vsub.f32 1.5, %v1352_v23  ;;  %7002 = vmatmul.msk.f32.vlgmr.msrb.gmra.mxu3 %vm134_vm0, %v1425_v63  ;;  %v1394_v33 = vmul.f32 %v8918_v8, %v1383_v27  ;;  %v9131_v27 = vld [vmem:[%s11610_s11 + $0x20] sm:$0xff] }
 0x470   :  { %v1403_v3 = vadd.f32 %v8924_v43, %v1392_v54  ;;  %2396 = vmatpush.msrb.mxu3 %v7612_v13  ;;  %v1363_v0 = vsub.f32 1.5, %v1362_v56  ;;  %v9150_v56 = vld [vmem:[%s11610_s11 + $0x28] sm:$0xff] }
 0x471   :  { %v1354_v32 = vmul.f32 %v8994_v25, %v1353_v50  ;;  %v1405_v18 = vadd.f32 %v8924_v43, %v1394_v33  ;;  %v1440_v33 = vrot.slane %v9001_v31, 1 }
 0x472   :  { %v1435_v29 = vrot.slane %v1403_v3, 1  ;;  %6996 = vmatmul.msk.f32.gmra.mxu2 %vm134_vm0, %v1403_v3  ;;  %2397 = vmatpush.msrb.mxu3 %v7613_v35  ;;  %v1411_v39 = vrot.slane %v1403_v3, 7 }
 0x473   :  { %v1358_v1 = vsel %vm1357_vm8, %v8994_v25, %v1354_v32  ;;  %v1364_v25 = vmul.f32 %v9008_v17, %v1363_v0  ;;  %v1437_v6 = vrot.slane %v1405_v18, 1  ;;  %v1413_v34 = vrot.slane %v1405_v18, 7  ;;  %v9171_v0 = vld [vmem:[%s11610_s11 + $0x30] sm:$0xff] }
 0x474   :  { %v1446_v16 = vsel %vm235_vm2, %v1434_v14, %v1435_v29  ;;  %2398 = vmatpush.msrb.mxu3 %v7614_v60  ;;  %v9064_v14 = vld [vmem:[%s11611_s12 + $0x8] sm:$0xff]  ;;  %v1422_v46 = vsel %vm210_vm1, %v1410_v12, %v1411_v39  ;;  %v1445_v51 = vsel %vm235_vm2, %v1435_v29, %v1436_v24  ;;  %v1384_v40 = vmul.f32 %v1358_v1, %v8906_v21 }
 0x475   :  { %v1450_v42 = vmul.f32 %v9064_v14, %v1446_v16  ;;  %v1427_v49 = vmul.f32 %v9086_v37, %v1422_v46  ;;  %v1451_v47 = vmul.f32 %v9092_v22, %v1445_v51  ;;  %v1368_v23 = vsel %vm1367_vm13, %v9008_v17, %v1364_v25  ;;  %v9116_v17 = vld [vmem:[%s11611_s12 + $0x18] sm:$0xff]  ;;  %v9177_v51 = vld [vmem:[%s11611_s12 + $0x30] sm:$0xff] }
 0x476   :  { %2399 = vmatpush.msrb.mxu3 %v7617_v62  ;;  %v1395_v21 = vmul.f32 %v8918_v8, %v1384_v40  ;;  %v1421_v63 = vsel %vm210_vm1, %v1411_v39, %v1412_v61  ;;  %v1444_v12 = vsel %vm235_vm2, %v1436_v24, %v1437_v6  ;;  %v1385_v5 = vmul.f32 %v1368_v23, %v8880_v48 }
 0x477   :  { %7003 = vmatmul.msk.f32.gmra.mxu3 %vm134_vm0, %v1426_v36  ;;  %7011 = vmatmul.msk.f32.gmra.mxu0 %vm134_vm0, %v1450_v42  ;;  %v1428_v50 = vmul.f32 %v9110_v9, %v1421_v63  ;;  %v1452_v3 = vmul.f32 %v9116_v17, %v1444_v12  ;;  %v1420_v45 = vsel %vm210_vm1, %v1412_v61, %v1413_v34  ;;  %v9156_v42 = vld [vmem:[%s11611_s12 + $0x28] sm:$0xff] }
 0x478   :  { %v1406_v54 = vadd.f32 %v8924_v43, %v1395_v21  ;;  %v1396_v48 = vmul.f32 %v8918_v8, %v1385_v5  ;;  %v1429_v35 = vmul.f32 %v9131_v27, %v1420_v45  ;;  %v9137_v8 = vld [vmem:[%s11611_s12 + $0x20] sm:$0xff]  ;;  %v1448_v25 = vsel %vm235_vm2, %v1440_v33, %v1433_v26 }
 0x47a   :  { %6997 = vmatmul.msk.f32.gmra.mxu2 %vm134_vm0, %v1404_v7  ;;  %v1438_v13 = vrot.slane %v1406_v54, 1  ;;  %v1407_v19 = vadd.f32 %v8924_v43, %v1396_v48  ;;  %v1414_v16 = vrot.slane %v1406_v54, 7 }
 0x47c   :  { %v1443_v29 = vsel %vm235_vm2, %v1437_v6, %v1438_v13  ;;  %v1439_v43 = vrot.slane %v1407_v19, 1  ;;  %v1419_v7 = vsel %vm210_vm1, %v1413_v34, %v1414_v16  ;;  %v1415_v62 = vrot.slane %v1407_v19, 7  ;;  %v9199_v6 = vld [vmem:[%s11611_s12 + $0x38] sm:$0xff] }
 0x47d   :  { %v1453_v32 = vmul.f32 %v9137_v8, %v1443_v29  ;;  %v1430_v36 = vmul.f32 %v9150_v56, %v1419_v7  ;;  %v11672_v29 = vld [vmem:[#allocation8_spill] sm:$0xff] }
 0x47e   :  { %v1442_v60 = vsel %vm235_vm2, %v1438_v13, %v1439_v43  ;;  %v1418_v1 = vsel %vm210_vm1, %v1414_v16, %v1415_v62  ;;  %v1441_v24 = vsel %vm235_vm2, %v1439_v43, %v1440_v33  ;;  %v1417_v40 = vsel %vm210_vm1, %v1415_v62, %v1416_v52 }
 0x47f   :  { %7004 = vmatmul.msk.f32.gmra.mxu3 %vm134_vm0, %v1427_v49  ;;  %7012 = vmatmul.msk.f32.gmra.mxu0 %vm134_vm0, %v1451_v47  ;;  %v1454_v39 = vmul.f32 %v9156_v42, %v1442_v60  ;;  %v1431_v46 = vmul.f32 %v9171_v0, %v1418_v1  ;;  %v9193_v49 = vld [vmem:[%s11610_s11 + $0x38] sm:$0xff] }
 0x480   :  { %v1432_v47 = vmul.f32 %v9193_v49, %v1417_v40 }
 0x482   :  { %6998 = vmatmul.msk.f32.gmra.mxu2 %vm134_vm0, %v1405_v18  ;;  %v1455_v18 = vmul.f32 %v9177_v51, %v1441_v24 }
 0x487   :  { %7005 = vmatmul.msk.f32.gmra.mxu3 %vm134_vm0, %v1428_v50  ;;  %7013 = vmatmul.msk.f32.gmra.mxu0 %vm134_vm0, %v1452_v3 }
 0x48a   :  { %6999 = vmatmul.msk.f32.gmra.mxu2 %vm134_vm0, %v1406_v54 }
 0x48f   :  { %7006 = vmatmul.msk.f32.gmra.mxu3 %vm134_vm0, %v1429_v35  ;;  %7014 = vmatmul.msk.f32.gmra.mxu0 %vm134_vm0, %v1453_v32 }
 0x492   :  { %7000 = vmatmul.msk.f32.gmra.mxu2 %vm134_vm0, %v1407_v19 }
 0x497   :  { %7007 = vmatmul.msk.f32.gmra.mxu3 %vm134_vm0, %v1430_v36  ;;  %7015 = vmatmul.msk.f32.gmra.mxu0 %vm134_vm0, %v1454_v39 }
 0x49a   :  { %7001 = vmatmul.msk.f32.gmra.mxu2 %vm134_vm0, %v9001_v31  ;;  %v1456_v31 = vmul.f32 %v9199_v6, %v1448_v25 }
 0x49f   :  { %7008 = vmatmul.msk.f32.gmra.mxu3 %vm134_vm0, %v1431_v46  ;;  %7016 = vmatmul.msk.f32.gmra.mxu0 %vm134_vm0, %v1455_v18 }
 0x4a7   :  { %7009 = vmatmul.msk.f32.gmra.mxu3 %vm134_vm0, %v1432_v47  ;;  %7017 = vmatmul.msk.f32.gmra.mxu0 %vm134_vm0, %v1456_v31 }
 0x4b5   :  { %v1498_v41 = vpop.f32.mrf.mxu2 }
 0x4bc   :  { %v1628_v26 = vpop.f32.mrf.mxu0 }
 0x4bd   :  { %v1501_v52 = vpop.f32.mrf.mxu2 }
 0x4f2   :  { %v1563_v21 = vpop.f32.mrf.mxu3 }
 0x4f3   :  { %v1564_v5 = vadd.f32 %v1563_v21, %v1498_v41 }
 0x4f4   :  { %v1631_v61 = vpop.f32.mrf.mxu0 }
 0x4f5   :  { %v1504_v23 = vpop.f32.mrf.mxu2  ;;  %v1652_v13 = vadd.f32 %v1628_v26, %v1564_v5 }
 0x4f7   :  { %v1660_v32 = vadd.f32 %v1652_v13, %v11672_v29 }
 0x4f9   :  { %v1668_v60 = vmax.f32 %v1660_v32, 0.0 }
 0x4fa   :  { %v1566_v63 = vpop.f32.mrf.mxu3 }
 0x4fb   :  { %v1567_v54 = vadd.f32 %v1566_v63, %v1501_v52  ;;  %v1676_v46 = vsel %vm134_vm0, %v1668_v60, 0.0 }
 0x4fc   :  { %v1634_v12 = vpop.f32.mrf.mxu0 }
 0x4fd   :  { %v1653_v50 = vadd.f32 %v1631_v61, %v1567_v54  ;;  %v1507_v3 = vpop.f32.mrf.mxu2 }
 0x4ff   :  { %v1661_v19 = vadd.f32 %v1653_v50, %v11672_v29 }
 0x501   :  { %v1669_v43 = vmax.f32 %v1661_v19, 0.0 }
 0x502   :  { %v1569_v34 = vpop.f32.mrf.mxu3 }
 0x503   :  { %v1570_v48 = vadd.f32 %v1569_v34, %v1504_v23  ;;  %v1677_v62 = vsel %vm134_vm0, %v1669_v43, 0.0 }
 0x504   :  { %v1637_v45 = vpop.f32.mrf.mxu0  ;;  %v1678_v25 = vadd.f32 %v1677_v62, %v1676_v46 }
 0x505   :  { %v1654_v35 = vadd.f32 %v1634_v12, %v1570_v48  ;;  %v1510_v33 = vpop.f32.mrf.mxu2 }
 0x507   :  { %v1662_v16 = vadd.f32 %v1654_v35, %v11672_v29 }
 0x509   :  { %v1670_v36 = vmax.f32 %v1662_v16, 0.0 }
 0x50a   :  { %v1572_v7 = vpop.f32.mrf.mxu3 }
 0x50b   :  { %v1573_v39 = vadd.f32 %v1572_v7, %v1507_v3  ;;  %v1679_v18 = vsel %vm134_vm0, %v1670_v36, 0.0 }
 0x50c   :  { %v1640_v24 = vpop.f32.mrf.mxu0  ;;  %v1680_v31 = vadd.f32 %v1679_v18, %v1678_v25 }
 0x50d   :  { %v1655_v1 = vadd.f32 %v1637_v45, %v1573_v39  ;;  %v1513_v61 = vpop.f32.mrf.mxu2 }
 0x50f   :  { %v1663_v40 = vadd.f32 %v1655_v1, %v11672_v29 }
 0x511   :  { %v1671_v47 = vmax.f32 %v1663_v40, 0.0 }
 0x512   :  { %v1575_v41 = vpop.f32.mrf.mxu3 }
 0x513   :  { %v1681_v26 = vsel %vm134_vm0, %v1671_v47, 0.0  ;;  %v1576_v34 = vadd.f32 %v1575_v41, %v1510_v33 }
 0x514   :  { %v1682_v52 = vadd.f32 %v1681_v26, %v1680_v31  ;;  %v1643_v63 = vpop.f32.mrf.mxu0 }
 0x515   :  { %v1516_v48 = vpop.f32.mrf.mxu2  ;;  %v1656_v16 = vadd.f32 %v1640_v24, %v1576_v34 }
 0x516   :  { %v1683_v21 = vrot.slane %v1682_v52, 4 }
 0x518   :  { %v1684_v23 = vadd.f32 %v1683_v21, %v1682_v52 }
 0x51a   :  { %v1685_v12 = vrot.slane %v1684_v23, 2  ;;  %v1578_v54 = vpop.f32.mrf.mxu3 }
 0x51b   :  { %v1579_v50 = vadd.f32 %v1578_v54, %v1513_v61 }
 0x51c   :  { %v1686_v5 = vadd.f32 %v1685_v12, %v1684_v23  ;;  %v1646_v35 = vpop.f32.mrf.mxu0 }
 0x51d   :  { %v1657_v45 = vadd.f32 %v1643_v63, %v1579_v50  ;;  %v1519_v21 = vpop.f32.mrf.mxu2 }
 0x51e   :  { %v1687_v3 = vrot.slane %v1686_v5, 1 }
 0x51f   :  { %v1665_v18 = vadd.f32 %v1657_v45, %v11672_v29 }
 0x520   :  { %v1688_v13 = vadd.f32 %v1687_v3, %v1686_v5 }
 0x521   :  { %v1673_v26 = vmax.f32 %v1665_v18, 0.0 }
 0x522   :  { %v1702_v19 = vmul.f32 %v1688_v13, %v8315_v11  ;;  %v1581_v32 = vpop.f32.mrf.mxu3 }
 0x523   :  { %v1582_v7 = vadd.f32 %v1581_v32, %v1516_v48  ;;  %v1690_v34 = vsel %vm134_vm0, %v1673_v26, 0.0 }
 0x524   :  { %v9213_v39 = vsub.f32 %v1668_v60, %v1702_v19  ;;  %v9215_v62 = vsub.f32 %v1669_v43, %v1702_v19  ;;  %v9217_v1 = vsub.f32 %v1670_v36, %v1702_v19  ;;  %v9219_v46 = vsub.f32 %v1671_v47, %v1702_v19  ;;  %v1649_v50 = vpop.f32.mrf.mxu0 }
 0x525   :  { %v1658_v33 = vadd.f32 %v1646_v35, %v1582_v7  ;;  %v1664_v60 = vadd.f32 %v1656_v16, %v11672_v29 }
 0x526   :  { %v1712_v40 = vmul.f32 %v9213_v39, %v9213_v39  ;;  %v1713_v25 = vmul.f32 %v9215_v62, %v9215_v62  ;;  %v1714_v24 = vmul.f32 %v9217_v1, %v9217_v1  ;;  %v1715_v36 = vmul.f32 %v9219_v46, %v9219_v46 }
 0x527   :  { %v1666_v43 = vadd.f32 %v1658_v33, %v11672_v29  ;;  %v1672_v63 = vmax.f32 %v1664_v60, 0.0 }
 0x528   :  { %v1720_v47 = vsel %vm134_vm0, %v1712_v40, 0.0  ;;  %v1721_v31 = vsel %vm134_vm0, %v1713_v25, 0.0  ;;  %v1723_v52 = vsel %vm134_vm0, %v1714_v24, 0.0  ;;  %v1725_v5 = vsel %vm134_vm0, %v1715_v36, 0.0 }
 0x529   :  { %v1722_v41 = vadd.f32 %v1721_v31, %v1720_v47  ;;  %v1674_v12 = vmax.f32 %v1666_v43, 0.0  ;;  %v1689_v45 = vsel %vm134_vm0, %v1672_v63, 0.0 }
 0x52a   :  { %v1584_v61 = vpop.f32.mrf.mxu3  ;;  %v1691_v32 = vadd.f32 %v1690_v34, %v1689_v45 }
 0x52b   :  { %v1724_v23 = vadd.f32 %v1723_v52, %v1722_v41  ;;  %v1585_v54 = vadd.f32 %v1584_v61, %v1519_v21  ;;  %v1692_v19 = vsel %vm134_vm0, %v1674_v12, 0.0 }
 0x52c   :  { %v1693_v18 = vadd.f32 %v1692_v19, %v1691_v32 }
 0x52d   :  { %v1726_v3 = vadd.f32 %v1725_v5, %v1724_v23  ;;  %v1659_v13 = vadd.f32 %v1649_v50, %v1585_v54 }
 0x52f   :  { %v1727_v48 = vrot.slane %v1726_v3, 4  ;;  %v1667_v35 = vadd.f32 %v1659_v13, %v11672_v29 }
 0x531   :  { %v1728_v16 = vadd.f32 %v1727_v48, %v1726_v3  ;;  %v1675_v7 = vmax.f32 %v1667_v35, 0.0 }
 0x533   :  { %v1729_v33 = vrot.slane %v1728_v16, 2  ;;  %v1694_v40 = vsel %vm134_vm0, %v1675_v7, 0.0 }
 0x534   :  { %v1695_v25 = vadd.f32 %v1694_v40, %v1693_v18 }
 0x535   :  { %v1730_v24 = vadd.f32 %v1729_v33, %v1728_v16 }
 0x536   :  { %v1696_v60 = vrot.slane %v1695_v25, 4 }
 0x537   :  { %v1731_v43 = vrot.slane %v1730_v24, 1 }
 0x538   :  { %v1697_v36 = vadd.f32 %v1696_v60, %v1695_v25 }
 0x539   :  { %v1732_v47 = vadd.f32 %v1731_v43, %v1730_v24 }
 0x53a   :  { %v1698_v31 = vrot.slane %v1697_v36, 2 }
 0x53b   :  { %v1746_v41 = vmul.f32 %v1732_v47, %v8315_v11 }
 0x53c   :  { %v1699_v52 = vadd.f32 %v1698_v31, %v1697_v36 }
 0x53d   :  { %v1748_v21 = vadd.f32 1e-05, %v1746_v41 }
 0x53e   :  { %v1700_v61 = vrot.slane %v1699_v52, 1 }
 0x53f   :  { %7342 = vrsqrt.f32 %v1748_v21  ;;  %vm1756_vm15 = vweird.f32 %v1748_v21 }
 0x540   :  { %v1701_v23 = vadd.f32 %v1700_v61, %v1699_v52 }
 0x542   :  { %v1703_v54 = vmul.f32 %v1701_v23, %v8315_v11 }
 0x544   :  { %v9243_v5 = vsub.f32 %v1672_v63, %v1703_v54  ;;  %v9245_v50 = vsub.f32 %v1673_v26, %v1703_v54  ;;  %v9247_v3 = vsub.f32 %v1674_v12, %v1703_v54  ;;  %v9249_v34 = vsub.f32 %v1675_v7, %v1703_v54 }
 0x545   :  { %v7343_v13 = vpop.eup %7342 }
 0x546   :  { %v1751_v48 = vmul.f32 %v7343_v13, %v1748_v21  ;;  %v1716_v45 = vmul.f32 %v9243_v5, %v9243_v5  ;;  %v1717_v19 = vmul.f32 %v9245_v50, %v9245_v50  ;;  %v1718_v35 = vmul.f32 %v9247_v3, %v9247_v3 }
 0x547   :  { %v1719_v26 = vmul.f32 %v9249_v34, %v9249_v34  ;;  %vm1757_vm14 = vweird.f32 %v7343_v13 }
 0x548   :  { %v1752_v32 = vmul.f32 %v7343_v13, %v1751_v48  ;;  %v1733_v63 = vsel %vm134_vm0, %v1716_v45, 0.0  ;;  %v1734_v12 = vsel %vm134_vm0, %v1717_v19, 0.0  ;;  %v1736_v18 = vsel %vm134_vm0, %v1718_v35, 0.0  ;;  %vm1758_vm3 = vmor %vm1756_vm15, %vm1757_vm14 }
 0x549   :  { %v1735_v16 = vadd.f32 %v1734_v12, %v1733_v63  ;;  %v1738_v25 = vsel %vm134_vm0, %v1719_v26, 0.0  ;;  %v7630_v26 = vld [vmem:[%s11656_s1 + $0x58] sm:$0xff] }
 0x54a   :  { %v1753_v7 = vmul.f32 0.5, %v1752_v32 }
 0x54b   :  { %v1737_v33 = vadd.f32 %v1736_v18, %v1735_v16  ;;  %v7631_v16 = vld [vmem:[%s11656_s1 + $0x50] sm:$0xff] }
 0x54c   :  { %v1754_v40 = vsub.f32 1.5, %v1753_v7 }
 0x54d   :  { %v1739_v24 = vadd.f32 %v1738_v25, %v1737_v33  ;;  %v7634_v25 = vld [vmem:[%s11656_s1 + $0x40] sm:$0xff] }
 0x54e   :  { %v1755_v60 = vmul.f32 %v7343_v13, %v1754_v40  ;;  %v7632_v40 = vld [vmem:[%s11656_s1 + $0x48] sm:$0xff] }
 0x54f   :  { %v1740_v43 = vrot.slane %v1739_v24, 4 }
 0x550   :  { %v1759_v36 = vsel %vm1758_vm3, %v7343_v13, %v1755_v60 }
 0x551   :  { %v1771_v47 = vmul.f32 %v1759_v36, %v9215_v62  ;;  %v1772_v31 = vmul.f32 %v1759_v36, %v9217_v1  ;;  %v1741_v41 = vadd.f32 %v1740_v43, %v1739_v24  ;;  %v1770_v52 = vmul.f32 %v1759_v36, %v9213_v39  ;;  %v7635_v43 = vld [vmem:[%s11656_s1 + $0x70] sm:$0xff] }
 0x552   :  { %v1773_v19 = vmul.f32 %v1759_v36, %v9219_v46  ;;  %v7636_v36 = vld [vmem:[%s11656_s1 + $0x68] sm:$0xff] }
 0x553   :  { %v1779_v61 = vmul.f32 %v1771_v47, %v8431_v15  ;;  %v1742_v23 = vrot.slane %v1741_v41, 2  ;;  %v1778_v54 = vmul.f32 %v1770_v52, %v8408_v55  ;;  %v1780_v48 = vmul.f32 %v1772_v31, %v8446_v30 }
 0x554   :  { %v1781_v7 = vmul.f32 %v1773_v19, %v8452_v57 }
 0x555   :  { %v9270_v45 = vadd.f32 %v1779_v61, %v8438_v10  ;;  %v1743_v21 = vadd.f32 %v1742_v23, %v1741_v41  ;;  %v9273_v13 = vadd.f32 %v1778_v54, %v8412_v44  ;;  %v9281_v35 = vadd.f32 %v1780_v48, %v8460_v20  ;;  %v7637_v41 = vld [vmem:[%s11656_s1 + $0x60] sm:$0xff] }
 0x556   :  { %v9308_v24 = vadd.f32 %v1781_v7, %v8487_v38 }
 0x557   :  { %v1744_v62 = vrot.slane %v1743_v21, 1  ;;  %v1819_v1 = vrot.slane %v9270_v45, 1  ;;  %v1818_v39 = vrot.slane %v9273_v13, 1  ;;  %7018 = vmatmul.msk.f32.vlgmr.msrb.gmra.mxu1 %vm134_vm0, %v9273_v13  ;;  %v1820_v18 = vrot.slane %v9281_v35, 1 }
 0x558   :  { %2526 = vmatpush.msrb.mxu1 %v7630_v26  ;;  %v1821_v31 = vrot.slane %v9308_v24, 1 }
 0x559   :  { %v1745_v32 = vadd.f32 %v1744_v62, %v1743_v21  ;;  %v1832_v63 = vsel %vm235_vm2, %v1818_v39, %v1819_v1  ;;  %v1831_v60 = vsel %vm235_vm2, %v1819_v1, %v1820_v18 }
 0x55a   :  { %v1834_v12 = vmul.f32 %v8954_v58, %v1832_v63  ;;  %2527 = vmatpush.msrb.mxu1 %v7631_v16  ;;  %v7633_v58 = vld [vmem:[%s11656_s1 + $0x78] sm:$0xff]  ;;  %v1835_v47 = vmul.f32 %v9064_v14, %v1831_v60  ;;  %v1830_v54 = vsel %vm235_vm2, %v1820_v18, %v1821_v31 }
 0x55b   :  { %v1747_v46 = vmul.f32 %v1745_v32, %v8315_v11  ;;  %v1836_v21 = vmul.f32 %v9092_v22, %v1830_v54 }
 0x55c   :  { %7034 = vmatmul.msk.f32.vlgmr.msra.gmra.mxu3 %vm134_vm0, %v1834_v12  ;;  %2528 = vmatpush.msrb.mxu1 %v7632_v40 }
 0x55d   :  { %v1749_v33 = vadd.f32 1e-05, %v1747_v46  ;;  %2846 = vmatpush.msra.mxu3 %v7633_v58 }
 0x55e   :  { %2529 = vmatpush.msrb.mxu1 %v7634_v25 }
 0x55f   :  { %7344 = vrsqrt.f32 %v1749_v33  ;;  %7019 = vmatmul.msk.f32.gmra.mxu1 %vm134_vm0, %v9270_v45  ;;  %2847 = vmatpush.msra.mxu3 %v7635_v43  ;;  %vm1766_vm5 = vweird.f32 %v1749_v33 }
 0x561   :  { %2848 = vmatpush.msra.mxu3 %v7636_v36 }
 0x563   :  { %2849 = vmatpush.msra.mxu3 %v7637_v41 }
 0x564   :  { %7035 = vmatmul.msk.f32.gmra.mxu3 %vm134_vm0, %v1835_v47  ;;  %v1795_v47 = vrot.slane %v9270_v45, 7  ;;  %v7639_v45 = vld [vmem:[%s11656_s1 + $0x90] sm:$0xff] }
 0x565   :  { %v7345_v52 = vpop.eup %7344 }
 0x566   :  { %v1761_v61 = vmul.f32 %v7345_v52, %v1749_v33  ;;  %vm1767_vm4 = vweird.f32 %v7345_v52  ;;  %v1794_v33 = vrot.slane %v9273_v13, 7 }
 0x567   :  { %7020 = vmatmul.msk.f32.gmra.mxu1 %vm134_vm0, %v9281_v35  ;;  %vm1768_vm6 = vmor %vm1766_vm5, %vm1767_vm4 }
 0x568   :  { %v1762_v23 = vmul.f32 %v7345_v52, %v1761_v61  ;;  %v7640_v61 = vld [vmem:[%s11656_s1 + $0x88] sm:$0xff] }
 0x56a   :  { %v1763_v48 = vmul.f32 0.5, %v1762_v23 }
 0x56c   :  { %v1764_v62 = vsub.f32 1.5, %v1763_v48  ;;  %7036 = vmatmul.msk.f32.gmra.mxu3 %vm134_vm0, %v1836_v21  ;;  %v1796_v21 = vrot.slane %v9281_v35, 7 }
 0x56e   :  { %v1765_v1 = vmul.f32 %v7345_v52, %v1764_v62  ;;  %v7641_v62 = vld [vmem:[%s11656_s1 + $0x80] sm:$0xff] }
 0x56f   :  { %7021 = vmatmul.msk.f32.gmra.mxu1 %vm134_vm0, %v9308_v24 }
 0x570   :  { %v1769_v19 = vsel %vm1768_vm6, %v7345_v52, %v1765_v1  ;;  %v1807_v1 = vsel %vm210_vm1, %v1795_v47, %v1796_v21 }
 0x571   :  { %v1777_v32 = vmul.f32 %v1769_v19, %v9249_v34  ;;  %v1774_v26 = vmul.f32 %v1769_v19, %v9243_v5  ;;  %v1775_v63 = vmul.f32 %v1769_v19, %v9245_v50  ;;  %v1776_v50 = vmul.f32 %v1769_v19, %v9247_v3  ;;  %v7638_v3 = vld [vmem:[%s11656_s1 + $0x98] sm:$0xff] }
 0x572   :  { %v1812_v19 = vmul.f32 %v9086_v37, %v1807_v1 }
 0x573   :  { %v1785_v46 = vmul.f32 %v1777_v32, %v8452_v57  ;;  %v1782_v12 = vmul.f32 %v1774_v26, %v8408_v55  ;;  %v1783_v16 = vmul.f32 %v1775_v63, %v8431_v15  ;;  %v1784_v41 = vmul.f32 %v1776_v50, %v8446_v30 }
 0x574   :  { %v1797_v32 = vrot.slane %v9308_v24, 7 }
 0x575   :  { %v9341_v7 = vadd.f32 %v1785_v46, %v8487_v38  ;;  %v1790_v18 = vadd.f32 %v1782_v12, %v8412_v44  ;;  %v1791_v5 = vadd.f32 %v1783_v16, %v8438_v10  ;;  %v1792_v52 = vadd.f32 %v1784_v41, %v8460_v20 }
 0x576   :  { %v1806_v63 = vsel %vm210_vm1, %v1796_v21, %v1797_v32 }
 0x577   :  { %v1822_v40 = vrot.slane %v1790_v18, 1  ;;  %v1801_v34 = vrot.slane %v9341_v7, 7  ;;  %7022 = vmatmul.msk.f32.gmra.mxu1 %vm134_vm0, %v1790_v18  ;;  %v1823_v36 = vrot.slane %v1791_v5, 1  ;;  %v1824_v48 = vrot.slane %v1792_v52, 1 }
 0x578   :  { %v1825_v26 = vrot.slane %v9341_v7, 1  ;;  %v1813_v37 = vmul.f32 %v9110_v9, %v1806_v63  ;;  %v1798_v24 = vrot.slane %v1790_v18, 7  ;;  %v1799_v9 = vrot.slane %v1791_v5, 7 }
 0x579   :  { %v1809_v58 = vsel %vm210_vm1, %v1801_v34, %v1794_v33  ;;  %v1829_v25 = vsel %vm235_vm2, %v1821_v31, %v1822_v40  ;;  %v1808_v31 = vsel %vm210_vm1, %v1794_v33, %v1795_v47 }
 0x57a   :  { %v1810_v60 = vmul.f32 %v9025_v53, %v1809_v58  ;;  %v1837_v43 = vmul.f32 %v9116_v17, %v1829_v25  ;;  %v1828_v53 = vsel %vm235_vm2, %v1822_v40, %v1823_v36  ;;  %v1811_v23 = vmul.f32 %v9058_v4, %v1808_v31 }
 0x57b   :  { %v1838_v54 = vmul.f32 %v9137_v8, %v1828_v53  ;;  %v1827_v4 = vsel %vm235_vm2, %v1823_v36, %v1824_v48  ;;  %v1826_v46 = vsel %vm235_vm2, %v1824_v48, %v1825_v26  ;;  %v1805_v16 = vsel %vm210_vm1, %v1797_v32, %v1798_v24  ;;  %v7646_v32 = vld [vmem:[%s11613_s14] sm:$0xff] }
 0x57c   :  { %7026 = vmatmul.msk.f32.vlgmr.msrb.gmra.mxu2 %vm134_vm0, %v1810_v60  ;;  %7037 = vmatmul.msk.f32.gmra.mxu3 %vm134_vm0, %v1837_v43  ;;  %v1839_v35 = vmul.f32 %v9156_v42, %v1827_v4  ;;  %v1840_v12 = vmul.f32 %v9177_v51, %v1826_v46  ;;  %v1833_v33 = vsel %vm235_vm2, %v1825_v26, %v1818_v39  ;;  %v1800_v25 = vrot.slane %v1792_v52, 7 }
 0x57d   :  { %2781 = vmatpush.msrb.mxu2 %v7638_v3  ;;  %v1814_v40 = vmul.f32 %v9131_v27, %v1805_v16  ;;  %v1841_v50 = vmul.f32 %v9199_v6, %v1833_v33  ;;  %v1804_v18 = vsel %vm210_vm1, %v1798_v24, %v1799_v9  ;;  %v7648_v24 = vld [vmem:[%s11656_s1 + $0xd0] sm:$0xff] }
 0x57e   :  { %v1815_v58 = vmul.f32 %v9150_v56, %v1804_v18  ;;  %v1803_v13 = vsel %vm210_vm1, %v1799_v9, %v1800_v25  ;;  %v1802_v39 = vsel %vm210_vm1, %v1800_v25, %v1801_v34  ;;  %v7650_v18 = vld [vmem:[%s11613_s14 + $0x8] sm:$0xff] }
 0x57f   :  { %2782 = vmatpush.msrb.mxu2 %v7639_v45  ;;  %7023 = vmatmul.msk.f32.gmra.mxu1 %vm134_vm0, %v1791_v5  ;;  %v1816_v27 = vmul.f32 %v9171_v0, %v1803_v13  ;;  %v1817_v5 = vmul.f32 %v9193_v49, %v1802_v39  ;;  %v7642_v49 = vld [vmem:[%s11656_s1 + $0xb8] sm:$0xff]  ;;  %v7651_v13 = vld [vmem:[%s11656_s1 + $0xc0] sm:$0xff] }
 0x581   :  { %2783 = vmatpush.msrb.mxu2 %v7640_v61  ;;  %v7644_v61 = vld [vmem:[%s11656_s1 + $0xa8] sm:$0xff] }
 0x583   :  { %2784 = vmatpush.msrb.mxu2 %v7641_v62 }
 0x584   :  { %7027 = vmatmul.msk.f32.gmra.mxu2 %vm134_vm0, %v1811_v23  ;;  %7038 = vmatmul.msk.f32.gmra.mxu3 %vm134_vm0, %v1838_v54  ;;  %v7645_v54 = vld [vmem:[%s11656_s1 + $0xa0] sm:$0xff] }
 0x587   :  { %7024 = vmatmul.msk.f32.gmra.mxu1 %vm134_vm0, %v1792_v52  ;;  %v7643_v52 = vld [vmem:[%s11656_s1 + $0xb0] sm:$0xff] }
 0x58c   :  { %7028 = vmatmul.msk.f32.gmra.mxu2 %vm134_vm0, %v1812_v19  ;;  %7039 = vmatmul.msk.f32.gmra.mxu3 %vm134_vm0, %v1839_v35 }
 0x58f   :  { %7025 = vmatmul.msk.f32.gmra.mxu1 %vm134_vm0, %v9341_v7 }
 0x594   :  { %7029 = vmatmul.msk.f32.gmra.mxu2 %vm134_vm0, %v1813_v37  ;;  %7040 = vmatmul.msk.f32.gmra.mxu3 %vm134_vm0, %v1840_v12  ;;  %v7647_v37 = vld [vmem:[%s11656_s1 + $0xd8] sm:$0xff] }
 0x59c   :  { %7030 = vmatmul.msk.f32.gmra.mxu2 %vm134_vm0, %v1814_v40  ;;  %7041 = vmatmul.msk.f32.gmra.mxu3 %vm134_vm0, %v1841_v50  ;;  %v7649_v50 = vld [vmem:[%s11656_s1 + $0xc8] sm:$0xff] }
 0x5a4   :  { %7031 = vmatmul.msk.f32.gmra.mxu2 %vm134_vm0, %v1815_v58 }
 0x5ac   :  { %7032 = vmatmul.msk.f32.gmra.mxu2 %vm134_vm0, %v1816_v27 }
 0x5b4   :  { %7033 = vmatmul.msk.f32.gmra.mxu2 %vm134_vm0, %v1817_v5 }
 0x5d4   :  { %v1883_v56 = vpop.f32.mrf.mxu1 }
 0x5dc   :  { %v1886_v43 = vpop.f32.mrf.mxu1 }
 0x5df   :  { %v2013_v60 = vpop.f32.mrf.mxu3 }
 0x5e4   :  { %v1889_v31 = vpop.f32.mrf.mxu1 }
 0x5e7   :  { %v2016_v36 = vpop.f32.mrf.mxu3 }
 0x5ec   :  { %v1892_v62 = vpop.f32.mrf.mxu1 }
 0x5ef   :  { %v2019_v53 = vpop.f32.mrf.mxu3 }
 0x5f4   :  { %v1895_v9 = vpop.f32.mrf.mxu1 }
 0x5ff   :  { %v1948_v47 = vpop.f32.mrf.mxu2  ;;  %v2022_v35 = vpop.f32.mrf.mxu3 }
 0x600   :  { %v1949_v41 = vadd.f32 %v1948_v47, %v1883_v56 }
 0x602   :  { %v2037_v3 = vadd.f32 %v2013_v60, %v1949_v41 }
 0x604   :  { %v9430_v0 = vadd.f32 %v2037_v3, %v8645_v2  ;;  %v1898_v3 = vpop.f32.mrf.mxu1 }
 0x606   :  { %7042 = vmatmul.msk.f32.vlgmr.msra.gmra.mxu0 %vm134_vm0, %v9430_v0  ;;  %v2077_v48 = vrot.slane %v9430_v0, 2 }
 0x607   :  { %v1951_v7 = vpop.f32.mrf.mxu2  ;;  %2911 = vmatpush.msra.mxu0 %v7642_v49  ;;  %v2025_v27 = vpop.f32.mrf.mxu3 }
 0x608   :  { %v1952_v34 = vadd.f32 %v1951_v7, %v1886_v43 }
 0x609   :  { %2912 = vmatpush.msra.mxu0 %v7643_v52 }
 0x60a   :  { %v2038_v45 = vadd.f32 %v2016_v36, %v1952_v34  ;;  %v7652_v36 = vld [vmem:[%s11613_s14 + $0x10] sm:$0xff] }
 0x60b   :  { %2913 = vmatpush.msra.mxu0 %v7644_v61 }
 0x60c   :  { %v9444_v23 = vadd.f32 %v2038_v45, %v8645_v2  ;;  %v7653_v45 = vld [vmem:[%s11613_s14 + $0x18] sm:$0xff] }
 0x60d   :  { %2914 = vmatpush.msra.mxu0 %v7645_v54 }
 0x60e   :  { %v2078_v21 = vrot.slane %v9444_v23, 2  ;;  %7043 = vmatmul.msk.f32.gmra.mxu0 %vm134_vm0, %v9444_v23 }
 0x60f   :  { %v1954_v1 = vpop.f32.mrf.mxu2  ;;  %v2028_v7 = vpop.f32.mrf.mxu3 }
 0x610   :  { %v2091_v4 = vsel %vm959_vm10, %v2077_v48, %v2078_v21  ;;  %v1955_v19 = vadd.f32 %v1954_v1, %v1889_v31 }
 0x611   :  { %v2093_v26 = vmul.f32 %v7646_v32, %v2091_v4 }
 0x612   :  { %v2039_v63 = vadd.f32 %v2019_v53, %v1955_v19 }
 0x613   :  { %7058 = vmatmul.msk.f32.vlgmr.msra.gmra.mxu2 %vm134_vm0, %v2093_v26  ;;  %v7654_v26 = vld [vmem:[%s11613_s14 + $0x20] sm:$0xff] }
 0x614   :  { %v9462_v46 = vadd.f32 %v2039_v63, %v8645_v2  ;;  %3105 = vmatpush.msra.mxu2 %v7647_v37 }
 0x616   :  { %v2079_v12 = vrot.slane %v9462_v46, 2  ;;  %7044 = vmatmul.msk.f32.gmra.mxu0 %vm134_vm0, %v9462_v46  ;;  %3106 = vmatpush.msra.mxu2 %v7648_v24 }
 0x617   :  { %v1957_v16 = vpop.f32.mrf.mxu2  ;;  %v2031_v4 = vpop.f32.mrf.mxu3 }
 0x618   :  { %v1958_v33 = vadd.f32 %v1957_v16, %v1892_v62  ;;  %v2090_v40 = vsel %vm959_vm10, %v2078_v21, %v2079_v12  ;;  %3107 = vmatpush.msra.mxu2 %v7649_v50  ;;  %v1901_v62 = vpop.f32.mrf.mxu1 }
 0x619   :  { %v2094_v58 = vmul.f32 %v7650_v18, %v2090_v40  ;;  %v7655_v18 = vld [vmem:[%s11613_s14 + $0x28] sm:$0xff] }
 0x61a   :  { %v2040_v25 = vadd.f32 %v2022_v35, %v1958_v33  ;;  %3108 = vmatpush.msra.mxu2 %v7651_v13 }
 0x61b   :  { %7059 = vmatmul.msk.f32.gmra.mxu2 %vm134_vm0, %v2094_v58 }
 0x61c   :  { %v9486_v39 = vadd.f32 %v2040_v25, %v8645_v2 }
 0x61e   :  { %v2080_v5 = vrot.slane %v9486_v39, 2  ;;  %7045 = vmatmul.msk.f32.gmra.mxu0 %vm134_vm0, %v9486_v39 }
 0x61f   :  { %v1960_v56 = vpop.f32.mrf.mxu2 }
 0x620   :  { %v1961_v60 = vadd.f32 %v1960_v56, %v1895_v9  ;;  %v2089_v43 = vsel %vm959_vm10, %v2079_v12, %v2080_v5  ;;  %v1904_v16 = vpop.f32.mrf.mxu1  ;;  %v2034_v9 = vpop.f32.mrf.mxu3 }
 0x621   :  { %v2095_v47 = vmul.f32 %v7652_v36, %v2089_v43  ;;  %v7656_v36 = vld [vmem:[%s11612_s13] sm:$0xff] }
 0x622   :  { %v2041_v41 = vadd.f32 %v2025_v27, %v1961_v60  ;;  %v2053_v27 = vrot.slane %v9430_v0, 6  ;;  %v7662_v0 = vld [vmem:[%s11613_s14 + $0x38] sm:$0xff] }
 0x623   :  { %7060 = vmatmul.msk.f32.gmra.mxu2 %vm134_vm0, %v2095_v47 }
 0x624   :  { %v9498_v31 = vadd.f32 %v2041_v41, %v8645_v2  ;;  %v7657_v41 = vld [vmem:[%s11613_s14 + $0x30] sm:$0xff] }
 0x626   :  { %v2081_v49 = vrot.slane %v9498_v31, 2  ;;  %7046 = vmatmul.msk.f32.gmra.mxu0 %vm134_vm0, %v9498_v31 }
 0x627   :  { %v1963_v34 = vpop.f32.mrf.mxu2 }
 0x628   :  { %v1964_v53 = vadd.f32 %v1963_v34, %v1898_v3  ;;  %v2088_v52 = vsel %vm959_vm10, %v2080_v5, %v2081_v49 }
 0x629   :  { %v2096_v61 = vmul.f32 %v7653_v45, %v2088_v52  ;;  %v7660_v52 = vld [vmem:[%s11656_s1 + $0xe8] sm:$0xff] }
 0x62a   :  { %v2042_v54 = vadd.f32 %v2028_v7, %v1964_v53  ;;  %v2054_v7 = vrot.slane %v9444_v23, 6  ;;  %v7659_v23 = vld [vmem:[%s11656_s1 + $0xf0] sm:$0xff]  ;;  %v7661_v45 = vld [vmem:[%s11612_s13 + $0x8] sm:$0xff] }
 0x62b   :  { %7061 = vmatmul.msk.f32.gmra.mxu2 %vm134_vm0, %v2096_v61 }
 0x62c   :  { %v9510_v21 = vadd.f32 %v2042_v54, %v8645_v2  ;;  %v2067_v34 = vsel %vm934_vm11, %v2053_v27, %v2054_v7  ;;  %v2055_v54 = vrot.slane %v9462_v46, 6 }
 0x62d   :  { %v2070_v61 = vmul.f32 %v7661_v45, %v2067_v34 }
 0x62e   :  { %v2082_v1 = vrot.slane %v9510_v21, 2  ;;  %7047 = vmatmul.msk.f32.gmra.mxu0 %vm134_vm0, %v9510_v21 }
 0x62f   :  { %v1966_v19 = vpop.f32.mrf.mxu2 }
 0x630   :  { %v1967_v35 = vadd.f32 %v1966_v19, %v1901_v62  ;;  %v2087_v32 = vsel %vm959_vm10, %v2081_v49, %v2082_v1  ;;  %v7658_v49 = vld [vmem:[%s11656_s1 + $0xf8] sm:$0xff]  ;;  %v7663_v62 = vld [vmem:[%s11656_s1 + $0xe0] sm:$0xff] }
 0x631   :  { %v2097_v63 = vmul.f32 %v7654_v26, %v2087_v32  ;;  %v7665_v32 = vld [vmem:[%s11612_s13 + $0x18] sm:$0xff] }
 0x632   :  { %v2043_v37 = vadd.f32 %v2031_v4, %v1967_v35  ;;  %v7664_v4 = vld [vmem:[%s11612_s13 + $0x10] sm:$0xff]  ;;  %v2056_v35 = vrot.slane %v9486_v39, 6  ;;  %v7666_v39 = vld [vmem:[%s11612_s13 + $0x20] sm:$0xff] }
 0x633   :  { %7062 = vmatmul.msk.f32.gmra.mxu2 %vm134_vm0, %v2097_v63  ;;  %v2057_v63 = vrot.slane %v9498_v31, 6  ;;  %v7667_v31 = vld [vmem:[%s11612_s13 + $0x28] sm:$0xff] }
 0x634   :  { %v9522_v12 = vadd.f32 %v2043_v37, %v8645_v2  ;;  %v2065_v46 = vsel %vm934_vm11, %v2055_v54, %v2056_v35 }
 0x635   :  { %v2072_v26 = vmul.f32 %v7665_v32, %v2065_v46  ;;  %v2064_v37 = vsel %vm934_vm11, %v2056_v35, %v2057_v63  ;;  %v9647_v35 = vld [vmem:[%s11611_s12] sm:$0xff] }
 0x636   :  { %v2083_v24 = vrot.slane %v9522_v12, 2  ;;  %7048 = vmatmul.msk.f32.gmra.mxu0 %vm134_vm0, %v9522_v12 }
 0x637   :  { %v1969_v33 = vpop.f32.mrf.mxu2 }
 0x638   :  { %v1970_v40 = vadd.f32 %v1969_v33, %v1904_v16  ;;  %v2086_v50 = vsel %vm959_vm10, %v2082_v1, %v2083_v24  ;;  %v2066_v1 = vsel %vm934_vm11, %v2054_v7, %v2055_v54  ;;  %v2058_v16 = vrot.slane %v9510_v21, 6  ;;  %v7668_v21 = vld [vmem:[%s11612_s13 + $0x30] sm:$0xff] }
 0x639   :  { %v2098_v58 = vmul.f32 %v7655_v18, %v2086_v50  ;;  %v2071_v19 = vmul.f32 %v7664_v4, %v2066_v1  ;;  %v2059_v50 = vrot.slane %v9522_v12, 6 }
 0x63a   :  { %v2044_v25 = vadd.f32 %v2034_v9, %v1970_v40  ;;  %v2063_v33 = vsel %vm934_vm11, %v2057_v63, %v2058_v16  ;;  %v7675_v63 = vld [vmem:[%s11656_s1 + $0x18] sm:$0xff] }
 0x63b   :  { %7063 = vmatmul.msk.f32.gmra.mxu2 %vm134_vm0, %v2098_v58  ;;  %v2074_v40 = vmul.f32 %v7667_v31, %v2063_v33  ;;  %v2062_v9 = vsel %vm934_vm11, %v2058_v16, %v2059_v50  ;;  %v7677_v31 = vld [vmem:[%s11656_s1 + $0x8] sm:$0xff] }
 0x63c   :  { %v2052_v13 = vadd.f32 %v2044_v25, %v8645_v2  ;;  %v2075_v18 = vmul.f32 %v7668_v21, %v2062_v9  ;;  %v7669_v25 = vld [vmem:[%s11612_s13 + $0x38] sm:$0xff]  ;;  %v7678_v21 = vld [vmem:[%s11656_s1] sm:$0xff] }
 0x63e   :  { %v2060_v5 = vrot.slane %v2052_v13, 6  ;;  %v2084_v56 = vrot.slane %v2052_v13, 2  ;;  %7049 = vmatmul.msk.f32.gmra.mxu0 %vm134_vm0, %v2052_v13 }
 0x640   :  { %v2068_v60 = vsel %vm934_vm11, %v2060_v5, %v2053_v27  ;;  %v2085_v43 = vsel %vm959_vm10, %v2083_v24, %v2084_v56  ;;  %v2092_v53 = vsel %vm959_vm10, %v2084_v56, %v2077_v48  ;;  %v2073_v24 = vmul.f32 %v7666_v39, %v2064_v37  ;;  %v7676_v39 = vld [vmem:[%s11656_s1 + $0x10] sm:$0xff] }
 0x641   :  { %v2069_v47 = vmul.f32 %v7656_v36, %v2068_v60  ;;  %v2099_v3 = vmul.f32 %v7657_v41, %v2085_v43  ;;  %v2100_v48 = vmul.f32 %v7662_v0, %v2092_v53  ;;  %v2061_v58 = vsel %vm934_vm11, %v2059_v50, %v2060_v5  ;;  %v7671_v53 = vld [vmem:[%s11656_s1 + $0x110] sm:$0xff] }
 0x642   :  { %v2076_v12 = vmul.f32 %v7669_v25, %v2061_v58 }
 0x643   :  { %7050 = vmatmul.msk.f32.vlgmr.msra.gmra.mxu1 %vm134_vm0, %v2069_v47  ;;  %7064 = vmatmul.msk.f32.gmra.mxu2 %vm134_vm0, %v2099_v3 }
 0x644   :  { %3040 = vmatpush.msra.mxu1 %v7658_v49  ;;  %v7670_v49 = vld [vmem:[%s11656_s1 + $0x118] sm:$0xff] }
 0x646   :  { %3041 = vmatpush.msra.mxu1 %v7659_v23 }
 0x648   :  { %3042 = vmatpush.msra.mxu1 %v7660_v52  ;;  %v7672_v52 = vld [vmem:[%s11656_s1 + $0x108] sm:$0xff] }
 0x64a   :  { %3043 = vmatpush.msra.mxu1 %v7663_v62 }
 0x64b   :  { %7051 = vmatmul.msk.f32.gmra.mxu1 %vm134_vm0, %v2070_v61  ;;  %7065 = vmatmul.msk.f32.gmra.mxu2 %vm134_vm0, %v2100_v48  ;;  %v7673_v61 = vld [vmem:[%s11656_s1 + $0x100] sm:$0xff] }
 0x653   :  { %7052 = vmatmul.msk.f32.gmra.mxu1 %vm134_vm0, %v2071_v19 }
 0x65b   :  { %7053 = vmatmul.msk.f32.gmra.mxu1 %vm134_vm0, %v2072_v26 }
 0x663   :  { %7054 = vmatmul.msk.f32.gmra.mxu1 %vm134_vm0, %v2073_v24 }
 0x66b   :  { %7055 = vmatmul.msk.f32.gmra.mxu1 %vm134_vm0, %v2074_v40 }
 0x673   :  { %7056 = vmatmul.msk.f32.gmra.mxu1 %vm134_vm0, %v2075_v18 }
 0x67b   :  { %7057 = vmatmul.msk.f32.gmra.mxu1 %vm134_vm0, %v2076_v12 }
 0x683   :  { %v2142_v13 = vpop.f32.mrf.mxu0 }
 0x68b   :  { %v2145_v56 = vpop.f32.mrf.mxu0 }
 0x693   :  { %v2148_v3 = vpop.f32.mrf.mxu0 }
 0x696   :  { %v2272_v27 = vpop.f32.mrf.mxu2 }
 0x69b   :  { %v2151_v54 = vpop.f32.mrf.mxu0 }
 0x69e   :  { %v2275_v60 = vpop.f32.mrf.mxu2 }
 0x6a3   :  { %v2154_v40 = vpop.f32.mrf.mxu0 }
 0x6a6   :  { %v2278_v5 = vpop.f32.mrf.mxu2 }
 0x6ae   :  { %v2281_v19 = vpop.f32.mrf.mxu2 }
 0x6b6   :  { %v2284_v18 = vpop.f32.mrf.mxu2 }
 0x6c0   :  { %v2207_v43 = vpop.f32.mrf.mxu1 }
 0x6c1   :  { %v2208_v36 = vadd.f32 %v2207_v43, %v2142_v13 }
 0x6c3   :  { %v2296_v47 = vadd.f32 %v2272_v27, %v2208_v36  ;;  %v2287_v36 = vpop.f32.mrf.mxu2 }
 0x6c5   :  { %v9617_v41 = vadd.f32 %v2296_v47, %v8819_v59 }
 0x6c7   :  { %7066 = vmatmul.msk.f32.vlgmr.msrb.gmra.mxu3 %vm134_vm0, %v9617_v41  ;;  %v2336_v0 = vrot.slane %v9617_v41, 1 }
 0x6c8   :  { %v2210_v7 = vpop.f32.mrf.mxu1  ;;  %3170 = vmatpush.msrb.mxu3 %v7670_v49 }
 0x6c9   :  { %v2211_v34 = vadd.f32 %v2210_v7, %v2145_v56 }
 0x6ca   :  { %3171 = vmatpush.msrb.mxu3 %v7671_v53 }
 0x6cb   :  { %v2297_v23 = vadd.f32 %v2275_v60, %v2211_v34  ;;  %v2157_v60 = vpop.f32.mrf.mxu0 }
 0x6cc   :  { %3172 = vmatpush.msrb.mxu3 %v7672_v52  ;;  %v2290_v52 = vpop.f32.mrf.mxu2 }
 0x6cd   :  { %v9631_v45 = vadd.f32 %v2297_v23, %v8819_v59 }
 0x6ce   :  { %3173 = vmatpush.msrb.mxu3 %v7673_v61 }
 0x6cf   :  { %v2337_v48 = vrot.slane %v9631_v45, 1  ;;  %7067 = vmatmul.msk.f32.gmra.mxu3 %vm134_vm0, %v9631_v45 }
 0x6d0   :  { %v2213_v62 = vpop.f32.mrf.mxu1 }
 0x6d1   :  { %v2350_v1 = vsel %vm235_vm2, %v2336_v0, %v2337_v48  ;;  %v2214_v4 = vadd.f32 %v2213_v62, %v2148_v3 }
 0x6d2   :  { %v2352_v46 = vmul.f32 %v9647_v35, %v2350_v1 }
 0x6d3   :  { %v2298_v32 = vadd.f32 %v2278_v5, %v2214_v4  ;;  %v2160_v53 = vpop.f32.mrf.mxu0 }
 0x6d4   :  { %7082 = vmatmul.msk.f32.vlgmr.msrb.gmra.mxu1 %vm134_vm0, %v2352_v46 }
 0x6d5   :  { %v9652_v26 = vadd.f32 %v2298_v32, %v8819_v59  ;;  %3364 = vmatpush.msrb.mxu1 %v7675_v63 }
 0x6d7   :  { %v2338_v37 = vrot.slane %v9652_v26, 1  ;;  %7068 = vmatmul.msk.f32.gmra.mxu3 %vm134_vm0, %v9652_v26  ;;  %3365 = vmatpush.msrb.mxu1 %v7676_v39 }
 0x6d8   :  { %v2216_v24 = vpop.f32.mrf.mxu1 }
 0x6d9   :  { %v2217_v16 = vadd.f32 %v2216_v24, %v2151_v54  ;;  %v2349_v33 = vsel %vm235_vm2, %v2337_v48, %v2338_v37  ;;  %3366 = vmatpush.msrb.mxu1 %v7677_v31 }
 0x6da   :  { %v2353_v50 = vmul.f32 %v9064_v14, %v2349_v33 }
 0x6db   :  { %v2299_v9 = vadd.f32 %v2281_v19, %v2217_v16  ;;  %3367 = vmatpush.msrb.mxu1 %v7678_v21  ;;  %v2163_v19 = vpop.f32.mrf.mxu0  ;;  %v2312_v16 = vrot.slane %v9617_v41, 7 }
 0x6dc   :  { %7083 = vmatmul.msk.f32.gmra.mxu1 %vm134_vm0, %v2353_v50 }
 0x6dd   :  { %v9674_v58 = vadd.f32 %v2299_v9, %v8819_v59 }
 0x6df   :  { %v2339_v25 = vrot.slane %v9674_v58, 1  ;;  %7069 = vmatmul.msk.f32.gmra.mxu3 %vm134_vm0, %v9674_v58 }
 0x6e0   :  { %v2219_v12 = vpop.f32.mrf.mxu1 }
 0x6e1   :  { %v2220_v13 = vadd.f32 %v2219_v12, %v2154_v40  ;;  %v2348_v14 = vsel %vm235_vm2, %v2338_v37, %v2339_v25  ;;  %v2293_v37 = vpop.f32.mrf.mxu2 }
 0x6e2   :  { %v2354_v27 = vmul.f32 %v9092_v22, %v2348_v14  ;;  %v9748_v14 = vld [vmem:[%s11610_s11 + $0x8] sm:$0xff] }
 0x6e3   :  { %v2300_v56 = vadd.f32 %v2284_v18, %v2220_v13  ;;  %v2313_v18 = vrot.slane %v9631_v45, 7  ;;  %v7682_v45 = vld [vmem:[%s11656_s1 + $0x28] sm:$0xff] }
 0x6e4   :  { %7084 = vmatmul.msk.f32.gmra.mxu1 %vm134_vm0, %v2354_v27 }
 0x6e5   :  { %v9684_v43 = vadd.f32 %v2300_v56, %v8819_v59  ;;  %v2326_v12 = vsel %vm210_vm1, %v2312_v16, %v2313_v18  ;;  %v7684_v56 = vld [vmem:[%s11656_s1 + $0x20] sm:$0xff] }
 0x6e6   :  { %v2329_v41 = vmul.f32 %v9748_v14, %v2326_v12 }
 0x6e7   :  { %v2340_v47 = vrot.slane %v9684_v43, 1  ;;  %7070 = vmatmul.msk.f32.gmra.mxu3 %vm134_vm0, %v9684_v43 }
 0x6e8   :  { %v2222_v3 = vpop.f32.mrf.mxu1 }
 0x6e9   :  { %v2223_v5 = vadd.f32 %v2222_v3, %v2157_v60  ;;  %v2347_v7 = vsel %vm235_vm2, %v2339_v25, %v2340_v47  ;;  %v7680_v25 = vld [vmem:[%s11656_s1 + $0x38] sm:$0xff] }
 0x6ea   :  { %v2355_v22 = vmul.f32 %v9116_v17, %v2347_v7  ;;  %v9773_v3 = vld [vmem:[%s11610_s11 + $0x18] sm:$0xff]  ;;  %v2316_v7 = vrot.slane %v9684_v43, 7  ;;  %v9793_v43 = vld [vmem:[%s11610_s11 + $0x28] sm:$0xff] }
 0x6eb   :  { %v2301_v49 = vadd.f32 %v2287_v36, %v2223_v5  ;;  %v9763_v36 = vld [vmem:[%s11610_s11 + $0x10] sm:$0xff] }
 0x6ec   :  { %7085 = vmatmul.msk.f32.gmra.mxu1 %vm134_vm0, %v2355_v22 }
 0x6ed   :  { %v9694_v34 = vadd.f32 %v2301_v49, %v8819_v59 }
 0x6ef   :  { %v2341_v23 = vrot.slane %v9694_v34, 1  ;;  %7071 = vmatmul.msk.f32.gmra.mxu3 %vm134_vm0, %v9694_v34 }
 0x6f0   :  { %v2225_v61 = vpop.f32.mrf.mxu1 }
 0x6f1   :  { %v2226_v48 = vadd.f32 %v2225_v61, %v2160_v53  ;;  %v2346_v54 = vsel %vm235_vm2, %v2340_v47, %v2341_v23  ;;  %v2317_v53 = vrot.slane %v9694_v34, 7  ;;  %v9803_v34 = vld [vmem:[%s11610_s11 + $0x30] sm:$0xff] }
 0x6f2   :  { %v2356_v17 = vmul.f32 %v9137_v8, %v2346_v54 }
 0x6f3   :  { %v2302_v62 = vadd.f32 %v2290_v52, %v2226_v48 }
 0x6f4   :  { %7086 = vmatmul.msk.f32.gmra.mxu1 %vm134_vm0, %v2356_v17 }
 0x6f5   :  { %v9704_v1 = vadd.f32 %v2302_v62, %v8819_v59  ;;  %v9812_v62 = vld [vmem:[%s11610_s11 + $0x38] sm:$0xff] }
 0x6f7   :  { %v2342_v4 = vrot.slane %v9704_v1, 1  ;;  %7072 = vmatmul.msk.f32.gmra.mxu3 %vm134_vm0, %v9704_v1  ;;  %v2318_v61 = vrot.slane %v9704_v1, 7 }
 0x6f8   :  { %v2228_v46 = vpop.f32.mrf.mxu1 }
 0x6f9   :  { %v2229_v32 = vadd.f32 %v2228_v46, %v2163_v19  ;;  %v2345_v63 = vsel %vm235_vm2, %v2341_v23, %v2342_v4  ;;  %v2322_v23 = vsel %vm210_vm1, %v2316_v7, %v2317_v53  ;;  %v2321_v48 = vsel %vm210_vm1, %v2317_v53, %v2318_v61 }
 0x6fa   :  { %v2357_v8 = vmul.f32 %v9156_v42, %v2345_v63  ;;  %v9723_v42 = vld [vmem:[%s11610_s11] sm:$0xff]  ;;  %v2333_v52 = vmul.f32 %v9793_v43, %v2322_v23  ;;  %v2334_v54 = vmul.f32 %v9803_v34, %v2321_v48 }
 0x6fb   :  { %v2303_v39 = vadd.f32 %v2293_v37, %v2229_v32 }
 0x6fc   :  { %7087 = vmatmul.msk.f32.gmra.mxu1 %vm134_vm0, %v2357_v8 }
 0x6fd   :  { %v2311_v24 = vadd.f32 %v2303_v39, %v8819_v59 }
 0x6ff   :  { %v2319_v33 = vrot.slane %v2311_v24, 7  ;;  %v2343_v31 = vrot.slane %v2311_v24, 1  ;;  %7073 = vmatmul.msk.f32.gmra.mxu3 %vm134_vm0, %v2311_v24 }
 0x701   :  { %v2327_v40 = vsel %vm210_vm1, %v2319_v33, %v2312_v16  ;;  %v2344_v50 = vsel %vm235_vm2, %v2342_v4, %v2343_v31  ;;  %v2351_v13 = vsel %vm235_vm2, %v2343_v31, %v2336_v0  ;;  %v2314_v0 = vrot.slane %v9652_v26, 7 }
 0x702   :  { %v2328_v9 = vmul.f32 %v9723_v42, %v2327_v40  ;;  %v2358_v21 = vmul.f32 %v9177_v51, %v2344_v50  ;;  %v7681_v51 = vld [vmem:[%s11656_s1 + $0x30] sm:$0xff]  ;;  %v2359_v27 = vmul.f32 %v9199_v6, %v2351_v13  ;;  %v2315_v26 = vrot.slane %v9674_v58, 7  ;;  %v9783_v58 = vld [vmem:[%s11610_s11 + $0x20] sm:$0xff] }
 0x703   :  { %v2325_v60 = vsel %vm210_vm1, %v2313_v18, %v2314_v0  ;;  %v2320_v17 = vsel %vm210_vm1, %v2318_v61, %v2319_v33 }
 0x704   :  { %7074 = vmatmul.msk.f32.vlgmr.msrb.gmra.mxu0 %vm134_vm0, %v2328_v9  ;;  %7088 = vmatmul.msk.f32.gmra.mxu1 %vm134_vm0, %v2358_v21  ;;  %v2330_v6 = vmul.f32 %v9763_v36, %v2325_v60  ;;  %v2324_v47 = vsel %vm210_vm1, %v2314_v0, %v2315_v26  ;;  %v2323_v22 = vsel %vm210_vm1, %v2315_v26, %v2316_v7 }
 0x705   :  { %3299 = vmatpush.msrb.mxu0 %v7680_v25  ;;  %v2331_v5 = vmul.f32 %v9773_v3, %v2324_v47  ;;  %v2332_v49 = vmul.f32 %v9783_v58, %v2323_v22  ;;  %v2335_v1 = vmul.f32 %v9812_v62, %v2320_v17 }
 0x707   :  { %3300 = vmatpush.msrb.mxu0 %v7681_v51 }
 0x709   :  { %3301 = vmatpush.msrb.mxu0 %v7682_v45 }
 0x70b   :  { %3302 = vmatpush.msrb.mxu0 %v7684_v56 }
 0x70c   :  { %7075 = vmatmul.msk.f32.gmra.mxu0 %vm134_vm0, %v2329_v41  ;;  %7089 = vmatmul.msk.f32.gmra.mxu1 %vm134_vm0, %v2359_v27 }
 0x714   :  { %7076 = vmatmul.msk.f32.gmra.mxu0 %vm134_vm0, %v2330_v6 }
 0x71c   :  { %7077 = vmatmul.msk.f32.gmra.mxu0 %vm134_vm0, %v2331_v5 }
 0x724   :  { %7078 = vmatmul.msk.f32.gmra.mxu0 %vm134_vm0, %v2332_v49 }
 0x72c   :  { %7079 = vmatmul.msk.f32.gmra.mxu0 %vm134_vm0, %v2333_v52 }
 0x734   :  { %7080 = vmatmul.msk.f32.gmra.mxu0 %vm134_vm0, %v2334_v54 }
 0x73c   :  { %7081 = vmatmul.msk.f32.gmra.mxu0 %vm134_vm0, %v2335_v1 }
 0x74a   :  { %v2401_v4 = vpop.f32.mrf.mxu3 }
 0x751   :  { %v2531_v19 = vpop.f32.mrf.mxu1 }
 0x752   :  { %v2404_v46 = vpop.f32.mrf.mxu3 }
 0x759   :  { %v2534_v32 = vpop.f32.mrf.mxu1 }
 0x75a   :  { %v2407_v37 = vpop.f32.mrf.mxu3 }
 0x761   :  { %v2537_v8 = vpop.f32.mrf.mxu1 }
 0x762   :  { %v2410_v31 = vpop.f32.mrf.mxu3 }
 0x769   :  { %v2540_v21 = vpop.f32.mrf.mxu1 }
 0x76a   :  { %v2413_v56 = vpop.f32.mrf.mxu3 }
 0x771   :  { %v2543_v26 = vpop.f32.mrf.mxu1 }
 0x772   :  { %v2416_v48 = vpop.f32.mrf.mxu3 }
 0x779   :  { %v2546_v17 = vpop.f32.mrf.mxu1 }
 0x781   :  { %v2466_v63 = vpop.f32.mrf.mxu0 }
 0x782   :  { %v2467_v16 = vadd.f32 %v2466_v63, %v2401_v4 }
 0x784   :  { %v2555_v50 = vadd.f32 %v2531_v19, %v2467_v16  ;;  %v2549_v16 = vpop.f32.mrf.mxu1 }
 0x786   :  { %v2563_v12 = vadd.f32 %v2555_v50, %v11672_v29 }
 0x788   :  { %v2571_v41 = vmax.f32 %v2563_v12, 0.0 }
 0x789   :  { %v2469_v39 = vpop.f32.mrf.mxu0 }
 0x78a   :  { %v2470_v24 = vadd.f32 %v2469_v39, %v2404_v46  ;;  %v2579_v47 = vsel %vm134_vm0, %v2571_v41, 0.0 }
 0x78c   :  { %v2556_v33 = vadd.f32 %v2534_v32, %v2470_v24 }
 0x78e   :  { %v2564_v18 = vadd.f32 %v2556_v33, %v11672_v29 }
 0x790   :  { %v2572_v51 = vmax.f32 %v2564_v18, 0.0 }
 0x791   :  { %v2472_v40 = vpop.f32.mrf.mxu0 }
 0x792   :  { %v2473_v9 = vadd.f32 %v2472_v40, %v2407_v37  ;;  %v2580_v60 = vsel %vm134_vm0, %v2572_v51, 0.0 }
 0x793   :  { %v2581_v22 = vadd.f32 %v2580_v60, %v2579_v47 }
 0x794   :  { %v2557_v25 = vadd.f32 %v2537_v8, %v2473_v9  ;;  %v2419_v8 = vpop.f32.mrf.mxu3 }
 0x796   :  { %v2565_v13 = vadd.f32 %v2557_v25, %v11672_v29 }
 0x798   :  { %v2573_v27 = vmax.f32 %v2565_v13, 0.0 }
 0x799   :  { %v2475_v45 = vpop.f32.mrf.mxu0 }
 0x79a   :  { %v2476_v0 = vadd.f32 %v2475_v45, %v2410_v31  ;;  %v2582_v5 = vsel %vm134_vm0, %v2573_v27, 0.0 }
 0x79b   :  { %v2583_v53 = vadd.f32 %v2582_v5, %v2581_v22 }
 0x79c   :  { %v2558_v6 = vadd.f32 %v2540_v21, %v2476_v0  ;;  %v2422_v5 = vpop.f32.mrf.mxu3 }
 0x79e   :  { %v2566_v7 = vadd.f32 %v2558_v6, %v11672_v29 }
 0x7a0   :  { %v2574_v49 = vmax.f32 %v2566_v7, 0.0 }
 0x7a1   :  { %v2478_v23 = vpop.f32.mrf.mxu0 }
 0x7a2   :  { %v2584_v52 = vsel %vm134_vm0, %v2574_v49, 0.0  ;;  %v2479_v37 = vadd.f32 %v2478_v23, %v2413_v56 }
 0x7a3   :  { %v2585_v61 = vadd.f32 %v2584_v52, %v2583_v53 }
 0x7a4   :  { %v2559_v40 = vadd.f32 %v2543_v26, %v2479_v37 }
 0x7a5   :  { %v2586_v54 = vrot.slane %v2585_v61, 4 }
 0x7a7   :  { %v2587_v1 = vadd.f32 %v2586_v54, %v2585_v61  ;;  %v2552_v61 = vpop.f32.mrf.mxu1 }
 0x7a9   :  { %v2588_v4 = vrot.slane %v2587_v1, 2  ;;  %v2481_v19 = vpop.f32.mrf.mxu0 }
 0x7aa   :  { %v2482_v32 = vadd.f32 %v2481_v19, %v2416_v48 }
 0x7ab   :  { %v2589_v46 = vadd.f32 %v2588_v4, %v2587_v1 }
 0x7ac   :  { %v2560_v24 = vadd.f32 %v2546_v17, %v2482_v32 }
 0x7ad   :  { %v2590_v63 = vrot.slane %v2589_v46, 1 }
 0x7ae   :  { %v2568_v12 = vadd.f32 %v2560_v24, %v11672_v29 }
 0x7af   :  { %v2591_v39 = vadd.f32 %v2590_v63, %v2589_v46 }
 0x7b0   :  { %v2576_v47 = vmax.f32 %v2568_v12, 0.0 }
 0x7b1   :  { %v2605_v33 = vmul.f32 %v2591_v39, %v8315_v11  ;;  %v2484_v31 = vpop.f32.mrf.mxu0 }
 0x7b2   :  { %v2485_v50 = vadd.f32 %v2484_v31, %v2419_v8  ;;  %v2593_v17 = vsel %vm134_vm0, %v2576_v47, 0.0 }
 0x7b3   :  { %v9825_v9 = vsub.f32 %v2571_v41, %v2605_v33  ;;  %v9827_v21 = vsub.f32 %v2572_v51, %v2605_v33  ;;  %v9829_v18 = vsub.f32 %v2573_v27, %v2605_v33  ;;  %v9831_v25 = vsub.f32 %v2574_v49, %v2605_v33 }
 0x7b4   :  { %v2561_v13 = vadd.f32 %v2549_v16, %v2485_v50  ;;  %v2567_v41 = vadd.f32 %v2559_v40, %v11672_v29 }
 0x7b5   :  { %v2615_v45 = vmul.f32 %v9825_v9, %v9825_v9  ;;  %v2616_v0 = vmul.f32 %v9827_v21, %v9827_v21  ;;  %v2617_v56 = vmul.f32 %v9829_v18, %v9829_v18  ;;  %v2618_v27 = vmul.f32 %v9831_v25, %v9831_v25 }
 0x7b6   :  { %v2569_v51 = vadd.f32 %v2561_v13, %v11672_v29  ;;  %v2575_v53 = vmax.f32 %v2567_v41, 0.0 }
 0x7b7   :  { %v2623_v60 = vsel %vm134_vm0, %v2615_v45, 0.0  ;;  %v2624_v6 = vsel %vm134_vm0, %v2616_v0, 0.0  ;;  %v2626_v7 = vsel %vm134_vm0, %v2617_v56, 0.0  ;;  %v2628_v48 = vsel %vm134_vm0, %v2618_v27, 0.0 }
 0x7b8   :  { %v2625_v26 = vadd.f32 %v2624_v6, %v2623_v60  ;;  %v2577_v23 = vmax.f32 %v2569_v51, 0.0  ;;  %v2592_v19 = vsel %vm134_vm0, %v2575_v53, 0.0 }
 0x7b9   :  { %v2487_v22 = vpop.f32.mrf.mxu0  ;;  %v2594_v63 = vadd.f32 %v2593_v17, %v2592_v19 }
 0x7ba   :  { %v2627_v49 = vadd.f32 %v2626_v7, %v2625_v26  ;;  %v2488_v52 = vadd.f32 %v2487_v22, %v2422_v5  ;;  %v2595_v46 = vsel %vm134_vm0, %v2577_v23, 0.0 }
 0x7bb   :  { %v2596_v39 = vadd.f32 %v2595_v46, %v2594_v63 }
 0x7bc   :  { %v2629_v54 = vadd.f32 %v2628_v48, %v2627_v49  ;;  %v2562_v1 = vadd.f32 %v2552_v61, %v2488_v52 }
 0x7be   :  { %v2630_v4 = vrot.slane %v2629_v54, 4  ;;  %v2570_v32 = vadd.f32 %v2562_v1, %v11672_v29 }
 0x7c0   :  { %v2631_v37 = vadd.f32 %v2630_v4, %v2629_v54  ;;  %v2578_v8 = vmax.f32 %v2570_v32, 0.0 }
 0x7c2   :  { %v2632_v24 = vrot.slane %v2631_v37, 2  ;;  %v2597_v16 = vsel %vm134_vm0, %v2578_v8, 0.0 }
 0x7c3   :  { %v2598_v33 = vadd.f32 %v2597_v16, %v2596_v39 }
 0x7c4   :  { %v2633_v31 = vadd.f32 %v2632_v24, %v2631_v37 }
 0x7c5   :  { %v2599_v40 = vrot.slane %v2598_v33, 4 }
 0x7c6   :  { %v2634_v50 = vrot.slane %v2633_v31, 1 }
 0x7c7   :  { %v2600_v12 = vadd.f32 %v2599_v40, %v2598_v33 }
 0x7c8   :  { %v2635_v13 = vadd.f32 %v2634_v50, %v2633_v31 }
 0x7c9   :  { %v2601_v45 = vrot.slane %v2600_v12, 2 }
 0x7ca   :  { %v2649_v0 = vmul.f32 %v2635_v13, %v8315_v11 }
 0x7cb   :  { %v2602_v56 = vadd.f32 %v2601_v45, %v2600_v12 }
 0x7cc   :  { %v2651_v41 = vadd.f32 1e-05, %v2649_v0 }
 0x7cd   :  { %v2603_v51 = vrot.slane %v2602_v56, 1 }
 0x7ce   :  { %7346 = vrsqrt.f32 %v2651_v41  ;;  %vm2659_vm8 = vweird.f32 %v2651_v41 }
 0x7cf   :  { %v2604_v27 = vadd.f32 %v2603_v51, %v2602_v56 }
 0x7d1   :  { %v2606_v60 = vmul.f32 %v2604_v27, %v8315_v11  ;;  %v7691_v27 = vld [vmem:[%s11656_s1 + $0x58] sm:$0xff] }
 0x7d3   :  { %v9855_v6 = vsub.f32 %v2575_v53, %v2606_v60  ;;  %v9857_v26 = vsub.f32 %v2576_v47, %v2606_v60  ;;  %v9859_v5 = vsub.f32 %v2577_v23, %v2606_v60  ;;  %v9861_v7 = vsub.f32 %v2578_v8, %v2606_v60 }
 0x7d4   :  { %v7347_v22 = vpop.eup %7346 }
 0x7d5   :  { %v2654_v49 = vmul.f32 %v7347_v22, %v2651_v41  ;;  %v2619_v52 = vmul.f32 %v9855_v6, %v9855_v6  ;;  %v2620_v61 = vmul.f32 %v9857_v26, %v9857_v26  ;;  %v2621_v48 = vmul.f32 %v9859_v5, %v9859_v5 }
 0x7d6   :  { %v2622_v47 = vmul.f32 %v9861_v7, %v9861_v7  ;;  %vm2660_vm7 = vweird.f32 %v7347_v22 }
 0x7d7   :  { %v2655_v54 = vmul.f32 %v7347_v22, %v2654_v49  ;;  %v2636_v53 = vsel %vm134_vm0, %v2619_v52, 0.0  ;;  %v2637_v23 = vsel %vm134_vm0, %v2620_v61, 0.0  ;;  %v2639_v4 = vsel %vm134_vm0, %v2621_v48, 0.0  ;;  %vm2661_vm9 = vmor %vm2659_vm8, %vm2660_vm7  ;;  %v7692_v49 = vld [vmem:[%s11656_s1 + $0x50] sm:$0xff] }
 0x7d8   :  { %v2638_v17 = vadd.f32 %v2637_v23, %v2636_v53  ;;  %v2641_v32 = vsel %vm134_vm0, %v2622_v47, 0.0  ;;  %vm6854_vm8 = vcmask 1041408  }
 0x7d9   :  { %v2656_v1 = vmul.f32 0.5, %v2655_v54  ;;  %v7693_v54 = vld [vmem:[%s11656_s1 + $0x48] sm:$0xff] }
 0x7da   :  { %v2640_v19 = vadd.f32 %v2639_v4, %v2638_v17  ;;  %v7695_v17 = vld [vmem:[%s11656_s1 + $0x70] sm:$0xff]  ;;  %v7697_v4 = vld [vmem:[%s11656_s1 + $0x68] sm:$0xff] }
 0x7db   :  { %v2657_v46 = vsub.f32 1.5, %v2656_v1  ;;  %v7696_v1 = vld [vmem:[%s11656_s1 + $0x40] sm:$0xff] }
 0x7dc   :  { %v2642_v63 = vadd.f32 %v2641_v32, %v2640_v19  ;;  %v9935_v19 = vld [vmem:[%s11611_s12 + $0x8] sm:$0xff] }
 0x7dd   :  { %v2658_v37 = vmul.f32 %v7347_v22, %v2657_v46 }
 0x7de   :  { %v2643_v8 = vrot.slane %v2642_v63, 4 }
 0x7df   :  { %v2662_v39 = vsel %vm2661_vm9, %v7347_v22, %v2658_v37  ;;  %vm6864_vm9 = vcmask 0  }
 0x7e0   :  { %v2673_v24 = vmul.f32 %v2662_v39, %v9825_v9  ;;  %v2674_v16 = vmul.f32 %v2662_v39, %v9827_v21  ;;  %v2675_v33 = vmul.f32 %v2662_v39, %v9829_v18  ;;  %v2644_v31 = vadd.f32 %v2643_v8, %v2642_v63  ;;  %v7699_v63 = vld [vmem:[%s11656_s1 + $0x60] sm:$0xff] }
 0x7e1   :  { %v2676_v9 = vmul.f32 %v2662_v39, %v9831_v25 }
 0x7e2   :  { %v2682_v40 = vmul.f32 %v2674_v16, %v8431_v15  ;;  %v2681_v50 = vmul.f32 %v2673_v24, %v8408_v55  ;;  %v2683_v12 = vmul.f32 %v2675_v33, %v8446_v30  ;;  %v2645_v13 = vrot.slane %v2644_v31, 2  ;;  %v9950_v16 = vld [vmem:[%s11611_s12 + $0x10] sm:$0xff] }
 0x7e3   :  { %v2684_v52 = vmul.f32 %v2676_v9, %v8452_v57 }
 0x7e4   :  { %v9882_v45 = vadd.f32 %v2682_v40, %v8438_v10  ;;  %v9885_v0 = vadd.f32 %v2681_v50, %v8412_v44  ;;  %v2646_v56 = vadd.f32 %v2645_v13, %v2644_v31  ;;  %v9893_v41 = vadd.f32 %v2683_v12, %v8460_v20 }
 0x7e5   :  { %v9917_v53 = vadd.f32 %v2684_v52, %v8487_v38 }
 0x7e6   :  { %v2721_v21 = vrot.slane %v9885_v0, 1  ;;  %7090 = vmatmul.msk.f32.vlgmr.msrb.gmra.mxu2 %vm134_vm0, %v9885_v0  ;;  %v2722_v18 = vrot.slane %v9882_v45, 1  ;;  %v2647_v51 = vrot.slane %v2646_v56, 1  ;;  %v2723_v61 = vrot.slane %v9893_v41, 1 }
 0x7e7   :  { %3429 = vmatpush.msrb.mxu2 %v7691_v27  ;;  %v2724_v32 = vrot.slane %v9917_v53, 1 }
 0x7e8   :  { %v2735_v25 = vsel %vm235_vm2, %v2721_v21, %v2722_v18  ;;  %v2648_v60 = vadd.f32 %v2647_v51, %v2646_v56  ;;  %v2734_v23 = vsel %vm235_vm2, %v2722_v18, %v2723_v61 }
 0x7e9   :  { %v2737_v22 = vmul.f32 %v9647_v35, %v2735_v25  ;;  %3430 = vmatpush.msrb.mxu2 %v7692_v49  ;;  %v7694_v35 = vld [vmem:[%s11656_s1 + $0x78] sm:$0xff]  ;;  %v2738_v46 = vmul.f32 %v9935_v19, %v2734_v23  ;;  %v2733_v39 = vsel %vm235_vm2, %v2723_v61, %v2724_v32 }
 0x7ea   :  { %v2650_v48 = vmul.f32 %v2648_v60, %v8315_v11  ;;  %v2739_v33 = vmul.f32 %v9950_v16, %v2733_v39  ;;  %v2699_v39 = vrot.slane %v9893_v41, 7 }
 0x7eb   :  { %7106 = vmatmul.msk.f32.vlgmr.msra.gmra.mxu0 %vm134_vm0, %v2737_v22  ;;  %3431 = vmatpush.msrb.mxu2 %v7693_v54  ;;  %v2697_v22 = vrot.slane %v9885_v0, 7  ;;  %v9987_v54 = vld [vmem:[%s11611_s12 + $0x18] sm:$0xff] }
 0x7ec   :  { %3749 = vmatpush.msra.mxu0 %v7694_v35  ;;  %v2652_v47 = vadd.f32 1e-05, %v2650_v48 }
 0x7ed   :  { %3432 = vmatpush.msrb.mxu2 %v7696_v1 }
 0x7ee   :  { %7091 = vmatmul.msk.f32.gmra.mxu2 %vm134_vm0, %v9882_v45  ;;  %3750 = vmatpush.msra.mxu0 %v7695_v17  ;;  %7348 = vrsqrt.f32 %v2652_v47  ;;  %vm2669_vm13 = vweird.f32 %v2652_v47 }
 0x7f0   :  { %3751 = vmatpush.msra.mxu0 %v7697_v4  ;;  %v7703_v4 = vld [vmem:[%s11656_s1 + $0x90] sm:$0xff] }
 0x7f2   :  { %3752 = vmatpush.msra.mxu0 %v7699_v63  ;;  %v10015_v63 = vld [vmem:[%s11611_s12 + $0x20] sm:$0xff] }
 0x7f3   :  { %7107 = vmatmul.msk.f32.gmra.mxu0 %vm134_vm0, %v2738_v46  ;;  %v7704_v46 = vld [vmem:[%s11656_s1 + $0x88] sm:$0xff] }
 0x7f4   :  { %v7349_v37 = vpop.eup %7348 }
 0x7f5   :  { %v2664_v8 = vmul.f32 %v7349_v37, %v2652_v47  ;;  %vm2670_vm12 = vweird.f32 %v7349_v37 }
 0x7f6   :  { %7092 = vmatmul.msk.f32.gmra.mxu2 %vm134_vm0, %v9893_v41  ;;  %vm2671_vm14 = vmor %vm2669_vm13, %vm2670_vm12  ;;  %v10033_v41 = vld [vmem:[%s11611_s12 + $0x28] sm:$0xff] }
 0x7f7   :  { %v2665_v24 = vmul.f32 %v7349_v37, %v2664_v8 }
 0x7f9   :  { %v2666_v31 = vmul.f32 0.5, %v2665_v24  ;;  %v7706_v24 = vld [vmem:[%s11656_s1 + $0x80] sm:$0xff] }
 0x7fb   :  { %7108 = vmatmul.msk.f32.gmra.mxu0 %vm134_vm0, %v2739_v33  ;;  %v2667_v40 = vsub.f32 1.5, %v2666_v31 }
 0x7fd   :  { %v2668_v50 = vmul.f32 %v7349_v37, %v2667_v40 }
 0x7fe   :  { %7093 = vmatmul.msk.f32.gmra.mxu2 %vm134_vm0, %v9917_v53 }
 0x7ff   :  { %v2672_v12 = vsel %vm2671_vm14, %v7349_v37, %v2668_v50  ;;  %v2700_v50 = vrot.slane %v9917_v53, 7  ;;  %v10050_v53 = vld [vmem:[%s11611_s12 + $0x30] sm:$0xff] }
 0x800   :  { %v2680_v13 = vmul.f32 %v2672_v12, %v9861_v7  ;;  %v2677_v56 = vmul.f32 %v2672_v12, %v9855_v6  ;;  %v2678_v9 = vmul.f32 %v2672_v12, %v9857_v26  ;;  %v2679_v49 = vmul.f32 %v2672_v12, %v9859_v5 }
 0x801   :  { %v2698_v5 = vrot.slane %v9882_v45, 7 }
 0x802   :  { %v2688_v18 = vmul.f32 %v2680_v13, %v8452_v57  ;;  %v2685_v51 = vmul.f32 %v2677_v56, %v8408_v55  ;;  %v2686_v27 = vmul.f32 %v2678_v9, %v8431_v15  ;;  %v2687_v23 = vmul.f32 %v2679_v49, %v8446_v30 }
 0x803   :  { %v2711_v17 = vsel %vm210_vm1, %v2697_v22, %v2698_v5 }
 0x804   :  { %v9963_v25 = vadd.f32 %v2688_v18, %v8487_v38  ;;  %v9966_v60 = vadd.f32 %v2685_v51, %v8412_v44  ;;  %v9974_v26 = vadd.f32 %v2686_v27, %v8438_v10  ;;  %v2695_v1 = vadd.f32 %v2687_v23, %v8460_v20 }
 0x806   :  { %v2704_v7 = vrot.slane %v9963_v25, 7  ;;  %v2725_v6 = vrot.slane %v9966_v60, 1  ;;  %7094 = vmatmul.msk.f32.gmra.mxu2 %vm134_vm0, %v9966_v60  ;;  %v2726_v47 = vrot.slane %v9974_v26, 1  ;;  %v2727_v8 = vrot.slane %v2695_v1, 1 }
 0x807   :  { %v2728_v12 = vrot.slane %v9963_v25, 1  ;;  %v2701_v18 = vrot.slane %v9966_v60, 7  ;;  %v2703_v49 = vrot.slane %v2695_v1, 7 }
 0x808   :  { %v2712_v52 = vsel %vm210_vm1, %v2704_v7, %v2697_v22  ;;  %v2732_v61 = vsel %vm235_vm2, %v2724_v32, %v2725_v6  ;;  %v2731_v45 = vsel %vm235_vm2, %v2725_v6, %v2726_v47  ;;  %v2714_v32 = vmul.f32 %v9748_v14, %v2711_v17  ;;  %v10066_v22 = vld [vmem:[%s11611_s12 + $0x38] sm:$0xff] }
 0x809   :  { %v2713_v48 = vmul.f32 %v9723_v42, %v2712_v52  ;;  %v2740_v35 = vmul.f32 %v9987_v54, %v2732_v61  ;;  %v7702_v42 = vld [vmem:[%s11656_s1 + $0x98] sm:$0xff]  ;;  %v2741_v37 = vmul.f32 %v10015_v63, %v2731_v45  ;;  %v2710_v14 = vsel %vm210_vm1, %v2698_v5, %v2699_v39 }
 0x80a   :  { %v2730_v33 = vsel %vm235_vm2, %v2726_v47, %v2727_v8  ;;  %v2715_v31 = vmul.f32 %v9763_v36, %v2710_v14  ;;  %v2709_v36 = vsel %vm210_vm1, %v2699_v39, %v2700_v50  ;;  %v2729_v13 = vsel %vm235_vm2, %v2727_v8, %v2728_v12 }
 0x80b   :  { %7098 = vmatmul.msk.f32.vlgmr.msra.gmra.mxu3 %vm134_vm0, %v2713_v48  ;;  %7109 = vmatmul.msk.f32.gmra.mxu0 %vm134_vm0, %v2740_v35  ;;  %v2742_v40 = vmul.f32 %v10033_v41, %v2730_v33  ;;  %v2716_v56 = vmul.f32 %v9773_v3, %v2709_v36  ;;  %v2743_v9 = vmul.f32 %v10050_v53, %v2729_v13  ;;  %v2702_v6 = vrot.slane %v9974_v26, 7 }
 0x80c   :  { %3684 = vmatpush.msra.mxu3 %v7702_v42  ;;  %v2708_v51 = vsel %vm210_vm1, %v2700_v50, %v2701_v18  ;;  %v2736_v3 = vsel %vm235_vm2, %v2728_v12, %v2721_v21  ;;  %v10117_v50 = vld [vmem:[%s11613_s14] sm:$0xff] }
 0x80d   :  { %v2717_v27 = vmul.f32 %v9783_v58, %v2708_v51  ;;  %v2744_v60 = vmul.f32 %v10066_v22, %v2736_v3  ;;  %v2707_v0 = vsel %vm210_vm1, %v2701_v18, %v2702_v6  ;;  %v2706_v58 = vsel %vm210_vm1, %v2702_v6, %v2703_v49  ;;  %v7716_v18 = vld [vmem:[%s11656_s1 + $0xd0] sm:$0xff] }
 0x80e   :  { %7095 = vmatmul.msk.f32.gmra.mxu2 %vm134_vm0, %v9974_v26  ;;  %3685 = vmatpush.msra.mxu3 %v7703_v4  ;;  %v2718_v21 = vmul.f32 %v9793_v43, %v2707_v0  ;;  %v2719_v52 = vmul.f32 %v9803_v34, %v2706_v58  ;;  %v2705_v26 = vsel %vm210_vm1, %v2703_v49, %v2704_v7  ;;  %v10141_v0 = vld [vmem:[%s11613_s14 + $0x8] sm:$0xff]  ;;  %v7719_v58 = vld [vmem:[%s11656_s1 + $0xc0] sm:$0xff] }
 0x80f   :  { %v2720_v61 = vmul.f32 %v9812_v62, %v2705_v26  ;;  %v7710_v62 = vld [vmem:[%s11656_s1 + $0xb8] sm:$0xff] }
 0x810   :  { %3686 = vmatpush.msra.mxu3 %v7704_v46  ;;  %v7712_v46 = vld [vmem:[%s11656_s1 + $0xa8] sm:$0xff] }
 0x812   :  { %3687 = vmatpush.msra.mxu3 %v7706_v24 }
 0x813   :  { %7099 = vmatmul.msk.f32.gmra.mxu3 %vm134_vm0, %v2714_v32  ;;  %7110 = vmatmul.msk.f32.gmra.mxu0 %vm134_vm0, %v2741_v37  ;;  %v7713_v37 = vld [vmem:[%s11656_s1 + $0xa0] sm:$0xff] }
 0x816   :  { %7096 = vmatmul.msk.f32.gmra.mxu2 %vm134_vm0, %v2695_v1  ;;  %v7711_v1 = vld [vmem:[%s11656_s1 + $0xb0] sm:$0xff] }
 0x81b   :  { %7100 = vmatmul.msk.f32.gmra.mxu3 %vm134_vm0, %v2715_v31  ;;  %7111 = vmatmul.msk.f32.gmra.mxu0 %vm134_vm0, %v2742_v40 }
 0x81e   :  { %7097 = vmatmul.msk.f32.gmra.mxu2 %vm134_vm0, %v9963_v25 }
 0x823   :  { %7101 = vmatmul.msk.f32.gmra.mxu3 %vm134_vm0, %v2716_v56  ;;  %7112 = vmatmul.msk.f32.gmra.mxu0 %vm134_vm0, %v2743_v9  ;;  %v7715_v56 = vld [vmem:[%s11656_s1 + $0xd8] sm:$0xff] }
 0x82b   :  { %7102 = vmatmul.msk.f32.gmra.mxu3 %vm134_vm0, %v2717_v27  ;;  %7113 = vmatmul.msk.f32.gmra.mxu0 %vm134_vm0, %v2744_v60  ;;  %v7717_v60 = vld [vmem:[%s11656_s1 + $0xc8] sm:$0xff] }
 0x833   :  { %7103 = vmatmul.msk.f32.gmra.mxu3 %vm134_vm0, %v2718_v21 }
 0x83b   :  { %7104 = vmatmul.msk.f32.gmra.mxu3 %vm134_vm0, %v2719_v52 }
 0x843   :  { %7105 = vmatmul.msk.f32.gmra.mxu3 %vm134_vm0, %v2720_v61 }
 0x868   :  { %v2916_v48 = vpop.f32.mrf.mxu0 }
 0x869   :  { %v2786_v43 = vpop.f32.mrf.mxu2 }
 0x870   :  { %v2919_v47 = vpop.f32.mrf.mxu0 }
 0x871   :  { %v2789_v35 = vpop.f32.mrf.mxu2 }
 0x878   :  { %v2922_v45 = vpop.f32.mrf.mxu0 }
 0x879   :  { %v2792_v17 = vpop.f32.mrf.mxu2 }
 0x881   :  { %v2795_v24 = vpop.f32.mrf.mxu2 }
 0x888   :  { %v2925_v40 = vpop.f32.mrf.mxu0 }
 0x889   :  { %v2798_v6 = vpop.f32.mrf.mxu2 }
 0x88e   :  { %v2851_v5 = vpop.f32.mrf.mxu3 }
 0x88f   :  { %v2852_v23 = vadd.f32 %v2851_v5, %v2786_v43 }
 0x890   :  { %v2928_v52 = vpop.f32.mrf.mxu0 }
 0x891   :  { %v2940_v42 = vadd.f32 %v2916_v48, %v2852_v23 }
 0x893   :  { %v10087_v34 = vadd.f32 %v2940_v42, %v8645_v2  ;;  %v2801_v42 = vpop.f32.mrf.mxu2 }
 0x895   :  { %7114 = vmatmul.msk.f32.vlgmr.msra.gmra.mxu1 %vm134_vm0, %v10087_v34  ;;  %v2980_v8 = vrot.slane %v10087_v34, 2 }
 0x896   :  { %v2854_v25 = vpop.f32.mrf.mxu3  ;;  %3814 = vmatpush.msra.mxu1 %v7710_v62 }
 0x897   :  { %v2855_v7 = vadd.f32 %v2854_v25, %v2789_v35 }
 0x898   :  { %3815 = vmatpush.msra.mxu1 %v7711_v1  ;;  %v2931_v25 = vpop.f32.mrf.mxu0 }
 0x899   :  { %v2941_v4 = vadd.f32 %v2919_v47, %v2855_v7  ;;  %v10159_v47 = vld [vmem:[%s11613_s14 + $0x10] sm:$0xff] }
 0x89a   :  { %3816 = vmatpush.msra.mxu1 %v7712_v46 }
 0x89b   :  { %v10101_v32 = vadd.f32 %v2941_v4, %v8645_v2  ;;  %v10174_v4 = vld [vmem:[%s11613_s14 + $0x18] sm:$0xff] }
 0x89c   :  { %3817 = vmatpush.msra.mxu1 %v7713_v37 }
 0x89d   :  { %v2981_v39 = vrot.slane %v10101_v32, 2  ;;  %7115 = vmatmul.msk.f32.gmra.mxu1 %vm134_vm0, %v10101_v32 }
 0x89e   :  { %v2857_v14 = vpop.f32.mrf.mxu3 }
 0x89f   :  { %v2994_v33 = vsel %vm959_vm10, %v2980_v8, %v2981_v39  ;;  %v2858_v31 = vadd.f32 %v2857_v14, %v2792_v17 }
 0x8a0   :  { %v2996_v12 = vmul.f32 %v10117_v50, %v2994_v33  ;;  %v2934_v33 = vpop.f32.mrf.mxu0 }
 0x8a1   :  { %v2942_v36 = vadd.f32 %v2922_v45, %v2858_v31 }
 0x8a2   :  { %7130 = vmatmul.msk.f32.vlgmr.msrb.gmra.mxu3 %vm134_vm0, %v2996_v12 }
 0x8a3   :  { %v10122_v13 = vadd.f32 %v2942_v36, %v8645_v2  ;;  %4008 = vmatpush.msrb.mxu3 %v7715_v56  ;;  %v10189_v36 = vld [vmem:[%s11613_s14 + $0x20] sm:$0xff] }
 0x8a5   :  { %v2982_v9 = vrot.slane %v10122_v13, 2  ;;  %7116 = vmatmul.msk.f32.gmra.mxu1 %vm134_vm0, %v10122_v13  ;;  %4009 = vmatpush.msrb.mxu3 %v7716_v18 }
 0x8a6   :  { %v2860_v51 = vpop.f32.mrf.mxu3 }
 0x8a7   :  { %v2861_v3 = vadd.f32 %v2860_v51, %v2795_v24  ;;  %v2993_v27 = vsel %vm959_vm10, %v2981_v39, %v2982_v9  ;;  %4010 = vmatpush.msrb.mxu3 %v7717_v60  ;;  %v2804_v24 = vpop.f32.mrf.mxu2 }
 0x8a8   :  { %v2997_v21 = vmul.f32 %v10141_v0, %v2993_v27 }
 0x8a9   :  { %v2943_v49 = vadd.f32 %v2925_v40, %v2861_v3  ;;  %4011 = vmatpush.msrb.mxu3 %v7719_v58 }
 0x8aa   :  { %7131 = vmatmul.msk.f32.gmra.mxu3 %vm134_vm0, %v2997_v21  ;;  %v2937_v21 = vpop.f32.mrf.mxu0 }
 0x8ab   :  { %v10149_v26 = vadd.f32 %v2943_v49, %v8645_v2  ;;  %v10204_v49 = vld [vmem:[%s11613_s14 + $0x28] sm:$0xff] }
 0x8ac   :  { %11673 = vst [vmem:[#allocation6_spill] sm:$0xff] %v10204_v49 }
 0x8ad   :  { %v2983_v61 = vrot.slane %v10149_v26, 2  ;;  %7117 = vmatmul.msk.f32.gmra.mxu1 %vm134_vm0, %v10149_v26 }
 0x8ae   :  { %v2863_v43 = vpop.f32.mrf.mxu3 }
 0x8af   :  { %v2864_v48 = vadd.f32 %v2863_v43, %v2798_v6  ;;  %v2992_v35 = vsel %vm959_vm10, %v2982_v9, %v2983_v61  ;;  %v2807_v3 = vpop.f32.mrf.mxu2  ;;  %v2956_v43 = vrot.slane %v10087_v34, 6 }
 0x8b0   :  { %v2998_v5 = vmul.f32 %v10159_v47, %v2992_v35 }
 0x8b1   :  { %v2944_v23 = vadd.f32 %v2928_v52, %v2864_v48 }
 0x8b2   :  { %7132 = vmatmul.msk.f32.gmra.mxu3 %vm134_vm0, %v2998_v5 }
 0x8b3   :  { %v10164_v17 = vadd.f32 %v2944_v23, %v8645_v2 }
 0x8b5   :  { %v2984_v62 = vrot.slane %v10164_v17, 2  ;;  %7118 = vmatmul.msk.f32.gmra.mxu1 %vm134_vm0, %v10164_v17 }
 0x8b6   :  { %v2866_v7 = vpop.f32.mrf.mxu3 }
 0x8b7   :  { %v2867_v45 = vadd.f32 %v2866_v7, %v2801_v42  ;;  %v2991_v1 = vsel %vm959_vm10, %v2983_v61, %v2984_v62  ;;  %v10218_v42 = vld [vmem:[%s11612_s13] sm:$0xff] }
 0x8b8   :  { %v2999_v46 = vmul.f32 %v10174_v4, %v2991_v1  ;;  %11674 = vst [vmem:[#allocation7_spill] sm:$0xff] %v10218_v42  ;;  %v7726_v1 = vld [vmem:[%s11656_s1 + $0xf8] sm:$0xff] }
 0x8b9   :  { %v2945_v37 = vadd.f32 %v2931_v25, %v2867_v45  ;;  %v2957_v45 = vrot.slane %v10101_v32, 6  ;;  %v7727_v32 = vld [vmem:[%s11656_s1 + $0xf0] sm:$0xff] }
 0x8ba   :  { %7133 = vmatmul.msk.f32.gmra.mxu3 %vm134_vm0, %v2999_v46 }
 0x8bb   :  { %v10179_v39 = vadd.f32 %v2945_v37, %v8645_v2  ;;  %v2970_v46 = vsel %vm934_vm11, %v2956_v43, %v2957_v45 }
 0x8bd   :  { %v2985_v14 = vrot.slane %v10179_v39, 2  ;;  %7119 = vmatmul.msk.f32.gmra.mxu1 %vm134_vm0, %v10179_v39 }
 0x8be   :  { %v2869_v31 = vpop.f32.mrf.mxu3 }
 0x8bf   :  { %v2870_v40 = vadd.f32 %v2869_v31, %v2804_v24  ;;  %v2990_v12 = vsel %vm959_vm10, %v2984_v62, %v2985_v14  ;;  %v10224_v62 = vld [vmem:[%s11613_s14 + $0x30] sm:$0xff]  ;;  %v7728_v24 = vld [vmem:[%s11656_s1 + $0xe8] sm:$0xff]  ;;  %v2958_v31 = vrot.slane %v10122_v13, 6  ;;  %v2959_v13 = vrot.slane %v10149_v26, 6  ;;  %v10288_v26 = vld [vmem:[%s11612_s13 + $0x20] sm:$0xff] }
 0x8c0   :  { %v3000_v56 = vmul.f32 %v10189_v36, %v2990_v12  ;;  %11675 = vst [vmem:[#allocation8_spill] sm:$0xff] %v10224_v62 }
 0x8c1   :  { %v2946_v9 = vadd.f32 %v2934_v33, %v2870_v40  ;;  %v7731_v40 = vld [vmem:[%s11656_s1 + $0xe0] sm:$0xff]  ;;  %v2969_v12 = vsel %vm934_vm11, %v2957_v45, %v2958_v31  ;;  %11680 = vst [vmem:[#allocation13_spill] sm:$0xff] %v10288_v26 }
 0x8c2   :  { %7134 = vmatmul.msk.f32.gmra.mxu3 %vm134_vm0, %v3000_v56  ;;  %v10268_v56 = vld [vmem:[%s11612_s13 + $0x10] sm:$0xff] }
 0x8c3   :  { %v10194_v18 = vadd.f32 %v2946_v9, %v8645_v2  ;;  %11678 = vst [vmem:[#allocation11_spill] sm:$0xff] %v10268_v56  ;;  %v2974_v9 = vmul.f32 %v10268_v56, %v2969_v12 }
 0x8c5   :  { %v2986_v51 = vrot.slane %v10194_v18, 2  ;;  %7120 = vmatmul.msk.f32.gmra.mxu1 %vm134_vm0, %v10194_v18 }
 0x8c6   :  { %v2872_v27 = vpop.f32.mrf.mxu3 }
 0x8c7   :  { %v2873_v60 = vadd.f32 %v2872_v27, %v2807_v3  ;;  %v2989_v6 = vsel %vm959_vm10, %v2985_v14, %v2986_v51  ;;  %v10248_v14 = vld [vmem:[%s11612_s13 + $0x8] sm:$0xff]  ;;  %v10278_v3 = vld [vmem:[%s11612_s13 + $0x18] sm:$0xff] }
 0x8c8   :  { %v3001_v58 = vmul.f32 %v10204_v49, %v2989_v6  ;;  %11676 = vst [vmem:[#allocation9_spill] sm:$0xff] %v10248_v14  ;;  %v2973_v34 = vmul.f32 %v10248_v14, %v2970_v46 }
 0x8c9   :  { %v2947_v52 = vadd.f32 %v2937_v21, %v2873_v60  ;;  %11679 = vst [vmem:[#allocation12_spill] sm:$0xff] %v10278_v3  ;;  %v2960_v60 = vrot.slane %v10164_v17, 6  ;;  %v10298_v17 = vld [vmem:[%s11612_s13 + $0x28] sm:$0xff] }
 0x8ca   :  { %7135 = vmatmul.msk.f32.gmra.mxu3 %vm134_vm0, %v3001_v58  ;;  %v2961_v58 = vrot.slane %v10179_v39, 6  ;;  %11681 = vst [vmem:[#allocation14_spill] sm:$0xff] %v10298_v17  ;;  %v10308_v39 = vld [vmem:[%s11612_s13 + $0x30] sm:$0xff] }
 0x8cb   :  { %v2955_v61 = vadd.f32 %v2947_v52, %v8645_v2  ;;  %v2967_v6 = vsel %vm934_vm11, %v2959_v13, %v2960_v60  ;;  %11682 = vst [vmem:[#allocation15_spill] sm:$0xff] %v10308_v39 }
 0x8cc   :  { %v2976_v21 = vmul.f32 %v10288_v26, %v2967_v6  ;;  %v2966_v52 = vsel %vm934_vm11, %v2960_v60, %v2961_v58  ;;  %v7741_v60 = vld [vmem:[%s11656_s1 + $0x100] sm:$0xff] }
 0x8cd   :  { %v2963_v48 = vrot.slane %v2955_v61, 6  ;;  %v2987_v35 = vrot.slane %v2955_v61, 2  ;;  %7121 = vmatmul.msk.f32.gmra.mxu1 %vm134_vm0, %v2955_v61  ;;  %v2977_v61 = vmul.f32 %v10298_v17, %v2966_v52 }
 0x8cf   :  { %v2971_v5 = vsel %vm934_vm11, %v2963_v48, %v2956_v43  ;;  %v2988_v23 = vsel %vm959_vm10, %v2986_v51, %v2987_v35  ;;  %v2995_v37 = vsel %vm959_vm10, %v2987_v35, %v2980_v8  ;;  %v10254_v8 = vld [vmem:[%s11613_s14 + $0x38] sm:$0xff]  ;;  %v2968_v51 = vsel %vm934_vm11, %v2958_v31, %v2959_v13 }
 0x8d0   :  { %v2972_v25 = vmul.f32 %v10218_v42, %v2971_v5  ;;  %v3002_v7 = vmul.f32 %v10224_v62, %v2988_v23  ;;  %11677 = vst [vmem:[#allocation10_spill] sm:$0xff] %v10254_v8  ;;  %v3003_v33 = vmul.f32 %v10254_v8, %v2995_v37  ;;  %v2975_v27 = vmul.f32 %v10278_v3, %v2968_v51  ;;  %v7740_v51 = vld [vmem:[%s11656_s1 + $0x108] sm:$0xff] }
 0x8d1   :  { %v2962_v43 = vrot.slane %v10194_v18, 6  ;;  %v10317_v18 = vld [vmem:[%s11612_s13 + $0x38] sm:$0xff] }
 0x8d2   :  { %7122 = vmatmul.msk.f32.vlgmr.msra.gmra.mxu2 %vm134_vm0, %v2972_v25  ;;  %7136 = vmatmul.msk.f32.gmra.mxu3 %vm134_vm0, %v3002_v7  ;;  %11683 = vst [vmem:[#allocation16_spill] sm:$0xff] %v10317_v18 }
 0x8d3   :  { %3943 = vmatpush.msra.mxu2 %v7726_v1  ;;  %v2965_v35 = vsel %vm934_vm11, %v2961_v58, %v2962_v43  ;;  %v2964_v23 = vsel %vm934_vm11, %v2962_v43, %v2963_v48 }
 0x8d4   :  { %v2978_v5 = vmul.f32 %v10308_v39, %v2965_v35  ;;  %v2979_v25 = vmul.f32 %v10317_v18, %v2964_v23 }
 0x8d5   :  { %3944 = vmatpush.msra.mxu2 %v7727_v32 }
 0x8d7   :  { %3945 = vmatpush.msra.mxu2 %v7728_v24 }
 0x8d9   :  { %3946 = vmatpush.msra.mxu2 %v7731_v40  ;;  %v7738_v40 = vld [vmem:[%s11656_s1 + $0x118] sm:$0xff] }
 0x8da   :  { %7123 = vmatmul.msk.f32.gmra.mxu2 %vm134_vm0, %v2973_v34  ;;  %7137 = vmatmul.msk.f32.gmra.mxu3 %vm134_vm0, %v3003_v33 }
 0x8e2   :  { %7124 = vmatmul.msk.f32.gmra.mxu2 %vm134_vm0, %v2974_v9  ;;  %v7739_v9 = vld [vmem:[%s11656_s1 + $0x110] sm:$0xff] }
 0x8ea   :  { %7125 = vmatmul.msk.f32.gmra.mxu2 %vm134_vm0, %v2975_v27 }
 0x8f2   :  { %7126 = vmatmul.msk.f32.gmra.mxu2 %vm134_vm0, %v2976_v21 }
 0x8fa   :  { %7127 = vmatmul.msk.f32.gmra.mxu2 %vm134_vm0, %v2977_v61 }
 0x902   :  { %7128 = vmatmul.msk.f32.gmra.mxu2 %vm134_vm0, %v2978_v5  ;;  %v10352_v5 = vld [vmem:[%s11611_s12] sm:$0xff]  ;;  %s6873_s12 = sshll.u32 %s11622_s23, 4  ;;  %s6874_s12 = int_to_ptr.hbm [resolvable:$true] %s6873_s12 }
 0x90a   :  { %7129 = vmatmul.msk.f32.gmra.mxu2 %vm134_vm0, %v2979_v25 }
 0x912   :  { %v3045_v7 = vpop.f32.mrf.mxu1 }
 0x91a   :  { %v3048_v1 = vpop.f32.mrf.mxu1 }
 0x922   :  { %v3051_v48 = vpop.f32.mrf.mxu1 }
 0x925   :  { %v3175_v45 = vpop.f32.mrf.mxu3 }
 0x92a   :  { %v3054_v58 = vpop.f32.mrf.mxu1 }
 0x92d   :  { %v3178_v46 = vpop.f32.mrf.mxu3 }
 0x935   :  { %v3181_v33 = vpop.f32.mrf.mxu3 }
 0x93d   :  { %v3184_v35 = vpop.f32.mrf.mxu3 }
 0x955   :  { %v3110_v37 = vpop.f32.mrf.mxu2 }
 0x956   :  { %v3111_v32 = vadd.f32 %v3110_v37, %v3045_v7 }
 0x958   :  { %v3199_v24 = vadd.f32 %v3175_v45, %v3111_v32  ;;  %v3057_v32 = vpop.f32.mrf.mxu1 }
 0x95a   :  { %v10322_v34 = vadd.f32 %v3199_v24, %v8819_v59 }
 0x95c   :  { %7138 = vmatmul.msk.f32.vlgmr.msrb.gmra.mxu0 %vm134_vm0, %v10322_v34  ;;  %v3239_v6 = vrot.slane %v10322_v34, 1 }
 0x95d   :  { %v3113_v31 = vpop.f32.mrf.mxu2  ;;  %4073 = vmatpush.msrb.mxu0 %v7738_v40 }
 0x95e   :  { %v3114_v12 = vadd.f32 %v3113_v31, %v3048_v1 }
 0x95f   :  { %4074 = vmatpush.msrb.mxu0 %v7739_v9 }
 0x960   :  { %v3200_v13 = vadd.f32 %v3178_v46, %v3114_v12 }
 0x961   :  { %4075 = vmatpush.msrb.mxu0 %v7740_v51 }
 0x962   :  { %v10336_v27 = vadd.f32 %v3200_v13, %v8819_v59 }
 0x963   :  { %4076 = vmatpush.msrb.mxu0 %v7741_v60 }
 0x964   :  { %v3240_v21 = vrot.slane %v10336_v27, 1  ;;  %7139 = vmatmul.msk.f32.gmra.mxu0 %vm134_vm0, %v10336_v27 }
 0x965   :  { %v3116_v52 = vpop.f32.mrf.mxu2 }
 0x966   :  { %v3253_v61 = vsel %vm235_vm2, %v3239_v6, %v3240_v21  ;;  %v3117_v43 = vadd.f32 %v3116_v52, %v3051_v48 }
 0x967   :  { %v3255_v23 = vmul.f32 %v10352_v5, %v3253_v61 }
 0x968   :  { %v3201_v25 = vadd.f32 %v3181_v33, %v3117_v43  ;;  %v3187_v33 = vpop.f32.mrf.mxu3 }
 0x969   :  { %7154 = vmatmul.msk.f32.vlgmr.msrb.gmra.mxu2 %vm134_vm0, %v3255_v23 }
 0x96a   :  { %v10357_v7 = vadd.f32 %v3201_v25, %v8819_v59 }
 0x96c   :  { %v3241_v45 = vrot.slane %v10357_v7, 1  ;;  %7140 = vmatmul.msk.f32.gmra.mxu0 %vm134_vm0, %v10357_v7 }
 0x96d   :  { %v3119_v1 = vpop.f32.mrf.mxu2 }
 0x96e   :  { %v3120_v46 = vadd.f32 %v3119_v1, %v3054_v58  ;;  %v3252_v37 = vsel %vm235_vm2, %v3240_v21, %v3241_v45  ;;  %v3060_v21 = vpop.f32.mrf.mxu1 }
 0x96f   :  { %v3256_v24 = vmul.f32 %v9935_v19, %v3252_v37 }
 0x970   :  { %v3202_v48 = vadd.f32 %v3184_v35, %v3120_v46  ;;  %v3190_v52 = vpop.f32.mrf.mxu3 }
 0x971   :  { %7155 = vmatmul.msk.f32.gmra.mxu2 %vm134_vm0, %v3256_v24 }
 0x972   :  { %v10367_v31 = vadd.f32 %v3202_v48, %v8819_v59 }
 0x974   :  { %v3242_v40 = vrot.slane %v10367_v31, 1  ;;  %7141 = vmatmul.msk.f32.gmra.mxu0 %vm134_vm0, %v10367_v31 }
 0x975   :  { %v3122_v12 = vpop.f32.mrf.mxu2 }
 0x976   :  { %v3123_v9 = vadd.f32 %v3122_v12, %v3057_v32  ;;  %v3251_v13 = vsel %vm235_vm2, %v3241_v45, %v3242_v40  ;;  %v3063_v46 = vpop.f32.mrf.mxu1 }
 0x977   :  { %v3257_v51 = vmul.f32 %v9950_v16, %v3251_v13 }
 0x978   :  { %v3203_v60 = vadd.f32 %v3187_v33, %v3123_v9  ;;  %v3193_v32 = vpop.f32.mrf.mxu3 }
 0x979   :  { %7156 = vmatmul.msk.f32.gmra.mxu2 %vm134_vm0, %v3257_v51 }
 0x97a   :  { %v10377_v58 = vadd.f32 %v3203_v60, %v8819_v59 }
 0x97c   :  { %v3243_v61 = vrot.slane %v10377_v58, 1  ;;  %7142 = vmatmul.msk.f32.gmra.mxu0 %vm134_vm0, %v10377_v58 }
 0x97d   :  { %v3125_v43 = vpop.f32.mrf.mxu2 }
 0x97e   :  { %v3126_v35 = vadd.f32 %v3125_v43, %v3060_v21  ;;  %v3250_v23 = vsel %vm235_vm2, %v3242_v40, %v3243_v61  ;;  %v3066_v51 = vpop.f32.mrf.mxu1 }
 0x97f   :  { %v3258_v25 = vmul.f32 %v9987_v54, %v3250_v23 }
 0x980   :  { %v3204_v45 = vadd.f32 %v3190_v52, %v3126_v35  ;;  %v3196_v43 = vpop.f32.mrf.mxu3 }
 0x981   :  { %7157 = vmatmul.msk.f32.gmra.mxu2 %vm134_vm0, %v3258_v25  ;;  %v3215_v25 = vrot.slane %v10322_v34, 7 }
 0x982   :  { %v10387_v1 = vadd.f32 %v3204_v45, %v8819_v59 }
 0x984   :  { %v3244_v37 = vrot.slane %v10387_v1, 1  ;;  %7143 = vmatmul.msk.f32.gmra.mxu0 %vm134_vm0, %v10387_v1 }
 0x985   :  { %v3128_v24 = vpop.f32.mrf.mxu2 }
 0x986   :  { %v3129_v48 = vadd.f32 %v3128_v24, %v3063_v46  ;;  %v3249_v33 = vsel %vm235_vm2, %v3243_v61, %v3244_v37  ;;  %v10412_v24 = vld [vmem:[%s11610_s11] sm:$0xff] }
 0x987   :  { %v3259_v40 = vmul.f32 %v10015_v63, %v3249_v33 }
 0x988   :  { %v3205_v12 = vadd.f32 %v3193_v32, %v3129_v48 }
 0x989   :  { %7158 = vmatmul.msk.f32.gmra.mxu2 %vm134_vm0, %v3259_v40  ;;  %v3216_v40 = vrot.slane %v10336_v27, 7 }
 0x98a   :  { %v3213_v9 = vadd.f32 %v3205_v12, %v8819_v59 }
 0x98b   :  { %v3229_v12 = vsel %vm210_vm1, %v3215_v25, %v3216_v40 }
 0x98c   :  { %v3245_v13 = vrot.slane %v3213_v9, 1  ;;  %7144 = vmatmul.msk.f32.gmra.mxu0 %vm134_vm0, %v3213_v9 }
 0x98d   :  { %v3131_v60 = vpop.f32.mrf.mxu2 }
 0x98e   :  { %v3132_v21 = vadd.f32 %v3131_v60, %v3066_v51  ;;  %v3248_v52 = vsel %vm235_vm2, %v3244_v37, %v3245_v13  ;;  %v10428_v51 = vld [vmem:[%s11610_s11 + $0x8] sm:$0xff] }
 0x98f   :  { %v3260_v35 = vmul.f32 %v10033_v41, %v3248_v52  ;;  %v3232_v60 = vmul.f32 %v10428_v51, %v3229_v12 }
 0x990   :  { %v3206_v61 = vadd.f32 %v3196_v43, %v3132_v21  ;;  %v3217_v21 = vrot.slane %v10357_v7, 7  ;;  %v3218_v43 = vrot.slane %v10367_v31, 7  ;;  %v10460_v31 = vld [vmem:[%s11610_s11 + $0x20] sm:$0xff] }
 0x991   :  { %7159 = vmatmul.msk.f32.gmra.mxu2 %vm134_vm0, %v3260_v35  ;;  %v10450_v35 = vld [vmem:[%s11610_s11 + $0x18] sm:$0xff] }
 0x992   :  { %v3214_v23 = vadd.f32 %v3206_v61, %v8819_v59  ;;  %v3228_v34 = vsel %vm210_vm1, %v3216_v40, %v3217_v21  ;;  %v3227_v7 = vsel %vm210_vm1, %v3217_v21, %v3218_v43 }
 0x993   :  { %v3234_v61 = vmul.f32 %v10450_v35, %v3227_v7 }
 0x994   :  { %v3222_v45 = vrot.slane %v3214_v23, 7  ;;  %v3246_v46 = vrot.slane %v3214_v23, 1  ;;  %7145 = vmatmul.msk.f32.gmra.mxu0 %vm134_vm0, %v3214_v23  ;;  %v3219_v23 = vrot.slane %v10377_v58, 7  ;;  %v10470_v58 = vld [vmem:[%s11610_s11 + $0x28] sm:$0xff] }
 0x996   :  { %v3230_v32 = vsel %vm210_vm1, %v3222_v45, %v3215_v25  ;;  %v3247_v37 = vsel %vm235_vm2, %v3245_v13, %v3246_v46  ;;  %v3254_v13 = vsel %vm235_vm2, %v3246_v46, %v3239_v6  ;;  %v10440_v6 = vld [vmem:[%s11610_s11 + $0x10] sm:$0xff]  ;;  %v3226_v25 = vsel %vm210_vm1, %v3218_v43, %v3219_v23 }
 0x997   :  { %v3231_v48 = vmul.f32 %v10412_v24, %v3230_v32  ;;  %v3261_v33 = vmul.f32 %v10050_v53, %v3247_v37  ;;  %v3262_v27 = vmul.f32 %v10066_v22, %v3254_v13  ;;  %v3233_v52 = vmul.f32 %v10440_v6, %v3228_v34 }
 0x998   :  { %v3235_v46 = vmul.f32 %v10460_v31, %v3226_v25  ;;  %v3220_v32 = vrot.slane %v10387_v1, 7  ;;  %v10479_v1 = vld [vmem:[%s11610_s11 + $0x30] sm:$0xff] }
 0x999   :  { %7146 = vmatmul.msk.f32.vlgmr.msrb.gmra.mxu1 %vm134_vm0, %v3231_v48  ;;  %7160 = vmatmul.msk.f32.gmra.mxu2 %vm134_vm0, %v3261_v33  ;;  %v3221_v33 = vrot.slane %v3213_v9, 7  ;;  %v10488_v9 = vld [vmem:[%s11610_s11 + $0x38] sm:$0xff] }
 0x99a   :  { %v3225_v37 = vsel %vm210_vm1, %v3219_v23, %v3220_v32 }
 0x99b   :  { %v3236_v48 = vmul.f32 %v10470_v58, %v3225_v37  ;;  %v3224_v40 = vsel %vm210_vm1, %v3220_v32, %v3221_v33  ;;  %v3223_v13 = vsel %vm210_vm1, %v3221_v33, %v3222_v45 }
 0x99c   :  { %v3237_v12 = vmul.f32 %v10479_v1, %v3224_v40 }
 0x9a1   :  { %7147 = vmatmul.msk.f32.gmra.mxu1 %vm134_vm0, %v3232_v60  ;;  %7161 = vmatmul.msk.f32.gmra.mxu2 %vm134_vm0, %v3262_v27  ;;  %v3238_v60 = vmul.f32 %v10488_v9, %v3223_v13 }
 0x9a9   :  { %7148 = vmatmul.msk.f32.gmra.mxu1 %vm134_vm0, %v3233_v52 }
 0x9b1   :  { %7149 = vmatmul.msk.f32.gmra.mxu1 %vm134_vm0, %v3234_v61 }
 0x9b9   :  { %7150 = vmatmul.msk.f32.gmra.mxu1 %vm134_vm0, %v3235_v46 }
 0x9c1   :  { %7151 = vmatmul.msk.f32.gmra.mxu1 %vm134_vm0, %v3236_v48 }
 0x9c9   :  { %7152 = vmatmul.msk.f32.gmra.mxu1 %vm134_vm0, %v3237_v12 }
 0x9d1   :  { %7153 = vmatmul.msk.f32.gmra.mxu1 %vm134_vm0, %v3238_v60 }
 0x9d9   :  { %v3304_v27 = vpop.f32.mrf.mxu0 }
 0x9e1   :  { %v3307_v34 = vpop.f32.mrf.mxu0 }
 0x9e9   :  { %v3310_v7 = vpop.f32.mrf.mxu0 }
 0x9ec   :  { %v3434_v21 = vpop.f32.mrf.mxu2 }
 0x9f1   :  { %v3313_v32 = vpop.f32.mrf.mxu0 }
 0x9f4   :  { %v3437_v52 = vpop.f32.mrf.mxu2 }
 0x9fc   :  { %v3440_v61 = vpop.f32.mrf.mxu2 }
 0xa04   :  { %v3443_v40 = vpop.f32.mrf.mxu2 }
 0xa16   :  { %v3369_v43 = vpop.f32.mrf.mxu1 }
 0xa17   :  { %v3370_v46 = vadd.f32 %v3369_v43, %v3304_v27  ;;  %v3446_v43 = vpop.f32.mrf.mxu2 }
 0xa19   :  { %v3458_v48 = vadd.f32 %v3434_v21, %v3370_v46 }
 0xa1b   :  { %v3466_v60 = vadd.f32 %v3458_v48, %v11672_v29 }
 0xa1d   :  { %v3474_v17 = vmax.f32 %v3466_v60, 0.0 }
 0xa1e   :  { %v3372_v23 = vpop.f32.mrf.mxu1 }
 0xa1f   :  { %v3373_v25 = vadd.f32 %v3372_v23, %v3307_v34  ;;  %v3316_v34 = vpop.f32.mrf.mxu0  ;;  %v3482_v21 = vsel %vm134_vm0, %v3474_v17, 0.0 }
 0xa21   :  { %v3459_v45 = vadd.f32 %v3437_v52, %v3373_v25 }
 0xa23   :  { %v3467_v12 = vadd.f32 %v3459_v45, %v11672_v29 }
 0xa25   :  { %v3475_v18 = vmax.f32 %v3467_v12, 0.0 }
 0xa26   :  { %v3375_v37 = vpop.f32.mrf.mxu1 }
 0xa27   :  { %v3376_v33 = vadd.f32 %v3375_v37, %v3310_v7  ;;  %v3483_v27 = vsel %vm134_vm0, %v3475_v18, 0.0 }
 0xa28   :  { %v3484_v23 = vadd.f32 %v3483_v27, %v3482_v21 }
 0xa29   :  { %v3460_v13 = vadd.f32 %v3440_v61, %v3376_v33 }
 0xa2b   :  { %v3468_v59 = vadd.f32 %v3460_v13, %v11672_v29 }
 0xa2d   :  { %v3476_v26 = vmax.f32 %v3468_v59, 0.0  ;;  %v3319_v59 = vpop.f32.mrf.mxu0 }
 0xa2e   :  { %v3378_v39 = vpop.f32.mrf.mxu1 }
 0xa2f   :  { %v3379_v3 = vadd.f32 %v3378_v39, %v3313_v32  ;;  %v3485_v7 = vsel %vm134_vm0, %v3476_v26, 0.0  ;;  %v3449_v32 = vpop.f32.mrf.mxu2 }
 0xa30   :  { %v3486_v46 = vadd.f32 %v3485_v7, %v3484_v23 }
 0xa31   :  { %v3461_v52 = vadd.f32 %v3443_v40, %v3379_v3 }
 0xa33   :  { %v3469_v61 = vadd.f32 %v3461_v52, %v11672_v29 }
 0xa35   :  { %v3477_v25 = vmax.f32 %v3469_v61, 0.0  ;;  %v3322_v8 = vpop.f32.mrf.mxu0 }
 0xa36   :  { %v3381_v45 = vpop.f32.mrf.mxu1 }
 0xa37   :  { %v3487_v37 = vsel %vm134_vm0, %v3477_v25, 0.0  ;;  %v3382_v56 = vadd.f32 %v3381_v45, %v3316_v34  ;;  %v3452_v27 = vpop.f32.mrf.mxu2 }
 0xa38   :  { %v3488_v48 = vadd.f32 %v3487_v37, %v3486_v46 }
 0xa39   :  { %v3462_v61 = vadd.f32 %v3446_v43, %v3382_v56 }
 0xa3a   :  { %v3489_v39 = vrot.slane %v3488_v48, 4 }
 0xa3b   :  { %v3470_v56 = vadd.f32 %v3462_v61, %v11672_v29 }
 0xa3c   :  { %v3490_v33 = vadd.f32 %v3489_v39, %v3488_v48 }
 0xa3e   :  { %v3491_v12 = vrot.slane %v3490_v33, 2  ;;  %v3384_v3 = vpop.f32.mrf.mxu1 }
 0xa3f   :  { %v3385_v13 = vadd.f32 %v3384_v3, %v3319_v59 }
 0xa40   :  { %v3492_v40 = vadd.f32 %v3491_v12, %v3490_v33  ;;  %v3325_v33 = vpop.f32.mrf.mxu0 }
 0xa41   :  { %v3463_v52 = vadd.f32 %v3449_v32, %v3385_v13  ;;  %v3478_v13 = vmax.f32 %v3470_v56, 0.0 }
 0xa42   :  { %v3493_v60 = vrot.slane %v3492_v40, 1 }
 0xa43   :  { %v3471_v59 = vadd.f32 %v3463_v52, %v11672_v29 }
 0xa44   :  { %v3494_v14 = vadd.f32 %v3493_v60, %v3492_v40 }
 0xa45   :  { %v3479_v32 = vmax.f32 %v3471_v59, 0.0 }
 0xa46   :  { %v3508_v21 = vmul.f32 %v3494_v14, %v8315_v11  ;;  %v3387_v7 = vpop.f32.mrf.mxu1 }
 0xa47   :  { %v3388_v23 = vadd.f32 %v3387_v7, %v3322_v8  ;;  %v3496_v61 = vsel %vm134_vm0, %v3479_v32, 0.0 }
 0xa48   :  { %v10501_v46 = vsub.f32 %v3474_v17, %v3508_v21  ;;  %v10503_v37 = vsub.f32 %v3475_v18, %v3508_v21  ;;  %v10505_v48 = vsub.f32 %v3476_v26, %v3508_v21  ;;  %v10507_v39 = vsub.f32 %v3477_v25, %v3508_v21 }
 0xa49   :  { %v3464_v34 = vadd.f32 %v3452_v27, %v3388_v23  ;;  %v3455_v27 = vpop.f32.mrf.mxu2 }
 0xa4a   :  { %v3518_v45 = vmul.f32 %v10501_v46, %v10501_v46  ;;  %v3519_v14 = vmul.f32 %v10503_v37, %v10503_v37  ;;  %v3520_v8 = vmul.f32 %v10505_v48, %v10505_v48  ;;  %v3521_v26 = vmul.f32 %v10507_v39, %v10507_v39 }
 0xa4b   :  { %v3472_v17 = vadd.f32 %v3464_v34, %v11672_v29 }
 0xa4c   :  { %v3526_v18 = vsel %vm134_vm0, %v3518_v45, 0.0  ;;  %v3527_v43 = vsel %vm134_vm0, %v3519_v14, 0.0  ;;  %v3529_v12 = vsel %vm134_vm0, %v3520_v8, 0.0  ;;  %v3531_v21 = vsel %vm134_vm0, %v3521_v26, 0.0 }
 0xa4d   :  { %v3528_v25 = vadd.f32 %v3527_v43, %v3526_v18  ;;  %v3480_v60 = vmax.f32 %v3472_v17, 0.0  ;;  %v3495_v45 = vsel %vm134_vm0, %v3478_v13, 0.0 }
 0xa4e   :  { %v3390_v3 = vpop.f32.mrf.mxu1  ;;  %v3497_v8 = vadd.f32 %v3496_v61, %v3495_v45 }
 0xa4f   :  { %v3530_v40 = vadd.f32 %v3529_v12, %v3528_v25  ;;  %v3391_v52 = vadd.f32 %v3390_v3, %v3325_v33  ;;  %v3498_v59 = vsel %vm134_vm0, %v3480_v60, 0.0 }
 0xa50   :  { %v3499_v56 = vadd.f32 %v3498_v59, %v3497_v8 }
 0xa51   :  { %v3532_v7 = vadd.f32 %v3531_v21, %v3530_v40  ;;  %v3465_v23 = vadd.f32 %v3455_v27, %v3391_v52 }
 0xa53   :  { %v3533_v34 = vrot.slane %v3532_v7, 4  ;;  %v3473_v14 = vadd.f32 %v3465_v23, %v11672_v29 }
 0xa55   :  { %v3534_v18 = vadd.f32 %v3533_v34, %v3532_v7  ;;  %v3481_v43 = vmax.f32 %v3473_v14, 0.0 }
 0xa57   :  { %v3535_v17 = vrot.slane %v3534_v18, 2  ;;  %v3500_v25 = vsel %vm134_vm0, %v3481_v43, 0.0 }
 0xa58   :  { %v3501_v33 = vadd.f32 %v3500_v25, %v3499_v56 }
 0xa59   :  { %v3536_v26 = vadd.f32 %v3535_v17, %v3534_v18 }
 0xa5a   :  { %v3502_v12 = vrot.slane %v3501_v33, 4 }
 0xa5b   :  { %v3537_v3 = vrot.slane %v3536_v26, 1 }
 0xa5c   :  { %v3503_v40 = vadd.f32 %v3502_v12, %v3501_v33 }
 0xa5d   :  { %v3538_v52 = vadd.f32 %v3537_v3, %v3536_v26 }
 0xa5e   :  { %v3504_v27 = vrot.slane %v3503_v40, 2 }
 0xa5f   :  { %v3552_v21 = vmul.f32 %v3538_v52, %v8315_v11 }
 0xa60   :  { %v3505_v62 = vadd.f32 %v3504_v27, %v3503_v40 }
 0xa61   :  { %v3554_v42 = vadd.f32 1e-05, %v3552_v21 }
 0xa62   :  { %v3506_v49 = vrot.slane %v3505_v62, 1 }
 0xa63   :  { %7350 = vrsqrt.f32 %v3554_v42  ;;  %vm3562_vm3 = vweird.f32 %v3554_v42 }
 0xa64   :  { %v3507_v29 = vadd.f32 %v3506_v49, %v3505_v62 }
 0xa66   :  { %v3509_v7 = vmul.f32 %v3507_v29, %v8315_v11 }
 0xa68   :  { %v10531_v61 = vsub.f32 %v3478_v13, %v3509_v7  ;;  %v10533_v23 = vsub.f32 %v3479_v32, %v3509_v7  ;;  %v10535_v34 = vsub.f32 %v3480_v60, %v3509_v7  ;;  %v10537_v45 = vsub.f32 %v3481_v43, %v3509_v7 }
 0xa69   :  { %v7351_v59 = vpop.eup %7350 }
 0xa6a   :  { %v3557_v14 = vmul.f32 %v7351_v59, %v3554_v42  ;;  %v3522_v8 = vmul.f32 %v10531_v61, %v10531_v61  ;;  %v3523_v18 = vmul.f32 %v10533_v23, %v10533_v23  ;;  %v3524_v49 = vmul.f32 %v10535_v34, %v10535_v34 }
 0xa6b   :  { %v3525_v32 = vmul.f32 %v10537_v45, %v10537_v45  ;;  %vm3563_vm15 = vweird.f32 %v7351_v59 }
 0xa6c   :  { %v3558_v62 = vmul.f32 %v7351_v59, %v3557_v14  ;;  %v3539_v13 = vsel %vm134_vm0, %v3522_v8, 0.0  ;;  %v3540_v60 = vsel %vm134_vm0, %v3523_v18, 0.0  ;;  %v3542_v17 = vsel %vm134_vm0, %v3524_v49, 0.0  ;;  %vm3564_vm4 = vmor %vm3562_vm3, %vm3563_vm15 }
 0xa6d   :  { %v3541_v43 = vadd.f32 %v3540_v60, %v3539_v13  ;;  %v3544_v26 = vsel %vm134_vm0, %v3525_v32, 0.0 }
 0xa6e   :  { %v3559_v56 = vmul.f32 0.5, %v3558_v62 }
 0xa6f   :  { %v3543_v25 = vadd.f32 %v3542_v17, %v3541_v43 }
 0xa70   :  { %v3560_v33 = vsub.f32 1.5, %v3559_v56 }
 0xa71   :  { %v3545_v12 = vadd.f32 %v3544_v26, %v3543_v25 }
 0xa72   :  { %v3561_v3 = vmul.f32 %v7351_v59, %v3560_v33 }
 0xa73   :  { %v3546_v40 = vrot.slane %v3545_v12, 4 }
 0xa74   :  { %v3565_v52 = vsel %vm3564_vm4, %v7351_v59, %v3561_v3 }
 0xa75   :  { %v3576_v27 = vmul.f32 %v3565_v52, %v10501_v46  ;;  %v3577_v21 = vmul.f32 %v3565_v52, %v10503_v37  ;;  %v3578_v29 = vmul.f32 %v3565_v52, %v10505_v48  ;;  %v3547_v7 = vadd.f32 %v3546_v40, %v3545_v12 }
 0xa76   :  { %v3579_v46 = vmul.f32 %v3565_v52, %v10507_v39 }
 0xa77   :  { %v3584_v14 = vmul.f32 %v3576_v27, %v8408_v55  ;;  %v3585_v8 = vmul.f32 %v3577_v21, %v8431_v15  ;;  %v3586_v18 = vmul.f32 %v3578_v29, %v8446_v30  ;;  %v3548_v49 = vrot.slane %v3547_v7, 2 }
 0xa78   :  { %v3587_v39 = vmul.f32 %v3579_v46, %v8452_v57 }
 0xa79   :  { %v10558_v62 = vadd.f32 %v3585_v8, %v8438_v10  ;;  %v10561_v42 = vadd.f32 %v3584_v14, %v8412_v44  ;;  %v3549_v59 = vadd.f32 %v3548_v49, %v3547_v7  ;;  %v10569_v32 = vadd.f32 %v3586_v18, %v8460_v20 }
 0xa7a   :  { %v10581_v26 = vadd.f32 %v3587_v39, %v8487_v38 }
 0xa7b   :  { %v3624_v37 = vrot.slane %v10561_v42, 1  ;;  %7162 = vmatmul.msk.f32.vlgmr.msra.gmra.mxu3 %vm134_vm0, %v10561_v42  ;;  %v3625_v48 = vrot.slane %v10558_v62, 1  ;;  %v3550_v13 = vrot.slane %v3549_v59, 1  ;;  %v3626_v17 = vrot.slane %v10569_v32, 1 }
 0xa7c   :  { %v3627_v3 = vrot.slane %v10581_v26, 1 }
 0xa7d   :  { %v3638_v60 = vsel %vm235_vm2, %v3624_v37, %v3625_v48  ;;  %v3551_v43 = vadd.f32 %v3550_v13, %v3549_v59  ;;  %v3637_v12 = vsel %vm235_vm2, %v3625_v48, %v3626_v17 }
 0xa7e   :  { %v3640_v56 = vmul.f32 %v10352_v5, %v3638_v60  ;;  %v3641_v5 = vmul.f32 %v9935_v19, %v3637_v12  ;;  %v3636_v52 = vsel %vm235_vm2, %v3626_v17, %v3627_v3  ;;  %v3600_v60 = vrot.slane %v10561_v42, 7 }
 0xa7f   :  { %v3553_v25 = vmul.f32 %v3551_v43, %v8315_v11  ;;  %v3642_v21 = vmul.f32 %v9950_v16, %v3636_v52 }
 0xa80   :  { %7178 = vmatmul.msk.f32.vlgmr.msra.gmra.mxu1 %vm134_vm0, %v3640_v56 }
 0xa81   :  { %v3555_v33 = vadd.f32 1e-05, %v3553_v25 }
 0xa83   :  { %7163 = vmatmul.msk.f32.gmra.mxu3 %vm134_vm0, %v10558_v62  ;;  %7352 = vrsqrt.f32 %v3555_v33  ;;  %vm3572_vm6 = vweird.f32 %v3555_v33 }
 0xa88   :  { %7179 = vmatmul.msk.f32.gmra.mxu1 %vm134_vm0, %v3641_v5 }
 0xa89   :  { %v7353_v11 = vpop.eup %7352 }
 0xa8a   :  { %v3567_v40 = vmul.f32 %v7353_v11, %v3555_v33  ;;  %vm3573_vm5 = vweird.f32 %v7353_v11 }
 0xa8b   :  { %7164 = vmatmul.msk.f32.gmra.mxu3 %vm134_vm0, %v10569_v32  ;;  %vm3574_vm7 = vmor %vm3572_vm6, %vm3573_vm5 }
 0xa8c   :  { %v3568_v27 = vmul.f32 %v7353_v11, %v3567_v40 }
 0xa8e   :  { %v3569_v29 = vmul.f32 0.5, %v3568_v27 }
 0xa90   :  { %7180 = vmatmul.msk.f32.gmra.mxu1 %vm134_vm0, %v3642_v21  ;;  %v3570_v7 = vsub.f32 1.5, %v3569_v29 }
 0xa92   :  { %v3571_v19 = vmul.f32 %v7353_v11, %v3570_v7 }
 0xa93   :  { %7165 = vmatmul.msk.f32.gmra.mxu3 %vm134_vm0, %v10581_v26 }
 0xa94   :  { %v3575_v14 = vsel %vm3574_vm7, %v7353_v11, %v3571_v19 }
 0xa95   :  { %v3583_v8 = vmul.f32 %v3575_v14, %v10537_v45  ;;  %v3580_v18 = vmul.f32 %v3575_v14, %v10531_v61  ;;  %v3581_v49 = vmul.f32 %v3575_v14, %v10533_v23  ;;  %v3582_v23 = vmul.f32 %v3575_v14, %v10535_v34 }
 0xa96   :  { %v3601_v45 = vrot.slane %v10558_v62, 7 }
 0xa97   :  { %v3591_v16 = vmul.f32 %v3583_v8, %v8452_v57  ;;  %v3588_v59 = vmul.f32 %v3580_v18, %v8408_v55  ;;  %v3589_v46 = vmul.f32 %v3581_v49, %v8431_v15  ;;  %v3590_v39 = vmul.f32 %v3582_v23, %v8446_v30 }
 0xa98   :  { %v3602_v30 = vrot.slane %v10569_v32, 7 }
 0xa99   :  { %v3599_v48 = vadd.f32 %v3591_v16, %v8487_v38  ;;  %v3596_v13 = vadd.f32 %v3588_v59, %v8412_v44  ;;  %v3597_v61 = vadd.f32 %v3589_v46, %v8438_v10  ;;  %v3614_v10 = vsel %vm210_vm1, %v3600_v60, %v3601_v45 }
 0xa9a   :  { %v3613_v25 = vsel %vm210_vm1, %v3601_v45, %v3602_v30 }
 0xa9b   :  { %v3607_v43 = vrot.slane %v3599_v48, 7  ;;  %v3628_v56 = vrot.slane %v3596_v13, 1  ;;  %7166 = vmatmul.msk.f32.gmra.mxu3 %vm134_vm0, %v3596_v13  ;;  %v3629_v15 = vrot.slane %v3597_v61, 1  ;;  %v3631_v12 = vrot.slane %v3599_v48, 1 }
 0xa9d   :  { %v3615_v57 = vsel %vm210_vm1, %v3607_v43, %v3600_v60  ;;  %v3635_v55 = vsel %vm235_vm2, %v3627_v3, %v3628_v56  ;;  %v3634_v34 = vsel %vm235_vm2, %v3628_v56, %v3629_v15  ;;  %v3639_v11 = vsel %vm235_vm2, %v3631_v12, %v3624_v37 }
 0xa9e   :  { %v3616_v38 = vmul.f32 %v10412_v24, %v3615_v57  ;;  %v3643_v44 = vmul.f32 %v9987_v54, %v3635_v55  ;;  %v3598_v24 = vadd.f32 %v3590_v39, %v8460_v20  ;;  %v3617_v54 = vmul.f32 %v10428_v51, %v3614_v10 }
 0xa9f   :  { %v3644_v62 = vmul.f32 %v10015_v63, %v3634_v34  ;;  %v3618_v20 = vmul.f32 %v10440_v6, %v3613_v25  ;;  %v3603_v63 = vrot.slane %v10581_v26, 7  ;;  %v3647_v52 = vmul.f32 %v10066_v22, %v3639_v11 }
 0xaa0   :  { %7170 = vmatmul.msk.f32.vlgmr.msra.gmra.mxu0 %vm134_vm0, %v3616_v38  ;;  %7181 = vmatmul.msk.f32.gmra.mxu1 %vm134_vm0, %v3643_v44  ;;  %v3630_v17 = vrot.slane %v3598_v24, 1  ;;  %v3606_v21 = vrot.slane %v3598_v24, 7 }
 0xaa1   :  { %v3612_v32 = vsel %vm210_vm1, %v3602_v30, %v3603_v63 }
 0xaa2   :  { %v3633_v33 = vsel %vm235_vm2, %v3629_v15, %v3630_v17  ;;  %v3632_v5 = vsel %vm235_vm2, %v3630_v17, %v3631_v12  ;;  %v3619_v3 = vmul.f32 %v10450_v35, %v3612_v32  ;;  %v3605_v35 = vrot.slane %v3597_v61, 7 }
 0xaa3   :  { %7167 = vmatmul.msk.f32.gmra.mxu3 %vm134_vm0, %v3597_v61  ;;  %v3645_v51 = vmul.f32 %v10033_v41, %v3633_v33  ;;  %v3646_v6 = vmul.f32 %v10050_v53, %v3632_v5  ;;  %v3604_v41 = vrot.slane %v3596_v13, 7  ;;  %v3608_v22 = vsel %vm210_vm1, %v3606_v21, %v3607_v43 }
 0xaa4   :  { %v3609_v42 = vsel %vm210_vm1, %v3605_v35, %v3606_v21  ;;  %v3623_v37 = vmul.f32 %v10488_v9, %v3608_v22  ;;  %vm4210_vm2 = vcmask 48128  }
 0xaa5   :  { %v3611_v26 = vsel %vm210_vm1, %v3603_v63, %v3604_v41  ;;  %v3610_v53 = vsel %vm210_vm1, %v3604_v41, %v3605_v35  ;;  %vm4471_vm1 = vcmask 46080  }
 0xaa6   :  { %v3620_v40 = vmul.f32 %v10460_v31, %v3611_v26  ;;  %v3621_v27 = vmul.f32 %v10470_v58, %v3610_v53  ;;  %v3622_v31 = vmul.f32 %v10479_v1, %v3609_v42 }
 0xaa8   :  { %7171 = vmatmul.msk.f32.gmra.mxu0 %vm134_vm0, %v3617_v54  ;;  %7182 = vmatmul.msk.f32.gmra.mxu1 %vm134_vm0, %v3644_v62 }
 0xaab   :  { %7168 = vmatmul.msk.f32.gmra.mxu3 %vm134_vm0, %v3598_v24 }
 0xab0   :  { %7172 = vmatmul.msk.f32.gmra.mxu0 %vm134_vm0, %v3618_v20  ;;  %7183 = vmatmul.msk.f32.gmra.mxu1 %vm134_vm0, %v3645_v51 }
 0xab3   :  { %7169 = vmatmul.msk.f32.gmra.mxu3 %vm134_vm0, %v3599_v48 }
 0xab8   :  { %7173 = vmatmul.msk.f32.gmra.mxu0 %vm134_vm0, %v3619_v3  ;;  %7184 = vmatmul.msk.f32.gmra.mxu1 %vm134_vm0, %v3646_v6 }
 0xac0   :  { %7174 = vmatmul.msk.f32.gmra.mxu0 %vm134_vm0, %v3620_v40  ;;  %7185 = vmatmul.msk.f32.gmra.mxu1 %vm134_vm0, %v3647_v52 }
 0xac8   :  { %7175 = vmatmul.msk.f32.gmra.mxu0 %vm134_vm0, %v3621_v27 }
 0xad0   :  { %7176 = vmatmul.msk.f32.gmra.mxu0 %vm134_vm0, %v3622_v31 }
 0xad8   :  { %7177 = vmatmul.msk.f32.gmra.mxu0 %vm134_vm0, %v3623_v37 }
 0xafd   :  { %v3819_v7 = vpop.f32.mrf.mxu1 }
 0xafe   :  { %v3689_v29 = vpop.f32.mrf.mxu3 }
 0xb05   :  { %v3822_v19 = vpop.f32.mrf.mxu1 }
 0xb06   :  { %v3692_v58 = vpop.f32.mrf.mxu3 }
 0xb0d   :  { %v3825_v46 = vpop.f32.mrf.mxu1 }
 0xb0e   :  { %v3695_v1 = vpop.f32.mrf.mxu3 }
 0xb16   :  { %v3698_v43 = vpop.f32.mrf.mxu3 }
 0xb1d   :  { %v3754_v14 = vpop.f32.mrf.mxu0  ;;  %v3828_v57 = vpop.f32.mrf.mxu1 }
 0xb1e   :  { %v3755_v8 = vadd.f32 %v3754_v14, %v3689_v29  ;;  %v3701_v34 = vpop.f32.mrf.mxu3 }
 0xb20   :  { %v3843_v18 = vadd.f32 %v3819_v7, %v3755_v8 }
 0xb22   :  { %v10673_v49 = vadd.f32 %v3843_v18, %v8645_v2 }
 0xb24   :  { %7186 = vmatmul.msk.f32.vlgmr.msra.gmra.mxu2 %vm134_vm0, %v10673_v49  ;;  %v3883_v13 = vrot.slane %v10673_v49, 2  ;;  %v3859_v18 = vrot.slane %v10673_v49, 6 }
 0xb25   :  { %v3757_v16 = vpop.f32.mrf.mxu0  ;;  %v3831_v54 = vpop.f32.mrf.mxu1 }
 0xb26   :  { %v3758_v59 = vadd.f32 %v3757_v16, %v3692_v58  ;;  %v3704_v51 = vpop.f32.mrf.mxu3 }
 0xb28   :  { %v3844_v9 = vadd.f32 %v3822_v19, %v3758_v59  ;;  %v11684_v19 = vld [vmem:[#allocation6_spill] sm:$0xff] }
 0xb2a   :  { %v10678_v48 = vadd.f32 %v3844_v9, %v8645_v2  ;;  %v11685_v9 = vld [vmem:[#allocation7_spill] sm:$0xff] }
 0xb2c   :  { %v3884_v60 = vrot.slane %v10678_v48, 2  ;;  %7187 = vmatmul.msk.f32.gmra.mxu2 %vm134_vm0, %v10678_v48 }
 0xb2d   :  { %v3760_v56 = vpop.f32.mrf.mxu0  ;;  %v3834_v12 = vpop.f32.mrf.mxu1 }
 0xb2e   :  { %v3897_v61 = vsel %vm959_vm10, %v3883_v13, %v3884_v60  ;;  %v3761_v23 = vadd.f32 %v3760_v56, %v3695_v1  ;;  %v3707_v11 = vpop.f32.mrf.mxu3 }
 0xb2f   :  { %v3899_v55 = vmul.f32 %v10117_v50, %v3897_v61  ;;  %v3860_v61 = vrot.slane %v10678_v48, 6 }
 0xb30   :  { %v3845_v38 = vadd.f32 %v3825_v46, %v3761_v23 }
 0xb31   :  { %7202 = vmatmul.msk.f32.vlgmr.msrb.gmra.mxu0 %vm134_vm0, %v3899_v55 }
 0xb32   :  { %v10691_v44 = vadd.f32 %v3845_v38, %v8645_v2  ;;  %v11688_v38 = vld [vmem:[#allocation10_spill] sm:$0xff] }
 0xb34   :  { %v3885_v15 = vrot.slane %v10691_v44, 2  ;;  %7188 = vmatmul.msk.f32.gmra.mxu2 %vm134_vm0, %v10691_v44 }
 0xb35   :  { %v3763_v45 = vpop.f32.mrf.mxu0  ;;  %v3837_v52 = vpop.f32.mrf.mxu1 }
 0xb36   :  { %v3764_v39 = vadd.f32 %v3763_v45, %v3698_v43  ;;  %v3896_v10 = vsel %vm959_vm10, %v3884_v60, %v3885_v15  ;;  %v3710_v22 = vpop.f32.mrf.mxu3  ;;  %v11686_v43 = vld [vmem:[#allocation8_spill] sm:$0xff]  ;;  %v3861_v45 = vrot.slane %v10691_v44, 6 }
 0xb37   :  { %v3900_v24 = vmul.f32 %v10141_v0, %v3896_v10 }
 0xb38   :  { %v3846_v50 = vadd.f32 %v3828_v57, %v3764_v39  ;;  %v11687_v57 = vld [vmem:[#allocation9_spill] sm:$0xff]  ;;  %v3872_v48 = vsel %vm934_vm11, %v3860_v61, %v3861_v45  ;;  %v11689_v39 = vld [vmem:[#allocation11_spill] sm:$0xff] }
 0xb39   :  { %7203 = vmatmul.msk.f32.gmra.mxu0 %vm134_vm0, %v3900_v24  ;;  %v3877_v10 = vmul.f32 %v11689_v39, %v3872_v48 }
 0xb3a   :  { %v10701_v62 = vadd.f32 %v3846_v50, %v8645_v2 }
 0xb3c   :  { %v3886_v17 = vrot.slane %v10701_v62, 2  ;;  %7189 = vmatmul.msk.f32.gmra.mxu2 %vm134_vm0, %v10701_v62  ;;  %v3862_v49 = vrot.slane %v10701_v62, 6 }
 0xb3d   :  { %v3766_v30 = vpop.f32.mrf.mxu0  ;;  %v3840_v58 = vpop.f32.mrf.mxu1 }
 0xb3e   :  { %v3767_v25 = vadd.f32 %v3766_v30, %v3701_v34  ;;  %v3895_v33 = vsel %vm959_vm10, %v3885_v15, %v3886_v17  ;;  %v11690_v34 = vld [vmem:[#allocation12_spill] sm:$0xff] }
 0xb3f   :  { %v3901_v20 = vmul.f32 %v10159_v47, %v3895_v33 }
 0xb40   :  { %v3847_v0 = vadd.f32 %v3831_v54, %v3767_v25  ;;  %v11691_v54 = vld [vmem:[#allocation13_spill] sm:$0xff]  ;;  %v11692_v25 = vld [vmem:[#allocation14_spill] sm:$0xff] }
 0xb41   :  { %7204 = vmatmul.msk.f32.gmra.mxu0 %vm134_vm0, %v3901_v20  ;;  %v4121_v20 = vld [vmem:[%s11608_s9 + $0x18] sm:$0xff] }
 0xb42   :  { %v10711_v63 = vadd.f32 %v3847_v0, %v8645_v2  ;;  %4162 = vmatpush.msrb.mxu1 %v4121_v20 }
 0xb44   :  { %v3887_v32 = vrot.slane %v10711_v63, 2  ;;  %7190 = vmatmul.msk.f32.gmra.mxu2 %vm134_vm0, %v10711_v63  ;;  %v3863_v44 = vrot.slane %v10711_v63, 6  ;;  %v11693_v63 = vld [vmem:[#allocation15_spill] sm:$0xff] }
 0xb45   :  { %v3769_v5 = vpop.f32.mrf.mxu0 }
 0xb46   :  { %v3770_v3 = vadd.f32 %v3769_v5, %v3704_v51  ;;  %v3894_v6 = vsel %vm959_vm10, %v3886_v17, %v3887_v32  ;;  %v3870_v50 = vsel %vm934_vm11, %v3862_v49, %v3863_v44  ;;  %v11694_v5 = vld [vmem:[#allocation16_spill] sm:$0xff] }
 0xb47   :  { %v3902_v47 = vmul.f32 %v10174_v4, %v3894_v6  ;;  %v3879_v17 = vmul.f32 %v11691_v54, %v3870_v50  ;;  %v4120_v6 = vld [vmem:[%s11608_s9 + $0x10] sm:$0xff] }
 0xb48   :  { %v3848_v41 = vadd.f32 %v3834_v12, %v3770_v3  ;;  %4163 = vmatpush.msrb.mxu1 %v4120_v6 }
 0xb49   :  { %7205 = vmatmul.msk.f32.gmra.mxu0 %vm134_vm0, %v3902_v47  ;;  %v4119_v47 = vld [vmem:[%s11608_s9 + $0x8] sm:$0xff] }
 0xb4a   :  { %v3856_v26 = vadd.f32 %v3848_v41, %v8645_v2  ;;  %4164 = vmatpush.msrb.mxu1 %v4119_v47  ;;  %v4118_v41 = vld [vmem:[%s11608_s9] sm:$0xff] }
 0xb4b   :  { %v7318_v47 = vld [vmem:[%s11619_s20] ss:$0 sm:$0xff] }
 0xb4c   :  { %v3888_v40 = vrot.slane %v3856_v26, 2  ;;  %7191 = vmatmul.msk.f32.gmra.mxu2 %vm134_vm0, %v3856_v26  ;;  %v3864_v30 = vrot.slane %v3856_v26, 6  ;;  %4165 = vmatpush.msrb.mxu1 %v4118_v41 }
 0xb4d   :  { %v3772_v35 = vpop.f32.mrf.mxu0 }
 0xb4e   :  { %v3773_v53 = vadd.f32 %v3772_v35, %v3707_v11  ;;  %v3893_v27 = vsel %vm959_vm10, %v3887_v32, %v3888_v40  ;;  %v3869_v62 = vsel %vm934_vm11, %v3863_v44, %v3864_v30 }
 0xb4f   :  { %v3903_v21 = vmul.f32 %v10189_v36, %v3893_v27  ;;  %v3880_v33 = vmul.f32 %v11692_v25, %v3869_v62  ;;  %v7317_v25 = vld [vmem:[%s11609_s10] ss:$0 sm:$0xff] }
 0xb50   :  { %v3849_v42 = vadd.f32 %v3837_v52, %v3773_v53 }
 0xb51   :  { %7206 = vmatmul.msk.f32.gmra.mxu0 %vm134_vm0, %v3903_v21  ;;  %v11695_v21 = vld [vmem:[#allocation5_spill] sm:$0xff] }
 0xb52   :  { %v3857_v4 = vadd.f32 %v3849_v42, %v8645_v2 }
 0xb54   :  { %v3889_v31 = vrot.slane %v3857_v4, 2  ;;  %7192 = vmatmul.msk.f32.gmra.mxu2 %vm134_vm0, %v3857_v4  ;;  %v3865_v0 = vrot.slane %v3857_v4, 6 }
 0xb55   :  { %v3775_v37 = vpop.f32.mrf.mxu0 }
 0xb56   :  { %v3776_v29 = vadd.f32 %v3775_v37, %v3710_v22  ;;  %v3892_v7 = vsel %vm959_vm10, %v3888_v40, %v3889_v31  ;;  %v3868_v51 = vsel %vm934_vm11, %v3864_v30, %v3865_v0 }
 0xb57   :  { %v3904_v14 = vmul.f32 %v11684_v19, %v3892_v7  ;;  %v3881_v12 = vmul.f32 %v11693_v63, %v3868_v51 }
 0xb58   :  { %v3850_v8 = vadd.f32 %v3840_v58, %v3776_v29 }
 0xb59   :  { %7207 = vmatmul.msk.f32.gmra.mxu0 %vm134_vm0, %v3904_v14 }
 0xb5a   :  { %v3858_v36 = vadd.f32 %v3850_v8, %v8645_v2  ;;  %v3873_v2 = vsel %vm934_vm11, %v3859_v18, %v3860_v61 }
 0xb5b   :  { %v3876_v55 = vmul.f32 %v11687_v57, %v3873_v2 }
 0xb5c   :  { %v3866_v1 = vrot.slane %v3858_v36, 6  ;;  %v3890_v16 = vrot.slane %v3858_v36, 2  ;;  %7193 = vmatmul.msk.f32.gmra.mxu2 %vm134_vm0, %v3858_v36 }
 0xb5e   :  { %v3874_v59 = vsel %vm934_vm11, %v3866_v1, %v3859_v18  ;;  %v3891_v46 = vsel %vm959_vm10, %v3889_v31, %v3890_v16  ;;  %v3898_v23 = vsel %vm959_vm10, %v3890_v16, %v3883_v13  ;;  %v3871_v13 = vsel %vm934_vm11, %v3861_v45, %v3862_v49 }
 0xb5f   :  { %v3875_v60 = vmul.f32 %v11685_v9, %v3874_v59  ;;  %v3905_v56 = vmul.f32 %v11686_v43, %v3891_v46  ;;  %v3906_v15 = vmul.f32 %v11688_v38, %v3898_v23  ;;  %v3878_v24 = vmul.f32 %v11690_v34, %v3871_v13 }
 0xb60   :  { %v3867_v32 = vsel %vm934_vm11, %v3865_v0, %v3866_v1  ;;  %vm4267_vm10 = vcmask 1045504   ;;  %vm6841_vm11 = vcmask 41984  }
 0xb61   :  { %7194 = vmatmul.msk.f32.vlgmr.msrb.gmra.mxu3 %vm134_vm0, %v3875_v60  ;;  %7208 = vmatmul.msk.f32.gmra.mxu0 %vm134_vm0, %v3905_v56  ;;  %v3882_v3 = vmul.f32 %v11694_v5, %v3867_v32  ;;  %v10821_v32 = vld [vmem:[%s11618_s19] sm:$0x3]  ;;  %v7789_v5 = vmov 1  }
 0xb62   :  { %7278 = vset.pattern.permute.xlu1 %v7789_v5 }
 0xb63   :  { %4520 = vperm.xlu1 %7278, %v10821_v32  }
 0xb69   :  { %7195 = vmatmul.msk.f32.gmra.mxu3 %vm134_vm0, %v3876_v55  ;;  %7209 = vmatmul.msk.f32.gmra.mxu0 %vm134_vm0, %v3906_v15 }
 0xb6b   :  { %7279 = vset.pattern.permute.xlu1 %v8056_v28 }
 0xb71   :  { %7196 = vmatmul.msk.f32.gmra.mxu3 %vm134_vm0, %v3877_v10 }
 0xb79   :  { %7197 = vmatmul.msk.f32.gmra.mxu3 %vm134_vm0, %v3878_v24 }
 0xb81   :  { %7198 = vmatmul.msk.f32.gmra.mxu3 %vm134_vm0, %v3879_v17 }
 0xb89   :  { %7199 = vmatmul.msk.f32.gmra.mxu3 %vm134_vm0, %v3880_v33 }
 0xb91   :  { %7200 = vmatmul.msk.f32.gmra.mxu3 %vm134_vm0, %v3881_v12 }
 0xb99   :  { %7201 = vmatmul.msk.f32.gmra.mxu3 %vm134_vm0, %v3882_v3 }
 0xba7   :  { %v3948_v26 = vpop.f32.mrf.mxu2 }
 0xbae   :  { %v4078_v11 = vpop.f32.mrf.mxu0 }
 0xbaf   :  { %v3951_v40 = vpop.f32.mrf.mxu2 }
 0xbb6   :  { %v4081_v52 = vpop.f32.mrf.mxu0 }
 0xbb7   :  { %v3954_v4 = vpop.f32.mrf.mxu2 }
 0xbbe   :  { %v4084_v31 = vpop.f32.mrf.mxu0 }
 0xbbf   :  { %v3957_v58 = vpop.f32.mrf.mxu2 }
 0xbc6   :  { %v4087_v8 = vpop.f32.mrf.mxu0 }
 0xbc7   :  { %v3960_v59 = vpop.f32.mrf.mxu2 }
 0xbce   :  { %v4090_v9 = vpop.f32.mrf.mxu0 }
 0xbcf   :  { %v3963_v2 = vpop.f32.mrf.mxu2 }
 0xbd6   :  { %v4093_v57 = vpop.f32.mrf.mxu0 }
 0xbd7   :  { %v3966_v48 = vpop.f32.mrf.mxu2 }
 0xbde   :  { %v4096_v39 = vpop.f32.mrf.mxu0 }
 0xbdf   :  { %v3969_v24 = vpop.f32.mrf.mxu2 }
 0xbe4   :  { %v4013_v35 = vpop.f32.mrf.mxu3 }
 0xbe5   :  { %v4014_v53 = vadd.f32 %v4013_v35, %v3948_v26 }
 0xbe6   :  { %v4099_v54 = vpop.f32.mrf.mxu0 }
 0xbe7   :  { %v4102_v27 = vadd.f32 %v4078_v11, %v4014_v53  ;;  %v10842_v53 = vld [vmem:[%s11621_s22] sm:$0x3f] }
 0xbe9   :  { %v4110_v42 = vadd.f32 %v4102_v27, %v11695_v21 }
 0xbeb   :  { %7210 = vmatmul.msk.f32.vlgmr.msrb.gmra.mxu1 %vm134_vm0, %v4110_v42 }
 0xbec   :  { %v4016_v22 = vpop.f32.mrf.mxu3 }
 0xbed   :  { %v4017_v37 = vadd.f32 %v4016_v22, %v3951_v40 }
 0xbef   :  { %v4103_v29 = vadd.f32 %v4081_v52, %v4017_v37 }
 0xbf1   :  { %v4111_v7 = vadd.f32 %v4103_v29, %v11695_v21 }
 0xbf3   :  { %7211 = vmatmul.msk.f32.gmra.mxu1 %vm134_vm0, %v4111_v7 }
 0xbf4   :  { %v4019_v19 = vpop.f32.mrf.mxu3 }
 0xbf5   :  { %v4020_v14 = vadd.f32 %v4019_v19, %v3954_v4 }
 0xbf7   :  { %v4104_v36 = vadd.f32 %v4084_v31, %v4020_v14 }
 0xbf9   :  { %v4112_v18 = vadd.f32 %v4104_v36, %v11695_v21 }
 0xbfb   :  { %7212 = vmatmul.msk.f32.gmra.mxu1 %vm134_vm0, %v4112_v18 }
 0xbfc   :  { %v4022_v1 = vpop.f32.mrf.mxu3 }
 0xbfd   :  { %v4023_v16 = vadd.f32 %v4022_v1, %v3957_v58 }
 0xbff   :  { %v4105_v46 = vadd.f32 %v4087_v8, %v4023_v16 }
 0xc01   :  { %v4113_v60 = vadd.f32 %v4105_v46, %v11695_v21 }
 0xc03   :  { %7213 = vmatmul.msk.f32.gmra.mxu1 %vm134_vm0, %v4113_v60 }
 0xc04   :  { %v4025_v43 = vpop.f32.mrf.mxu3 }
 0xc05   :  { %v4026_v56 = vadd.f32 %v4025_v43, %v3960_v59 }
 0xc07   :  { %v4106_v61 = vadd.f32 %v4090_v9, %v4026_v56 }
 0xc09   :  { %v4114_v23 = vadd.f32 %v4106_v61, %v11695_v21 }
 0xc0b   :  { %7214 = vmatmul.msk.f32.gmra.mxu1 %vm134_vm0, %v4114_v23 }
 0xc0c   :  { %v4028_v55 = vpop.f32.mrf.mxu3 }
 0xc0d   :  { %v4029_v38 = vadd.f32 %v4028_v55, %v3963_v2 }
 0xc0f   :  { %v4107_v15 = vadd.f32 %v4093_v57, %v4029_v38 }
 0xc11   :  { %v4115_v45 = vadd.f32 %v4107_v15, %v11695_v21 }
 0xc13   :  { %7215 = vmatmul.msk.f32.gmra.mxu1 %vm134_vm0, %v4115_v45 }
 0xc14   :  { %v4031_v10 = vpop.f32.mrf.mxu3 }
 0xc15   :  { %v4032_v49 = vadd.f32 %v4031_v10, %v3966_v48 }
 0xc17   :  { %v4108_v13 = vadd.f32 %v4096_v39, %v4032_v49 }
 0xc19   :  { %v4116_v34 = vadd.f32 %v4108_v13, %v11695_v21 }
 0xc1b   :  { %7216 = vmatmul.msk.f32.gmra.mxu1 %vm134_vm0, %v4116_v34 }
 0xc1c   :  { %v4034_v44 = vpop.f32.mrf.mxu3 }
 0xc1d   :  { %v4035_v50 = vadd.f32 %v4034_v44, %v3969_v24 }
 0xc1f   :  { %v4109_v17 = vadd.f32 %v4099_v54, %v4035_v50 }
 0xc21   :  { %v4117_v30 = vadd.f32 %v4109_v17, %v11695_v21 }
 0xc23   :  { %7217 = vmatmul.msk.f32.gmra.mxu1 %vm134_vm0, %v4117_v30  ;;  %vm4447_vm0 = vcmask 1041409  }
 0xc68   :  { %v4167_v62 = vpop.f32.mrf.mxu1 }
 0xc69   :  { %v10829_v41 = vadd.f32 %v7317_v25, %v4167_v62 }
 0xc6b   :  { %v4467_v18 = vperm.slane %v10829_v41, 1 }
 0xc70   :  { %v4170_v33 = vpop.f32.mrf.mxu1 }
 0xc71   :  { %v10812_v20 = vadd.f32 %v7317_v25, %v4170_v33 }
 0xc78   :  { %v4173_v0 = vpop.f32.mrf.mxu1 }
 0xc79   :  { %v10814_v51 = vadd.f32 %v7317_v25, %v4173_v0 }
 0xc80   :  { %v4176_v63 = vpop.f32.mrf.mxu1 }
 0xc81   :  { %v10816_v12 = vadd.f32 %v7317_v25, %v4176_v63 }
 0xc88   :  { %v4179_v3 = vpop.f32.mrf.mxu1 }
 0xc89   :  { %v10824_v6 = vadd.f32 %v7317_v25, %v4179_v3 }
 0xc8b   :  { %v4446_v26 = vrot.slane %v10824_v6, 7  ;;  %v4468_v21 = vperm.slane %v10824_v6, 1 }
 0xc8d   :  { %v4448_v11 = vsel %vm4447_vm0, %v4446_v26, %v10829_v41 }
 0xc8e   :  { %v10835_v40 = vadd.f32 %v7318_v47, %v4448_v11  ;;  %v4521_v47 = vpop.permute.xlu1 %4520 }
 0xc90   :  { %v4458_v52 = vperm.slane %v10835_v40, 1  ;;  %v4451_v35 = vperm.slane %v10835_v40, 0  ;;  %v4513_v33 = vrot.slane %v10835_v40, 1 }
 0xc92   :  { %4463 = vperm.xlu2 %7276, %v4458_v52   ;;  %4456 = vperm.xlu0 %7277, %v4451_v35  }
 0xcec   :  { %v4464_v27 = vpop.permute.xlu2 %4463 }
 0xced   :  { %v4466_v42 = vadd.f32 %v4464_v27, %v10842_v53 }
 0xcef   :  { %v4470_v4 = vadd.f32 %v4468_v21, %v4466_v42 }
 0xcf1   :  { %v4479_v31 = vsel %vm4471_vm1, %v4470_v4, -inf }
 0xcf2   :  { %v4480_v22 = vrot.slane %v4479_v31, 4 }
 0xcf4   :  { %v4481_v37 = vmax.f32 %v4479_v31, %v4480_v22  ;;  %v4547_v22 = vperm.slane %v10824_v6, 2 }
 0xcf6   :  { %v4482_v29 = vrot.slane %v4481_v37, 2 }
 0xcf8   :  { %v4483_v7 = vmax.f32 %v4481_v37, %v4482_v29 }
 0xcfa   :  { %v4484_v58 = vrot.slane %v4483_v7, 1 }
 0xcfc   :  { %v4485_v19 = vmax.f32 %v4483_v7, %v4484_v58 }
 0xcfe   :  { %v4487_v14 = vsub.f32 %v4470_v4, %v4485_v19  ;;  %v7790_v4 = vmov 2  }
 0xd00   :  { %v4490_v8 = vmul.f32 1.442695, %v4487_v14 }
 0xd02   :  { %7354 = vpow2.f32 %v4490_v8 }
 0xd04   :  { %v4457_v36 = vpop.permute.xlu0 %4456 }
 0xd05   :  { %v4465_v1 = vadd.f32 %v4457_v36, %v10842_v53 }
 0xd07   :  { %v4469_v16 = vadd.f32 %v4467_v18, %v4465_v1 }
 0xd08   :  { %v7355_v59 = vpop.eup %7354 }
 0xd09   :  { %v4499_v46 = vsel %vm4471_vm1, %v7355_v59, 0.0  ;;  %v4472_v9 = vsel %vm4471_vm1, %v4469_v16, -inf  ;;  %v4546_v59 = vperm.slane %v10829_v41, 2 }
 0xd0a   :  { %v4473_v60 = vrot.slane %v4472_v9, 4  ;;  %v4500_v43 = vrot.slane %v4499_v46, 4 }
 0xd0c   :  { %v4474_v56 = vmax.f32 %v4472_v9, %v4473_v60  ;;  %v4501_v2 = vadd.f32 %v4500_v43, %v4499_v46 }
 0xd0e   :  { %v4475_v61 = vrot.slane %v4474_v56, 2  ;;  %v4502_v55 = vrot.slane %v4501_v2, 2 }
 0xd10   :  { %v4476_v23 = vmax.f32 %v4474_v56, %v4475_v61  ;;  %v4503_v48 = vadd.f32 %v4502_v55, %v4501_v2 }
 0xd12   :  { %v4477_v57 = vrot.slane %v4476_v23, 1  ;;  %v4504_v39 = vrot.slane %v4503_v48, 1 }
 0xd14   :  { %v4478_v38 = vmax.f32 %v4476_v23, %v4477_v57  ;;  %v4505_v49 = vadd.f32 %v4504_v39, %v4503_v48 }
 0xd16   :  { %v4486_v15 = vsub.f32 %v4469_v16, %v4478_v38 }
 0xd18   :  { %v4488_v45 = vmul.f32 1.442695, %v4486_v15 }
 0xd1a   :  { %7356 = vpow2.f32 %v4488_v45 }
 0xd1b   :  { %7358 = vlog2.f32 %v4505_v49 }
 0xd20   :  { %v7357_v10 = vpop.eup %7356 }
 0xd21   :  { %v4492_v13 = vsel %vm4471_vm1, %v7357_v10, 0.0  ;;  %v7359_v54 = vpop.eup %7358 }
 0xd22   :  { %v4493_v34 = vrot.slane %v4492_v13, 4  ;;  %v4509_v62 = vmul.f32 0.6931472, %v7359_v54  ;;  %v7791_v54 = vmov 3  }
 0xd23   :  { %7282 = vset.pattern.permute.xlu0 %v7791_v54 }
 0xd24   :  { %v4494_v24 = vadd.f32 %v4493_v34, %v4492_v13  ;;  %v4511_v25 = vadd.f32 %v4509_v62, %v4485_v19  ;;  %4674 = vperm.xlu0 %7282, %v10821_v32  }
 0xd26   :  { %v4495_v44 = vrot.slane %v4494_v24, 2  ;;  %v4517_v5 = vsub.f32 %v4511_v25, %v4513_v33 }
 0xd28   :  { %v4496_v50 = vadd.f32 %v4495_v44, %v4494_v24  ;;  %v4525_v11 = vrot.slane %v4517_v5, 7 }
 0xd2a   :  { %v4497_v17 = vrot.slane %v4496_v50, 1 }
 0xd2c   :  { %v4498_v30 = vadd.f32 %v4497_v17, %v4496_v50  ;;  %7284 = vset.pattern.permute.xlu0 %v8056_v28 }
 0xd2e   :  { %7360 = vlog2.f32 %v4498_v30 }
 0xd34   :  { %v7361_v0 = vpop.eup %7360 }
 0xd35   :  { %v4507_v63 = vmul.f32 0.6931472, %v7361_v0 }
 0xd37   :  { %v4510_v3 = vadd.f32 %v4507_v63, %v4478_v38 }
 0xd39   :  { %v4516_v26 = vsub.f32 %v4510_v3, %v10835_v40 }
 0xd3b   :  { %v4526_v52 = vsel %vm4447_vm0, %v4525_v11, %v4516_v26 }
 0xd3c   :  { %v4528_v35 = vmul.f32 %v4526_v52, %v4521_v47 }
 0xd3e   :  { %v10856_v27 = vadd.f32 %v4528_v35, %v10835_v40 }
 0xd40   :  { %v4537_v21 = vperm.slane %v10856_v27, 1  ;;  %v4530_v42 = vperm.slane %v10856_v27, 0  ;;  %v4591_v3 = vrot.slane %v10856_v27, 1 }
 0xd42   :  { %4542 = vperm.xlu2 %7276, %v4537_v21   ;;  %4535 = vperm.xlu1 %7279, %v4530_v42  }
 0xd4a   :  { %7280 = vset.pattern.permute.xlu2 %v7790_v4 }
 0xd4b   :  { %4597 = vperm.xlu2 %7280, %v10821_v32  }
 0xd53   :  { %7281 = vset.pattern.permute.xlu2 %v8056_v28 }
 0xd9c   :  { %v4543_v31 = vpop.permute.xlu2 %4542 }
 0xd9d   :  { %v4545_v37 = vadd.f32 %v4543_v31, %v10842_v53 }
 0xd9f   :  { %v4549_v29 = vadd.f32 %v4547_v22, %v4545_v37 }
 0xda1   :  { %v4557_v40 = vsel %vm4471_vm1, %v4549_v29, -inf }
 0xda2   :  { %v4558_v7 = vrot.slane %v4557_v40, 4 }
 0xda4   :  { %v4559_v58 = vmax.f32 %v4557_v40, %v4558_v7  ;;  %v4623_v7 = vperm.slane %v10829_v41, 3 }
 0xda5   :  { %v4598_v21 = vpop.permute.xlu2 %4597 }
 0xda6   :  { %v4560_v19 = vrot.slane %v4559_v58, 2 }
 0xda8   :  { %v4561_v14 = vmax.f32 %v4559_v58, %v4560_v19 }
 0xdaa   :  { %v4562_v8 = vrot.slane %v4561_v14, 1 }
 0xdac   :  { %v4563_v36 = vmax.f32 %v4561_v14, %v4562_v8 }
 0xdae   :  { %v4565_v18 = vsub.f32 %v4549_v29, %v4563_v36 }
 0xdb0   :  { %v4568_v1 = vmul.f32 1.442695, %v4565_v18 }
 0xdb2   :  { %7362 = vpow2.f32 %v4568_v1 }
 0xdb4   :  { %v4536_v16 = vpop.permute.xlu1 %4535 }
 0xdb5   :  { %v4544_v46 = vadd.f32 %v4536_v16, %v10842_v53 }
 0xdb7   :  { %v4548_v9 = vadd.f32 %v4546_v59, %v4544_v46 }
 0xdb8   :  { %v7363_v60 = vpop.eup %7362 }
 0xdb9   :  { %v4577_v43 = vsel %vm4471_vm1, %v7363_v60, 0.0  ;;  %v4550_v56 = vsel %vm4471_vm1, %v4548_v9, -inf  ;;  %v4624_v60 = vperm.slane %v10824_v6, 3 }
 0xdba   :  { %v4551_v61 = vrot.slane %v4550_v56, 4  ;;  %v4578_v2 = vrot.slane %v4577_v43, 4 }
 0xdbc   :  { %v4552_v23 = vmax.f32 %v4550_v56, %v4551_v61  ;;  %v4579_v55 = vadd.f32 %v4578_v2, %v4577_v43 }
 0xdbe   :  { %v4553_v57 = vrot.slane %v4552_v23, 2  ;;  %v4580_v45 = vrot.slane %v4579_v55, 2 }
 0xdc0   :  { %v4554_v38 = vmax.f32 %v4552_v23, %v4553_v57  ;;  %v4581_v49 = vadd.f32 %v4580_v45, %v4579_v55 }
 0xdc2   :  { %v4555_v15 = vrot.slane %v4554_v38, 1  ;;  %v4582_v13 = vrot.slane %v4581_v49, 1 }
 0xdc4   :  { %v4556_v48 = vmax.f32 %v4554_v38, %v4555_v15  ;;  %v4583_v24 = vadd.f32 %v4582_v13, %v4581_v49 }
 0xdc6   :  { %v4564_v39 = vsub.f32 %v4548_v9, %v4556_v48 }
 0xdc8   :  { %v4566_v10 = vmul.f32 1.442695, %v4564_v39 }
 0xdca   :  { %7364 = vpow2.f32 %v4566_v10 }
 0xdcb   :  { %7366 = vlog2.f32 %v4583_v24 }
 0xdd0   :  { %v7365_v34 = vpop.eup %7364 }
 0xdd1   :  { %v4570_v44 = vsel %vm4471_vm1, %v7365_v34, 0.0  ;;  %v7367_v25 = vpop.eup %7366 }
 0xdd2   :  { %v4571_v50 = vrot.slane %v4570_v44, 4  ;;  %v4587_v63 = vmul.f32 0.6931472, %v7367_v25 }
 0xdd4   :  { %v4572_v17 = vadd.f32 %v4571_v50, %v4570_v44  ;;  %v4589_v5 = vadd.f32 %v4587_v63, %v4563_v36 }
 0xdd6   :  { %v4573_v30 = vrot.slane %v4572_v17, 2  ;;  %v4595_v26 = vsub.f32 %v4589_v5, %v4591_v3 }
 0xdd8   :  { %v4574_v62 = vadd.f32 %v4573_v30, %v4572_v17  ;;  %v4602_v35 = vrot.slane %v4595_v26, 7 }
 0xdda   :  { %v4575_v33 = vrot.slane %v4574_v62, 1 }
 0xddc   :  { %v4576_v0 = vadd.f32 %v4575_v33, %v4574_v62 }
 0xdde   :  { %7368 = vlog2.f32 %v4576_v0 }
 0xde4   :  { %v7369_v47 = vpop.eup %7368 }
 0xde5   :  { %v4585_v11 = vmul.f32 0.6931472, %v7369_v47 }
 0xde7   :  { %v4588_v52 = vadd.f32 %v4585_v11, %v4556_v48 }
 0xde9   :  { %v4594_v42 = vsub.f32 %v4588_v52, %v10856_v27 }
 0xdeb   :  { %v4603_v4 = vsel %vm4447_vm0, %v4602_v35, %v4594_v42 }
 0xdec   :  { %v4605_v31 = vmul.f32 %v4603_v4, %v4598_v21 }
 0xdee   :  { %v10876_v22 = vadd.f32 %v4605_v31, %v10856_v27  ;;  %v4675_v31 = vpop.permute.xlu0 %4674 }
 0xdf0   :  { %v4614_v37 = vperm.slane %v10876_v22, 1  ;;  %v4607_v29 = vperm.slane %v10876_v22, 0  ;;  %v4668_v35 = vrot.slane %v10876_v22, 1 }
 0xdf2   :  { %4619 = vperm.xlu1 %7279, %v4614_v37   ;;  %4612 = vperm.xlu2 %7281, %v4607_v29  }
 0xe4c   :  { %v4613_v40 = vpop.permute.xlu2 %4612 }
 0xe4d   :  { %v4621_v58 = vadd.f32 %v4613_v40, %v10842_v53 }
 0xe4f   :  { %v4625_v19 = vadd.f32 %v4623_v7, %v4621_v58 }
 0xe51   :  { %v4627_v14 = vsel %vm4471_vm1, %v4625_v19, -inf }
 0xe52   :  { %v4628_v8 = vrot.slane %v4627_v14, 4 }
 0xe54   :  { %v4629_v36 = vmax.f32 %v4627_v14, %v4628_v8  ;;  %v4700_v8 = vperm.slane %v10829_v41, 4 }
 0xe56   :  { %v4630_v18 = vrot.slane %v4629_v36, 2 }
 0xe58   :  { %v4631_v1 = vmax.f32 %v4629_v36, %v4630_v18 }
 0xe5a   :  { %v4632_v27 = vrot.slane %v4631_v1, 1 }
 0xe5c   :  { %v4633_v16 = vmax.f32 %v4631_v1, %v4632_v27 }
 0xe5e   :  { %v4641_v59 = vsub.f32 %v4625_v19, %v4633_v16  ;;  %v7792_v19 = vmov 4  }
 0xe60   :  { %v4643_v46 = vmul.f32 1.442695, %v4641_v59 }
 0xe62   :  { %7370 = vpow2.f32 %v4643_v46 }
 0xe64   :  { %v4620_v9 = vpop.permute.xlu1 %4619 }
 0xe65   :  { %v4622_v43 = vadd.f32 %v4620_v9, %v10842_v53 }
 0xe67   :  { %v4626_v56 = vadd.f32 %v4624_v60, %v4622_v43 }
 0xe68   :  { %v7371_v23 = vpop.eup %7370 }
 0xe69   :  { %v4634_v61 = vsel %vm4471_vm1, %v4626_v56, -inf  ;;  %v4647_v38 = vsel %vm4471_vm1, %v7371_v23, 0.0 }
 0xe6a   :  { %v4635_v2 = vrot.slane %v4634_v61, 4  ;;  %v4648_v45 = vrot.slane %v4647_v38, 4 }
 0xe6c   :  { %v4636_v57 = vmax.f32 %v4634_v61, %v4635_v2  ;;  %v4649_v10 = vadd.f32 %v4648_v45, %v4647_v38  ;;  %v4701_v61 = vperm.slane %v10824_v6, 4 }
 0xe6e   :  { %v4637_v55 = vrot.slane %v4636_v57, 2  ;;  %v4650_v34 = vrot.slane %v4649_v10, 2 }
 0xe70   :  { %v4638_v15 = vmax.f32 %v4636_v57, %v4637_v55  ;;  %v4651_v24 = vadd.f32 %v4650_v34, %v4649_v10 }
 0xe72   :  { %v4639_v48 = vrot.slane %v4638_v15, 1  ;;  %v4652_v17 = vrot.slane %v4651_v24, 1 }
 0xe74   :  { %v4640_v39 = vmax.f32 %v4638_v15, %v4639_v48  ;;  %v4653_v25 = vadd.f32 %v4652_v17, %v4651_v24 }
 0xe76   :  { %v4642_v49 = vsub.f32 %v4626_v56, %v4640_v39 }
 0xe78   :  { %v4645_v13 = vmul.f32 1.442695, %v4642_v49 }
 0xe7a   :  { %7372 = vpow2.f32 %v4645_v13 }
 0xe7b   :  { %7374 = vlog2.f32 %v4653_v25 }
 0xe80   :  { %v7373_v44 = vpop.eup %7372 }
 0xe81   :  { %v4654_v50 = vsel %vm4471_vm1, %v7373_v44, 0.0  ;;  %v7375_v5 = vpop.eup %7374 }
 0xe82   :  { %v4655_v54 = vrot.slane %v4654_v50, 4  ;;  %v4662_v3 = vmul.f32 0.6931472, %v7375_v5 }
 0xe84   :  { %v4656_v30 = vadd.f32 %v4655_v54, %v4654_v50  ;;  %v4665_v11 = vadd.f32 %v4662_v3, %v4633_v16 }
 0xe86   :  { %v4657_v62 = vrot.slane %v4656_v30, 2  ;;  %v4671_v42 = vsub.f32 %v4665_v11, %v10876_v22 }
 0xe88   :  { %v4658_v33 = vadd.f32 %v4657_v62, %v4656_v30 }
 0xe8a   :  { %v4659_v0 = vrot.slane %v4658_v33, 1 }
 0xe8c   :  { %v4660_v63 = vadd.f32 %v4659_v0, %v4658_v33  ;;  %v7793_v0 = vmov 5  }
 0xe8e   :  { %7376 = vlog2.f32 %v4660_v63 }
 0xe94   :  { %v7377_v47 = vpop.eup %7376 }
 0xe95   :  { %v4664_v26 = vmul.f32 0.6931472, %v7377_v47 }
 0xe97   :  { %v4666_v52 = vadd.f32 %v4664_v26, %v4640_v39 }
 0xe99   :  { %v4672_v21 = vsub.f32 %v4666_v52, %v4668_v35 }
 0xe9b   :  { %v4679_v4 = vrot.slane %v4672_v21, 7 }
 0xe9d   :  { %v4680_v37 = vsel %vm4447_vm0, %v4679_v4, %v4671_v42 }
 0xe9e   :  { %v4682_v29 = vmul.f32 %v4680_v37, %v4675_v31 }
 0xea0   :  { %v10892_v40 = vadd.f32 %v4682_v29, %v10876_v22 }
 0xea2   :  { %v4691_v7 = vperm.slane %v10892_v40, 1  ;;  %v4684_v58 = vperm.slane %v10892_v40, 0  ;;  %v4745_v4 = vrot.slane %v10892_v40, 1 }
 0xea4   :  { %4696 = vperm.xlu1 %7279, %v4691_v7   ;;  %4689 = vperm.xlu2 %7281, %v4684_v58  }
 0xeac   :  { %7283 = vset.pattern.permute.xlu1 %v7792_v19 }
 0xead   :  { %4751 = vperm.xlu1 %7283, %v10821_v32  }
 0xeb5   :  { %7285 = vset.pattern.permute.xlu1 %v7793_v0 }
 0xeb6   :  { %4828 = vperm.xlu1 %7285, %v10821_v32  }
 0xebe   :  { %7286 = vset.pattern.permute.xlu1 %v8056_v28 }
 0xefe   :  { %v4690_v14 = vpop.permute.xlu2 %4689 }
 0xeff   :  { %v4698_v36 = vadd.f32 %v4690_v14, %v10842_v53 }
 0xf01   :  { %v4702_v18 = vadd.f32 %v4700_v8, %v4698_v36 }
 0xf03   :  { %v4704_v1 = vsel %vm4471_vm1, %v4702_v18, -inf }
 0xf04   :  { %v4705_v22 = vrot.slane %v4704_v1, 4 }
 0xf06   :  { %v4706_v27 = vmax.f32 %v4704_v1, %v4705_v22  ;;  %v4778_v1 = vperm.slane %v10824_v6, 5 }
 0xf08   :  { %v4707_v16 = vrot.slane %v4706_v27, 2 }
 0xf0a   :  { %v4708_v59 = vmax.f32 %v4706_v27, %v4707_v16 }
 0xf0c   :  { %v4709_v46 = vrot.slane %v4708_v59, 1 }
 0xf0e   :  { %v4710_v9 = vmax.f32 %v4708_v59, %v4709_v46 }
 0xf10   :  { %v4718_v60 = vsub.f32 %v4702_v18, %v4710_v9 }
 0xf12   :  { %v4720_v43 = vmul.f32 1.442695, %v4718_v60 }
 0xf14   :  { %7378 = vpow2.f32 %v4720_v43 }
 0xf16   :  { %v4697_v56 = vpop.permute.xlu1 %4696 }
 0xf17   :  { %v4699_v2 = vadd.f32 %v4697_v56, %v10842_v53 }
 0xf19   :  { %v4703_v23 = vadd.f32 %v4701_v61, %v4699_v2 }
 0xf1a   :  { %v7379_v38 = vpop.eup %7378 }
 0xf1b   :  { %v4711_v57 = vsel %vm4471_vm1, %v4703_v23, -inf  ;;  %v4724_v48 = vsel %vm4471_vm1, %v7379_v38, 0.0 }
 0xf1c   :  { %v4712_v55 = vrot.slane %v4711_v57, 4  ;;  %v4725_v10 = vrot.slane %v4724_v48, 4 }
 0xf1e   :  { %v4713_v15 = vmax.f32 %v4711_v57, %v4712_v55  ;;  %v4726_v34 = vadd.f32 %v4725_v10, %v4724_v48 }
 0xf1f   :  { %v4752_v7 = vpop.permute.xlu1 %4751 }
 0xf20   :  { %v4714_v45 = vrot.slane %v4713_v15, 2  ;;  %v4727_v50 = vrot.slane %v4726_v34, 2 }
 0xf22   :  { %v4715_v39 = vmax.f32 %v4713_v15, %v4714_v45  ;;  %v4728_v54 = vadd.f32 %v4727_v50, %v4726_v34 }
 0xf24   :  { %v4716_v49 = vrot.slane %v4715_v39, 1  ;;  %v4729_v25 = vrot.slane %v4728_v54, 1 }
 0xf26   :  { %v4717_v13 = vmax.f32 %v4715_v39, %v4716_v49  ;;  %v4730_v5 = vadd.f32 %v4729_v25, %v4728_v54 }
 0xf28   :  { %v4719_v24 = vsub.f32 %v4703_v23, %v4717_v13  ;;  %v4777_v23 = vperm.slane %v10829_v41, 5 }
 0xf2a   :  { %v4722_v44 = vmul.f32 1.442695, %v4719_v24 }
 0xf2c   :  { %7380 = vpow2.f32 %v4722_v44 }
 0xf2d   :  { %7382 = vlog2.f32 %v4730_v5 }
 0xf32   :  { %v7381_v17 = vpop.eup %7380 }
 0xf33   :  { %v4731_v30 = vsel %vm4471_vm1, %v7381_v17, 0.0  ;;  %v7383_v11 = vpop.eup %7382 }
 0xf34   :  { %v4732_v62 = vrot.slane %v4731_v30, 4  ;;  %v4739_v52 = vmul.f32 0.6931472, %v7383_v11 }
 0xf36   :  { %v4733_v33 = vadd.f32 %v4732_v62, %v4731_v30  ;;  %v4742_v31 = vadd.f32 %v4739_v52, %v4710_v9 }
 0xf38   :  { %v4734_v63 = vrot.slane %v4733_v33, 2  ;;  %v4748_v58 = vsub.f32 %v4742_v31, %v10892_v40 }
 0xf3a   :  { %v4735_v3 = vadd.f32 %v4734_v63, %v4733_v33 }
 0xf3c   :  { %v4736_v47 = vrot.slane %v4735_v3, 1 }
 0xf3e   :  { %v4737_v26 = vadd.f32 %v4736_v47, %v4735_v3 }
 0xf40   :  { %7384 = vlog2.f32 %v4737_v26 }
 0xf46   :  { %v7385_v35 = vpop.eup %7384 }
 0xf47   :  { %v4741_v21 = vmul.f32 0.6931472, %v7385_v35 }
 0xf49   :  { %v4743_v42 = vadd.f32 %v4741_v21, %v4717_v13 }
 0xf4b   :  { %v4749_v37 = vsub.f32 %v4743_v42, %v4745_v4 }
 0xf4d   :  { %v4756_v29 = vrot.slane %v4749_v37, 7 }
 0xf4f   :  { %v4757_v19 = vsel %vm4447_vm0, %v4756_v29, %v4748_v58 }
 0xf50   :  { %v4759_v14 = vmul.f32 %v4757_v19, %v4752_v7  ;;  %v4829_v7 = vpop.permute.xlu1 %4828 }
 0xf52   :  { %v10911_v8 = vadd.f32 %v4759_v14, %v10892_v40 }
 0xf54   :  { %v4768_v28 = vperm.slane %v10911_v8, 1  ;;  %v4761_v36 = vperm.slane %v10911_v8, 0  ;;  %v4822_v42 = vrot.slane %v10911_v8, 1 }
 0xf56   :  { %4773 = vperm.xlu2 %7281, %v4768_v28   ;;  %4766 = vperm.xlu0 %7284, %v4761_v36  }
 0xfb0   :  { %v4774_v18 = vpop.permute.xlu2 %4773 }
 0xfb1   :  { %v4776_v22 = vadd.f32 %v4774_v18, %v10842_v53 }
 0xfb3   :  { %v4780_v27 = vadd.f32 %v4778_v1, %v4776_v22  ;;  %v7794_v22 = vmov 6  }
 0xfb5   :  { %v4788_v16 = vsel %vm4471_vm1, %v4780_v27, -inf }
 0xfb6   :  { %v4789_v59 = vrot.slane %v4788_v16, 4 }
 0xfb8   :  { %v4790_v46 = vmax.f32 %v4788_v16, %v4789_v59  ;;  %v7796_v16 = vmov 8   ;;  %v7798_v59 = vmov 10  }
 0xfba   :  { %v4791_v9 = vrot.slane %v4790_v46, 2 }
 0xfbc   :  { %v4792_v60 = vmax.f32 %v4790_v46, %v4791_v9  ;;  %v7799_v46 = vmov 11   ;;  %v7800_v9 = vmov 12  }
 0xfbe   :  { %v4793_v40 = vrot.slane %v4792_v60, 1 }
 0xfc0   :  { %v4794_v43 = vmax.f32 %v4792_v60, %v4793_v40  ;;  %v7801_v60 = vmov 13   ;;  %v7802_v40 = vmov 14  }
 0xfc2   :  { %v4796_v56 = vsub.f32 %v4780_v27, %v4794_v43  ;;  %v7795_v27 = vmov 7  }
 0xfc4   :  { %v4799_v61 = vmul.f32 1.442695, %v4796_v56 }
 0xfc6   :  { %7386 = vpow2.f32 %v4799_v61  ;;  %v4855_v61 = vperm.slane %v10824_v6, 6 }
 0xfc8   :  { %v4767_v2 = vpop.permute.xlu0 %4766 }
 0xfc9   :  { %v4775_v57 = vadd.f32 %v4767_v2, %v10842_v53 }
 0xfcb   :  { %v4779_v55 = vadd.f32 %v4777_v23, %v4775_v57 }
 0xfcc   :  { %v7387_v38 = vpop.eup %7386 }
 0xfcd   :  { %v4808_v15 = vsel %vm4471_vm1, %v7387_v38, 0.0  ;;  %v4781_v45 = vsel %vm4471_vm1, %v4779_v55, -inf }
 0xfce   :  { %v4782_v48 = vrot.slane %v4781_v45, 4  ;;  %v4809_v39 = vrot.slane %v4808_v15, 4 }
 0xfd0   :  { %v4783_v10 = vmax.f32 %v4781_v45, %v4782_v48  ;;  %v4810_v13 = vadd.f32 %v4809_v39, %v4808_v15  ;;  %v7804_v15 = vmov 16  }
 0xfd2   :  { %v4784_v49 = vrot.slane %v4783_v10, 2  ;;  %v4811_v44 = vrot.slane %v4810_v13, 2 }
 0xfd4   :  { %v4785_v34 = vmax.f32 %v4783_v10, %v4784_v49  ;;  %v4812_v30 = vadd.f32 %v4811_v44, %v4810_v13  ;;  %v7805_v49 = vmov 17   ;;  %v4854_v44 = vperm.slane %v10829_v41, 6 }
 0xfd6   :  { %v4786_v24 = vrot.slane %v4785_v34, 1  ;;  %v4813_v62 = vrot.slane %v4812_v30, 1 }
 0xfd8   :  { %v4787_v50 = vmax.f32 %v4785_v34, %v4786_v24  ;;  %v4814_v33 = vadd.f32 %v4813_v62, %v4812_v30 }
 0xfda   :  { %v4795_v54 = vsub.f32 %v4779_v55, %v4787_v50 }
 0xfdc   :  { %v4797_v17 = vmul.f32 1.442695, %v4795_v54  ;;  %v7806_v54 = vmov 18  }
 0xfde   :  { %7388 = vpow2.f32 %v4797_v17 }
 0xfdf   :  { %7390 = vlog2.f32 %v4814_v33 }
 0xfe4   :  { %v7389_v25 = vpop.eup %7388 }
 0xfe5   :  { %v4801_v0 = vsel %vm4471_vm1, %v7389_v25, 0.0  ;;  %v7391_v26 = vpop.eup %7390 }
 0xfe6   :  { %v4802_v63 = vrot.slane %v4801_v0, 4  ;;  %v4818_v35 = vmul.f32 0.6931472, %v7391_v26 }
 0xfe8   :  { %v4803_v5 = vadd.f32 %v4802_v63, %v4801_v0  ;;  %v4820_v21 = vadd.f32 %v4818_v35, %v4794_v43  ;;  %v7803_v43 = vmov 15  }
 0xfea   :  { %v4804_v3 = vrot.slane %v4803_v5, 2  ;;  %v4826_v37 = vsub.f32 %v4820_v21, %v4822_v42 }
 0xfec   :  { %v4805_v47 = vadd.f32 %v4804_v3, %v4803_v5  ;;  %v4833_v19 = vrot.slane %v4826_v37, 7  ;;  %v7807_v3 = vmov 19  }
 0xfee   :  { %v4806_v11 = vrot.slane %v4805_v47, 1 }
 0xff0   :  { %v4807_v52 = vadd.f32 %v4806_v11, %v4805_v47 }
 0xff2   :  { %7392 = vlog2.f32 %v4807_v52 }
 0xff8   :  { %v7393_v4 = vpop.eup %7392 }
 0xff9   :  { %v4816_v31 = vmul.f32 0.6931472, %v7393_v4  ;;  %v7808_v4 = vmov 20  }
 0xffb   :  { %v4819_v29 = vadd.f32 %v4816_v31, %v4787_v50 }
 0xffd   :  { %v4825_v58 = vsub.f32 %v4819_v29, %v10911_v8 }
 0xfff   :  { %v4834_v14 = vsel %vm4447_vm0, %v4833_v19, %v4825_v58  ;;  %v7809_v19 = vmov 21  }
0x1000   :  { %v4836_v28 = vmul.f32 %v4834_v14, %v4829_v7 }
0x1002   :  { %v10927_v36 = vadd.f32 %v4836_v28, %v10911_v8  ;;  %v7797_v8 = vmov 9  }
0x1004   :  { %v4845_v18 = vperm.slane %v10927_v36, 1  ;;  %v4838_v1 = vperm.slane %v10927_v36, 0 }
0x1006   :  { %4850 = vperm.xlu2 %7281, %v4845_v18   ;;  %4843 = vperm.xlu1 %7286, %v4838_v1  }
0x100e   :  { %7287 = vset.pattern.permute.xlu2 %v7794_v22 }
0x100f   :  { %4905 = vperm.xlu2 %7287, %v10821_v32  }
0x1017   :  { %7288 = vset.pattern.permute.xlu2 %v7795_v27  ;;  %v7810_v27 = vmov 22  }
0x1018   :  { %4982 = vperm.xlu2 %7288, %v10821_v32  }
0x1020   :  { %7289 = vset.pattern.permute.xlu2 %v7796_v16 }
0x1021   :  { %5059 = vperm.xlu2 %7289, %v10821_v32  }
0x1029   :  { %7290 = vset.pattern.permute.xlu2 %v7797_v8 }
0x102a   :  { %5136 = vperm.xlu2 %7290, %v10821_v32  }
0x1032   :  { %7291 = vset.pattern.permute.xlu2 %v7798_v59 }
0x1033   :  { %5213 = vperm.xlu2 %7291, %v10821_v32  }
0x103b   :  { %7292 = vset.pattern.permute.xlu2 %v7799_v46 }
0x103c   :  { %5290 = vperm.xlu2 %7292, %v10821_v32  }
0x1044   :  { %7293 = vset.pattern.permute.xlu2 %v7800_v9  ;;  %v7811_v9 = vmov 23  }
0x1045   :  { %5367 = vperm.xlu2 %7293, %v10821_v32  }
0x104d   :  { %7294 = vset.pattern.permute.xlu2 %v7801_v60  ;;  %v4899_v60 = vrot.slane %v10927_v36, 1 }
0x104e   :  { %5444 = vperm.xlu2 %7294, %v10821_v32  }
0x1056   :  { %7295 = vset.pattern.permute.xlu2 %v7802_v40 }
0x1057   :  { %5521 = vperm.xlu2 %7295, %v10821_v32  }
0x105f   :  { %7296 = vset.pattern.permute.xlu2 %v7803_v43 }
0x1060   :  { %5598 = vperm.xlu2 %7296, %v10821_v32   ;;  %v4851_v56 = vpop.permute.xlu2 %4850 }
0x1061   :  { %v4853_v2 = vadd.f32 %v4851_v56, %v10842_v53 }
0x1063   :  { %v4857_v23 = vadd.f32 %v4855_v61, %v4853_v2 }
0x1065   :  { %v4865_v57 = vsel %vm4471_vm1, %v4857_v23, -inf }
0x1066   :  { %v4866_v55 = vrot.slane %v4865_v57, 4 }
0x1068   :  { %v4867_v38 = vmax.f32 %v4865_v57, %v4866_v55  ;;  %7297 = vset.pattern.permute.xlu2 %v7804_v15  ;;  %v7812_v15 = vmov 24  }
0x1069   :  { %5675 = vperm.xlu2 %7297, %v10821_v32  }
0x106a   :  { %v4868_v45 = vrot.slane %v4867_v38, 2 }
0x106c   :  { %v4869_v48 = vmax.f32 %v4867_v38, %v4868_v45 }
0x106e   :  { %v4870_v39 = vrot.slane %v4869_v48, 1 }
0x1070   :  { %v4871_v10 = vmax.f32 %v4869_v48, %v4870_v39 }
0x1071   :  { %7298 = vset.pattern.permute.xlu2 %v7805_v49  ;;  %v7814_v49 = vmov 26  }
0x1072   :  { %v4873_v13 = vsub.f32 %v4857_v23, %v4871_v10  ;;  %5752 = vperm.xlu2 %7298, %v10821_v32   ;;  %v4906_v23 = vpop.permute.xlu2 %4905 }
0x1074   :  { %v4876_v34 = vmul.f32 1.442695, %v4873_v13  ;;  %v7815_v13 = vmov 27  }
0x1076   :  { %7394 = vpow2.f32 %v4876_v34  ;;  %v7817_v34 = vmov 29  }
0x1078   :  { %v4844_v24 = vpop.permute.xlu1 %4843 }
0x1079   :  { %v4852_v50 = vadd.f32 %v4844_v24, %v10842_v53  ;;  %v7818_v24 = vmov 30  }
0x107a   :  { %7299 = vset.pattern.permute.xlu2 %v7806_v54 }
0x107b   :  { %v4856_v17 = vadd.f32 %v4854_v44, %v4852_v50  ;;  %5829 = vperm.xlu2 %7299, %v10821_v32   ;;  %v7819_v44 = vmov 31   ;;  %v4195_v50 = vld [vmem:[%s11614_s15 + $0x8] sm:$0xff] }
0x107c   :  { %v7395_v30 = vpop.eup %7394  ;;  %v4203_v54 = vmul.f32 %v4195_v50, %v10812_v20 }
0x107d   :  { %v4885_v62 = vsel %vm4471_vm1, %v7395_v30, 0.0  ;;  %v4858_v25 = vsel %vm4471_vm1, %v4856_v17, -inf  ;;  %v4196_v30 = vld [vmem:[%s11614_s15 + $0x10] sm:$0xff] }
0x107e   :  { %v4859_v33 = vrot.slane %v4858_v25, 4  ;;  %v4886_v0 = vrot.slane %v4885_v62, 4 }
0x1080   :  { %v4860_v63 = vmax.f32 %v4858_v25, %v4859_v33  ;;  %v4887_v47 = vadd.f32 %v4886_v0, %v4885_v62  ;;  %v4204_v62 = vmul.f32 %v4196_v30, %v10814_v51  ;;  %v4932_v0 = vperm.slane %v10824_v6, 7 }
0x1082   :  { %v4861_v5 = vrot.slane %v4860_v63, 2  ;;  %v4888_v52 = vrot.slane %v4887_v47, 2  ;;  %v4217_v25 = vsel %vm4210_vm2, %v4204_v62, 0.0 }
0x1083   :  { %7300 = vset.pattern.permute.xlu2 %v7807_v3 }
0x1084   :  { %v4862_v26 = vmax.f32 %v4860_v63, %v4861_v5  ;;  %5906 = vperm.xlu2 %7300, %v10821_v32   ;;  %v4889_v31 = vadd.f32 %v4888_v52, %v4887_v47  ;;  %v4931_v5 = vperm.slane %v10829_v41, 7 }
0x1086   :  { %v4863_v11 = vrot.slane %v4862_v26, 1  ;;  %v4890_v37 = vrot.slane %v4889_v31, 1 }
0x1088   :  { %v4864_v35 = vmax.f32 %v4862_v26, %v4863_v11  ;;  %v4891_v7 = vadd.f32 %v4890_v37, %v4889_v31 }
0x108a   :  { %v4872_v21 = vsub.f32 %v4856_v17, %v4864_v35  ;;  %v4214_v17 = vsel %vm4210_vm2, %v4203_v54, 0.0  ;;  %v4983_v54 = vpop.permute.xlu2 %4982 }
0x108c   :  { %v4874_v42 = vmul.f32 1.442695, %v4872_v21  ;;  %7301 = vset.pattern.permute.xlu2 %v7808_v4 }
0x108d   :  { %5983 = vperm.xlu2 %7301, %v10821_v32  }
0x108e   :  { %7396 = vpow2.f32 %v4874_v42 }
0x108f   :  { %7398 = vlog2.f32 %v4891_v7 }
0x1094   :  { %v7397_v29 = vpop.eup %7396 }
0x1095   :  { %v4878_v58 = vsel %vm4471_vm1, %v7397_v29, 0.0  ;;  %7302 = vset.pattern.permute.xlu2 %v7809_v19  ;;  %v7399_v22 = vpop.eup %7398 }
0x1096   :  { %v4879_v14 = vrot.slane %v4878_v58, 4  ;;  %6060 = vperm.xlu2 %7302, %v10821_v32   ;;  %v4895_v59 = vmul.f32 0.6931472, %v7399_v22 }
0x1098   :  { %v4880_v28 = vadd.f32 %v4879_v14, %v4878_v58  ;;  %v4897_v46 = vadd.f32 %v4895_v59, %v4871_v10  ;;  %v7813_v10 = vmov 25  }
0x109a   :  { %v4881_v18 = vrot.slane %v4880_v28, 2  ;;  %v4903_v43 = vsub.f32 %v4897_v46, %v4899_v60 }
0x109c   :  { %v4882_v1 = vadd.f32 %v4881_v18, %v4880_v28  ;;  %v4910_v2 = vrot.slane %v4903_v43, 7 }
0x109e   :  { %7303 = vset.pattern.permute.xlu2 %v7810_v27  ;;  %v4883_v16 = vrot.slane %v4882_v1, 1 }
0x109f   :  { %6137 = vperm.xlu2 %7303, %v10821_v32  }
0x10a0   :  { %v4884_v8 = vadd.f32 %v4883_v16, %v4882_v1 }
0x10a2   :  { %7400 = vlog2.f32 %v4884_v8 }
0x10a7   :  { %7304 = vset.pattern.permute.xlu2 %v7811_v9 }
0x10a8   :  { %v7401_v40 = vpop.eup %7400  ;;  %6214 = vperm.xlu2 %7304, %v10821_v32  }
0x10a9   :  { %v4893_v56 = vmul.f32 0.6931472, %v7401_v40 }
0x10ab   :  { %v4896_v61 = vadd.f32 %v4893_v56, %v4864_v35 }
0x10ad   :  { %v4902_v57 = vsub.f32 %v4896_v61, %v10927_v36 }
0x10af   :  { %v4911_v55 = vsel %vm4447_vm0, %v4910_v2, %v4902_v57 }
0x10b0   :  { %v4913_v38 = vmul.f32 %v4911_v55, %v4906_v23  ;;  %7305 = vset.pattern.permute.xlu2 %v7812_v15 }
0x10b1   :  { %6291 = vperm.xlu2 %7305, %v10821_v32  }
0x10b2   :  { %v10962_v45 = vadd.f32 %v4913_v38, %v10927_v36  ;;  %v7816_v36 = vmov 28  }
0x10b4   :  { %v4922_v48 = vperm.slane %v10962_v45, 1  ;;  %v4915_v39 = vperm.slane %v10962_v45, 0 }
0x10b6   :  { %4927 = vperm.xlu0 %7284, %v4922_v48   ;;  %4920 = vperm.xlu1 %7286, %v4915_v39  }
0x10b9   :  { %7306 = vset.pattern.permute.xlu2 %v7813_v10 }
0x10ba   :  { %6368 = vperm.xlu2 %7306, %v10821_v32  }
0x10c2   :  { %7307 = vset.pattern.permute.xlu2 %v7814_v49  ;;  %v4976_v49 = vrot.slane %v10962_v45, 1 }
0x10c3   :  { %6445 = vperm.xlu2 %7307, %v10821_v32  }
0x10cb   :  { %7308 = vset.pattern.permute.xlu2 %v7815_v13 }
0x10cc   :  { %6522 = vperm.xlu2 %7308, %v10821_v32  }
0x10d4   :  { %7309 = vset.pattern.permute.xlu2 %v7816_v36 }
0x10d5   :  { %6599 = vperm.xlu2 %7309, %v10821_v32  }
0x10dd   :  { %7310 = vset.pattern.permute.xlu2 %v7817_v34 }
0x10de   :  { %6676 = vperm.xlu2 %7310, %v10821_v32  }
0x10e6   :  { %7311 = vset.pattern.permute.xlu2 %v7818_v24 }
0x10e7   :  { %6753 = vperm.xlu2 %7311, %v10821_v32  }
0x10ef   :  { %7312 = vset.pattern.permute.xlu2 %v7819_v44 }
0x10f0   :  { %6830 = vperm.xlu2 %7312, %v10821_v32  }
0x1119   :  { %4215 = vadd.xlane.f32.xlu2 %v4214_v17 }
0x1121   :  { %4218 = vadd.xlane.f32.xlu2 %v4217_v25 }
0x1128   :  { %v4928_v32 = vpop.permute.xlu0 %4927  ;;  %v4921_v33 = vpop.permute.xlu1 %4920 }
0x1129   :  { %v4930_v63 = vadd.f32 %v4928_v32, %v10842_v53  ;;  %v4929_v3 = vadd.f32 %v4921_v33, %v10842_v53  ;;  %v4182_v33 = vpop.f32.mrf.mxu1 }
0x112b   :  { %v4934_v47 = vadd.f32 %v4932_v0, %v4930_v63  ;;  %v4933_v26 = vadd.f32 %v4931_v5, %v4929_v3  ;;  %v7751_v0 = vld [vmem:[%s11609_s10] ss:$0 sm:$0xff] }
0x112c   :  { %v11003_v63 = vadd.f32 %v7751_v0, %v4182_v33 }
0x112d   :  { %v4942_v11 = vsel %vm4471_vm1, %v4934_v47, -inf  ;;  %v4935_v52 = vsel %vm4471_vm1, %v4933_v26, -inf }
0x112e   :  { %v4943_v35 = vrot.slane %v4942_v11, 4  ;;  %v4936_v21 = vrot.slane %v4935_v52, 4 }
0x1130   :  { %v4944_v42 = vmax.f32 %v4942_v11, %v4943_v35  ;;  %v4937_v4 = vmax.f32 %v4935_v52, %v4936_v21  ;;  %v5008_v11 = vperm.slane %v10812_v20, 0 }
0x1132   :  { %v4945_v31 = vrot.slane %v4944_v42, 2  ;;  %v4938_v37 = vrot.slane %v4937_v4, 2 }
0x1134   :  { %v4946_v29 = vmax.f32 %v4944_v42, %v4945_v31  ;;  %v4939_v7 = vmax.f32 %v4937_v4, %v4938_v37 }
0x1136   :  { %v4947_v58 = vrot.slane %v4946_v29, 1  ;;  %v4940_v19 = vrot.slane %v4939_v7, 1 }
0x1138   :  { %v4948_v14 = vmax.f32 %v4946_v29, %v4947_v58  ;;  %v4941_v28 = vmax.f32 %v4939_v7, %v4940_v19 }
0x113a   :  { %v4950_v18 = vsub.f32 %v4934_v47, %v4948_v14  ;;  %v4949_v53 = vsub.f32 %v4933_v26, %v4941_v28  ;;  %v5009_v26 = vperm.slane %v11003_v63, 0 }
0x113c   :  { %v4953_v1 = vmul.f32 1.442695, %v4950_v18  ;;  %v4951_v22 = vmul.f32 1.442695, %v4949_v53 }
0x113e   :  { %7402 = vpow2.f32 %v4953_v1 }
0x113f   :  { %7404 = vpow2.f32 %v4951_v22 }
0x1144   :  { %v7403_v27 = vpop.eup %7402 }
0x1145   :  { %v7405_v16 = vpop.eup %7404  ;;  %v4962_v8 = vsel %vm4471_vm1, %v7403_v27, 0.0 }
0x1146   :  { %v4963_v59 = vrot.slane %v4962_v8, 4  ;;  %v4955_v46 = vsel %vm4471_vm1, %v7405_v16, 0.0 }
0x1147   :  { %v4956_v9 = vrot.slane %v4955_v46, 4 }
0x1148   :  { %v4964_v60 = vadd.f32 %v4963_v59, %v4962_v8 }
0x1149   :  { %v4957_v40 = vadd.f32 %v4956_v9, %v4955_v46 }
0x114a   :  { %v4965_v43 = vrot.slane %v4964_v60, 2 }
0x114b   :  { %v4958_v56 = vrot.slane %v4957_v40, 2 }
0x114c   :  { %v4966_v61 = vadd.f32 %v4965_v43, %v4964_v60 }
0x114d   :  { %v4959_v2 = vadd.f32 %v4958_v56, %v4957_v40 }
0x114e   :  { %v4967_v23 = vrot.slane %v4966_v61, 1 }
0x114f   :  { %v4960_v57 = vrot.slane %v4959_v2, 1 }
0x1150   :  { %v4968_v55 = vadd.f32 %v4967_v23, %v4966_v61 }
0x1151   :  { %v4961_v38 = vadd.f32 %v4960_v57, %v4959_v2 }
0x1152   :  { %7406 = vlog2.f32 %v4968_v55 }
0x1153   :  { %7408 = vlog2.f32 %v4961_v38 }
0x1158   :  { %v7407_v15 = vpop.eup %7406 }
0x1159   :  { %v7409_v48 = vpop.eup %7408  ;;  %v4972_v39 = vmul.f32 0.6931472, %v7407_v15 }
0x115a   :  { %v4970_v10 = vmul.f32 0.6931472, %v7409_v48 }
0x115b   :  { %v4974_v13 = vadd.f32 %v4972_v39, %v4948_v14 }
0x115c   :  { %v4973_v36 = vadd.f32 %v4970_v10, %v4941_v28 }
0x115d   :  { %v4980_v34 = vsub.f32 %v4974_v13, %v4976_v49 }
0x115e   :  { %v4979_v50 = vsub.f32 %v4973_v36, %v10962_v45 }
0x115f   :  { %v4987_v24 = vrot.slane %v4980_v34, 7 }
0x1161   :  { %v4988_v17 = vsel %vm4447_vm0, %v4987_v24, %v4979_v50 }
0x1162   :  { %v4990_v30 = vmul.f32 %v4988_v17, %v4983_v54 }
0x1164   :  { %v10996_v62 = vadd.f32 %v4990_v30, %v10962_v45  ;;  %v11008_v45 = vld [vmem:[%s11621_s22] sm:$0x3f] }
0x1166   :  { %v4999_v25 = vperm.slane %v10996_v62, 1  ;;  %v4992_v32 = vperm.slane %v10996_v62, 0  ;;  %v5053_v24 = vrot.slane %v10996_v62, 1 }
0x1168   :  { %5004 = vperm.xlu0 %7284, %v4999_v25   ;;  %4997 = vperm.xlu1 %7286, %v4992_v32   ;;  %v5060_v32 = vpop.permute.xlu2 %5059 }
0x11da   :  { %v5005_v5 = vpop.permute.xlu0 %5004  ;;  %v4998_v3 = vpop.permute.xlu1 %4997 }
0x11db   :  { %v5007_v47 = vadd.f32 %v11008_v45, %v5005_v5  ;;  %v5006_v52 = vadd.f32 %v11008_v45, %v4998_v3 }
0x11dd   :  { %v5011_v35 = vadd.f32 %v5009_v26, %v5007_v47  ;;  %v5010_v21 = vadd.f32 %v5008_v11, %v5006_v52  ;;  %v5086_v52 = vperm.slane %v11003_v63, 1 }
0x11df   :  { %v5019_v42 = vsel %vm4471_vm1, %v5011_v35, -inf  ;;  %v5012_v4 = vsel %vm4471_vm1, %v5010_v21, -inf }
0x11e0   :  { %v5020_v31 = vrot.slane %v5019_v42, 4  ;;  %v5013_v37 = vrot.slane %v5012_v4, 4 }
0x11e2   :  { %v5021_v29 = vmax.f32 %v5019_v42, %v5020_v31  ;;  %v5014_v7 = vmax.f32 %v5012_v4, %v5013_v37 }
0x11e4   :  { %v5022_v58 = vrot.slane %v5021_v29, 2  ;;  %v5015_v19 = vrot.slane %v5014_v7, 2 }
0x11e6   :  { %v5023_v14 = vmax.f32 %v5021_v29, %v5022_v58  ;;  %v5016_v28 = vmax.f32 %v5014_v7, %v5015_v19 }
0x11e8   :  { %v5024_v18 = vrot.slane %v5023_v14, 1  ;;  %v5017_v53 = vrot.slane %v5016_v28, 1 }
0x11ea   :  { %v5025_v1 = vmax.f32 %v5023_v14, %v5024_v18  ;;  %v5018_v22 = vmax.f32 %v5016_v28, %v5017_v53 }
0x11ec   :  { %v5027_v27 = vsub.f32 %v5011_v35, %v5025_v1  ;;  %v5026_v16 = vsub.f32 %v5010_v21, %v5018_v22  ;;  %v5085_v21 = vperm.slane %v10812_v20, 1 }
0x11ee   :  { %v5030_v8 = vmul.f32 1.442695, %v5027_v27  ;;  %v5028_v59 = vmul.f32 1.442695, %v5026_v16 }
0x11f0   :  { %7410 = vpow2.f32 %v5030_v8 }
0x11f1   :  { %7412 = vpow2.f32 %v5028_v59 }
0x11f6   :  { %v7411_v46 = vpop.eup %7410 }
0x11f7   :  { %v7413_v9 = vpop.eup %7412  ;;  %v5039_v60 = vsel %vm4471_vm1, %v7411_v46, 0.0 }
0x11f8   :  { %v5040_v40 = vrot.slane %v5039_v60, 4  ;;  %v5032_v43 = vsel %vm4471_vm1, %v7413_v9, 0.0 }
0x11f9   :  { %v5033_v56 = vrot.slane %v5032_v43, 4 }
0x11fa   :  { %v5041_v61 = vadd.f32 %v5040_v40, %v5039_v60 }
0x11fb   :  { %v5034_v2 = vadd.f32 %v5033_v56, %v5032_v43 }
0x11fc   :  { %v5042_v23 = vrot.slane %v5041_v61, 2 }
0x11fd   :  { %v5035_v57 = vrot.slane %v5034_v2, 2 }
0x11fe   :  { %v5043_v55 = vadd.f32 %v5042_v23, %v5041_v61 }
0x11ff   :  { %v5036_v38 = vadd.f32 %v5035_v57, %v5034_v2 }
0x1200   :  { %v5044_v15 = vrot.slane %v5043_v55, 1 }
0x1201   :  { %v5037_v48 = vrot.slane %v5036_v38, 1 }
0x1202   :  { %v5045_v39 = vadd.f32 %v5044_v15, %v5043_v55 }
0x1203   :  { %v5038_v10 = vadd.f32 %v5037_v48, %v5036_v38 }
0x1204   :  { %7414 = vlog2.f32 %v5045_v39 }
0x1205   :  { %7416 = vlog2.f32 %v5038_v10 }
0x120a   :  { %v7415_v49 = vpop.eup %7414 }
0x120b   :  { %v7417_v13 = vpop.eup %7416  ;;  %v5049_v36 = vmul.f32 0.6931472, %v7415_v49 }
0x120c   :  { %v5047_v34 = vmul.f32 0.6931472, %v7417_v13 }
0x120d   :  { %v5051_v50 = vadd.f32 %v5049_v36, %v5025_v1 }
0x120e   :  { %v5050_v54 = vadd.f32 %v5047_v34, %v5018_v22 }
0x120f   :  { %v5057_v17 = vsub.f32 %v5051_v50, %v5053_v24 }
0x1210   :  { %v5056_v25 = vsub.f32 %v5050_v54, %v10996_v62 }
0x1211   :  { %v5064_v30 = vrot.slane %v5057_v17, 7 }
0x1213   :  { %v5065_v33 = vsel %vm4447_vm0, %v5064_v30, %v5056_v25 }
0x1214   :  { %v5067_v0 = vmul.f32 %v5065_v33, %v5060_v32 }
0x1216   :  { %v11022_v5 = vadd.f32 %v5067_v0, %v10996_v62  ;;  %v5137_v0 = vpop.permute.xlu2 %5136 }
0x1218   :  { %v5076_v3 = vperm.slane %v11022_v5, 1  ;;  %v5069_v47 = vperm.slane %v11022_v5, 0  ;;  %v5130_v54 = vrot.slane %v11022_v5, 1 }
0x121a   :  { %5081 = vperm.xlu0 %7284, %v5076_v3   ;;  %5074 = vperm.xlu1 %7286, %v5069_v47  }
0x128c   :  { %v5082_v26 = vpop.permute.xlu0 %5081  ;;  %v5075_v11 = vpop.permute.xlu1 %5074 }
0x128d   :  { %v5084_v35 = vadd.f32 %v11008_v45, %v5082_v26  ;;  %v5083_v42 = vadd.f32 %v11008_v45, %v5075_v11 }
0x128f   :  { %v5088_v4 = vadd.f32 %v5086_v52, %v5084_v35  ;;  %v5087_v31 = vadd.f32 %v5085_v21, %v5083_v42  ;;  %v5163_v42 = vperm.slane %v11003_v63, 2 }
0x1291   :  { %v5096_v62 = vsel %vm4471_vm1, %v5088_v4, -inf  ;;  %v5089_v37 = vsel %vm4471_vm1, %v5087_v31, -inf }
0x1292   :  { %v5097_v29 = vrot.slane %v5096_v62, 4  ;;  %v5090_v7 = vrot.slane %v5089_v37, 4 }
0x1294   :  { %v5098_v58 = vmax.f32 %v5096_v62, %v5097_v29  ;;  %v5091_v19 = vmax.f32 %v5089_v37, %v5090_v7 }
0x1296   :  { %v5099_v14 = vrot.slane %v5098_v58, 2  ;;  %v5092_v28 = vrot.slane %v5091_v19, 2 }
0x1298   :  { %v5100_v18 = vmax.f32 %v5098_v58, %v5099_v14  ;;  %v5093_v53 = vmax.f32 %v5091_v19, %v5092_v28 }
0x129a   :  { %v5101_v1 = vrot.slane %v5100_v18, 1  ;;  %v5094_v22 = vrot.slane %v5093_v53, 1 }
0x129c   :  { %v5102_v27 = vmax.f32 %v5100_v18, %v5101_v1  ;;  %v5095_v16 = vmax.f32 %v5093_v53, %v5094_v22 }
0x129e   :  { %v5104_v8 = vsub.f32 %v5088_v4, %v5102_v27  ;;  %v5103_v59 = vsub.f32 %v5087_v31, %v5095_v16  ;;  %v5162_v31 = vperm.slane %v10812_v20, 2 }
0x12a0   :  { %v5107_v46 = vmul.f32 1.442695, %v5104_v8  ;;  %v5105_v9 = vmul.f32 1.442695, %v5103_v59 }
0x12a2   :  { %7418 = vpow2.f32 %v5107_v46 }
0x12a3   :  { %7420 = vpow2.f32 %v5105_v9 }
0x12a8   :  { %v7419_v60 = vpop.eup %7418 }
0x12a9   :  { %v7421_v40 = vpop.eup %7420  ;;  %v5116_v43 = vsel %vm4471_vm1, %v7419_v60, 0.0 }
0x12aa   :  { %v5117_v56 = vrot.slane %v5116_v43, 4  ;;  %v5109_v61 = vsel %vm4471_vm1, %v7421_v40, 0.0 }
0x12ab   :  { %v5110_v2 = vrot.slane %v5109_v61, 4 }
0x12ac   :  { %v5118_v23 = vadd.f32 %v5117_v56, %v5116_v43 }
0x12ad   :  { %v5111_v57 = vadd.f32 %v5110_v2, %v5109_v61 }
0x12ae   :  { %v5119_v55 = vrot.slane %v5118_v23, 2 }
0x12af   :  { %v5112_v38 = vrot.slane %v5111_v57, 2 }
0x12b0   :  { %v5120_v15 = vadd.f32 %v5119_v55, %v5118_v23 }
0x12b1   :  { %v5113_v48 = vadd.f32 %v5112_v38, %v5111_v57 }
0x12b2   :  { %v5121_v39 = vrot.slane %v5120_v15, 1 }
0x12b3   :  { %v5114_v10 = vrot.slane %v5113_v48, 1 }
0x12b4   :  { %v5122_v49 = vadd.f32 %v5121_v39, %v5120_v15 }
0x12b5   :  { %v5115_v13 = vadd.f32 %v5114_v10, %v5113_v48 }
0x12b6   :  { %7422 = vlog2.f32 %v5122_v49 }
0x12b7   :  { %7424 = vlog2.f32 %v5115_v13 }
0x12bc   :  { %v7423_v36 = vpop.eup %7422 }
0x12bd   :  { %v7425_v34 = vpop.eup %7424  ;;  %v5126_v24 = vmul.f32 0.6931472, %v7423_v36 }
0x12be   :  { %v5124_v50 = vmul.f32 0.6931472, %v7425_v34 }
0x12bf   :  { %v5128_v17 = vadd.f32 %v5126_v24, %v5102_v27 }
0x12c0   :  { %v5127_v30 = vadd.f32 %v5124_v50, %v5095_v16 }
0x12c1   :  { %v5134_v25 = vsub.f32 %v5128_v17, %v5130_v54 }
0x12c2   :  { %v5133_v33 = vsub.f32 %v5127_v30, %v11022_v5 }
0x12c3   :  { %v5141_v32 = vrot.slane %v5134_v25, 7 }
0x12c5   :  { %v5142_v3 = vsel %vm4447_vm0, %v5141_v32, %v5133_v33 }
0x12c6   :  { %v5144_v47 = vmul.f32 %v5142_v3, %v5137_v0 }
0x12c8   :  { %v11038_v26 = vadd.f32 %v5144_v47, %v11022_v5  ;;  %v5214_v47 = vpop.permute.xlu2 %5213 }
0x12ca   :  { %v5153_v11 = vperm.slane %v11038_v26, 1  ;;  %v5146_v52 = vperm.slane %v11038_v26, 0  ;;  %v5207_v30 = vrot.slane %v11038_v26, 1 }
0x12cc   :  { %5158 = vperm.xlu0 %7284, %v5153_v11   ;;  %5151 = vperm.xlu1 %7286, %v5146_v52  }
0x133e   :  { %v5159_v35 = vpop.permute.xlu0 %5158  ;;  %v5152_v21 = vpop.permute.xlu1 %5151 }
0x133f   :  { %v5161_v4 = vadd.f32 %v11008_v45, %v5159_v35  ;;  %v5160_v62 = vadd.f32 %v11008_v45, %v5152_v21 }
0x1341   :  { %v5165_v37 = vadd.f32 %v5163_v42, %v5161_v4  ;;  %v5164_v29 = vadd.f32 %v5162_v31, %v5160_v62  ;;  %v5240_v62 = vperm.slane %v11003_v63, 3 }
0x1343   :  { %v5173_v5 = vsel %vm4471_vm1, %v5165_v37, -inf  ;;  %v5166_v7 = vsel %vm4471_vm1, %v5164_v29, -inf }
0x1344   :  { %v5174_v58 = vrot.slane %v5173_v5, 4  ;;  %v5167_v19 = vrot.slane %v5166_v7, 4 }
0x1346   :  { %v5175_v14 = vmax.f32 %v5173_v5, %v5174_v58  ;;  %v5168_v28 = vmax.f32 %v5166_v7, %v5167_v19 }
0x1348   :  { %v5176_v18 = vrot.slane %v5175_v14, 2  ;;  %v5169_v53 = vrot.slane %v5168_v28, 2 }
0x134a   :  { %v5177_v1 = vmax.f32 %v5175_v14, %v5176_v18  ;;  %v5170_v22 = vmax.f32 %v5168_v28, %v5169_v53 }
0x134c   :  { %v5178_v27 = vrot.slane %v5177_v1, 1  ;;  %v5171_v16 = vrot.slane %v5170_v22, 1 }
0x134e   :  { %v5179_v8 = vmax.f32 %v5177_v1, %v5178_v27  ;;  %v5172_v59 = vmax.f32 %v5170_v22, %v5171_v16 }
0x1350   :  { %v5181_v46 = vsub.f32 %v5165_v37, %v5179_v8  ;;  %v5180_v9 = vsub.f32 %v5164_v29, %v5172_v59  ;;  %v5239_v29 = vperm.slane %v10812_v20, 3 }
0x1352   :  { %v5184_v60 = vmul.f32 1.442695, %v5181_v46  ;;  %v5182_v40 = vmul.f32 1.442695, %v5180_v9 }
0x1354   :  { %7426 = vpow2.f32 %v5184_v60 }
0x1355   :  { %7428 = vpow2.f32 %v5182_v40 }
0x135a   :  { %v7427_v43 = vpop.eup %7426 }
0x135b   :  { %v7429_v56 = vpop.eup %7428  ;;  %v5193_v61 = vsel %vm4471_vm1, %v7427_v43, 0.0 }
0x135c   :  { %v5194_v2 = vrot.slane %v5193_v61, 4  ;;  %v5186_v23 = vsel %vm4471_vm1, %v7429_v56, 0.0 }
0x135d   :  { %v5187_v57 = vrot.slane %v5186_v23, 4 }
0x135e   :  { %v5195_v55 = vadd.f32 %v5194_v2, %v5193_v61 }
0x135f   :  { %v5188_v38 = vadd.f32 %v5187_v57, %v5186_v23 }
0x1360   :  { %v5196_v15 = vrot.slane %v5195_v55, 2 }
0x1361   :  { %v5189_v48 = vrot.slane %v5188_v38, 2 }
0x1362   :  { %v5197_v39 = vadd.f32 %v5196_v15, %v5195_v55 }
0x1363   :  { %v5190_v10 = vadd.f32 %v5189_v48, %v5188_v38 }
0x1364   :  { %v5198_v49 = vrot.slane %v5197_v39, 1 }
0x1365   :  { %v5191_v13 = vrot.slane %v5190_v10, 1 }
0x1366   :  { %v5199_v36 = vadd.f32 %v5198_v49, %v5197_v39 }
0x1367   :  { %v5192_v34 = vadd.f32 %v5191_v13, %v5190_v10 }
0x1368   :  { %7430 = vlog2.f32 %v5199_v36 }
0x1369   :  { %7432 = vlog2.f32 %v5192_v34 }
0x136e   :  { %v7431_v24 = vpop.eup %7430 }
0x136f   :  { %v7433_v50 = vpop.eup %7432  ;;  %v5203_v54 = vmul.f32 0.6931472, %v7431_v24 }
0x1370   :  { %v5201_v17 = vmul.f32 0.6931472, %v7433_v50 }
0x1371   :  { %v5205_v25 = vadd.f32 %v5203_v54, %v5179_v8 }
0x1372   :  { %v5204_v32 = vadd.f32 %v5201_v17, %v5172_v59 }
0x1373   :  { %v5211_v33 = vsub.f32 %v5205_v25, %v5207_v30 }
0x1374   :  { %v5210_v3 = vsub.f32 %v5204_v32, %v11038_v26 }
0x1375   :  { %v5218_v0 = vrot.slane %v5211_v33, 7 }
0x1377   :  { %v5219_v11 = vsel %vm4447_vm0, %v5218_v0, %v5210_v3 }
0x1378   :  { %v5221_v52 = vmul.f32 %v5219_v11, %v5214_v47 }
0x137a   :  { %v11054_v35 = vadd.f32 %v5221_v52, %v11038_v26  ;;  %v5291_v52 = vpop.permute.xlu2 %5290 }
0x137c   :  { %v5230_v21 = vperm.slane %v11054_v35, 1  ;;  %v5223_v42 = vperm.slane %v11054_v35, 0  ;;  %v5284_v32 = vrot.slane %v11054_v35, 1 }
0x137e   :  { %5235 = vperm.xlu0 %7284, %v5230_v21   ;;  %5228 = vperm.xlu1 %7286, %v5223_v42  }
0x13f0   :  { %v5236_v4 = vpop.permute.xlu0 %5235  ;;  %v5229_v31 = vpop.permute.xlu1 %5228 }
0x13f1   :  { %v5238_v37 = vadd.f32 %v11008_v45, %v5236_v4  ;;  %v5237_v5 = vadd.f32 %v11008_v45, %v5229_v31 }
0x13f3   :  { %v5242_v7 = vadd.f32 %v5240_v62, %v5238_v37  ;;  %v5241_v58 = vadd.f32 %v5239_v29, %v5237_v5  ;;  %v5317_v5 = vperm.slane %v11003_v63, 4 }
0x13f5   :  { %v5250_v26 = vsel %vm4471_vm1, %v5242_v7, -inf  ;;  %v5243_v19 = vsel %vm4471_vm1, %v5241_v58, -inf }
0x13f6   :  { %v5251_v14 = vrot.slane %v5250_v26, 4  ;;  %v5244_v28 = vrot.slane %v5243_v19, 4 }
0x13f8   :  { %v5252_v18 = vmax.f32 %v5250_v26, %v5251_v14  ;;  %v5245_v53 = vmax.f32 %v5243_v19, %v5244_v28 }
0x13fa   :  { %v5253_v1 = vrot.slane %v5252_v18, 2  ;;  %v5246_v22 = vrot.slane %v5245_v53, 2 }
0x13fc   :  { %v5254_v27 = vmax.f32 %v5252_v18, %v5253_v1  ;;  %v5247_v16 = vmax.f32 %v5245_v53, %v5246_v22 }
0x13fe   :  { %v5255_v8 = vrot.slane %v5254_v27, 1  ;;  %v5248_v59 = vrot.slane %v5247_v16, 1 }
0x1400   :  { %v5256_v46 = vmax.f32 %v5254_v27, %v5255_v8  ;;  %v5249_v9 = vmax.f32 %v5247_v16, %v5248_v59 }
0x1402   :  { %v5258_v60 = vsub.f32 %v5242_v7, %v5256_v46  ;;  %v5257_v40 = vsub.f32 %v5241_v58, %v5249_v9  ;;  %v5316_v58 = vperm.slane %v10812_v20, 4 }
0x1404   :  { %v5261_v43 = vmul.f32 1.442695, %v5258_v60  ;;  %v5259_v56 = vmul.f32 1.442695, %v5257_v40 }
0x1406   :  { %7434 = vpow2.f32 %v5261_v43 }
0x1407   :  { %7436 = vpow2.f32 %v5259_v56 }
0x140c   :  { %v7435_v61 = vpop.eup %7434 }
0x140d   :  { %v7437_v2 = vpop.eup %7436  ;;  %v5270_v23 = vsel %vm4471_vm1, %v7435_v61, 0.0 }
0x140e   :  { %v5271_v57 = vrot.slane %v5270_v23, 4  ;;  %v5263_v55 = vsel %vm4471_vm1, %v7437_v2, 0.0 }
0x140f   :  { %v5264_v38 = vrot.slane %v5263_v55, 4 }
0x1410   :  { %v5272_v15 = vadd.f32 %v5271_v57, %v5270_v23 }
0x1411   :  { %v5265_v48 = vadd.f32 %v5264_v38, %v5263_v55 }
0x1412   :  { %v5273_v39 = vrot.slane %v5272_v15, 2 }
0x1413   :  { %v5266_v10 = vrot.slane %v5265_v48, 2 }
0x1414   :  { %v5274_v49 = vadd.f32 %v5273_v39, %v5272_v15 }
0x1415   :  { %v5267_v13 = vadd.f32 %v5266_v10, %v5265_v48 }
0x1416   :  { %v5275_v36 = vrot.slane %v5274_v49, 1 }
0x1417   :  { %v5268_v34 = vrot.slane %v5267_v13, 1 }
0x1418   :  { %v5276_v24 = vadd.f32 %v5275_v36, %v5274_v49 }
0x1419   :  { %v5269_v50 = vadd.f32 %v5268_v34, %v5267_v13 }
0x141a   :  { %7438 = vlog2.f32 %v5276_v24 }
0x141b   :  { %7440 = vlog2.f32 %v5269_v50 }
0x1420   :  { %v7439_v54 = vpop.eup %7438 }
0x1421   :  { %v7441_v17 = vpop.eup %7440  ;;  %v5280_v30 = vmul.f32 0.6931472, %v7439_v54 }
0x1422   :  { %v5278_v25 = vmul.f32 0.6931472, %v7441_v17 }
0x1423   :  { %v5282_v33 = vadd.f32 %v5280_v30, %v5256_v46 }
0x1424   :  { %v5281_v0 = vadd.f32 %v5278_v25, %v5249_v9 }
0x1425   :  { %v5288_v3 = vsub.f32 %v5282_v33, %v5284_v32 }
0x1426   :  { %v5287_v11 = vsub.f32 %v5281_v0, %v11054_v35 }
0x1427   :  { %v5295_v47 = vrot.slane %v5288_v3, 7 }
0x1429   :  { %v5296_v21 = vsel %vm4447_vm0, %v5295_v47, %v5287_v11 }
0x142a   :  { %v5298_v42 = vmul.f32 %v5296_v21, %v5291_v52 }
0x142c   :  { %v11070_v4 = vadd.f32 %v5298_v42, %v11054_v35  ;;  %v5368_v42 = vpop.permute.xlu2 %5367 }
0x142e   :  { %v5307_v31 = vperm.slane %v11070_v4, 1  ;;  %v5300_v62 = vperm.slane %v11070_v4, 0  ;;  %v5361_v0 = vrot.slane %v11070_v4, 1 }
0x1430   :  { %5312 = vperm.xlu0 %7284, %v5307_v31   ;;  %5305 = vperm.xlu1 %7286, %v5300_v62  }
0x14a2   :  { %v5313_v37 = vpop.permute.xlu0 %5312  ;;  %v5306_v29 = vpop.permute.xlu1 %5305 }
0x14a3   :  { %v5315_v7 = vadd.f32 %v11008_v45, %v5313_v37  ;;  %v5314_v26 = vadd.f32 %v11008_v45, %v5306_v29 }
0x14a5   :  { %v5319_v19 = vadd.f32 %v5317_v5, %v5315_v7  ;;  %v5318_v14 = vadd.f32 %v5316_v58, %v5314_v26  ;;  %v5394_v26 = vperm.slane %v11003_v63, 5 }
0x14a7   :  { %v5327_v35 = vsel %vm4471_vm1, %v5319_v19, -inf  ;;  %v5320_v28 = vsel %vm4471_vm1, %v5318_v14, -inf }
0x14a8   :  { %v5328_v18 = vrot.slane %v5327_v35, 4  ;;  %v5321_v53 = vrot.slane %v5320_v28, 4 }
0x14aa   :  { %v5329_v1 = vmax.f32 %v5327_v35, %v5328_v18  ;;  %v5322_v22 = vmax.f32 %v5320_v28, %v5321_v53 }
0x14ac   :  { %v5330_v27 = vrot.slane %v5329_v1, 2  ;;  %v5323_v16 = vrot.slane %v5322_v22, 2 }
0x14ae   :  { %v5331_v8 = vmax.f32 %v5329_v1, %v5330_v27  ;;  %v5324_v59 = vmax.f32 %v5322_v22, %v5323_v16 }
0x14b0   :  { %v5332_v46 = vrot.slane %v5331_v8, 1  ;;  %v5325_v9 = vrot.slane %v5324_v59, 1 }
0x14b2   :  { %v5333_v60 = vmax.f32 %v5331_v8, %v5332_v46  ;;  %v5326_v40 = vmax.f32 %v5324_v59, %v5325_v9 }
0x14b4   :  { %v5335_v43 = vsub.f32 %v5319_v19, %v5333_v60  ;;  %v5334_v56 = vsub.f32 %v5318_v14, %v5326_v40  ;;  %v5393_v14 = vperm.slane %v10812_v20, 5 }
0x14b6   :  { %v5338_v61 = vmul.f32 1.442695, %v5335_v43  ;;  %v5336_v2 = vmul.f32 1.442695, %v5334_v56 }
0x14b8   :  { %7442 = vpow2.f32 %v5338_v61 }
0x14b9   :  { %7444 = vpow2.f32 %v5336_v2 }
0x14be   :  { %v7443_v23 = vpop.eup %7442 }
0x14bf   :  { %v7445_v57 = vpop.eup %7444  ;;  %v5347_v55 = vsel %vm4471_vm1, %v7443_v23, 0.0 }
0x14c0   :  { %v5348_v38 = vrot.slane %v5347_v55, 4  ;;  %v5340_v15 = vsel %vm4471_vm1, %v7445_v57, 0.0 }
0x14c1   :  { %v5341_v48 = vrot.slane %v5340_v15, 4 }
0x14c2   :  { %v5349_v39 = vadd.f32 %v5348_v38, %v5347_v55 }
0x14c3   :  { %v5342_v10 = vadd.f32 %v5341_v48, %v5340_v15 }
0x14c4   :  { %v5350_v49 = vrot.slane %v5349_v39, 2 }
0x14c5   :  { %v5343_v13 = vrot.slane %v5342_v10, 2 }
0x14c6   :  { %v5351_v36 = vadd.f32 %v5350_v49, %v5349_v39 }
0x14c7   :  { %v5344_v34 = vadd.f32 %v5343_v13, %v5342_v10 }
0x14c8   :  { %v5352_v24 = vrot.slane %v5351_v36, 1 }
0x14c9   :  { %v5345_v50 = vrot.slane %v5344_v34, 1 }
0x14ca   :  { %v5353_v54 = vadd.f32 %v5352_v24, %v5351_v36 }
0x14cb   :  { %v5346_v17 = vadd.f32 %v5345_v50, %v5344_v34 }
0x14cc   :  { %7446 = vlog2.f32 %v5353_v54 }
0x14cd   :  { %7448 = vlog2.f32 %v5346_v17 }
0x14d2   :  { %v7447_v30 = vpop.eup %7446 }
0x14d3   :  { %v7449_v25 = vpop.eup %7448  ;;  %v5357_v32 = vmul.f32 0.6931472, %v7447_v30 }
0x14d4   :  { %v5355_v33 = vmul.f32 0.6931472, %v7449_v25 }
0x14d5   :  { %v5359_v3 = vadd.f32 %v5357_v32, %v5333_v60 }
0x14d6   :  { %v5358_v47 = vadd.f32 %v5355_v33, %v5326_v40 }
0x14d7   :  { %v5365_v11 = vsub.f32 %v5359_v3, %v5361_v0 }
0x14d8   :  { %v5364_v21 = vsub.f32 %v5358_v47, %v11070_v4 }
0x14d9   :  { %v5372_v52 = vrot.slane %v5365_v11, 7 }
0x14db   :  { %v5373_v31 = vsel %vm4447_vm0, %v5372_v52, %v5364_v21 }
0x14dc   :  { %v5375_v62 = vmul.f32 %v5373_v31, %v5368_v42 }
0x14de   :  { %v11086_v37 = vadd.f32 %v5375_v62, %v11070_v4  ;;  %v5445_v62 = vpop.permute.xlu2 %5444 }
0x14e0   :  { %v5384_v29 = vperm.slane %v11086_v37, 1  ;;  %v5377_v5 = vperm.slane %v11086_v37, 0  ;;  %v5438_v47 = vrot.slane %v11086_v37, 1 }
0x14e2   :  { %5389 = vperm.xlu0 %7284, %v5384_v29   ;;  %5382 = vperm.xlu1 %7286, %v5377_v5  }
0x1554   :  { %v5390_v7 = vpop.permute.xlu0 %5389  ;;  %v5383_v58 = vpop.permute.xlu1 %5382 }
0x1555   :  { %v5392_v19 = vadd.f32 %v11008_v45, %v5390_v7  ;;  %v5391_v35 = vadd.f32 %v11008_v45, %v5383_v58 }
0x1557   :  { %v5396_v28 = vadd.f32 %v5394_v26, %v5392_v19  ;;  %v5395_v18 = vadd.f32 %v5393_v14, %v5391_v35  ;;  %v5471_v35 = vperm.slane %v11003_v63, 6 }
0x1559   :  { %v5404_v4 = vsel %vm4471_vm1, %v5396_v28, -inf  ;;  %v5397_v53 = vsel %vm4471_vm1, %v5395_v18, -inf }
0x155a   :  { %v5405_v1 = vrot.slane %v5404_v4, 4  ;;  %v5398_v22 = vrot.slane %v5397_v53, 4 }
0x155c   :  { %v5406_v27 = vmax.f32 %v5404_v4, %v5405_v1  ;;  %v5399_v16 = vmax.f32 %v5397_v53, %v5398_v22 }
0x155e   :  { %v5407_v8 = vrot.slane %v5406_v27, 2  ;;  %v5400_v59 = vrot.slane %v5399_v16, 2 }
0x1560   :  { %v5408_v46 = vmax.f32 %v5406_v27, %v5407_v8  ;;  %v5401_v9 = vmax.f32 %v5399_v16, %v5400_v59 }
0x1562   :  { %v5409_v60 = vrot.slane %v5408_v46, 1  ;;  %v5402_v40 = vrot.slane %v5401_v9, 1 }
0x1564   :  { %v5410_v43 = vmax.f32 %v5408_v46, %v5409_v60  ;;  %v5403_v56 = vmax.f32 %v5401_v9, %v5402_v40 }
0x1566   :  { %v5412_v61 = vsub.f32 %v5396_v28, %v5410_v43  ;;  %v5411_v2 = vsub.f32 %v5395_v18, %v5403_v56  ;;  %v5470_v18 = vperm.slane %v10812_v20, 6 }
0x1568   :  { %v5415_v23 = vmul.f32 1.442695, %v5412_v61  ;;  %v5413_v57 = vmul.f32 1.442695, %v5411_v2 }
0x156a   :  { %7450 = vpow2.f32 %v5415_v23 }
0x156b   :  { %7452 = vpow2.f32 %v5413_v57 }
0x1570   :  { %v7451_v55 = vpop.eup %7450 }
0x1571   :  { %v7453_v38 = vpop.eup %7452  ;;  %v5424_v15 = vsel %vm4471_vm1, %v7451_v55, 0.0 }
0x1572   :  { %v5425_v48 = vrot.slane %v5424_v15, 4  ;;  %v5417_v39 = vsel %vm4471_vm1, %v7453_v38, 0.0 }
0x1573   :  { %v5418_v10 = vrot.slane %v5417_v39, 4 }
0x1574   :  { %v5426_v49 = vadd.f32 %v5425_v48, %v5424_v15 }
0x1575   :  { %v5419_v13 = vadd.f32 %v5418_v10, %v5417_v39 }
0x1576   :  { %v5427_v36 = vrot.slane %v5426_v49, 2 }
0x1577   :  { %v5420_v34 = vrot.slane %v5419_v13, 2 }
0x1578   :  { %v5428_v24 = vadd.f32 %v5427_v36, %v5426_v49 }
0x1579   :  { %v5421_v50 = vadd.f32 %v5420_v34, %v5419_v13 }
0x157a   :  { %v5429_v54 = vrot.slane %v5428_v24, 1 }
0x157b   :  { %v5422_v17 = vrot.slane %v5421_v50, 1 }
0x157c   :  { %v5430_v30 = vadd.f32 %v5429_v54, %v5428_v24 }
0x157d   :  { %v5423_v25 = vadd.f32 %v5422_v17, %v5421_v50 }
0x157e   :  { %7454 = vlog2.f32 %v5430_v30 }
0x157f   :  { %7456 = vlog2.f32 %v5423_v25 }
0x1584   :  { %v7455_v32 = vpop.eup %7454 }
0x1585   :  { %v7457_v33 = vpop.eup %7456  ;;  %v5434_v0 = vmul.f32 0.6931472, %v7455_v32 }
0x1586   :  { %v5432_v3 = vmul.f32 0.6931472, %v7457_v33 }
0x1587   :  { %v5436_v11 = vadd.f32 %v5434_v0, %v5410_v43 }
0x1588   :  { %v5435_v52 = vadd.f32 %v5432_v3, %v5403_v56 }
0x1589   :  { %v5442_v21 = vsub.f32 %v5436_v11, %v5438_v47 }
0x158a   :  { %v5441_v31 = vsub.f32 %v5435_v52, %v11086_v37 }
0x158b   :  { %v5449_v42 = vrot.slane %v5442_v21, 7 }
0x158d   :  { %v5450_v29 = vsel %vm4447_vm0, %v5449_v42, %v5441_v31 }
0x158e   :  { %v5452_v5 = vmul.f32 %v5450_v29, %v5445_v62 }
0x1590   :  { %v11102_v7 = vadd.f32 %v5452_v5, %v11086_v37  ;;  %v5522_v5 = vpop.permute.xlu2 %5521 }
0x1592   :  { %v5461_v58 = vperm.slane %v11102_v7, 1  ;;  %v5454_v26 = vperm.slane %v11102_v7, 0  ;;  %v5515_v52 = vrot.slane %v11102_v7, 1 }
0x1594   :  { %5466 = vperm.xlu0 %7284, %v5461_v58   ;;  %5459 = vperm.xlu1 %7286, %v5454_v26  }
0x1606   :  { %v5467_v19 = vpop.permute.xlu0 %5466  ;;  %v5460_v14 = vpop.permute.xlu1 %5459 }
0x1607   :  { %v5469_v28 = vadd.f32 %v11008_v45, %v5467_v19  ;;  %v5468_v4 = vadd.f32 %v11008_v45, %v5460_v14 }
0x1609   :  { %v5473_v53 = vadd.f32 %v5471_v35, %v5469_v28  ;;  %v5472_v1 = vadd.f32 %v5470_v18, %v5468_v4  ;;  %v5548_v4 = vperm.slane %v11003_v63, 7 }
0x160b   :  { %v5481_v37 = vsel %vm4471_vm1, %v5473_v53, -inf  ;;  %v5474_v22 = vsel %vm4471_vm1, %v5472_v1, -inf }
0x160c   :  { %v5482_v27 = vrot.slane %v5481_v37, 4  ;;  %v5475_v16 = vrot.slane %v5474_v22, 4 }
0x160e   :  { %v5483_v8 = vmax.f32 %v5481_v37, %v5482_v27  ;;  %v5476_v59 = vmax.f32 %v5474_v22, %v5475_v16 }
0x1610   :  { %v5484_v46 = vrot.slane %v5483_v8, 2  ;;  %v5477_v9 = vrot.slane %v5476_v59, 2 }
0x1612   :  { %v5485_v60 = vmax.f32 %v5483_v8, %v5484_v46  ;;  %v5478_v40 = vmax.f32 %v5476_v59, %v5477_v9 }
0x1614   :  { %v5486_v43 = vrot.slane %v5485_v60, 1  ;;  %v5479_v56 = vrot.slane %v5478_v40, 1 }
0x1616   :  { %v5487_v61 = vmax.f32 %v5485_v60, %v5486_v43  ;;  %v5480_v2 = vmax.f32 %v5478_v40, %v5479_v56 }
0x1618   :  { %v5489_v23 = vsub.f32 %v5473_v53, %v5487_v61  ;;  %v5488_v57 = vsub.f32 %v5472_v1, %v5480_v2  ;;  %v5547_v1 = vperm.slane %v10812_v20, 7 }
0x161a   :  { %v5492_v55 = vmul.f32 1.442695, %v5489_v23  ;;  %v5490_v38 = vmul.f32 1.442695, %v5488_v57 }
0x161c   :  { %7458 = vpow2.f32 %v5492_v55 }
0x161d   :  { %7460 = vpow2.f32 %v5490_v38 }
0x1622   :  { %v7459_v15 = vpop.eup %7458 }
0x1623   :  { %v7461_v48 = vpop.eup %7460  ;;  %v5501_v39 = vsel %vm4471_vm1, %v7459_v15, 0.0 }
0x1624   :  { %v5502_v10 = vrot.slane %v5501_v39, 4  ;;  %v5494_v49 = vsel %vm4471_vm1, %v7461_v48, 0.0 }
0x1625   :  { %v5495_v13 = vrot.slane %v5494_v49, 4 }
0x1626   :  { %v5503_v36 = vadd.f32 %v5502_v10, %v5501_v39 }
0x1627   :  { %v5496_v34 = vadd.f32 %v5495_v13, %v5494_v49 }
0x1628   :  { %v5504_v24 = vrot.slane %v5503_v36, 2 }
0x1629   :  { %v5497_v50 = vrot.slane %v5496_v34, 2 }
0x162a   :  { %v5505_v54 = vadd.f32 %v5504_v24, %v5503_v36 }
0x162b   :  { %v5498_v17 = vadd.f32 %v5497_v50, %v5496_v34 }
0x162c   :  { %v5506_v30 = vrot.slane %v5505_v54, 1 }
0x162d   :  { %v5499_v25 = vrot.slane %v5498_v17, 1 }
0x162e   :  { %v5507_v32 = vadd.f32 %v5506_v30, %v5505_v54 }
0x162f   :  { %v5500_v33 = vadd.f32 %v5499_v25, %v5498_v17 }
0x1630   :  { %7462 = vlog2.f32 %v5507_v32 }
0x1631   :  { %7464 = vlog2.f32 %v5500_v33 }
0x1636   :  { %v7463_v0 = vpop.eup %7462 }
0x1637   :  { %v7465_v3 = vpop.eup %7464  ;;  %v5511_v47 = vmul.f32 0.6931472, %v7463_v0 }
0x1638   :  { %v5509_v11 = vmul.f32 0.6931472, %v7465_v3 }
0x1639   :  { %v5513_v21 = vadd.f32 %v5511_v47, %v5487_v61 }
0x163a   :  { %v5512_v42 = vadd.f32 %v5509_v11, %v5480_v2 }
0x163b   :  { %v5519_v31 = vsub.f32 %v5513_v21, %v5515_v52 }
0x163c   :  { %v5518_v29 = vsub.f32 %v5512_v42, %v11102_v7 }
0x163d   :  { %v5526_v62 = vrot.slane %v5519_v31, 7 }
0x163f   :  { %v5527_v58 = vsel %vm4447_vm0, %v5526_v62, %v5518_v29 }
0x1640   :  { %v5529_v26 = vmul.f32 %v5527_v58, %v5522_v5  ;;  %v5599_v5 = vpop.permute.xlu2 %5598 }
0x1642   :  { %v11118_v19 = vadd.f32 %v5529_v26, %v11102_v7 }
0x1644   :  { %v5538_v14 = vperm.slane %v11118_v19, 1  ;;  %v5531_v35 = vperm.slane %v11118_v19, 0  ;;  %v5592_v52 = vrot.slane %v11118_v19, 1 }
0x1646   :  { %5543 = vperm.xlu0 %7284, %v5538_v14   ;;  %5536 = vperm.xlu1 %7286, %v5531_v35  }
0x16b8   :  { %v5544_v28 = vpop.permute.xlu0 %5543  ;;  %v5537_v18 = vpop.permute.xlu1 %5536 }
0x16b9   :  { %v5546_v53 = vadd.f32 %v11008_v45, %v5544_v28  ;;  %v5545_v37 = vadd.f32 %v11008_v45, %v5537_v18  ;;  %v4185_v18 = vpop.f32.mrf.mxu1 }
0x16bb   :  { %v5550_v22 = vadd.f32 %v5548_v4, %v5546_v53  ;;  %v5549_v27 = vadd.f32 %v5547_v1, %v5545_v37  ;;  %v7753_v4 = vld [vmem:[%s11609_s10] ss:$0 sm:$0xff] }
0x16bc   :  { %v11141_v53 = vadd.f32 %v7753_v4, %v4185_v18 }
0x16bd   :  { %v5558_v7 = vsel %vm4471_vm1, %v5550_v22, -inf  ;;  %v5551_v16 = vsel %vm4471_vm1, %v5549_v27, -inf }
0x16be   :  { %v5559_v8 = vrot.slane %v5558_v7, 4  ;;  %v5552_v59 = vrot.slane %v5551_v16, 4 }
0x16c0   :  { %v5560_v46 = vmax.f32 %v5558_v7, %v5559_v8  ;;  %v5553_v9 = vmax.f32 %v5551_v16, %v5552_v59  ;;  %v5624_v7 = vperm.slane %v10814_v51, 0 }
0x16c2   :  { %v5561_v60 = vrot.slane %v5560_v46, 2  ;;  %v5554_v40 = vrot.slane %v5553_v9, 2 }
0x16c4   :  { %v5562_v43 = vmax.f32 %v5560_v46, %v5561_v60  ;;  %v5555_v56 = vmax.f32 %v5553_v9, %v5554_v40 }
0x16c6   :  { %v5563_v61 = vrot.slane %v5562_v43, 1  ;;  %v5556_v2 = vrot.slane %v5555_v56, 1 }
0x16c8   :  { %v5564_v23 = vmax.f32 %v5562_v43, %v5563_v61  ;;  %v5557_v20 = vmax.f32 %v5555_v56, %v5556_v2 }
0x16ca   :  { %v5566_v57 = vsub.f32 %v5550_v22, %v5564_v23  ;;  %v5565_v45 = vsub.f32 %v5549_v27, %v5557_v20  ;;  %v5625_v27 = vperm.slane %v11141_v53, 0 }
0x16cc   :  { %v5569_v55 = vmul.f32 1.442695, %v5566_v57  ;;  %v5567_v38 = vmul.f32 1.442695, %v5565_v45 }
0x16ce   :  { %7466 = vpow2.f32 %v5569_v55 }
0x16cf   :  { %7468 = vpow2.f32 %v5567_v38 }
0x16d4   :  { %v7467_v15 = vpop.eup %7466 }
0x16d5   :  { %v7469_v48 = vpop.eup %7468  ;;  %v5578_v39 = vsel %vm4471_vm1, %v7467_v15, 0.0 }
0x16d6   :  { %v5579_v10 = vrot.slane %v5578_v39, 4  ;;  %v5571_v49 = vsel %vm4471_vm1, %v7469_v48, 0.0 }
0x16d7   :  { %v5572_v13 = vrot.slane %v5571_v49, 4 }
0x16d8   :  { %v5580_v36 = vadd.f32 %v5579_v10, %v5578_v39 }
0x16d9   :  { %v5573_v34 = vadd.f32 %v5572_v13, %v5571_v49 }
0x16da   :  { %v5581_v24 = vrot.slane %v5580_v36, 2 }
0x16db   :  { %v5574_v50 = vrot.slane %v5573_v34, 2 }
0x16dc   :  { %v5582_v54 = vadd.f32 %v5581_v24, %v5580_v36 }
0x16dd   :  { %v5575_v17 = vadd.f32 %v5574_v50, %v5573_v34 }
0x16de   :  { %v5583_v30 = vrot.slane %v5582_v54, 1 }
0x16df   :  { %v5576_v25 = vrot.slane %v5575_v17, 1 }
0x16e0   :  { %v5584_v32 = vadd.f32 %v5583_v30, %v5582_v54 }
0x16e1   :  { %v5577_v33 = vadd.f32 %v5576_v25, %v5575_v17 }
0x16e2   :  { %7470 = vlog2.f32 %v5584_v32 }
0x16e3   :  { %7472 = vlog2.f32 %v5577_v33 }
0x16e8   :  { %v7471_v0 = vpop.eup %7470 }
0x16e9   :  { %v7473_v3 = vpop.eup %7472  ;;  %v5588_v47 = vmul.f32 0.6931472, %v7471_v0 }
0x16ea   :  { %v5586_v11 = vmul.f32 0.6931472, %v7473_v3 }
0x16eb   :  { %v5590_v21 = vadd.f32 %v5588_v47, %v5564_v23 }
0x16ec   :  { %v5589_v42 = vadd.f32 %v5586_v11, %v5557_v20 }
0x16ed   :  { %v5596_v31 = vsub.f32 %v5590_v21, %v5592_v52 }
0x16ee   :  { %v5595_v29 = vsub.f32 %v5589_v42, %v11118_v19 }
0x16ef   :  { %v5603_v62 = vrot.slane %v5596_v31, 7 }
0x16f1   :  { %v5604_v58 = vsel %vm4447_vm0, %v5603_v62, %v5595_v29 }
0x16f2   :  { %v5606_v26 = vmul.f32 %v5604_v58, %v5599_v5 }
0x16f4   :  { %v11134_v14 = vadd.f32 %v5606_v26, %v11118_v19  ;;  %v11146_v19 = vld [vmem:[%s11621_s22] sm:$0x3f] }
0x16f6   :  { %v5615_v35 = vperm.slane %v11134_v14, 1  ;;  %v5608_v28 = vperm.slane %v11134_v14, 0  ;;  %v5669_v62 = vrot.slane %v11134_v14, 1 }
0x16f8   :  { %5620 = vperm.xlu0 %7284, %v5615_v35   ;;  %5613 = vperm.xlu1 %7286, %v5608_v28   ;;  %v5676_v28 = vpop.permute.xlu2 %5675 }
0x176a   :  { %v5621_v1 = vpop.permute.xlu0 %5620  ;;  %v5614_v37 = vpop.permute.xlu1 %5613 }
0x176b   :  { %v5623_v22 = vadd.f32 %v11146_v19, %v5621_v1  ;;  %v5622_v16 = vadd.f32 %v11146_v19, %v5614_v37 }
0x176d   :  { %v5627_v8 = vadd.f32 %v5625_v27, %v5623_v22  ;;  %v5626_v59 = vadd.f32 %v5624_v7, %v5622_v16  ;;  %v5702_v16 = vperm.slane %v11141_v53, 1 }
0x176f   :  { %v5635_v46 = vsel %vm4471_vm1, %v5627_v8, -inf  ;;  %v5628_v9 = vsel %vm4471_vm1, %v5626_v59, -inf }
0x1770   :  { %v5636_v60 = vrot.slane %v5635_v46, 4  ;;  %v5629_v40 = vrot.slane %v5628_v9, 4 }
0x1772   :  { %v5637_v43 = vmax.f32 %v5635_v46, %v5636_v60  ;;  %v5630_v56 = vmax.f32 %v5628_v9, %v5629_v40 }
0x1774   :  { %v5638_v61 = vrot.slane %v5637_v43, 2  ;;  %v5631_v2 = vrot.slane %v5630_v56, 2 }
0x1776   :  { %v5639_v23 = vmax.f32 %v5637_v43, %v5638_v61  ;;  %v5632_v20 = vmax.f32 %v5630_v56, %v5631_v2 }
0x1778   :  { %v5640_v57 = vrot.slane %v5639_v23, 1  ;;  %v5633_v45 = vrot.slane %v5632_v20, 1 }
0x177a   :  { %v5641_v55 = vmax.f32 %v5639_v23, %v5640_v57  ;;  %v5634_v38 = vmax.f32 %v5632_v20, %v5633_v45 }
0x177c   :  { %v5643_v15 = vsub.f32 %v5627_v8, %v5641_v55  ;;  %v5642_v48 = vsub.f32 %v5626_v59, %v5634_v38  ;;  %v5701_v59 = vperm.slane %v10814_v51, 1 }
0x177e   :  { %v5646_v39 = vmul.f32 1.442695, %v5643_v15  ;;  %v5644_v10 = vmul.f32 1.442695, %v5642_v48 }
0x1780   :  { %7474 = vpow2.f32 %v5646_v39 }
0x1781   :  { %7476 = vpow2.f32 %v5644_v10 }
0x1786   :  { %v7475_v49 = vpop.eup %7474 }
0x1787   :  { %v7477_v13 = vpop.eup %7476  ;;  %v5655_v36 = vsel %vm4471_vm1, %v7475_v49, 0.0 }
0x1788   :  { %v5656_v34 = vrot.slane %v5655_v36, 4  ;;  %v5648_v24 = vsel %vm4471_vm1, %v7477_v13, 0.0 }
0x1789   :  { %v5649_v50 = vrot.slane %v5648_v24, 4 }
0x178a   :  { %v5657_v54 = vadd.f32 %v5656_v34, %v5655_v36 }
0x178b   :  { %v5650_v17 = vadd.f32 %v5649_v50, %v5648_v24 }
0x178c   :  { %v5658_v30 = vrot.slane %v5657_v54, 2 }
0x178d   :  { %v5651_v25 = vrot.slane %v5650_v17, 2 }
0x178e   :  { %v5659_v32 = vadd.f32 %v5658_v30, %v5657_v54 }
0x178f   :  { %v5652_v33 = vadd.f32 %v5651_v25, %v5650_v17 }
0x1790   :  { %v5660_v0 = vrot.slane %v5659_v32, 1 }
0x1791   :  { %v5653_v3 = vrot.slane %v5652_v33, 1 }
0x1792   :  { %v5661_v47 = vadd.f32 %v5660_v0, %v5659_v32 }
0x1793   :  { %v5654_v11 = vadd.f32 %v5653_v3, %v5652_v33 }
0x1794   :  { %7478 = vlog2.f32 %v5661_v47 }
0x1795   :  { %7480 = vlog2.f32 %v5654_v11 }
0x179a   :  { %v7479_v52 = vpop.eup %7478 }
0x179b   :  { %v7481_v21 = vpop.eup %7480  ;;  %v5665_v42 = vmul.f32 0.6931472, %v7479_v52 }
0x179c   :  { %v5663_v31 = vmul.f32 0.6931472, %v7481_v21 }
0x179d   :  { %v5667_v29 = vadd.f32 %v5665_v42, %v5641_v55 }
0x179e   :  { %v5666_v5 = vadd.f32 %v5663_v31, %v5634_v38 }
0x179f   :  { %v5673_v58 = vsub.f32 %v5667_v29, %v5669_v62 }
0x17a0   :  { %v5672_v35 = vsub.f32 %v5666_v5, %v11134_v14 }
0x17a1   :  { %v5680_v26 = vrot.slane %v5673_v58, 7 }
0x17a3   :  { %v5681_v18 = vsel %vm4447_vm0, %v5680_v26, %v5672_v35 }
0x17a4   :  { %v5683_v4 = vmul.f32 %v5681_v18, %v5676_v28 }
0x17a6   :  { %v11160_v1 = vadd.f32 %v5683_v4, %v11134_v14  ;;  %v5753_v4 = vpop.permute.xlu2 %5752 }
0x17a8   :  { %v5692_v37 = vperm.slane %v11160_v1, 1  ;;  %v5685_v22 = vperm.slane %v11160_v1, 0  ;;  %v5746_v5 = vrot.slane %v11160_v1, 1 }
0x17aa   :  { %5697 = vperm.xlu0 %7284, %v5692_v37   ;;  %5690 = vperm.xlu1 %7286, %v5685_v22  }
0x181c   :  { %v5698_v27 = vpop.permute.xlu0 %5697  ;;  %v5691_v7 = vpop.permute.xlu1 %5690 }
0x181d   :  { %v5700_v8 = vadd.f32 %v11146_v19, %v5698_v27  ;;  %v5699_v46 = vadd.f32 %v11146_v19, %v5691_v7 }
0x181f   :  { %v5704_v9 = vadd.f32 %v5702_v16, %v5700_v8  ;;  %v5703_v60 = vadd.f32 %v5701_v59, %v5699_v46  ;;  %v5779_v46 = vperm.slane %v11141_v53, 2 }
0x1821   :  { %v5712_v14 = vsel %vm4471_vm1, %v5704_v9, -inf  ;;  %v5705_v40 = vsel %vm4471_vm1, %v5703_v60, -inf }
0x1822   :  { %v5713_v43 = vrot.slane %v5712_v14, 4  ;;  %v5706_v56 = vrot.slane %v5705_v40, 4 }
0x1824   :  { %v5714_v61 = vmax.f32 %v5712_v14, %v5713_v43  ;;  %v5707_v2 = vmax.f32 %v5705_v40, %v5706_v56 }
0x1826   :  { %v5715_v23 = vrot.slane %v5714_v61, 2  ;;  %v5708_v20 = vrot.slane %v5707_v2, 2 }
0x1828   :  { %v5716_v57 = vmax.f32 %v5714_v61, %v5715_v23  ;;  %v5709_v45 = vmax.f32 %v5707_v2, %v5708_v20 }
0x182a   :  { %v5717_v55 = vrot.slane %v5716_v57, 1  ;;  %v5710_v38 = vrot.slane %v5709_v45, 1 }
0x182c   :  { %v5718_v15 = vmax.f32 %v5716_v57, %v5717_v55  ;;  %v5711_v48 = vmax.f32 %v5709_v45, %v5710_v38 }
0x182e   :  { %v5720_v39 = vsub.f32 %v5704_v9, %v5718_v15  ;;  %v5719_v10 = vsub.f32 %v5703_v60, %v5711_v48  ;;  %v5778_v60 = vperm.slane %v10814_v51, 2 }
0x1830   :  { %v5723_v49 = vmul.f32 1.442695, %v5720_v39  ;;  %v5721_v13 = vmul.f32 1.442695, %v5719_v10 }
0x1832   :  { %7482 = vpow2.f32 %v5723_v49 }
0x1833   :  { %7484 = vpow2.f32 %v5721_v13 }
0x1838   :  { %v7483_v36 = vpop.eup %7482 }
0x1839   :  { %v7485_v34 = vpop.eup %7484  ;;  %v5732_v24 = vsel %vm4471_vm1, %v7483_v36, 0.0 }
0x183a   :  { %v5733_v50 = vrot.slane %v5732_v24, 4  ;;  %v5725_v54 = vsel %vm4471_vm1, %v7485_v34, 0.0 }
0x183b   :  { %v5726_v17 = vrot.slane %v5725_v54, 4 }
0x183c   :  { %v5734_v30 = vadd.f32 %v5733_v50, %v5732_v24 }
0x183d   :  { %v5727_v25 = vadd.f32 %v5726_v17, %v5725_v54 }
0x183e   :  { %v5735_v32 = vrot.slane %v5734_v30, 2 }
0x183f   :  { %v5728_v33 = vrot.slane %v5727_v25, 2 }
0x1840   :  { %v5736_v0 = vadd.f32 %v5735_v32, %v5734_v30 }
0x1841   :  { %v5729_v3 = vadd.f32 %v5728_v33, %v5727_v25 }
0x1842   :  { %v5737_v47 = vrot.slane %v5736_v0, 1 }
0x1843   :  { %v5730_v11 = vrot.slane %v5729_v3, 1 }
0x1844   :  { %v5738_v52 = vadd.f32 %v5737_v47, %v5736_v0 }
0x1845   :  { %v5731_v21 = vadd.f32 %v5730_v11, %v5729_v3 }
0x1846   :  { %7486 = vlog2.f32 %v5738_v52 }
0x1847   :  { %7488 = vlog2.f32 %v5731_v21 }
0x184c   :  { %v7487_v42 = vpop.eup %7486 }
0x184d   :  { %v7489_v31 = vpop.eup %7488  ;;  %v5742_v62 = vmul.f32 0.6931472, %v7487_v42 }
0x184e   :  { %v5740_v29 = vmul.f32 0.6931472, %v7489_v31 }
0x184f   :  { %v5744_v58 = vadd.f32 %v5742_v62, %v5718_v15 }
0x1850   :  { %v5743_v26 = vadd.f32 %v5740_v29, %v5711_v48 }
0x1851   :  { %v5750_v35 = vsub.f32 %v5744_v58, %v5746_v5 }
0x1852   :  { %v5749_v18 = vsub.f32 %v5743_v26, %v11160_v1 }
0x1853   :  { %v5757_v28 = vrot.slane %v5750_v35, 7 }
0x1855   :  { %v5758_v37 = vsel %vm4447_vm0, %v5757_v28, %v5749_v18 }
0x1856   :  { %v5760_v22 = vmul.f32 %v5758_v37, %v5753_v4 }
0x1858   :  { %v11176_v27 = vadd.f32 %v5760_v22, %v11160_v1  ;;  %v5830_v22 = vpop.permute.xlu2 %5829 }
0x185a   :  { %v5769_v7 = vperm.slane %v11176_v27, 1  ;;  %v5762_v16 = vperm.slane %v11176_v27, 0  ;;  %v5823_v26 = vrot.slane %v11176_v27, 1 }
0x185c   :  { %5774 = vperm.xlu0 %7284, %v5769_v7   ;;  %5767 = vperm.xlu1 %7286, %v5762_v16  }
0x18ce   :  { %v5775_v8 = vpop.permute.xlu0 %5774  ;;  %v5768_v59 = vpop.permute.xlu1 %5767 }
0x18cf   :  { %v5777_v9 = vadd.f32 %v11146_v19, %v5775_v8  ;;  %v5776_v14 = vadd.f32 %v11146_v19, %v5768_v59 }
0x18d1   :  { %v5781_v40 = vadd.f32 %v5779_v46, %v5777_v9  ;;  %v5780_v43 = vadd.f32 %v5778_v60, %v5776_v14  ;;  %v5856_v14 = vperm.slane %v11141_v53, 3 }
0x18d3   :  { %v5789_v1 = vsel %vm4471_vm1, %v5781_v40, -inf  ;;  %v5782_v56 = vsel %vm4471_vm1, %v5780_v43, -inf }
0x18d4   :  { %v5790_v61 = vrot.slane %v5789_v1, 4  ;;  %v5783_v2 = vrot.slane %v5782_v56, 4 }
0x18d6   :  { %v5791_v23 = vmax.f32 %v5789_v1, %v5790_v61  ;;  %v5784_v20 = vmax.f32 %v5782_v56, %v5783_v2 }
0x18d8   :  { %v5792_v57 = vrot.slane %v5791_v23, 2  ;;  %v5785_v45 = vrot.slane %v5784_v20, 2 }
0x18da   :  { %v5793_v55 = vmax.f32 %v5791_v23, %v5792_v57  ;;  %v5786_v38 = vmax.f32 %v5784_v20, %v5785_v45 }
0x18dc   :  { %v5794_v15 = vrot.slane %v5793_v55, 1  ;;  %v5787_v48 = vrot.slane %v5786_v38, 1 }
0x18de   :  { %v5795_v39 = vmax.f32 %v5793_v55, %v5794_v15  ;;  %v5788_v10 = vmax.f32 %v5786_v38, %v5787_v48 }
0x18e0   :  { %v5797_v49 = vsub.f32 %v5781_v40, %v5795_v39  ;;  %v5796_v13 = vsub.f32 %v5780_v43, %v5788_v10  ;;  %v5855_v43 = vperm.slane %v10814_v51, 3 }
0x18e2   :  { %v5800_v36 = vmul.f32 1.442695, %v5797_v49  ;;  %v5798_v34 = vmul.f32 1.442695, %v5796_v13 }
0x18e4   :  { %7490 = vpow2.f32 %v5800_v36 }
0x18e5   :  { %7492 = vpow2.f32 %v5798_v34 }
0x18ea   :  { %v7491_v24 = vpop.eup %7490 }
0x18eb   :  { %v7493_v50 = vpop.eup %7492  ;;  %v5809_v54 = vsel %vm4471_vm1, %v7491_v24, 0.0 }
0x18ec   :  { %v5810_v17 = vrot.slane %v5809_v54, 4  ;;  %v5802_v30 = vsel %vm4471_vm1, %v7493_v50, 0.0 }
0x18ed   :  { %v5803_v25 = vrot.slane %v5802_v30, 4 }
0x18ee   :  { %v5811_v32 = vadd.f32 %v5810_v17, %v5809_v54 }
0x18ef   :  { %v5804_v33 = vadd.f32 %v5803_v25, %v5802_v30 }
0x18f0   :  { %v5812_v0 = vrot.slane %v5811_v32, 2 }
0x18f1   :  { %v5805_v3 = vrot.slane %v5804_v33, 2 }
0x18f2   :  { %v5813_v47 = vadd.f32 %v5812_v0, %v5811_v32 }
0x18f3   :  { %v5806_v11 = vadd.f32 %v5805_v3, %v5804_v33 }
0x18f4   :  { %v5814_v52 = vrot.slane %v5813_v47, 1 }
0x18f5   :  { %v5807_v21 = vrot.slane %v5806_v11, 1 }
0x18f6   :  { %v5815_v42 = vadd.f32 %v5814_v52, %v5813_v47 }
0x18f7   :  { %v5808_v31 = vadd.f32 %v5807_v21, %v5806_v11 }
0x18f8   :  { %7494 = vlog2.f32 %v5815_v42 }
0x18f9   :  { %7496 = vlog2.f32 %v5808_v31 }
0x18fe   :  { %v7495_v62 = vpop.eup %7494 }
0x18ff   :  { %v7497_v29 = vpop.eup %7496  ;;  %v5819_v5 = vmul.f32 0.6931472, %v7495_v62 }
0x1900   :  { %v5817_v58 = vmul.f32 0.6931472, %v7497_v29 }
0x1901   :  { %v5821_v35 = vadd.f32 %v5819_v5, %v5795_v39 }
0x1902   :  { %v5820_v28 = vadd.f32 %v5817_v58, %v5788_v10 }
0x1903   :  { %v5827_v18 = vsub.f32 %v5821_v35, %v5823_v26 }
0x1904   :  { %v5826_v37 = vsub.f32 %v5820_v28, %v11176_v27 }
0x1905   :  { %v5834_v4 = vrot.slane %v5827_v18, 7 }
0x1907   :  { %v5835_v7 = vsel %vm4447_vm0, %v5834_v4, %v5826_v37 }
0x1908   :  { %v5837_v16 = vmul.f32 %v5835_v7, %v5830_v22 }
0x190a   :  { %v11192_v8 = vadd.f32 %v5837_v16, %v11176_v27  ;;  %v5907_v16 = vpop.permute.xlu2 %5906 }
0x190c   :  { %v5846_v59 = vperm.slane %v11192_v8, 1  ;;  %v5839_v46 = vperm.slane %v11192_v8, 0  ;;  %v5900_v28 = vrot.slane %v11192_v8, 1 }
0x190e   :  { %5851 = vperm.xlu0 %7284, %v5846_v59   ;;  %5844 = vperm.xlu1 %7286, %v5839_v46  }
0x1980   :  { %v5852_v9 = vpop.permute.xlu0 %5851  ;;  %v5845_v60 = vpop.permute.xlu1 %5844 }
0x1981   :  { %v5854_v40 = vadd.f32 %v11146_v19, %v5852_v9  ;;  %v5853_v1 = vadd.f32 %v11146_v19, %v5845_v60 }
0x1983   :  { %v5858_v56 = vadd.f32 %v5856_v14, %v5854_v40  ;;  %v5857_v61 = vadd.f32 %v5855_v43, %v5853_v1  ;;  %v5933_v1 = vperm.slane %v11141_v53, 4 }
0x1985   :  { %v5866_v27 = vsel %vm4471_vm1, %v5858_v56, -inf  ;;  %v5859_v2 = vsel %vm4471_vm1, %v5857_v61, -inf }
0x1986   :  { %v5867_v23 = vrot.slane %v5866_v27, 4  ;;  %v5860_v20 = vrot.slane %v5859_v2, 4 }
0x1988   :  { %v5868_v57 = vmax.f32 %v5866_v27, %v5867_v23  ;;  %v5861_v45 = vmax.f32 %v5859_v2, %v5860_v20 }
0x198a   :  { %v5869_v55 = vrot.slane %v5868_v57, 2  ;;  %v5862_v38 = vrot.slane %v5861_v45, 2 }
0x198c   :  { %v5870_v15 = vmax.f32 %v5868_v57, %v5869_v55  ;;  %v5863_v48 = vmax.f32 %v5861_v45, %v5862_v38 }
0x198e   :  { %v5871_v39 = vrot.slane %v5870_v15, 1  ;;  %v5864_v10 = vrot.slane %v5863_v48, 1 }
0x1990   :  { %v5872_v49 = vmax.f32 %v5870_v15, %v5871_v39  ;;  %v5865_v13 = vmax.f32 %v5863_v48, %v5864_v10 }
0x1992   :  { %v5874_v36 = vsub.f32 %v5858_v56, %v5872_v49  ;;  %v5873_v34 = vsub.f32 %v5857_v61, %v5865_v13  ;;  %v5932_v61 = vperm.slane %v10814_v51, 4 }
0x1994   :  { %v5877_v24 = vmul.f32 1.442695, %v5874_v36  ;;  %v5875_v50 = vmul.f32 1.442695, %v5873_v34 }
0x1996   :  { %7498 = vpow2.f32 %v5877_v24 }
0x1997   :  { %7500 = vpow2.f32 %v5875_v50 }
0x199c   :  { %v7499_v54 = vpop.eup %7498 }
0x199d   :  { %v7501_v17 = vpop.eup %7500  ;;  %v5886_v30 = vsel %vm4471_vm1, %v7499_v54, 0.0 }
0x199e   :  { %v5887_v25 = vrot.slane %v5886_v30, 4  ;;  %v5879_v32 = vsel %vm4471_vm1, %v7501_v17, 0.0 }
0x199f   :  { %v5880_v33 = vrot.slane %v5879_v32, 4 }
0x19a0   :  { %v5888_v0 = vadd.f32 %v5887_v25, %v5886_v30 }
0x19a1   :  { %v5881_v3 = vadd.f32 %v5880_v33, %v5879_v32 }
0x19a2   :  { %v5889_v47 = vrot.slane %v5888_v0, 2 }
0x19a3   :  { %v5882_v11 = vrot.slane %v5881_v3, 2 }
0x19a4   :  { %v5890_v52 = vadd.f32 %v5889_v47, %v5888_v0 }
0x19a5   :  { %v5883_v21 = vadd.f32 %v5882_v11, %v5881_v3 }
0x19a6   :  { %v5891_v42 = vrot.slane %v5890_v52, 1 }
0x19a7   :  { %v5884_v31 = vrot.slane %v5883_v21, 1 }
0x19a8   :  { %v5892_v62 = vadd.f32 %v5891_v42, %v5890_v52 }
0x19a9   :  { %v5885_v29 = vadd.f32 %v5884_v31, %v5883_v21 }
0x19aa   :  { %7502 = vlog2.f32 %v5892_v62 }
0x19ab   :  { %7504 = vlog2.f32 %v5885_v29 }
0x19b0   :  { %v7503_v5 = vpop.eup %7502 }
0x19b1   :  { %v7505_v58 = vpop.eup %7504  ;;  %v5896_v26 = vmul.f32 0.6931472, %v7503_v5 }
0x19b2   :  { %v5894_v35 = vmul.f32 0.6931472, %v7505_v58 }
0x19b3   :  { %v5898_v18 = vadd.f32 %v5896_v26, %v5872_v49 }
0x19b4   :  { %v5897_v4 = vadd.f32 %v5894_v35, %v5865_v13 }
0x19b5   :  { %v5904_v37 = vsub.f32 %v5898_v18, %v5900_v28 }
0x19b6   :  { %v5903_v7 = vsub.f32 %v5897_v4, %v11192_v8 }
0x19b7   :  { %v5911_v22 = vrot.slane %v5904_v37, 7 }
0x19b9   :  { %v5912_v59 = vsel %vm4447_vm0, %v5911_v22, %v5903_v7 }
0x19ba   :  { %v5914_v46 = vmul.f32 %v5912_v59, %v5907_v16 }
0x19bc   :  { %v11208_v9 = vadd.f32 %v5914_v46, %v11192_v8  ;;  %v5984_v46 = vpop.permute.xlu2 %5983 }
0x19be   :  { %v5923_v60 = vperm.slane %v11208_v9, 1  ;;  %v5916_v14 = vperm.slane %v11208_v9, 0  ;;  %v5977_v4 = vrot.slane %v11208_v9, 1 }
0x19c0   :  { %5928 = vperm.xlu0 %7284, %v5923_v60   ;;  %5921 = vperm.xlu1 %7286, %v5916_v14  }
0x1a32   :  { %v5929_v40 = vpop.permute.xlu0 %5928  ;;  %v5922_v43 = vpop.permute.xlu1 %5921 }
0x1a33   :  { %v5931_v56 = vadd.f32 %v11146_v19, %v5929_v40  ;;  %v5930_v27 = vadd.f32 %v11146_v19, %v5922_v43 }
0x1a35   :  { %v5935_v2 = vadd.f32 %v5933_v1, %v5931_v56  ;;  %v5934_v23 = vadd.f32 %v5932_v61, %v5930_v27  ;;  %v6010_v27 = vperm.slane %v11141_v53, 5 }
0x1a37   :  { %v5943_v8 = vsel %vm4471_vm1, %v5935_v2, -inf  ;;  %v5936_v20 = vsel %vm4471_vm1, %v5934_v23, -inf }
0x1a38   :  { %v5944_v57 = vrot.slane %v5943_v8, 4  ;;  %v5937_v45 = vrot.slane %v5936_v20, 4 }
0x1a3a   :  { %v5945_v55 = vmax.f32 %v5943_v8, %v5944_v57  ;;  %v5938_v38 = vmax.f32 %v5936_v20, %v5937_v45 }
0x1a3c   :  { %v5946_v15 = vrot.slane %v5945_v55, 2  ;;  %v5939_v48 = vrot.slane %v5938_v38, 2 }
0x1a3e   :  { %v5947_v39 = vmax.f32 %v5945_v55, %v5946_v15  ;;  %v5940_v10 = vmax.f32 %v5938_v38, %v5939_v48 }
0x1a40   :  { %v5948_v49 = vrot.slane %v5947_v39, 1  ;;  %v5941_v13 = vrot.slane %v5940_v10, 1 }
0x1a42   :  { %v5949_v36 = vmax.f32 %v5947_v39, %v5948_v49  ;;  %v5942_v34 = vmax.f32 %v5940_v10, %v5941_v13 }
0x1a44   :  { %v5951_v24 = vsub.f32 %v5935_v2, %v5949_v36  ;;  %v5950_v50 = vsub.f32 %v5934_v23, %v5942_v34  ;;  %v6009_v23 = vperm.slane %v10814_v51, 5 }
0x1a46   :  { %v5954_v54 = vmul.f32 1.442695, %v5951_v24  ;;  %v5952_v17 = vmul.f32 1.442695, %v5950_v50 }
0x1a48   :  { %7506 = vpow2.f32 %v5954_v54 }
0x1a49   :  { %7508 = vpow2.f32 %v5952_v17 }
0x1a4e   :  { %v7507_v30 = vpop.eup %7506 }
0x1a4f   :  { %v7509_v25 = vpop.eup %7508  ;;  %v5963_v32 = vsel %vm4471_vm1, %v7507_v30, 0.0 }
0x1a50   :  { %v5964_v33 = vrot.slane %v5963_v32, 4  ;;  %v5956_v0 = vsel %vm4471_vm1, %v7509_v25, 0.0 }
0x1a51   :  { %v5957_v3 = vrot.slane %v5956_v0, 4 }
0x1a52   :  { %v5965_v47 = vadd.f32 %v5964_v33, %v5963_v32 }
0x1a53   :  { %v5958_v11 = vadd.f32 %v5957_v3, %v5956_v0 }
0x1a54   :  { %v5966_v52 = vrot.slane %v5965_v47, 2 }
0x1a55   :  { %v5959_v21 = vrot.slane %v5958_v11, 2 }
0x1a56   :  { %v5967_v42 = vadd.f32 %v5966_v52, %v5965_v47 }
0x1a57   :  { %v5960_v31 = vadd.f32 %v5959_v21, %v5958_v11 }
0x1a58   :  { %v5968_v62 = vrot.slane %v5967_v42, 1 }
0x1a59   :  { %v5961_v29 = vrot.slane %v5960_v31, 1 }
0x1a5a   :  { %v5969_v5 = vadd.f32 %v5968_v62, %v5967_v42 }
0x1a5b   :  { %v5962_v58 = vadd.f32 %v5961_v29, %v5960_v31 }
0x1a5c   :  { %7510 = vlog2.f32 %v5969_v5 }
0x1a5d   :  { %7512 = vlog2.f32 %v5962_v58 }
0x1a62   :  { %v7511_v26 = vpop.eup %7510 }
0x1a63   :  { %v7513_v35 = vpop.eup %7512  ;;  %v5973_v28 = vmul.f32 0.6931472, %v7511_v26 }
0x1a64   :  { %v5971_v18 = vmul.f32 0.6931472, %v7513_v35 }
0x1a65   :  { %v5975_v37 = vadd.f32 %v5973_v28, %v5949_v36 }
0x1a66   :  { %v5974_v22 = vadd.f32 %v5971_v18, %v5942_v34 }
0x1a67   :  { %v5981_v7 = vsub.f32 %v5975_v37, %v5977_v4 }
0x1a68   :  { %v5980_v59 = vsub.f32 %v5974_v22, %v11208_v9 }
0x1a69   :  { %v5988_v16 = vrot.slane %v5981_v7, 7 }
0x1a6b   :  { %v5989_v60 = vsel %vm4447_vm0, %v5988_v16, %v5980_v59 }
0x1a6c   :  { %v5991_v14 = vmul.f32 %v5989_v60, %v5984_v46 }
0x1a6e   :  { %v11224_v40 = vadd.f32 %v5991_v14, %v11208_v9  ;;  %v6061_v14 = vpop.permute.xlu2 %6060 }
0x1a70   :  { %v6000_v43 = vperm.slane %v11224_v40, 1  ;;  %v5993_v1 = vperm.slane %v11224_v40, 0  ;;  %v6054_v22 = vrot.slane %v11224_v40, 1 }
0x1a72   :  { %6005 = vperm.xlu0 %7284, %v6000_v43   ;;  %5998 = vperm.xlu1 %7286, %v5993_v1  }
0x1ae4   :  { %v6006_v56 = vpop.permute.xlu0 %6005  ;;  %v5999_v61 = vpop.permute.xlu1 %5998 }
0x1ae5   :  { %v6008_v2 = vadd.f32 %v11146_v19, %v6006_v56  ;;  %v6007_v8 = vadd.f32 %v11146_v19, %v5999_v61 }
0x1ae7   :  { %v6012_v20 = vadd.f32 %v6010_v27, %v6008_v2  ;;  %v6011_v57 = vadd.f32 %v6009_v23, %v6007_v8  ;;  %v6087_v8 = vperm.slane %v11141_v53, 6 }
0x1ae9   :  { %v6020_v9 = vsel %vm4471_vm1, %v6012_v20, -inf  ;;  %v6013_v45 = vsel %vm4471_vm1, %v6011_v57, -inf }
0x1aea   :  { %v6021_v55 = vrot.slane %v6020_v9, 4  ;;  %v6014_v38 = vrot.slane %v6013_v45, 4 }
0x1aec   :  { %v6022_v15 = vmax.f32 %v6020_v9, %v6021_v55  ;;  %v6015_v48 = vmax.f32 %v6013_v45, %v6014_v38 }
0x1aee   :  { %v6023_v39 = vrot.slane %v6022_v15, 2  ;;  %v6016_v10 = vrot.slane %v6015_v48, 2 }
0x1af0   :  { %v6024_v49 = vmax.f32 %v6022_v15, %v6023_v39  ;;  %v6017_v13 = vmax.f32 %v6015_v48, %v6016_v10 }
0x1af2   :  { %v6025_v36 = vrot.slane %v6024_v49, 1  ;;  %v6018_v34 = vrot.slane %v6017_v13, 1 }
0x1af4   :  { %v6026_v24 = vmax.f32 %v6024_v49, %v6025_v36  ;;  %v6019_v50 = vmax.f32 %v6017_v13, %v6018_v34 }
0x1af6   :  { %v6028_v54 = vsub.f32 %v6012_v20, %v6026_v24  ;;  %v6027_v17 = vsub.f32 %v6011_v57, %v6019_v50  ;;  %v6086_v57 = vperm.slane %v10814_v51, 6 }
0x1af8   :  { %v6031_v30 = vmul.f32 1.442695, %v6028_v54  ;;  %v6029_v25 = vmul.f32 1.442695, %v6027_v17 }
0x1afa   :  { %7514 = vpow2.f32 %v6031_v30 }
0x1afb   :  { %7516 = vpow2.f32 %v6029_v25 }
0x1b00   :  { %v7515_v32 = vpop.eup %7514 }
0x1b01   :  { %v7517_v33 = vpop.eup %7516  ;;  %v6040_v0 = vsel %vm4471_vm1, %v7515_v32, 0.0 }
0x1b02   :  { %v6041_v3 = vrot.slane %v6040_v0, 4  ;;  %v6033_v47 = vsel %vm4471_vm1, %v7517_v33, 0.0 }
0x1b03   :  { %v6034_v11 = vrot.slane %v6033_v47, 4 }
0x1b04   :  { %v6042_v52 = vadd.f32 %v6041_v3, %v6040_v0 }
0x1b05   :  { %v6035_v21 = vadd.f32 %v6034_v11, %v6033_v47 }
0x1b06   :  { %v6043_v42 = vrot.slane %v6042_v52, 2 }
0x1b07   :  { %v6036_v31 = vrot.slane %v6035_v21, 2 }
0x1b08   :  { %v6044_v62 = vadd.f32 %v6043_v42, %v6042_v52 }
0x1b09   :  { %v6037_v29 = vadd.f32 %v6036_v31, %v6035_v21 }
0x1b0a   :  { %v6045_v5 = vrot.slane %v6044_v62, 1 }
0x1b0b   :  { %v6038_v58 = vrot.slane %v6037_v29, 1 }
0x1b0c   :  { %v6046_v26 = vadd.f32 %v6045_v5, %v6044_v62 }
0x1b0d   :  { %v6039_v35 = vadd.f32 %v6038_v58, %v6037_v29 }
0x1b0e   :  { %7518 = vlog2.f32 %v6046_v26 }
0x1b0f   :  { %7520 = vlog2.f32 %v6039_v35 }
0x1b14   :  { %v7519_v28 = vpop.eup %7518 }
0x1b15   :  { %v7521_v18 = vpop.eup %7520  ;;  %v6050_v4 = vmul.f32 0.6931472, %v7519_v28 }
0x1b16   :  { %v6048_v37 = vmul.f32 0.6931472, %v7521_v18 }
0x1b17   :  { %v6052_v7 = vadd.f32 %v6050_v4, %v6026_v24 }
0x1b18   :  { %v6051_v16 = vadd.f32 %v6048_v37, %v6019_v50 }
0x1b19   :  { %v6058_v59 = vsub.f32 %v6052_v7, %v6054_v22 }
0x1b1a   :  { %v6057_v60 = vsub.f32 %v6051_v16, %v11224_v40 }
0x1b1b   :  { %v6065_v46 = vrot.slane %v6058_v59, 7 }
0x1b1d   :  { %v6066_v43 = vsel %vm4447_vm0, %v6065_v46, %v6057_v60 }
0x1b1e   :  { %v6068_v1 = vmul.f32 %v6066_v43, %v6061_v14 }
0x1b20   :  { %v11240_v56 = vadd.f32 %v6068_v1, %v11224_v40  ;;  %v6138_v1 = vpop.permute.xlu2 %6137 }
0x1b22   :  { %v6077_v61 = vperm.slane %v11240_v56, 1  ;;  %v6070_v27 = vperm.slane %v11240_v56, 0  ;;  %v6131_v16 = vrot.slane %v11240_v56, 1 }
0x1b24   :  { %6082 = vperm.xlu0 %7284, %v6077_v61   ;;  %6075 = vperm.xlu1 %7286, %v6070_v27  }
0x1b96   :  { %v6083_v2 = vpop.permute.xlu0 %6082  ;;  %v6076_v23 = vpop.permute.xlu1 %6075 }
0x1b97   :  { %v6085_v20 = vadd.f32 %v11146_v19, %v6083_v2  ;;  %v6084_v9 = vadd.f32 %v11146_v19, %v6076_v23 }
0x1b99   :  { %v6089_v45 = vadd.f32 %v6087_v8, %v6085_v20  ;;  %v6088_v55 = vadd.f32 %v6086_v57, %v6084_v9  ;;  %v6164_v9 = vperm.slane %v11141_v53, 7 }
0x1b9b   :  { %v6097_v40 = vsel %vm4471_vm1, %v6089_v45, -inf  ;;  %v6090_v38 = vsel %vm4471_vm1, %v6088_v55, -inf }
0x1b9c   :  { %v6098_v15 = vrot.slane %v6097_v40, 4  ;;  %v6091_v48 = vrot.slane %v6090_v38, 4 }
0x1b9e   :  { %v6099_v39 = vmax.f32 %v6097_v40, %v6098_v15  ;;  %v6092_v10 = vmax.f32 %v6090_v38, %v6091_v48 }
0x1ba0   :  { %v6100_v49 = vrot.slane %v6099_v39, 2  ;;  %v6093_v13 = vrot.slane %v6092_v10, 2 }
0x1ba2   :  { %v6101_v36 = vmax.f32 %v6099_v39, %v6100_v49  ;;  %v6094_v34 = vmax.f32 %v6092_v10, %v6093_v13 }
0x1ba4   :  { %v6102_v24 = vrot.slane %v6101_v36, 1  ;;  %v6095_v50 = vrot.slane %v6094_v34, 1 }
0x1ba6   :  { %v6103_v54 = vmax.f32 %v6101_v36, %v6102_v24  ;;  %v6096_v17 = vmax.f32 %v6094_v34, %v6095_v50 }
0x1ba8   :  { %v6105_v30 = vsub.f32 %v6089_v45, %v6103_v54  ;;  %v6104_v25 = vsub.f32 %v6088_v55, %v6096_v17  ;;  %v6163_v55 = vperm.slane %v10814_v51, 7 }
0x1baa   :  { %v6108_v32 = vmul.f32 1.442695, %v6105_v30  ;;  %v6106_v33 = vmul.f32 1.442695, %v6104_v25 }
0x1bac   :  { %7522 = vpow2.f32 %v6108_v32 }
0x1bad   :  { %7524 = vpow2.f32 %v6106_v33 }
0x1bb2   :  { %v7523_v0 = vpop.eup %7522 }
0x1bb3   :  { %v7525_v3 = vpop.eup %7524  ;;  %v6117_v47 = vsel %vm4471_vm1, %v7523_v0, 0.0 }
0x1bb4   :  { %v6118_v11 = vrot.slane %v6117_v47, 4  ;;  %v6110_v52 = vsel %vm4471_vm1, %v7525_v3, 0.0 }
0x1bb5   :  { %v6111_v21 = vrot.slane %v6110_v52, 4 }
0x1bb6   :  { %v6119_v42 = vadd.f32 %v6118_v11, %v6117_v47 }
0x1bb7   :  { %v6112_v31 = vadd.f32 %v6111_v21, %v6110_v52 }
0x1bb8   :  { %v6120_v62 = vrot.slane %v6119_v42, 2 }
0x1bb9   :  { %v6113_v29 = vrot.slane %v6112_v31, 2 }
0x1bba   :  { %v6121_v5 = vadd.f32 %v6120_v62, %v6119_v42 }
0x1bbb   :  { %v6114_v58 = vadd.f32 %v6113_v29, %v6112_v31 }
0x1bbc   :  { %v6122_v26 = vrot.slane %v6121_v5, 1 }
0x1bbd   :  { %v6115_v35 = vrot.slane %v6114_v58, 1 }
0x1bbe   :  { %v6123_v28 = vadd.f32 %v6122_v26, %v6121_v5 }
0x1bbf   :  { %v6116_v18 = vadd.f32 %v6115_v35, %v6114_v58 }
0x1bc0   :  { %7526 = vlog2.f32 %v6123_v28 }
0x1bc1   :  { %7528 = vlog2.f32 %v6116_v18 }
0x1bc6   :  { %v7527_v4 = vpop.eup %7526 }
0x1bc7   :  { %v7529_v37 = vpop.eup %7528  ;;  %v6127_v22 = vmul.f32 0.6931472, %v7527_v4 }
0x1bc8   :  { %v6125_v7 = vmul.f32 0.6931472, %v7529_v37 }
0x1bc9   :  { %v6129_v59 = vadd.f32 %v6127_v22, %v6103_v54 }
0x1bca   :  { %v6128_v46 = vadd.f32 %v6125_v7, %v6096_v17 }
0x1bcb   :  { %v6135_v60 = vsub.f32 %v6129_v59, %v6131_v16 }
0x1bcc   :  { %v6134_v43 = vsub.f32 %v6128_v46, %v11240_v56 }
0x1bcd   :  { %v6142_v14 = vrot.slane %v6135_v60, 7 }
0x1bcf   :  { %v6143_v61 = vsel %vm4447_vm0, %v6142_v14, %v6134_v43 }
0x1bd0   :  { %v6145_v27 = vmul.f32 %v6143_v61, %v6138_v1  ;;  %v6215_v1 = vpop.permute.xlu2 %6214 }
0x1bd2   :  { %v11256_v2 = vadd.f32 %v6145_v27, %v11240_v56 }
0x1bd4   :  { %v6154_v23 = vperm.slane %v11256_v2, 1  ;;  %v6147_v8 = vperm.slane %v11256_v2, 0  ;;  %v6208_v16 = vrot.slane %v11256_v2, 1 }
0x1bd6   :  { %6159 = vperm.xlu0 %7284, %v6154_v23   ;;  %6152 = vperm.xlu1 %7286, %v6147_v8  }
0x1c48   :  { %v6160_v20 = vpop.permute.xlu0 %6159  ;;  %v6153_v57 = vpop.permute.xlu1 %6152 }
0x1c49   :  { %v6162_v45 = vadd.f32 %v11146_v19, %v6160_v20  ;;  %v6161_v40 = vadd.f32 %v11146_v19, %v6153_v57  ;;  %v4188_v57 = vpop.f32.mrf.mxu1 }
0x1c4b   :  { %v6166_v38 = vadd.f32 %v6164_v9, %v6162_v45  ;;  %v6165_v15 = vadd.f32 %v6163_v55, %v6161_v40  ;;  %v7755_v9 = vld [vmem:[%s11609_s10] ss:$0 sm:$0xff] }
0x1c4c   :  { %v11279_v45 = vadd.f32 %v7755_v9, %v4188_v57 }
0x1c4d   :  { %v6174_v56 = vsel %vm4471_vm1, %v6166_v38, -inf  ;;  %v6167_v48 = vsel %vm4471_vm1, %v6165_v15, -inf }
0x1c4e   :  { %v6175_v39 = vrot.slane %v6174_v56, 4  ;;  %v6168_v10 = vrot.slane %v6167_v48, 4 }
0x1c50   :  { %v6176_v49 = vmax.f32 %v6174_v56, %v6175_v39  ;;  %v6169_v13 = vmax.f32 %v6167_v48, %v6168_v10  ;;  %v6240_v56 = vperm.slane %v10816_v12, 0 }
0x1c52   :  { %v6177_v36 = vrot.slane %v6176_v49, 2  ;;  %v6170_v34 = vrot.slane %v6169_v13, 2 }
0x1c54   :  { %v6178_v24 = vmax.f32 %v6176_v49, %v6177_v36  ;;  %v6171_v50 = vmax.f32 %v6169_v13, %v6170_v34 }
0x1c56   :  { %v6179_v54 = vrot.slane %v6178_v24, 1  ;;  %v6172_v17 = vrot.slane %v6171_v50, 1 }
0x1c58   :  { %v6180_v30 = vmax.f32 %v6178_v24, %v6179_v54  ;;  %v6173_v51 = vmax.f32 %v6171_v50, %v6172_v17 }
0x1c5a   :  { %v6182_v25 = vsub.f32 %v6166_v38, %v6180_v30  ;;  %v6181_v19 = vsub.f32 %v6165_v15, %v6173_v51  ;;  %v6241_v38 = vperm.slane %v11279_v45, 0 }
0x1c5c   :  { %v6185_v32 = vmul.f32 1.442695, %v6182_v25  ;;  %v6183_v33 = vmul.f32 1.442695, %v6181_v19 }
0x1c5e   :  { %7530 = vpow2.f32 %v6185_v32 }
0x1c5f   :  { %7532 = vpow2.f32 %v6183_v33 }
0x1c64   :  { %v7531_v0 = vpop.eup %7530 }
0x1c65   :  { %v7533_v3 = vpop.eup %7532  ;;  %v6194_v47 = vsel %vm4471_vm1, %v7531_v0, 0.0 }
0x1c66   :  { %v6195_v11 = vrot.slane %v6194_v47, 4  ;;  %v6187_v52 = vsel %vm4471_vm1, %v7533_v3, 0.0 }
0x1c67   :  { %v6188_v21 = vrot.slane %v6187_v52, 4 }
0x1c68   :  { %v6196_v42 = vadd.f32 %v6195_v11, %v6194_v47 }
0x1c69   :  { %v6189_v31 = vadd.f32 %v6188_v21, %v6187_v52 }
0x1c6a   :  { %v6197_v62 = vrot.slane %v6196_v42, 2 }
0x1c6b   :  { %v6190_v29 = vrot.slane %v6189_v31, 2 }
0x1c6c   :  { %v6198_v5 = vadd.f32 %v6197_v62, %v6196_v42 }
0x1c6d   :  { %v6191_v58 = vadd.f32 %v6190_v29, %v6189_v31 }
0x1c6e   :  { %v6199_v26 = vrot.slane %v6198_v5, 1 }
0x1c6f   :  { %v6192_v35 = vrot.slane %v6191_v58, 1 }
0x1c70   :  { %v6200_v28 = vadd.f32 %v6199_v26, %v6198_v5 }
0x1c71   :  { %v6193_v18 = vadd.f32 %v6192_v35, %v6191_v58 }
0x1c72   :  { %7534 = vlog2.f32 %v6200_v28 }
0x1c73   :  { %7536 = vlog2.f32 %v6193_v18 }
0x1c78   :  { %v7535_v4 = vpop.eup %7534 }
0x1c79   :  { %v7537_v37 = vpop.eup %7536  ;;  %v6204_v22 = vmul.f32 0.6931472, %v7535_v4 }
0x1c7a   :  { %v6202_v7 = vmul.f32 0.6931472, %v7537_v37 }
0x1c7b   :  { %v6206_v59 = vadd.f32 %v6204_v22, %v6180_v30 }
0x1c7c   :  { %v6205_v46 = vadd.f32 %v6202_v7, %v6173_v51 }
0x1c7d   :  { %v6212_v60 = vsub.f32 %v6206_v59, %v6208_v16 }
0x1c7e   :  { %v6211_v43 = vsub.f32 %v6205_v46, %v11256_v2 }
0x1c7f   :  { %v6219_v14 = vrot.slane %v6212_v60, 7 }
0x1c81   :  { %v6220_v61 = vsel %vm4447_vm0, %v6219_v14, %v6211_v43 }
0x1c82   :  { %v6222_v27 = vmul.f32 %v6220_v61, %v6215_v1 }
0x1c84   :  { %v11272_v23 = vadd.f32 %v6222_v27, %v11256_v2  ;;  %v11285_v2 = vld [vmem:[%s11621_s22] sm:$0x3f] }
0x1c85   :  { %7218 = vmatpush.msk.msrb.mxu2 %vm4267_vm10, %v11285_v2 }
0x1c86   :  { %v6231_v8 = vperm.slane %v11272_v23, 1  ;;  %v6224_v20 = vperm.slane %v11272_v23, 0  ;;  %v6285_v14 = vrot.slane %v11272_v23, 1 }
0x1c88   :  { %6236 = vperm.xlu0 %7284, %v6231_v8   ;;  %6229 = vperm.xlu1 %7286, %v6224_v20   ;;  %v6292_v20 = vpop.permute.xlu2 %6291 }
0x1cfa   :  { %v6237_v55 = vpop.permute.xlu0 %6236  ;;  %v6230_v40 = vpop.permute.xlu1 %6229 }
0x1cfb   :  { %v6239_v15 = vadd.f32 %v11285_v2, %v6237_v55  ;;  %v6238_v48 = vadd.f32 %v11285_v2, %v6230_v40 }
0x1cfd   :  { %v6243_v39 = vadd.f32 %v6241_v38, %v6239_v15  ;;  %v6242_v10 = vadd.f32 %v6240_v56, %v6238_v48  ;;  %v6318_v48 = vperm.slane %v11279_v45, 1 }
0x1cff   :  { %v6251_v49 = vsel %vm4471_vm1, %v6243_v39, -inf  ;;  %v6244_v13 = vsel %vm4471_vm1, %v6242_v10, -inf }
0x1d00   :  { %v6252_v36 = vrot.slane %v6251_v49, 4  ;;  %v6245_v34 = vrot.slane %v6244_v13, 4 }
0x1d02   :  { %v6253_v24 = vmax.f32 %v6251_v49, %v6252_v36  ;;  %v6246_v50 = vmax.f32 %v6244_v13, %v6245_v34 }
0x1d04   :  { %v6254_v54 = vrot.slane %v6253_v24, 2  ;;  %v6247_v17 = vrot.slane %v6246_v50, 2 }
0x1d06   :  { %v6255_v30 = vmax.f32 %v6253_v24, %v6254_v54  ;;  %v6248_v51 = vmax.f32 %v6246_v50, %v6247_v17 }
0x1d08   :  { %v6256_v25 = vrot.slane %v6255_v30, 1  ;;  %v6249_v19 = vrot.slane %v6248_v51, 1 }
0x1d0a   :  { %v6257_v32 = vmax.f32 %v6255_v30, %v6256_v25  ;;  %v6250_v33 = vmax.f32 %v6248_v51, %v6249_v19 }
0x1d0c   :  { %v6259_v0 = vsub.f32 %v6243_v39, %v6257_v32  ;;  %v6258_v3 = vsub.f32 %v6242_v10, %v6250_v33  ;;  %v6317_v10 = vperm.slane %v10816_v12, 1 }
0x1d0e   :  { %v6262_v47 = vmul.f32 1.442695, %v6259_v0  ;;  %v6260_v11 = vmul.f32 1.442695, %v6258_v3 }
0x1d10   :  { %7538 = vpow2.f32 %v6262_v47 }
0x1d11   :  { %7540 = vpow2.f32 %v6260_v11 }
0x1d16   :  { %v7539_v52 = vpop.eup %7538 }
0x1d17   :  { %v7541_v21 = vpop.eup %7540  ;;  %v6271_v42 = vsel %vm4471_vm1, %v7539_v52, 0.0 }
0x1d18   :  { %v6272_v31 = vrot.slane %v6271_v42, 4  ;;  %v6264_v62 = vsel %vm4471_vm1, %v7541_v21, 0.0 }
0x1d19   :  { %v6265_v29 = vrot.slane %v6264_v62, 4 }
0x1d1a   :  { %v6273_v5 = vadd.f32 %v6272_v31, %v6271_v42 }
0x1d1b   :  { %v6266_v58 = vadd.f32 %v6265_v29, %v6264_v62 }
0x1d1c   :  { %v6274_v26 = vrot.slane %v6273_v5, 2 }
0x1d1d   :  { %v6267_v35 = vrot.slane %v6266_v58, 2 }
0x1d1e   :  { %v6275_v28 = vadd.f32 %v6274_v26, %v6273_v5 }
0x1d1f   :  { %v6268_v18 = vadd.f32 %v6267_v35, %v6266_v58 }
0x1d20   :  { %v6276_v4 = vrot.slane %v6275_v28, 1 }
0x1d21   :  { %v6269_v37 = vrot.slane %v6268_v18, 1 }
0x1d22   :  { %v6277_v22 = vadd.f32 %v6276_v4, %v6275_v28 }
0x1d23   :  { %v6270_v7 = vadd.f32 %v6269_v37, %v6268_v18 }
0x1d24   :  { %7542 = vlog2.f32 %v6277_v22 }
0x1d25   :  { %7544 = vlog2.f32 %v6270_v7 }
0x1d2a   :  { %v7543_v16 = vpop.eup %7542 }
0x1d2b   :  { %v7545_v59 = vpop.eup %7544  ;;  %v6281_v46 = vmul.f32 0.6931472, %v7543_v16 }
0x1d2c   :  { %v6279_v60 = vmul.f32 0.6931472, %v7545_v59 }
0x1d2d   :  { %v6283_v43 = vadd.f32 %v6281_v46, %v6257_v32 }
0x1d2e   :  { %v6282_v1 = vadd.f32 %v6279_v60, %v6250_v33 }
0x1d2f   :  { %v6289_v61 = vsub.f32 %v6283_v43, %v6285_v14 }
0x1d30   :  { %v6288_v8 = vsub.f32 %v6282_v1, %v11272_v23 }
0x1d31   :  { %v6296_v27 = vrot.slane %v6289_v61, 7 }
0x1d33   :  { %v6297_v57 = vsel %vm4447_vm0, %v6296_v27, %v6288_v8 }
0x1d34   :  { %v6299_v9 = vmul.f32 %v6297_v57, %v6292_v20 }
0x1d36   :  { %v11298_v55 = vadd.f32 %v6299_v9, %v11272_v23  ;;  %v6369_v9 = vpop.permute.xlu2 %6368 }
0x1d38   :  { %v6308_v40 = vperm.slane %v11298_v55, 1  ;;  %v6301_v38 = vperm.slane %v11298_v55, 0  ;;  %v6362_v1 = vrot.slane %v11298_v55, 1 }
0x1d3a   :  { %6313 = vperm.xlu0 %7284, %v6308_v40   ;;  %6306 = vperm.xlu1 %7286, %v6301_v38  }
0x1dac   :  { %v6314_v15 = vpop.permute.xlu0 %6313  ;;  %v6307_v56 = vpop.permute.xlu1 %6306 }
0x1dad   :  { %v6316_v39 = vadd.f32 %v11285_v2, %v6314_v15  ;;  %v6315_v49 = vadd.f32 %v11285_v2, %v6307_v56 }
0x1daf   :  { %v6320_v13 = vadd.f32 %v6318_v48, %v6316_v39  ;;  %v6319_v36 = vadd.f32 %v6317_v10, %v6315_v49  ;;  %v6395_v49 = vperm.slane %v11279_v45, 2 }
0x1db1   :  { %v6328_v23 = vsel %vm4471_vm1, %v6320_v13, -inf  ;;  %v6321_v34 = vsel %vm4471_vm1, %v6319_v36, -inf }
0x1db2   :  { %v6329_v24 = vrot.slane %v6328_v23, 4  ;;  %v6322_v50 = vrot.slane %v6321_v34, 4 }
0x1db4   :  { %v6330_v54 = vmax.f32 %v6328_v23, %v6329_v24  ;;  %v6323_v17 = vmax.f32 %v6321_v34, %v6322_v50 }
0x1db6   :  { %v6331_v30 = vrot.slane %v6330_v54, 2  ;;  %v6324_v51 = vrot.slane %v6323_v17, 2 }
0x1db8   :  { %v6332_v25 = vmax.f32 %v6330_v54, %v6331_v30  ;;  %v6325_v19 = vmax.f32 %v6323_v17, %v6324_v51 }
0x1dba   :  { %v6333_v32 = vrot.slane %v6332_v25, 1  ;;  %v6326_v33 = vrot.slane %v6325_v19, 1 }
0x1dbc   :  { %v6334_v0 = vmax.f32 %v6332_v25, %v6333_v32  ;;  %v6327_v3 = vmax.f32 %v6325_v19, %v6326_v33 }
0x1dbe   :  { %v6336_v47 = vsub.f32 %v6320_v13, %v6334_v0  ;;  %v6335_v11 = vsub.f32 %v6319_v36, %v6327_v3  ;;  %v6394_v36 = vperm.slane %v10816_v12, 2 }
0x1dc0   :  { %v6339_v52 = vmul.f32 1.442695, %v6336_v47  ;;  %v6337_v21 = vmul.f32 1.442695, %v6335_v11 }
0x1dc2   :  { %7546 = vpow2.f32 %v6339_v52 }
0x1dc3   :  { %7548 = vpow2.f32 %v6337_v21 }
0x1dc8   :  { %v7547_v42 = vpop.eup %7546 }
0x1dc9   :  { %v7549_v31 = vpop.eup %7548  ;;  %v6348_v62 = vsel %vm4471_vm1, %v7547_v42, 0.0 }
0x1dca   :  { %v6349_v29 = vrot.slane %v6348_v62, 4  ;;  %v6341_v5 = vsel %vm4471_vm1, %v7549_v31, 0.0 }
0x1dcb   :  { %v6342_v58 = vrot.slane %v6341_v5, 4 }
0x1dcc   :  { %v6350_v26 = vadd.f32 %v6349_v29, %v6348_v62 }
0x1dcd   :  { %v6343_v35 = vadd.f32 %v6342_v58, %v6341_v5 }
0x1dce   :  { %v6351_v28 = vrot.slane %v6350_v26, 2 }
0x1dcf   :  { %v6344_v18 = vrot.slane %v6343_v35, 2 }
0x1dd0   :  { %v6352_v4 = vadd.f32 %v6351_v28, %v6350_v26 }
0x1dd1   :  { %v6345_v37 = vadd.f32 %v6344_v18, %v6343_v35 }
0x1dd2   :  { %v6353_v22 = vrot.slane %v6352_v4, 1 }
0x1dd3   :  { %v6346_v7 = vrot.slane %v6345_v37, 1 }
0x1dd4   :  { %v6354_v16 = vadd.f32 %v6353_v22, %v6352_v4 }
0x1dd5   :  { %v6347_v59 = vadd.f32 %v6346_v7, %v6345_v37 }
0x1dd6   :  { %7550 = vlog2.f32 %v6354_v16 }
0x1dd7   :  { %7552 = vlog2.f32 %v6347_v59 }
0x1ddc   :  { %v7551_v46 = vpop.eup %7550 }
0x1ddd   :  { %v7553_v60 = vpop.eup %7552  ;;  %v6358_v14 = vmul.f32 0.6931472, %v7551_v46 }
0x1dde   :  { %v6356_v43 = vmul.f32 0.6931472, %v7553_v60 }
0x1ddf   :  { %v6360_v61 = vadd.f32 %v6358_v14, %v6334_v0 }
0x1de0   :  { %v6359_v27 = vadd.f32 %v6356_v43, %v6327_v3 }
0x1de1   :  { %v6366_v8 = vsub.f32 %v6360_v61, %v6362_v1 }
0x1de2   :  { %v6365_v57 = vsub.f32 %v6359_v27, %v11298_v55 }
0x1de3   :  { %v6373_v20 = vrot.slane %v6366_v8, 7 }
0x1de5   :  { %v6374_v40 = vsel %vm4447_vm0, %v6373_v20, %v6365_v57 }
0x1de6   :  { %v6376_v38 = vmul.f32 %v6374_v40, %v6369_v9 }
0x1de8   :  { %v11314_v15 = vadd.f32 %v6376_v38, %v11298_v55  ;;  %v6446_v38 = vpop.permute.xlu2 %6445 }
0x1dea   :  { %v6385_v56 = vperm.slane %v11314_v15, 1  ;;  %v6378_v48 = vperm.slane %v11314_v15, 0  ;;  %v6439_v27 = vrot.slane %v11314_v15, 1 }
0x1dec   :  { %6390 = vperm.xlu0 %7284, %v6385_v56   ;;  %6383 = vperm.xlu1 %7286, %v6378_v48  }
0x1e5e   :  { %v6391_v39 = vpop.permute.xlu0 %6390  ;;  %v6384_v10 = vpop.permute.xlu1 %6383 }
0x1e5f   :  { %v6393_v13 = vadd.f32 %v11285_v2, %v6391_v39  ;;  %v6392_v23 = vadd.f32 %v11285_v2, %v6384_v10 }
0x1e61   :  { %v6397_v34 = vadd.f32 %v6395_v49, %v6393_v13  ;;  %v6396_v24 = vadd.f32 %v6394_v36, %v6392_v23  ;;  %v6472_v23 = vperm.slane %v11279_v45, 3 }
0x1e63   :  { %v6405_v55 = vsel %vm4471_vm1, %v6397_v34, -inf  ;;  %v6398_v50 = vsel %vm4471_vm1, %v6396_v24, -inf }
0x1e64   :  { %v6406_v54 = vrot.slane %v6405_v55, 4  ;;  %v6399_v17 = vrot.slane %v6398_v50, 4 }
0x1e66   :  { %v6407_v30 = vmax.f32 %v6405_v55, %v6406_v54  ;;  %v6400_v51 = vmax.f32 %v6398_v50, %v6399_v17 }
0x1e68   :  { %v6408_v25 = vrot.slane %v6407_v30, 2  ;;  %v6401_v19 = vrot.slane %v6400_v51, 2 }
0x1e6a   :  { %v6409_v32 = vmax.f32 %v6407_v30, %v6408_v25  ;;  %v6402_v33 = vmax.f32 %v6400_v51, %v6401_v19 }
0x1e6c   :  { %v6410_v0 = vrot.slane %v6409_v32, 1  ;;  %v6403_v3 = vrot.slane %v6402_v33, 1 }
0x1e6e   :  { %v6411_v47 = vmax.f32 %v6409_v32, %v6410_v0  ;;  %v6404_v11 = vmax.f32 %v6402_v33, %v6403_v3 }
0x1e70   :  { %v6413_v52 = vsub.f32 %v6397_v34, %v6411_v47  ;;  %v6412_v21 = vsub.f32 %v6396_v24, %v6404_v11  ;;  %v6471_v24 = vperm.slane %v10816_v12, 3 }
0x1e72   :  { %v6416_v42 = vmul.f32 1.442695, %v6413_v52  ;;  %v6414_v31 = vmul.f32 1.442695, %v6412_v21 }
0x1e74   :  { %7554 = vpow2.f32 %v6416_v42 }
0x1e75   :  { %7556 = vpow2.f32 %v6414_v31 }
0x1e7a   :  { %v7555_v62 = vpop.eup %7554 }
0x1e7b   :  { %v7557_v29 = vpop.eup %7556  ;;  %v6425_v5 = vsel %vm4471_vm1, %v7555_v62, 0.0 }
0x1e7c   :  { %v6426_v58 = vrot.slane %v6425_v5, 4  ;;  %v6418_v26 = vsel %vm4471_vm1, %v7557_v29, 0.0 }
0x1e7d   :  { %v6419_v35 = vrot.slane %v6418_v26, 4 }
0x1e7e   :  { %v6427_v28 = vadd.f32 %v6426_v58, %v6425_v5 }
0x1e7f   :  { %v6420_v18 = vadd.f32 %v6419_v35, %v6418_v26 }
0x1e80   :  { %v6428_v4 = vrot.slane %v6427_v28, 2 }
0x1e81   :  { %v6421_v37 = vrot.slane %v6420_v18, 2 }
0x1e82   :  { %v6429_v22 = vadd.f32 %v6428_v4, %v6427_v28 }
0x1e83   :  { %v6422_v7 = vadd.f32 %v6421_v37, %v6420_v18 }
0x1e84   :  { %v6430_v16 = vrot.slane %v6429_v22, 1 }
0x1e85   :  { %v6423_v59 = vrot.slane %v6422_v7, 1 }
0x1e86   :  { %v6431_v46 = vadd.f32 %v6430_v16, %v6429_v22 }
0x1e87   :  { %v6424_v60 = vadd.f32 %v6423_v59, %v6422_v7 }
0x1e88   :  { %7558 = vlog2.f32 %v6431_v46 }
0x1e89   :  { %7560 = vlog2.f32 %v6424_v60 }
0x1e8e   :  { %v7559_v14 = vpop.eup %7558 }
0x1e8f   :  { %v7561_v43 = vpop.eup %7560  ;;  %v6435_v1 = vmul.f32 0.6931472, %v7559_v14 }
0x1e90   :  { %v6433_v61 = vmul.f32 0.6931472, %v7561_v43 }
0x1e91   :  { %v6437_v8 = vadd.f32 %v6435_v1, %v6411_v47 }
0x1e92   :  { %v6436_v20 = vadd.f32 %v6433_v61, %v6404_v11 }
0x1e93   :  { %v6443_v57 = vsub.f32 %v6437_v8, %v6439_v27 }
0x1e94   :  { %v6442_v40 = vsub.f32 %v6436_v20, %v11314_v15 }
0x1e95   :  { %v6450_v9 = vrot.slane %v6443_v57, 7 }
0x1e97   :  { %v6451_v56 = vsel %vm4447_vm0, %v6450_v9, %v6442_v40 }
0x1e98   :  { %v6453_v48 = vmul.f32 %v6451_v56, %v6446_v38 }
0x1e9a   :  { %v11330_v39 = vadd.f32 %v6453_v48, %v11314_v15  ;;  %v6523_v48 = vpop.permute.xlu2 %6522 }
0x1e9c   :  { %v6462_v10 = vperm.slane %v11330_v39, 1  ;;  %v6455_v49 = vperm.slane %v11330_v39, 0  ;;  %v6516_v20 = vrot.slane %v11330_v39, 1 }
0x1e9e   :  { %6467 = vperm.xlu0 %7284, %v6462_v10   ;;  %6460 = vperm.xlu1 %7286, %v6455_v49  }
0x1f10   :  { %v6468_v13 = vpop.permute.xlu0 %6467  ;;  %v6461_v36 = vpop.permute.xlu1 %6460 }
0x1f11   :  { %v6470_v34 = vadd.f32 %v11285_v2, %v6468_v13  ;;  %v6469_v55 = vadd.f32 %v11285_v2, %v6461_v36 }
0x1f13   :  { %v6474_v50 = vadd.f32 %v6472_v23, %v6470_v34  ;;  %v6473_v54 = vadd.f32 %v6471_v24, %v6469_v55  ;;  %v6549_v55 = vperm.slane %v11279_v45, 4 }
0x1f15   :  { %v6482_v15 = vsel %vm4471_vm1, %v6474_v50, -inf  ;;  %v6475_v17 = vsel %vm4471_vm1, %v6473_v54, -inf }
0x1f16   :  { %v6483_v30 = vrot.slane %v6482_v15, 4  ;;  %v6476_v51 = vrot.slane %v6475_v17, 4 }
0x1f18   :  { %v6484_v25 = vmax.f32 %v6482_v15, %v6483_v30  ;;  %v6477_v19 = vmax.f32 %v6475_v17, %v6476_v51 }
0x1f1a   :  { %v6485_v32 = vrot.slane %v6484_v25, 2  ;;  %v6478_v33 = vrot.slane %v6477_v19, 2 }
0x1f1c   :  { %v6486_v0 = vmax.f32 %v6484_v25, %v6485_v32  ;;  %v6479_v3 = vmax.f32 %v6477_v19, %v6478_v33 }
0x1f1e   :  { %v6487_v47 = vrot.slane %v6486_v0, 1  ;;  %v6480_v11 = vrot.slane %v6479_v3, 1 }
0x1f20   :  { %v6488_v52 = vmax.f32 %v6486_v0, %v6487_v47  ;;  %v6481_v21 = vmax.f32 %v6479_v3, %v6480_v11 }
0x1f22   :  { %v6490_v42 = vsub.f32 %v6474_v50, %v6488_v52  ;;  %v6489_v31 = vsub.f32 %v6473_v54, %v6481_v21  ;;  %v6548_v54 = vperm.slane %v10816_v12, 4 }
0x1f24   :  { %v6493_v62 = vmul.f32 1.442695, %v6490_v42  ;;  %v6491_v29 = vmul.f32 1.442695, %v6489_v31 }
0x1f26   :  { %7562 = vpow2.f32 %v6493_v62 }
0x1f27   :  { %7564 = vpow2.f32 %v6491_v29 }
0x1f2c   :  { %v7563_v5 = vpop.eup %7562 }
0x1f2d   :  { %v7565_v58 = vpop.eup %7564  ;;  %v6502_v26 = vsel %vm4471_vm1, %v7563_v5, 0.0 }
0x1f2e   :  { %v6503_v35 = vrot.slane %v6502_v26, 4  ;;  %v6495_v28 = vsel %vm4471_vm1, %v7565_v58, 0.0 }
0x1f2f   :  { %v6496_v18 = vrot.slane %v6495_v28, 4 }
0x1f30   :  { %v6504_v4 = vadd.f32 %v6503_v35, %v6502_v26 }
0x1f31   :  { %v6497_v37 = vadd.f32 %v6496_v18, %v6495_v28 }
0x1f32   :  { %v6505_v22 = vrot.slane %v6504_v4, 2 }
0x1f33   :  { %v6498_v7 = vrot.slane %v6497_v37, 2 }
0x1f34   :  { %v6506_v16 = vadd.f32 %v6505_v22, %v6504_v4 }
0x1f35   :  { %v6499_v59 = vadd.f32 %v6498_v7, %v6497_v37 }
0x1f36   :  { %v6507_v46 = vrot.slane %v6506_v16, 1 }
0x1f37   :  { %v6500_v60 = vrot.slane %v6499_v59, 1 }
0x1f38   :  { %v6508_v14 = vadd.f32 %v6507_v46, %v6506_v16 }
0x1f39   :  { %v6501_v43 = vadd.f32 %v6500_v60, %v6499_v59 }
0x1f3a   :  { %7566 = vlog2.f32 %v6508_v14 }
0x1f3b   :  { %7568 = vlog2.f32 %v6501_v43 }
0x1f40   :  { %v7567_v1 = vpop.eup %7566 }
0x1f41   :  { %v7569_v61 = vpop.eup %7568  ;;  %v6512_v27 = vmul.f32 0.6931472, %v7567_v1 }
0x1f42   :  { %v6510_v8 = vmul.f32 0.6931472, %v7569_v61 }
0x1f43   :  { %v6514_v57 = vadd.f32 %v6512_v27, %v6488_v52 }
0x1f44   :  { %v6513_v9 = vadd.f32 %v6510_v8, %v6481_v21 }
0x1f45   :  { %v6520_v40 = vsub.f32 %v6514_v57, %v6516_v20 }
0x1f46   :  { %v6519_v56 = vsub.f32 %v6513_v9, %v11330_v39 }
0x1f47   :  { %v6527_v38 = vrot.slane %v6520_v40, 7 }
0x1f49   :  { %v6528_v10 = vsel %vm4447_vm0, %v6527_v38, %v6519_v56 }
0x1f4a   :  { %v6530_v49 = vmul.f32 %v6528_v10, %v6523_v48 }
0x1f4c   :  { %v11346_v13 = vadd.f32 %v6530_v49, %v11330_v39  ;;  %v6600_v49 = vpop.permute.xlu2 %6599 }
0x1f4e   :  { %v6539_v36 = vperm.slane %v11346_v13, 1  ;;  %v6532_v23 = vperm.slane %v11346_v13, 0  ;;  %v6593_v9 = vrot.slane %v11346_v13, 1 }
0x1f50   :  { %6544 = vperm.xlu0 %7284, %v6539_v36   ;;  %6537 = vperm.xlu1 %7286, %v6532_v23  }
0x1fc2   :  { %v6545_v34 = vpop.permute.xlu0 %6544  ;;  %v6538_v24 = vpop.permute.xlu1 %6537 }
0x1fc3   :  { %v6547_v50 = vadd.f32 %v11285_v2, %v6545_v34  ;;  %v6546_v15 = vadd.f32 %v11285_v2, %v6538_v24 }
0x1fc5   :  { %v6551_v17 = vadd.f32 %v6549_v55, %v6547_v50  ;;  %v6550_v30 = vadd.f32 %v6548_v54, %v6546_v15  ;;  %v6626_v15 = vperm.slane %v11279_v45, 5 }
0x1fc7   :  { %v6559_v39 = vsel %vm4471_vm1, %v6551_v17, -inf  ;;  %v6552_v51 = vsel %vm4471_vm1, %v6550_v30, -inf }
0x1fc8   :  { %v6560_v25 = vrot.slane %v6559_v39, 4  ;;  %v6553_v19 = vrot.slane %v6552_v51, 4 }
0x1fca   :  { %v6561_v32 = vmax.f32 %v6559_v39, %v6560_v25  ;;  %v6554_v33 = vmax.f32 %v6552_v51, %v6553_v19 }
0x1fcc   :  { %v6562_v0 = vrot.slane %v6561_v32, 2  ;;  %v6555_v3 = vrot.slane %v6554_v33, 2 }
0x1fce   :  { %v6563_v47 = vmax.f32 %v6561_v32, %v6562_v0  ;;  %v6556_v11 = vmax.f32 %v6554_v33, %v6555_v3 }
0x1fd0   :  { %v6564_v52 = vrot.slane %v6563_v47, 1  ;;  %v6557_v21 = vrot.slane %v6556_v11, 1 }
0x1fd2   :  { %v6565_v42 = vmax.f32 %v6563_v47, %v6564_v52  ;;  %v6558_v31 = vmax.f32 %v6556_v11, %v6557_v21 }
0x1fd4   :  { %v6567_v62 = vsub.f32 %v6551_v17, %v6565_v42  ;;  %v6566_v29 = vsub.f32 %v6550_v30, %v6558_v31  ;;  %v6625_v30 = vperm.slane %v10816_v12, 5 }
0x1fd6   :  { %v6570_v5 = vmul.f32 1.442695, %v6567_v62  ;;  %v6568_v58 = vmul.f32 1.442695, %v6566_v29 }
0x1fd8   :  { %7570 = vpow2.f32 %v6570_v5 }
0x1fd9   :  { %7572 = vpow2.f32 %v6568_v58 }
0x1fde   :  { %v7571_v26 = vpop.eup %7570 }
0x1fdf   :  { %v7573_v35 = vpop.eup %7572  ;;  %v6579_v28 = vsel %vm4471_vm1, %v7571_v26, 0.0 }
0x1fe0   :  { %v6580_v18 = vrot.slane %v6579_v28, 4  ;;  %v6572_v4 = vsel %vm4471_vm1, %v7573_v35, 0.0 }
0x1fe1   :  { %v6573_v37 = vrot.slane %v6572_v4, 4 }
0x1fe2   :  { %v6581_v22 = vadd.f32 %v6580_v18, %v6579_v28 }
0x1fe3   :  { %v6574_v7 = vadd.f32 %v6573_v37, %v6572_v4 }
0x1fe4   :  { %v6582_v16 = vrot.slane %v6581_v22, 2 }
0x1fe5   :  { %v6575_v59 = vrot.slane %v6574_v7, 2 }
0x1fe6   :  { %v6583_v46 = vadd.f32 %v6582_v16, %v6581_v22 }
0x1fe7   :  { %v6576_v60 = vadd.f32 %v6575_v59, %v6574_v7  ;;  %v4235_v59 = vld [vmem:[%s11615_s16] sm:$0xff] }
0x1fe8   :  { %v6584_v14 = vrot.slane %v6583_v46, 1  ;;  %7219 = vmatmul.msk.f32.vlgmr.msrb.gmra.mxu2 %vm4210_vm2, %v4235_v59 }
0x1fe9   :  { %v6577_v43 = vrot.slane %v6576_v60, 1 }
0x1fea   :  { %v6585_v1 = vadd.f32 %v6584_v14, %v6583_v46 }
0x1feb   :  { %v6578_v61 = vadd.f32 %v6577_v43, %v6576_v60 }
0x1fec   :  { %7574 = vlog2.f32 %v6585_v1 }
0x1fed   :  { %7576 = vlog2.f32 %v6578_v61 }
0x1ff2   :  { %v7575_v27 = vpop.eup %7574 }
0x1ff3   :  { %v7577_v8 = vpop.eup %7576  ;;  %v6589_v20 = vmul.f32 0.6931472, %v7575_v27 }
0x1ff4   :  { %v6587_v57 = vmul.f32 0.6931472, %v7577_v8  ;;  %v4236_v8 = vld [vmem:[%s11615_s16 + $0x8] sm:$0xff] }
0x1ff5   :  { %v6591_v40 = vadd.f32 %v6589_v20, %v6565_v42  ;;  %7220 = vmatmul.msk.f32.gmra.mxu2 %vm4210_vm2, %v4236_v8 }
0x1ff6   :  { %v6590_v38 = vadd.f32 %v6587_v57, %v6558_v31 }
0x1ff7   :  { %v6597_v56 = vsub.f32 %v6591_v40, %v6593_v9  ;;  %v4237_v9 = vld [vmem:[%s11615_s16 + $0x10] sm:$0xff] }
0x1ff8   :  { %v6596_v10 = vsub.f32 %v6590_v38, %v11346_v13 }
0x1ff9   :  { %v6604_v48 = vrot.slane %v6597_v56, 7 }
0x1ffb   :  { %v6605_v36 = vsel %vm4447_vm0, %v6604_v48, %v6596_v10 }
0x1ffc   :  { %v6607_v23 = vmul.f32 %v6605_v36, %v6600_v49 }
0x1ffd   :  { %7221 = vmatmul.msk.f32.gmra.mxu2 %vm4210_vm2, %v4237_v9 }
0x1ffe   :  { %v11362_v34 = vadd.f32 %v6607_v23, %v11346_v13 }
0x2000   :  { %v6616_v24 = vperm.slane %v11362_v34, 1  ;;  %v6609_v55 = vperm.slane %v11362_v34, 0  ;;  %v6670_v10 = vrot.slane %v11362_v34, 1 }
0x2002   :  { %6621 = vperm.xlu0 %7284, %v6616_v24   ;;  %6614 = vperm.xlu1 %7286, %v6609_v55  }
0x2074   :  { %v6622_v50 = vpop.permute.xlu0 %6621  ;;  %v6615_v54 = vpop.permute.xlu1 %6614 }
0x2075   :  { %v6624_v17 = vadd.f32 %v11285_v2, %v6622_v50  ;;  %v6623_v39 = vadd.f32 %v11285_v2, %v6615_v54  ;;  %v4238_v50 = vld [vmem:[%s11615_s16 + $0x18] sm:$0xff]  ;;  %v6677_v54 = vpop.permute.xlu2 %6676 }
0x2076   :  { %7222 = vmatmul.msk.f32.gmra.mxu2 %vm4210_vm2, %v4238_v50 }
0x2077   :  { %v6628_v51 = vadd.f32 %v6626_v15, %v6624_v17  ;;  %v6627_v25 = vadd.f32 %v6625_v30, %v6623_v39 }
0x2079   :  { %v6636_v13 = vsel %vm4471_vm1, %v6628_v51, -inf  ;;  %v6629_v19 = vsel %vm4471_vm1, %v6627_v25, -inf }
0x207a   :  { %v6637_v32 = vrot.slane %v6636_v13, 4  ;;  %v6630_v33 = vrot.slane %v6629_v19, 4 }
0x207c   :  { %v6638_v0 = vmax.f32 %v6636_v13, %v6637_v32  ;;  %v6631_v3 = vmax.f32 %v6629_v19, %v6630_v33  ;;  %v4240_v13 = vld [vmem:[%s11615_s16 + $0x28] sm:$0xff]  ;;  %v4242_v19 = vld [vmem:[%s11615_s16 + $0x38] sm:$0xff] }
0x207e   :  { %v6639_v47 = vrot.slane %v6638_v0, 2  ;;  %v6632_v11 = vrot.slane %v6631_v3, 2 }
0x2080   :  { %v6640_v52 = vmax.f32 %v6638_v0, %v6639_v47  ;;  %v6633_v21 = vmax.f32 %v6631_v3, %v6632_v11  ;;  %v6703_v0 = vperm.slane %v11279_v45, 6  ;;  %v6702_v47 = vperm.slane %v10816_v12, 6 }
0x2082   :  { %v6641_v42 = vrot.slane %v6640_v52, 1  ;;  %v6634_v31 = vrot.slane %v6633_v21, 1 }
0x2084   :  { %v6642_v62 = vmax.f32 %v6640_v52, %v6641_v42  ;;  %v6635_v29 = vmax.f32 %v6633_v21, %v6634_v31 }
0x2086   :  { %v6644_v5 = vsub.f32 %v6628_v51, %v6642_v62  ;;  %v6643_v58 = vsub.f32 %v6627_v25, %v6635_v29  ;;  %v4239_v25 = vld [vmem:[%s11615_s16 + $0x20] sm:$0xff] }
0x2087   :  { %7223 = vmatmul.msk.f32.gmra.mxu2 %vm4210_vm2, %v4239_v25  ;;  %v6754_v25 = vpop.permute.xlu2 %6753 }
0x2088   :  { %v6647_v26 = vmul.f32 1.442695, %v6644_v5  ;;  %v6645_v35 = vmul.f32 1.442695, %v6643_v58 }
0x208a   :  { %7578 = vpow2.f32 %v6647_v26 }
0x208b   :  { %7580 = vpow2.f32 %v6645_v35 }
0x208f   :  { %7224 = vmatmul.msk.f32.gmra.mxu2 %vm4210_vm2, %v4240_v13 }
0x2090   :  { %v7579_v28 = vpop.eup %7578 }
0x2091   :  { %v7581_v18 = vpop.eup %7580  ;;  %v6656_v4 = vsel %vm4471_vm1, %v7579_v28, 0.0 }
0x2092   :  { %v6657_v37 = vrot.slane %v6656_v4, 4  ;;  %v6649_v22 = vsel %vm4471_vm1, %v7581_v18, 0.0 }
0x2093   :  { %v6650_v7 = vrot.slane %v6649_v22, 4 }
0x2094   :  { %v6658_v16 = vadd.f32 %v6657_v37, %v6656_v4 }
0x2095   :  { %v6651_v46 = vadd.f32 %v6650_v7, %v6649_v22 }
0x2096   :  { %v6659_v60 = vrot.slane %v6658_v16, 2 }
0x2097   :  { %v6652_v14 = vrot.slane %v6651_v46, 2 }
0x2098   :  { %v6660_v43 = vadd.f32 %v6659_v60, %v6658_v16 }
0x2099   :  { %v6653_v1 = vadd.f32 %v6652_v14, %v6651_v46 }
0x209a   :  { %v6661_v61 = vrot.slane %v6660_v43, 1 }
0x209b   :  { %v6654_v27 = vrot.slane %v6653_v1, 1 }
0x209c   :  { %v6662_v20 = vadd.f32 %v6661_v61, %v6660_v43 }
0x209d   :  { %v6655_v57 = vadd.f32 %v6654_v27, %v6653_v1 }
0x209e   :  { %7582 = vlog2.f32 %v6662_v20 }
0x209f   :  { %7584 = vlog2.f32 %v6655_v57 }
0x20a4   :  { %v7583_v40 = vpop.eup %7582 }
0x20a5   :  { %v7585_v38 = vpop.eup %7584  ;;  %v6666_v56 = vmul.f32 0.6931472, %v7583_v40 }
0x20a6   :  { %v6664_v48 = vmul.f32 0.6931472, %v7585_v38 }
0x20a7   :  { %v6668_v49 = vadd.f32 %v6666_v56, %v6642_v62 }
0x20a8   :  { %v6667_v36 = vadd.f32 %v6664_v48, %v6635_v29 }
0x20a9   :  { %v6674_v23 = vsub.f32 %v6668_v49, %v6670_v10 }
0x20aa   :  { %v6673_v55 = vsub.f32 %v6667_v36, %v11362_v34 }
0x20ab   :  { %v6681_v24 = vrot.slane %v6674_v23, 7 }
0x20ad   :  { %v6682_v15 = vsel %vm4447_vm0, %v6681_v24, %v6673_v55 }
0x20ae   :  { %v6684_v17 = vmul.f32 %v6682_v15, %v6677_v54 }
0x20b0   :  { %v11395_v30 = vadd.f32 %v6684_v17, %v11362_v34  ;;  %v4241_v34 = vld [vmem:[%s11615_s16 + $0x30] sm:$0xff] }
0x20b1   :  { %7225 = vmatmul.msk.f32.gmra.mxu2 %vm4210_vm2, %v4241_v34 }
0x20b2   :  { %v6693_v39 = vperm.slane %v11395_v30, 1  ;;  %v6686_v51 = vperm.slane %v11395_v30, 0  ;;  %v6747_v50 = vrot.slane %v11395_v30, 1 }
0x20b4   :  { %6698 = vperm.xlu0 %7284, %v6693_v39   ;;  %6691 = vperm.xlu1 %7286, %v6686_v51  }
0x20b9   :  { %7226 = vmatmul.msk.f32.gmra.mxu2 %vm4210_vm2, %v4242_v19 }
0x2126   :  { %v6699_v32 = vpop.permute.xlu0 %6698  ;;  %v6692_v33 = vpop.permute.xlu1 %6691 }
0x2127   :  { %v6701_v3 = vadd.f32 %v11285_v2, %v6699_v32  ;;  %v6700_v11 = vadd.f32 %v11285_v2, %v6692_v33 }
0x2129   :  { %v6705_v52 = vadd.f32 %v6703_v0, %v6701_v3  ;;  %v6704_v21 = vadd.f32 %v6702_v47, %v6700_v11  ;;  %v11431_v0 = vpop.f32.mrf.mxu2  ;;  %v11437_v47 = vld [vmem:[%s11620_s21] ss:$0 sm:$0xff]  ;;  %v4364_v11 = vld [vmem:[%s11617_s18 + $0x8] sm:$0xff] }
0x212b   :  { %v6713_v42 = vsel %vm4471_vm1, %v6705_v52, -inf  ;;  %v6706_v31 = vsel %vm4471_vm1, %v6704_v21, -inf }
0x212c   :  { %v6714_v62 = vrot.slane %v6713_v42, 4  ;;  %v6707_v29 = vrot.slane %v6706_v31, 4 }
0x212e   :  { %v6715_v5 = vmax.f32 %v6713_v42, %v6714_v62  ;;  %v6708_v58 = vmax.f32 %v6706_v31, %v6707_v29  ;;  %v4346_v29 = vld [vmem:[%s11616_s17 + $0x10] sm:$0xff] }
0x2130   :  { %v6716_v26 = vrot.slane %v6715_v5, 2  ;;  %v6709_v35 = vrot.slane %v6708_v58, 2 }
0x2131   :  { %v4291_v3 = vpop.f32.mrf.mxu2 }
0x2132   :  { %v6717_v28 = vmax.f32 %v6715_v5, %v6716_v26  ;;  %v6710_v18 = vmax.f32 %v6708_v58, %v6709_v35  ;;  %v4365_v5 = vld [vmem:[%s11617_s18 + $0x10] sm:$0xff] }
0x2133   :  { %v4376_v26 = vmul.f32 %v11437_v47, %v4365_v5 }
0x2134   :  { %v6718_v4 = vrot.slane %v6717_v28, 1  ;;  %v6711_v37 = vrot.slane %v6710_v18, 1 }
0x2136   :  { %v6719_v22 = vmax.f32 %v6717_v28, %v6718_v4  ;;  %v6712_v7 = vmax.f32 %v6710_v18, %v6711_v37  ;;  %v11467_v4 = vld [vmem:[%s11614_s15] sm:$0xff]  ;;  %v4347_v37 = vld [vmem:[%s11616_s17 + $0x18] sm:$0xff] }
0x2138   :  { %v6721_v16 = vsub.f32 %v6705_v52, %v6719_v22  ;;  %v6720_v2 = vsub.f32 %v6704_v21, %v6712_v7  ;;  %v11448_v52 = vld [vmem:[%s11619_s20] ss:$0 sm:$0xff]  ;;  %v4375_v21 = vmul.f32 %v11437_v47, %v4364_v11  ;;  %v4370_v11 = vld [vmem:[%s11617_s18 + $0x38] sm:$0xff] }
0x2139   :  { %v11452_v31 = vpop.f32.mrf.mxu2  ;;  %v4357_v58 = vmul.f32 %v11448_v52, %v4346_v29 }
0x213a   :  { %v6724_v59 = vmul.f32 1.442695, %v6721_v16  ;;  %v6722_v46 = vmul.f32 1.442695, %v6720_v2  ;;  %v4202_v2 = vmul.f32 %v11467_v4, %v10829_v41  ;;  %v4363_v41 = vld [vmem:[%s11617_s18] sm:$0xff] }
0x213b   :  { %v4384_v35 = vadd.f32 %v4376_v26, %v4357_v58  ;;  %v6780_v58 = vperm.slane %v11279_v45, 7  ;;  %v7759_v26 = vld [vmem:[%s11621_s22] sm:$0x3f] }
0x213c   :  { %7586 = vpow2.f32 %v6724_v59 }
0x213d   :  { %7588 = vpow2.f32 %v6722_v46  ;;  %v4396_v28 = vsel %vm4210_vm2, %v4384_v35, 0.0 }
0x2141   :  { %v4297_v18 = vpop.f32.mrf.mxu2 }
0x2142   :  { %v7587_v60 = vpop.eup %7586 }
0x2143   :  { %v7589_v14 = vpop.eup %7588  ;;  %v6733_v43 = vsel %vm4471_vm1, %v7587_v60, 0.0  ;;  %v4211_v60 = vsel %vm4210_vm2, %v4202_v2, 0.0 }
0x2144   :  { %v6734_v1 = vrot.slane %v6733_v43, 4  ;;  %v6726_v61 = vsel %vm4471_vm1, %v7589_v14, 0.0 }
0x2145   :  { %v6727_v27 = vrot.slane %v6726_v61, 4 }
0x2146   :  { %v6735_v8 = vadd.f32 %v6734_v1, %v6733_v43  ;;  %v7758_v43 = vld [vmem:[%s11614_s15 + $0x8] sm:$0xff] }
0x2147   :  { %v6728_v20 = vadd.f32 %v6727_v27, %v6726_v61  ;;  %v4313_v1 = vmul.f32 %v7758_v43, %v4291_v3  ;;  %v4344_v61 = vld [vmem:[%s11616_s17] sm:$0xff] }
0x2148   :  { %v6736_v57 = vrot.slane %v6735_v8, 2 }
0x2149   :  { %v6729_v9 = vrot.slane %v6728_v20, 2  ;;  %v4300_v14 = vpop.f32.mrf.mxu2  ;;  %v4323_v27 = vsel %vm4210_vm2, %v4313_v1, 0.0 }
0x214a   :  { %v6737_v40 = vadd.f32 %v6736_v57, %v6735_v8  ;;  %v4355_v8 = vmul.f32 %v11448_v52, %v4344_v61  ;;  %v4199_v57 = vld [vmem:[%s11614_s15 + $0x28] sm:$0xff] }
0x214b   :  { %v6730_v38 = vadd.f32 %v6729_v9, %v6728_v20  ;;  %v4374_v20 = vmul.f32 %v11437_v47, %v4363_v41 }
0x214c   :  { %v6738_v56 = vrot.slane %v6737_v40, 1 }
0x214d   :  { %v6731_v48 = vrot.slane %v6730_v38, 1 }
0x214e   :  { %v6739_v10 = vadd.f32 %v6738_v56, %v6737_v40  ;;  %v4382_v40 = vadd.f32 %v4374_v20, %v4355_v8 }
0x214f   :  { %v6732_v49 = vadd.f32 %v6731_v48, %v6730_v38 }
0x2150   :  { %7590 = vlog2.f32 %v6739_v10  ;;  %v4390_v48 = vsel %vm4210_vm2, %v4382_v40, 0.0  ;;  %v11501_v10 = vld [vmem:[%s11614_s15 + $0x18] sm:$0xff] }
0x2151   :  { %7592 = vlog2.f32 %v6732_v49  ;;  %v4303_v9 = vpop.f32.mrf.mxu2  ;;  %v4200_v49 = vld [vmem:[%s11614_s15 + $0x30] sm:$0xff] }
0x2152   :  { %v4317_v38 = vmul.f32 %v4303_v9, %v4199_v57 }
0x2154   :  { %v4335_v56 = vsel %vm4210_vm2, %v4317_v38, 0.0 }
0x2156   :  { %v7591_v36 = vpop.eup %7590 }
0x2157   :  { %v7593_v23 = vpop.eup %7592  ;;  %v6743_v24 = vmul.f32 0.6931472, %v7591_v36 }
0x2158   :  { %v6741_v55 = vmul.f32 0.6931472, %v7593_v23  ;;  %v4315_v23 = vmul.f32 %v4297_v18, %v11501_v10 }
0x2159   :  { %v6745_v54 = vadd.f32 %v6743_v24, %v6719_v22  ;;  %v4366_v22 = vld [vmem:[%s11617_s18 + $0x18] sm:$0xff]  ;;  %v4306_v36 = vpop.f32.mrf.mxu2 }
0x215a   :  { %v6744_v15 = vadd.f32 %v6741_v55, %v6712_v7  ;;  %v4358_v7 = vmul.f32 %v11448_v52, %v4347_v37  ;;  %v4377_v16 = vmul.f32 %v11437_v47, %v4366_v22  ;;  %v4318_v24 = vmul.f32 %v4306_v36, %v4200_v49 }
0x215b   :  { %v6751_v17 = vsub.f32 %v6745_v54, %v6747_v50  ;;  %v4329_v50 = vsel %vm4210_vm2, %v4315_v23, 0.0  ;;  %v11512_v54 = vld [vmem:[%s11614_s15 + $0x20] sm:$0xff] }
0x215c   :  { %v6750_v51 = vsub.f32 %v6744_v15, %v11395_v30  ;;  %v4385_v59 = vadd.f32 %v4377_v16, %v4358_v7  ;;  %v4338_v55 = vsel %vm4210_vm2, %v4318_v24, 0.0  ;;  %v4201_v15 = vld [vmem:[%s11614_s15 + $0x38] sm:$0xff] }
0x215d   :  { %v6758_v39 = vrot.slane %v6751_v17, 7 }
0x215e   :  { %v4399_v46 = vsel %vm4210_vm2, %v4385_v59, 0.0 }
0x215f   :  { %v6759_v13 = vsel %vm4447_vm0, %v6758_v39, %v6750_v51  ;;  %v4316_v39 = vmul.f32 %v4300_v14, %v11512_v54 }
0x2160   :  { %v6761_v34 = vmul.f32 %v6759_v13, %v6754_v25 }
0x2161   :  { %v4309_v17 = vpop.f32.mrf.mxu2  ;;  %v4332_v13 = vsel %vm4210_vm2, %v4316_v39, 0.0 }
0x2162   :  { %v11427_v19 = vadd.f32 %v6761_v34, %v11395_v30  ;;  %v4345_v30 = vld [vmem:[%s11616_s17 + $0x8] sm:$0xff]  ;;  %v4319_v51 = vmul.f32 %v4309_v17, %v4201_v15  ;;  %v4207_v34 = vmul.f32 %v4199_v57, %v11003_v63 }
0x2164   :  { %v6770_v32 = vperm.slane %v11427_v19, 1  ;;  %v6763_v33 = vperm.slane %v11427_v19, 0  ;;  %v4341_v25 = vsel %vm4210_vm2, %v4319_v51, 0.0 }
0x2166   :  { %6775 = vperm.xlu0 %7284, %v6770_v32   ;;  %6768 = vperm.xlu1 %7286, %v6763_v33   ;;  %v4226_v32 = vsel %vm4210_vm2, %v4207_v34, 0.0  ;;  %v4208_v33 = vmul.f32 %v4200_v49, %v11141_v53 }
0x2168   :  { %v4229_v3 = vsel %vm4210_vm2, %v4208_v33, 0.0 }
0x216e   :  { %7313 = vset.pattern.permute.xlu0 %v7819_v44  ;;  %v4356_v44 = vmul.f32 %v11448_v52, %v4345_v30  ;;  %v4351_v30 = vld [vmem:[%s11616_s17 + $0x38] sm:$0xff] }
0x216f   :  { %v4362_v63 = vmul.f32 %v11448_v52, %v4351_v30 }
0x2170   :  { %v4383_v42 = vadd.f32 %v4375_v21, %v4356_v44  ;;  %v4209_v44 = vmul.f32 %v4201_v15, %v11279_v45  ;;  %v4381_v21 = vmul.f32 %v11437_v47, %v4370_v11  ;;  %v6824_v11 = vrot.slane %v11427_v19, 1 }
0x2172   :  { %v4393_v62 = vsel %vm4210_vm2, %v4383_v42, 0.0  ;;  %v4232_v42 = vsel %vm4210_vm2, %v4209_v44, 0.0  ;;  %v4389_v53 = vadd.f32 %v4381_v21, %v4362_v63 }
0x2173   :  { %4394 = vadd.xlane.f32.xlu2 %v4393_v62 }
0x2174   :  { %v4411_v62 = vsel %vm4210_vm2, %v4389_v53, 0.0 }
0x217b   :  { %4397 = vadd.xlane.f32.xlu2 %v4396_v28  ;;  %v6779_v28 = vperm.slane %v10816_v12, 7 }
0x2183   :  { %4400 = vadd.xlane.f32.xlu2 %v4399_v46 }
0x218b   :  { %4336 = vadd.xlane.f32.xlu2 %v4335_v56 }
0x2190   :  { %4212 = vadd.xlane.f32.xlu1 %v4211_v60 }
0x2193   :  { %4339 = vadd.xlane.f32.xlu2 %v4338_v55 }
0x2198   :  { %4324 = vadd.xlane.f32.xlu1 %v4323_v27 }
0x219b   :  { %4342 = vadd.xlane.f32.xlu2 %v4341_v25 }
0x21a0   :  { %4391 = vadd.xlane.f32.xlu1 %v4390_v48 }
0x21a8   :  { %4330 = vadd.xlane.f32.xlu1 %v4329_v50 }
0x21b0   :  { %4333 = vadd.xlane.f32.xlu1 %v4332_v13 }
0x21b8   :  { %4227 = vadd.xlane.f32.xlu1 %v4226_v32 }
0x21c0   :  { %4230 = vadd.xlane.f32.xlu1 %v4229_v3 }
0x21c8   :  { %4233 = vadd.xlane.f32.xlu1 %v4232_v42 }
0x21d0   :  { %4412 = vadd.xlane.f32.xlu1 %v4411_v62  ;;  %v6831_v62 = vpop.permute.xlu2 %6830 }
0x21d8   :  { %v6776_v29 = vpop.permute.xlu0 %6775  ;;  %v6769_v5 = vpop.permute.xlu1 %6768 }
0x21d9   :  { %v6778_v35 = vadd.f32 %v7759_v26, %v6776_v29  ;;  %v6777_v18 = vadd.f32 %v7759_v26, %v6769_v5 }
0x21db   :  { %v6782_v37 = vadd.f32 %v6780_v58, %v6778_v35  ;;  %v6781_v22 = vadd.f32 %v6779_v28, %v6777_v18  ;;  %v4312_v28 = vmul.f32 %v11431_v0, %v11467_v4  ;;  %v4348_v0 = vld [vmem:[%s11616_s17 + $0x20] sm:$0xff] }
0x21dc   :  { %v4367_v4 = vld [vmem:[%s11617_s18 + $0x20] sm:$0xff] }
0x21dd   :  { %v6790_v7 = vsel %vm4471_vm1, %v6782_v37, -inf  ;;  %v6783_v16 = vsel %vm4471_vm1, %v6781_v22, -inf  ;;  %v4320_v18 = vsel %vm4210_vm2, %v4312_v28, 0.0 }
0x21de   :  { %v6791_v2 = vrot.slane %v6790_v7, 4  ;;  %v6784_v59 = vrot.slane %v6783_v16, 4 }
0x21e0   :  { %v6792_v46 = vmax.f32 %v6790_v7, %v6791_v2  ;;  %v6785_v60 = vmax.f32 %v6783_v16, %v6784_v59  ;;  %v4205_v7 = vmul.f32 %v11501_v10, %v10816_v12  ;;  %v4359_v2 = vmul.f32 %v11448_v52, %v4348_v0 }
0x21e1   :  { %v4378_v59 = vmul.f32 %v11437_v47, %v4367_v4 }
0x21e2   :  { %v6793_v14 = vrot.slane %v6792_v46, 2  ;;  %v6786_v45 = vrot.slane %v6785_v60, 2  ;;  %v4220_v16 = vsel %vm4210_vm2, %v4205_v7, 0.0 }
0x21e3   :  { %v4386_v10 = vadd.f32 %v4378_v59, %v4359_v2 }
0x21e4   :  { %v6794_v43 = vmax.f32 %v6792_v46, %v6793_v14  ;;  %v6787_v1 = vmax.f32 %v6785_v60, %v6786_v45  ;;  %v4349_v46 = vld [vmem:[%s11616_s17 + $0x28] sm:$0xff] }
0x21e5   :  { %v4368_v60 = vld [vmem:[%s11617_s18 + $0x28] sm:$0xff]  ;;  %v4402_v14 = vsel %vm4210_vm2, %v4386_v10, 0.0 }
0x21e6   :  { %v6795_v61 = vrot.slane %v6794_v43, 1  ;;  %v6788_v41 = vrot.slane %v6787_v1, 1 }
0x21e8   :  { %v6796_v27 = vmax.f32 %v6794_v43, %v6795_v61  ;;  %v6789_v8 = vmax.f32 %v6787_v1, %v6788_v41 }
0x21ea   :  { %v6798_v20 = vsub.f32 %v6782_v37, %v6796_v27  ;;  %v6797_v57 = vsub.f32 %v6781_v22, %v6789_v8  ;;  %v7760_v37 = vld [vmem:[%s11614_s15 + $0x10] sm:$0xff] }
0x21eb   :  { %v4314_v22 = vmul.f32 %v7760_v37, %v11452_v31  ;;  %v4206_v31 = vmul.f32 %v11512_v54, %v10824_v6  ;;  %v4360_v6 = vmul.f32 %v11448_v52, %v4349_v46  ;;  %v4379_v54 = vmul.f32 %v11437_v47, %v4368_v60 }
0x21ec   :  { %v6801_v9 = vmul.f32 1.442695, %v6798_v20  ;;  %v6799_v40 = vmul.f32 1.442695, %v6797_v57 }
0x21ed   :  { %v4223_v12 = vsel %vm4210_vm2, %v4206_v31, 0.0  ;;  %v4387_v45 = vadd.f32 %v4379_v54, %v4360_v6 }
0x21ee   :  { %7594 = vpow2.f32 %v6801_v9 }
0x21ef   :  { %7596 = vpow2.f32 %v6799_v40  ;;  %v4405_v43 = vsel %vm4210_vm2, %v4387_v45, 0.0 }
0x21f4   :  { %v7595_v38 = vpop.eup %7594 }
0x21f5   :  { %v7597_v56 = vpop.eup %7596  ;;  %v6810_v48 = vsel %vm4471_vm1, %v7595_v38, 0.0 }
0x21f6   :  { %v6811_v49 = vrot.slane %v6810_v48, 4  ;;  %v6803_v36 = vsel %vm4471_vm1, %v7597_v56, 0.0 }
0x21f7   :  { %v6804_v23 = vrot.slane %v6803_v36, 4 }
0x21f8   :  { %v6812_v24 = vadd.f32 %v6811_v49, %v6810_v48 }
0x21f9   :  { %v6805_v55 = vadd.f32 %v6804_v23, %v6803_v36  ;;  %v4216_v36 = vpop.xlane.xlu2 %4215 }
0x21fa   :  { %v6813_v50 = vrot.slane %v6812_v24, 2 }
0x21fb   :  { %v6806_v15 = vrot.slane %v6805_v55, 2 }
0x21fc   :  { %v6814_v17 = vadd.f32 %v6813_v50, %v6812_v24 }
0x21fd   :  { %v6807_v39 = vadd.f32 %v6806_v15, %v6805_v55 }
0x21fe   :  { %v6815_v51 = vrot.slane %v6814_v17, 1 }
0x21ff   :  { %v6808_v25 = vrot.slane %v6807_v39, 1 }
0x2200   :  { %v6816_v13 = vadd.f32 %v6815_v51, %v6814_v17 }
0x2201   :  { %v6809_v34 = vadd.f32 %v6808_v25, %v6807_v39  ;;  %v4219_v55 = vpop.xlane.xlu2 %4218 }
0x2202   :  { %7598 = vlog2.f32 %v6816_v13 }
0x2203   :  { %7600 = vlog2.f32 %v6809_v34  ;;  %v4213_v48 = vpop.xlane.xlu1 %4212 }
0x2208   :  { %v7599_v32 = vpop.eup %7598 }
0x2209   :  { %v7601_v33 = vpop.eup %7600  ;;  %v6820_v3 = vmul.f32 0.6931472, %v7599_v32  ;;  %v4395_v15 = vpop.xlane.xlu2 %4394 }
0x220a   :  { %v6818_v30 = vmul.f32 0.6931472, %v7601_v33 }
0x220b   :  { %v6822_v44 = vadd.f32 %v6820_v3, %v6796_v27  ;;  %v4350_v27 = vld [vmem:[%s11616_s17 + $0x30] sm:$0xff]  ;;  %v4325_v49 = vpop.xlane.xlu1 %4324  ;;  %s7820_s17 = smov [#allocation2]  }
0x220c   :  { %v6821_v63 = vadd.f32 %v6818_v30, %v6789_v8  ;;  %v4369_v8 = vld [vmem:[%s11617_s18 + $0x30] sm:$0xff]  ;;  %v4361_v20 = vmul.f32 %v11448_v52, %v4350_v27  ;;  %s6871_s18 = sshll.u32 %s7820_s17, 4  ;;  %s6872_s18 = int_to_ptr.vmem [resolvable:$true] %s6871_s18 }
0x220d   :  { %v6828_v21 = vsub.f32 %v6822_v44, %v6824_v11  ;;  %v4380_v57 = vmul.f32 %v11437_v47, %v4369_v8  ;;  %v4415_v11 = vadd.f32 %v4325_v49, %v4216_v36 }
0x220e   :  { %v6827_v53 = vsub.f32 %v6821_v63, %v11427_v19 }
0x220f   :  { %v6835_v42 = vrot.slane %v6828_v21, 7  ;;  %v4388_v38 = vadd.f32 %v4380_v57, %v4361_v20 }
0x2211   :  { %v6836_v29 = vsel %vm4447_vm0, %v6835_v42, %v6827_v53  ;;  %v4408_v56 = vsel %vm4210_vm2, %v4388_v38, 0.0  ;;  %v4398_v39 = vpop.xlane.xlu2 %4397 }
0x2212   :  { %v6838_v5 = vmul.f32 %v6836_v29, %v6831_v62  ;;  %v4423_v62 = vadd.f32 %v4415_v11, %v4395_v15 }
0x2213   :  { %v4392_v24 = vpop.xlane.xlu1 %4391 }
0x2214   :  { %v6839_v58 = vadd.f32 %v6838_v5, %v11427_v19  ;;  %v4326_v19 = vsel %vm4210_vm2, %v4314_v22, 0.0 }
0x2216   :  { %v6840_v26 = vadd.f32 %v11437_v47, %v6839_v58 }
0x2218   :  { %v6842_v35 = vsel %vm6841_vm11, %v6840_v26, -inf }
0x2219   :  { %6843 = vmax.xlane.f32.xlu0 %v6842_v35  ;;  %v4401_v25 = vpop.xlane.xlu2 %4400 }
0x221b   :  { %v4331_v17 = vpop.xlane.xlu1 %4330 }
0x2221   :  { %4321 = vadd.xlane.f32.xlu0 %v4320_v18  ;;  %v4337_v32 = vpop.xlane.xlu2 %4336 }
0x2223   :  { %v4334_v47 = vpop.xlane.xlu1 %4333 }
0x2229   :  { %4327 = vadd.xlane.f32.xlu0 %v4326_v19  ;;  %v4340_v63 = vpop.xlane.xlu2 %4339 }
0x222b   :  { %v4228_v13 = vpop.xlane.xlu1 %4227 }
0x222c   :  { %v4419_v28 = vadd.f32 %v4337_v32, %v4228_v13 }
0x2231   :  { %4221 = vadd.xlane.f32.xlu0 %v4220_v16  ;;  %v4343_v7 = vpop.xlane.xlu2 %4342 }
0x2233   :  { %v4231_v33 = vpop.xlane.xlu1 %4230 }
0x2234   :  { %v4420_v0 = vadd.f32 %v4340_v63, %v4231_v33 }
0x2239   :  { %4224 = vadd.xlane.f32.xlu0 %v4223_v12 }
0x223b   :  { %v4234_v53 = vpop.xlane.xlu1 %4233 }
0x223c   :  { %v4421_v12 = vadd.f32 %v4343_v7, %v4234_v53 }
0x2241   :  { %4403 = vadd.xlane.f32.xlu0 %v4402_v14 }
0x2243   :  { %v4413_v31 = vpop.xlane.xlu1 %4412 }
0x2244   :  { %v4429_v14 = vadd.f32 %v4421_v12, %v4413_v31 }
0x2249   :  { %4406 = vadd.xlane.f32.xlu0 %v4405_v43 }
0x228c   :  { %v11582_v1 = vpop.xlane.xlu0 %6843 }
0x228d   :  { %v6845_v61 = vsub.f32 %v6840_v26, %v11582_v1 }
0x228f   :  { %v6846_v41 = vmul.f32 1.442695, %v6845_v61 }
0x2291   :  { %7602 = vpow2.f32 %v6846_v41 }
0x2294   :  { %v4322_v23 = vpop.xlane.xlu0 %4321 }
0x2295   :  { %v4414_v30 = vadd.f32 %v4322_v23, %v4213_v48 }
0x2297   :  { %v7603_v9 = vpop.eup %7602  ;;  %v4422_v21 = vadd.f32 %v4414_v30, %v4392_v24 }
0x2298   :  { %v6848_v40 = vsel %vm6841_vm11, %v7603_v9, 0.0 }
0x2299   :  { %6849 = vadd.xlane.f32.xlu0 %v6848_v40  ;;  %v4430_v58 = vadd.f32 %v4423_v62, %v4422_v21 }
0x229c   :  { %v4328_v50 = vpop.xlane.xlu0 %4327 }
0x229d   :  { %v4416_v44 = vadd.f32 %v4328_v50, %v4219_v55 }
0x229f   :  { %v4424_v29 = vadd.f32 %v4416_v44, %v4398_v39 }
0x22a1   :  { %4409 = vadd.xlane.f32.xlu0 %v4408_v56  ;;  %v4431_v18 = vadd.f32 %v4430_v58, %v4424_v29 }
0x22a4   :  { %v4222_v52 = vpop.xlane.xlu0 %4221 }
0x22a5   :  { %v4417_v42 = vadd.f32 %v4331_v17, %v4222_v52 }
0x22a7   :  { %v4425_v26 = vadd.f32 %v4417_v42, %v4401_v25 }
0x22a9   :  { %v4432_v22 = vadd.f32 %v4431_v18, %v4425_v26 }
0x22ac   :  { %v4225_v51 = vpop.xlane.xlu0 %4224 }
0x22ad   :  { %v4418_v35 = vadd.f32 %v4334_v47, %v4225_v51 }
0x22b4   :  { %v4404_v34 = vpop.xlane.xlu0 %4403 }
0x22b5   :  { %v4426_v37 = vadd.f32 %v4418_v35, %v4404_v34 }
0x22b7   :  { %v4433_v4 = vadd.f32 %v4432_v22, %v4426_v37 }
0x22bc   :  { %v4407_v3 = vpop.xlane.xlu0 %4406 }
0x22bd   :  { %v4427_v19 = vadd.f32 %v4419_v28, %v4407_v3 }
0x22bf   :  { %v4434_v10 = vadd.f32 %v4433_v4, %v4427_v19 }
0x230c   :  { %v6850_v5 = vpop.xlane.xlu0 %6849 }
0x230d   :  { %7604 = vlog2.f32 %v6850_v5 }
0x2313   :  { %v7605_v16 = vpop.eup %7604 }
0x2314   :  { %v6852_v2 = vmul.f32 0.6931472, %v7605_v16  ;;  %v4410_v59 = vpop.xlane.xlu0 %4409 }
0x2315   :  { %v4428_v46 = vadd.f32 %v4420_v0, %v4410_v59 }
0x2316   :  { %v6853_v60 = vadd.f32 %v6852_v2, %v11582_v1 }
0x2317   :  { %v4435_v6 = vadd.f32 %v4434_v10, %v4428_v46 }
0x2318   :  { %v6855_v54 = vsel %vm6854_vm8, %v6853_v60, 0.0 }
0x2319   :  { %v6856_v45 = vrot.slane %v6855_v54, 4  ;;  %v4436_v43 = vadd.f32 %v4435_v6, %v4429_v14 }
0x231b   :  { %v6857_v61 = vadd.f32 %v6856_v45, %v6855_v54  ;;  %v4437_v41 = vrot.slane %v4436_v43, 4 }
0x231d   :  { %v6858_v27 = vrot.slane %v6857_v61, 2  ;;  %v4438_v8 = vadd.f32 %v4437_v41, %v4436_v43 }
0x231f   :  { %v6859_v20 = vadd.f32 %v6858_v27, %v6857_v61  ;;  %v4439_v57 = vrot.slane %v4438_v8, 2 }
0x2321   :  { %v4440_v9 = vadd.f32 %v4439_v57, %v4438_v8  ;;  %v6860_v40 = vrot.slane %v6859_v20, 1 }
0x2323   :  { %v4441_v38 = vrot.slane %v4440_v9, 1  ;;  %v6861_v48 = vadd.f32 %v6860_v40, %v6859_v20 }
0x2325   :  { %v4442_v56 = vadd.f32 %v4441_v38, %v4440_v9 }
0x2327   :  { %v6862_v1 = vsub.f32 %v6861_v48, %v4442_v56 }
0x2329   :  { %v6863_v49 = vmul.f32 0.5, %v6862_v1 }
0x232b   :  { %6865 = vst.msk [vmem:[#allocation2] sm:$0x1] %vm6864_vm9, %v6863_v49 }
0x232c   :  { %6876 = dma.vmem_to_hbm [thread:$0]  %s6872_s18, 16, %s6874_s12, [#allocation3]  }
0x232d   :  { %7785 = dma.done.wait [#allocation3], 16  }
0x232e   :  { %7786 = vsyncadd [#allocation3], 4294967280 }
0x232f   :  { %6881 = vsyncpa [#allocation3], 1 }

</bundles_post_ra>
